<compile_context>
chip_gen: v5e
topology: v5e:2x2
jax: 0.10.0
libtpu: 0.0.40
codegen_flags: <defaults>
</compile_context>

<pallas_src>
import jax
import jax.numpy as jnp
from jax import lax
from jax.experimental import pallas as pl
from jax.experimental.pallas import tpu as pltpu

BN_EPS = 1e-5

# Static network geometry (fc6 -> reshape([B, 16, -1]) with 1504 = 16 * 94).
C0, L0 = 16, 94          # convt0 input channels / length
C1, L1 = 8, 188          # convt0 output channels / length
C2, L2 = 4, 375          # convt1 output channels / length
L3 = 750                 # convt2 output length
K = 3                    # kernel size of every ConvTranspose1d (stride=2, pad=1)
LPMAX = L3 + 2           # 752: upsampled+padded length of the largest layer


# ------------------------------ fused kernel --------------------------------
def _make_kernel(B, n_channel, wr0, wr1, wr2, pr3):
    f32 = jnp.float32

    def kernel(z_ref, w4_ref, w5_ref, w6_hbm, pack_ref, o_ref, w6_vmem, w6_sem):
        # ---- start the big fc6-weight HBM->VMEM copy; overlap with fc4/fc5 +
        #      upsample-matrix construction ---------------------------------
        w6_copy = pltpu.make_async_copy(w6_hbm, w6_vmem, w6_sem.at[0])
        w6_copy.start()

        ones_b = jnp.ones((B, 1), f32)

        # ---- fc4 -> tanh -> fc5 -> tanh (biases folded into weight rows) ---
        h = jnp.tanh(jnp.dot(jnp.concatenate([z_ref[...], ones_b], axis=1),
                             w4_ref[...], preferred_element_type=f32))
        h = jnp.tanh(jnp.dot(jnp.concatenate([h, ones_b], axis=1),
                             w5_ref[...], preferred_element_type=f32))

        # ---- zero-upsample scatter matrix, built once at the largest size --
        # U[i, p] = 1 iff p == 2*i + 1; smaller layers slice the top-left.
        ri = lax.broadcasted_iota(jnp.int32, (L2, LPMAX), 0)
        ci = lax.broadcasted_iota(jnp.int32, (L2, LPMAX), 1)
        u_full = jnp.where(ci == 2 * ri + 1, 1.0, 0.0).astype(f32)

        # ---- fc6 -> tanh (needs the DMA'd weight) --------------------------
        w6_copy.wait()
        h = jnp.tanh(jnp.dot(jnp.concatenate([h, ones_b], axis=1),
                             w6_vmem[...], preferred_element_type=f32))   # (B, 1504)

        # ---- reshape([B, 16, -1]) -> stacked channel-first (B*16, 94) ------
        per_b = []
        for b in range(B):
            rows = [h[b:b + 1, c * L0:(c + 1) * L0] for c in range(C0)]
            per_b.append(jnp.concatenate(rows, axis=0))                   # (16, 94)
        x = jnp.concatenate(per_b, axis=0)                                # (B*16, 94)

        pack = pack_ref[...]

        def batchnorm(x, C, gcol, bcol):
            """Training-mode BatchNorm1d over the stacked (B*C, L) block (1 pass)."""
            L = x.shape[1]
            inv_n = 1.0 / float(B * L)
            rs = jnp.sum(x, axis=1, keepdims=True)                        # (B*C, 1)
            rq = jnp.sum(x * x, axis=1, keepdims=True)
            cs, cq = rs[0:C], rq[0:C]
            for b in range(1, B):
                cs = cs + rs[b * C:(b + 1) * C]
                cq = cq + rq[b * C:(b + 1) * C]
            mean = cs * inv_n
            var = cq * inv_n - mean * mean                                # biased
            gamma = pack[pr3:pr3 + C, gcol:gcol + 1]
            beta = pack[pr3:pr3 + C, bcol:bcol + 1]
            scale = gamma * lax.rsqrt(var + BN_EPS)
            shift = beta - mean * scale
            scale_r = jnp.concatenate([scale] * B, axis=0)                # (B*C, 1)
            shift_r = jnp.concatenate([shift] * B, axis=0)
            return x * scale_r + shift_r

        def conv_transpose(x, C_in, C_out, L_in, L_out, wrow, bcol):
            """ConvTranspose1d(k=3, s=2, p=1) on the stacked (B*C_in, L_in) block."""
            L_pad = L_out + 2                       # == 2*L_in + 1 + output_padding
            xp = jnp.dot(x, u_full[0:L_in, 0:L_pad],
                         preferred_element_type=f32)                      # (B*C_in, L_pad)
            x3 = jnp.concatenate([xp[:, 0:L_out],
                                  xp[:, 1:L_out + 1],
                                  xp[:, 2:L_out + 2]], axis=0)            # (3*B*C_in, L_out)
            w = pack[wrow:wrow + B * C_out, 0:3 * B * C_in]               # (B*C_out, 3*B*C_in)
            bias = pack[pr3:pr3 + B * C_out, bcol:bcol + 1]               # (B*C_out, 1)
            return jnp.dot(w, x3, preferred_element_type=f32) + bias

        # ---- bn4 -> convt0 -> tanh ----
        x = batchnorm(x, C0, 0, 1)
        x = jnp.tanh(conv_transpose(x, C0, C1, L0, L1, wr0, 2))
        # ---- bn5 -> convt1 -> tanh ----
        x = batchnorm(x, C1, 3, 4)
        x = jnp.tanh(conv_transpose(x, C1, C2, L1, L2, wr1, 5))
        # ---- bn6 -> convt2 (no activation) ----
        x = batchnorm(x, C2, 6, 7)
        x = conv_transpose(x, C2, n_channel, L2, L3, wr2, 8)              # (B*nc, 750)

        o_ref[...] = x                                                    # lane-dense slab

    return kernel


# --------------------------- host-side preprocessing ------------------------
def _build_inputs(params, z):
    """Weight-only (tiny) preprocessing that feeds the single fused kernel."""
    f32 = jnp.float32
    p = params
    B = z.shape[0]
    n_channel = p["c2_w"].shape[1]

    def fold_bias(w, b):                     # fc bias becomes an extra weight row
        return jnp.concatenate([w, b.reshape(1, -1)], axis=0).astype(f32)

    def block_weight(w):                     # (C_in, C_out, K) -> (B*C_out, K*B*C_in)
        wt = jnp.transpose(w[:, :, ::-1].astype(f32), (2, 1, 0))   # (K, C_out, C_in)
        eye_b = jnp.eye(B, dtype=f32)
        return jnp.concatenate([jnp.kron(eye_b, wt[k]) for k in range(K)], axis=1)

    wb0 = block_weight(p["c0_w"])            # (B*8,  3*B*16)
    wb1 = block_weight(p["c1_w"])            # (B*4,  3*B*8)
    wb2 = block_weight(p["c2_w"])            # (B*nc, 3*B*4)

    wr0 = 0
    wr1 = wr0 + wb0.shape[0]
    wr2 = wr1 + wb1.shape[0]
    pr3 = wr2 + wb2.shape[0]
    h3 = max(C0, B * C1, B * n_channel)      # param-column region height
    n_rows = pr3 + h3
    width = max(wb0.shape[1], 16)

    pack = jnp.zeros((n_rows, width), f32)
    pack = pack.at[wr0:wr0 + wb0.shape[0], 0:wb0.shape[1]].set(wb0)
    pack = pack.at[wr1:wr1 + wb1.shape[0], 0:wb1.shape[1]].set(wb1)
    pack = pack.at[wr2:wr2 + wb2.shape[0], 0:wb2.shape[1]].set(wb2)

    def put_col(pk, col, vec):
        v = vec.astype(f32).reshape(-1, 1)
        return pk.at[pr3:pr3 + v.shape[0], col:col + 1].set(v)

    pack = put_col(pack, 0, p["bn4_g"])
    pack = put_col(pack, 1, p["bn4_b"])
    pack = put_col(pack, 2, jnp.tile(p["c0_b"], B))
    pack = put_col(pack, 3, p["bn5_g"])
    pack = put_col(pack, 4, p["bn5_b"])
    pack = put_col(pack, 5, jnp.tile(p["c1_b"], B))
    pack = put_col(pack, 6, p["bn6_g"])
    pack = put_col(pack, 7, p["bn6_b"])
    pack = put_col(pack, 8, jnp.tile(p["c2_b"], B))

    args = (z.astype(f32),
            fold_bias(p["w4"], p["b4"]),
            fold_bias(p["w5"], p["b5"]),
            fold_bias(p["w6"], p["b6"]),
            pack)
    return args, (wr0, wr1, wr2, pr3), B, n_channel


def conv1d_decoder_forward(params, z):
    args, (wr0, wr1, wr2, pr3), B, n_channel = _build_inputs(params, z)
    kernel = _make_kernel(B, n_channel, wr0, wr1, wr2, pr3)
    w6a = args[3]

    out_flat = pl.pallas_call(
        kernel,
        out_shape=jax.ShapeDtypeStruct((B * n_channel, L3), jnp.float32),
        in_specs=[
            pl.BlockSpec(memory_space=pltpu.MemorySpace.VMEM),   # z
            pl.BlockSpec(memory_space=pltpu.MemorySpace.VMEM),   # w4 (+bias row)
            pl.BlockSpec(memory_space=pltpu.MemorySpace.VMEM),   # w5 (+bias row)
            pl.BlockSpec(memory_space=pl.ANY),                   # w6 (+bias row), manual DMA
            pl.BlockSpec(memory_space=pltpu.MemorySpace.VMEM),   # packed small params
        ],
        out_specs=pl.BlockSpec(memory_space=pltpu.MemorySpace.VMEM),
        scratch_shapes=[
            pltpu.VMEM(w6a.shape, jnp.float32),                  # fc6-weight landing buffer
            pltpu.SemaphoreType.DMA((1,)),
        ],
    )(*args)

    return out_flat.reshape(B, n_channel, L3)


# --------------------------- parameters / reference -------------------------
def init_params(key, n_latent, n_channel=3):
    ks = jax.random.split(key, 12)

    def _uniform(k, shape, fan_in):
        bound = 1.0 / jnp.sqrt(float(fan_in))
        return jax.random.uniform(k, shape, jnp.float32, -bound, bound)

    p = {}
    p["w4"] = _uniform(ks[0], (n_latent, 128), n_latent)
    p["b4"] = _uniform(ks[1], (128,), n_latent)
    p["w5"] = _uniform(ks[2], (128, 256), 128)
    p["b5"] = _uniform(ks[3], (256,), 128)
    p["w6"] = _uniform(ks[4], (256, 1504), 256)
    p["b6"] = _uniform(ks[5], (1504,), 256)
    # ConvTranspose1d weights, PyTorch layout (C_in, C_out, K)
    p["c0_w"] = _uniform(ks[6], (16, 8, 3), 16 * 3)
    p["c0_b"] = _uniform(ks[7], (8,), 16 * 3)
    p["c1_w"] = _uniform(ks[8], (8, 4, 3), 8 * 3)
    p["c1_b"] = _uniform(ks[9], (4,), 8 * 3)
    p["c2_w"] = _uniform(ks[10], (4, n_channel, 3), 4 * 3)
    p["c2_b"] = _uniform(ks[11], (n_channel,), 4 * 3)
    # BatchNorm affine params (PyTorch defaults: weight=1, bias=0)
    p["bn4_g"] = jnp.ones((16,), jnp.float32)
    p["bn4_b"] = jnp.zeros((16,), jnp.float32)
    p["bn5_g"] = jnp.ones((8,), jnp.float32)
    p["bn5_b"] = jnp.zeros((8,), jnp.float32)
    p["bn6_g"] = jnp.ones((4,), jnp.float32)
    p["bn6_b"] = jnp.zeros((4,), jnp.float32)
    return p


def reference_forward(params, z):
    """Pure-JAX reference (training-mode BN, PyTorch ConvTranspose1d semantics)."""
    p = params
    prec = lax.Precision.HIGHEST
    B = z.shape[0]
    h = jnp.tanh(jnp.dot(z, p["w4"], precision=prec) + p["b4"])
    h = jnp.tanh(jnp.dot(h, p["w5"], precision=prec) + p["b5"])
    h = jnp.tanh(jnp.dot(h, p["w6"], precision=prec) + p["b6"])
    x = h.reshape(B, 16, -1)

    def bn(x, g, b):
        m = jnp.mean(x, axis=(0, 2), keepdims=True)
        v = jnp.mean((x - m) ** 2, axis=(0, 2), keepdims=True)
        return (x - m) * lax.rsqrt(v + BN_EPS) * g.reshape(1, -1, 1) + b.reshape(1, -1, 1)

    def convt(x, w, b, out_pad):
        wf = jnp.transpose(w[:, :, ::-1], (1, 0, 2))          # (C_out, C_in, K), flipped
        y = lax.conv_general_dilated(
            x, wf, window_strides=(1,), padding=[(1, 1 + out_pad)],
            lhs_dilation=(2,), dimension_numbers=("NCH", "OIH", "NCH"),
            precision=prec)
        return y + b.reshape(1, -1, 1)

    x = jnp.tanh(convt(bn(x, p["bn4_g"], p["bn4_b"]), p["c0_w"], p["c0_b"], 1))
    x = jnp.tanh(convt(bn(x, p["bn5_g"], p["bn5_b"]), p["c1_w"], p["c1_b"], 0))
    x = convt(bn(x, p["bn6_g"], p["bn6_b"]), p["c2_w"], p["c2_b"], 1)
    return x.reshape(B, p["c2_w"].shape[1], -1)


if __name__ == "__main__":
    key = jax.random.PRNGKey(0)
    k_param, k_z = jax.random.split(key)
    n_latent, batch = 8, 2
    params = init_params(k_param, n_latent, n_channel=3)
    z = jax.random.normal(k_z, (batch, n_latent), jnp.float32)

    out = jax.block_until_ready(jax.jit(conv1d_decoder_forward)(params, z))
    assert out.shape == (batch, 3, L3), out.shape
    assert bool(jnp.all(jnp.isfinite(out)))

    ref = jax.block_until_ready(jax.jit(reference_forward)(params, z))
    err = float(jnp.max(jnp.abs(out - ref)))
    assert err < 2e-3, f"max |pallas - reference| = {err}"
    print("KERNEL_OK")
</pallas_src>

<mosaic_0001>
module attributes {stable_mosaic.version = 11 : i64} {
  func.func @kernel(%arg0: memref<2x8xf32, #tpu.memory_space<vmem>>, %arg1: memref<9x128xf32, #tpu.memory_space<vmem>>, %arg2: memref<129x256xf32, #tpu.memory_space<vmem>>, %arg3: memref<257x1504xf32, #tpu.memory_space<any>>, %arg4: memref<46x96xf32, #tpu.memory_space<vmem>>, %arg5: memref<6x750xf32, #tpu.memory_space<vmem>>, %arg6: memref<257x1504xf32, #tpu.memory_space<vmem>>, %arg7: memref<1x!tpu.dma_semaphore, #tpu.memory_space<semaphore_mem>>) attributes {dimension_semantics = [], scalar_prefetch = 0 : i64, scratch_operands = 2 : i64, tpu.core_type = #tpu.core_type<tc>} {
    %c0_i32 = arith.constant 0 : i32
    %0 = tpu.memref_slice %arg7[%c0_i32] : memref<1x!tpu.dma_semaphore, #tpu.memory_space<semaphore_mem>> -> memref<1x!tpu.dma_semaphore, #tpu.memory_space<semaphore_mem>>
    %1 = tpu.memref_squeeze %0 : memref<1x!tpu.dma_semaphore, #tpu.memory_space<semaphore_mem>> -> memref<!tpu.dma_semaphore, #tpu.memory_space<semaphore_mem>>
    tpu.enqueue_dma source(%arg3 : memref<257x1504xf32, #tpu.memory_space<any>>) target(%arg6 : memref<257x1504xf32, #tpu.memory_space<vmem>>) target_semaphore(%1 : memref<!tpu.dma_semaphore, #tpu.memory_space<semaphore_mem>>)
    %cst = arith.constant 1.000000e+00 : f32
    %2 = vector.broadcast %cst : f32 to vector<2x1xf32>
    %c0 = arith.constant 0 : index
    %c0_0 = arith.constant 0 : index
    %3 = vector.load %arg0[%c0, %c0_0] : memref<2x8xf32, #tpu.memory_space<vmem>>, vector<2x8xf32>
    %4 = tpu.concatenate %3, %2 in 1 : vector<2x8xf32>, vector<2x1xf32> -> vector<2x9xf32>
    %c0_1 = arith.constant 0 : index
    %c0_2 = arith.constant 0 : index
    %5 = vector.load %arg1[%c0_1, %c0_2] : memref<9x128xf32, #tpu.memory_space<vmem>>, vector<9x128xf32>
    %cst_3 = arith.constant dense<0.000000e+00> : vector<2x128xf32>
    %6 = tpu.matmul %4, %5, %cst_3 {dimension_numbers = #tpu.dot_dimension_numbers<[1], [0], [0], [1], [0, 0, 1, 1], [], []>} : vector<2x9xf32>, vector<9x128xf32>, vector<2x128xf32> -> vector<2x128xf32>
    %7 = math.tanh %6 : vector<2x128xf32>
    %8 = tpu.concatenate %7, %2 in 1 : vector<2x128xf32>, vector<2x1xf32> -> vector<2x129xf32>
    %c0_4 = arith.constant 0 : index
    %c0_5 = arith.constant 0 : index
    %9 = vector.load %arg2[%c0_4, %c0_5] : memref<129x256xf32, #tpu.memory_space<vmem>>, vector<129x256xf32>
    %cst_6 = arith.constant dense<0.000000e+00> : vector<2x256xf32>
    %10 = tpu.matmul %8, %9, %cst_6 {dimension_numbers = #tpu.dot_dimension_numbers<[1], [0], [0], [1], [0, 0, 1, 1], [], []>} : vector<2x129xf32>, vector<129x256xf32>, vector<2x256xf32> -> vector<2x256xf32>
    %11 = math.tanh %10 : vector<2x256xf32>
    %12 = tpu.iota {dimensions = array<i32: 0>} : vector<375x752xi32>
    %13 = tpu.iota {dimensions = array<i32: 1>} : vector<375x752xi32>
    %c2_i32 = arith.constant 2 : i32
    %14 = vector.broadcast %c2_i32 : i32 to vector<375x752xi32>
    %15 = arith.muli %14, %12 : vector<375x752xi32>
    %c1_i32 = arith.constant 1 : i32
    %16 = vector.broadcast %c1_i32 : i32 to vector<375x752xi32>
    %17 = arith.addi %15, %16 : vector<375x752xi32>
    %18 = arith.cmpi eq, %13, %17 : vector<375x752xi32>
    %cst_7 = arith.constant 1.000000e+00 : f32
    %cst_8 = arith.constant 0.000000e+00 : f32
    %19 = vector.broadcast %cst_7 : f32 to vector<375x752xf32>
    %20 = vector.broadcast %cst_8 : f32 to vector<375x752xf32>
    %21 = arith.select %18, %19, %20 : vector<375x752xi1>, vector<375x752xf32>
    %c0_i32_9 = arith.constant 0 : i32
    %22 = tpu.memref_slice %arg7[%c0_i32_9] : memref<1x!tpu.dma_semaphore, #tpu.memory_space<semaphore_mem>> -> memref<1x!tpu.dma_semaphore, #tpu.memory_space<semaphore_mem>>
    %23 = tpu.memref_squeeze %22 : memref<1x!tpu.dma_semaphore, #tpu.memory_space<semaphore_mem>> -> memref<!tpu.dma_semaphore, #tpu.memory_space<semaphore_mem>>
    tpu.wait_dma2 semaphore(%23 : memref<!tpu.dma_semaphore, #tpu.memory_space<semaphore_mem>>) src(%arg3 : memref<257x1504xf32, #tpu.memory_space<any>>) dst(%arg6 : memref<257x1504xf32, #tpu.memory_space<vmem>>)
    %24 = tpu.concatenate %11, %2 in 1 : vector<2x256xf32>, vector<2x1xf32> -> vector<2x257xf32>
    %c0_10 = arith.constant 0 : index
    %c0_11 = arith.constant 0 : index
    %25 = vector.load %arg6[%c0_10, %c0_11] : memref<257x1504xf32, #tpu.memory_space<vmem>>, vector<257x1504xf32>
    %cst_12 = arith.constant dense<0.000000e+00> : vector<2x1504xf32>
    %26 = tpu.matmul %24, %25, %cst_12 {dimension_numbers = #tpu.dot_dimension_numbers<[1], [0], [0], [1], [0, 0, 1, 1], [], []>} : vector<2x257xf32>, vector<257x1504xf32>, vector<2x1504xf32> -> vector<2x1504xf32>
    %27 = math.tanh %26 : vector<2x1504xf32>
    %28 = vector.extract_strided_slice %27 {offsets = [0, 0], sizes = [1, 94], strides = [1, 1]} : vector<2x1504xf32> to vector<1x94xf32>
    %29 = vector.extract_strided_slice %27 {offsets = [0, 94], sizes = [1, 94], strides = [1, 1]} : vector<2x1504xf32> to vector<1x94xf32>
    %30 = vector.extract_strided_slice %27 {offsets = [0, 188], sizes = [1, 94], strides = [1, 1]} : vector<2x1504xf32> to vector<1x94xf32>
    %31 = vector.extract_strided_slice %27 {offsets = [0, 282], sizes = [1, 94], strides = [1, 1]} : vector<2x1504xf32> to vector<1x94xf32>
    %32 = vector.extract_strided_slice %27 {offsets = [0, 376], sizes = [1, 94], strides = [1, 1]} : vector<2x1504xf32> to vector<1x94xf32>
    %33 = vector.extract_strided_slice %27 {offsets = [0, 470], sizes = [1, 94], strides = [1, 1]} : vector<2x1504xf32> to vector<1x94xf32>
    %34 = vector.extract_strided_slice %27 {offsets = [0, 564], sizes = [1, 94], strides = [1, 1]} : vector<2x1504xf32> to vector<1x94xf32>
    %35 = vector.extract_strided_slice %27 {offsets = [0, 658], sizes = [1, 94], strides = [1, 1]} : vector<2x1504xf32> to vector<1x94xf32>
    %36 = vector.extract_strided_slice %27 {offsets = [0, 752], sizes = [1, 94], strides = [1, 1]} : vector<2x1504xf32> to vector<1x94xf32>
    %37 = vector.extract_strided_slice %27 {offsets = [0, 846], sizes = [1, 94], strides = [1, 1]} : vector<2x1504xf32> to vector<1x94xf32>
    %38 = vector.extract_strided_slice %27 {offsets = [0, 940], sizes = [1, 94], strides = [1, 1]} : vector<2x1504xf32> to vector<1x94xf32>
    %39 = vector.extract_strided_slice %27 {offsets = [0, 1034], sizes = [1, 94], strides = [1, 1]} : vector<2x1504xf32> to vector<1x94xf32>
    %40 = vector.extract_strided_slice %27 {offsets = [0, 1128], sizes = [1, 94], strides = [1, 1]} : vector<2x1504xf32> to vector<1x94xf32>
    %41 = vector.extract_strided_slice %27 {offsets = [0, 1222], sizes = [1, 94], strides = [1, 1]} : vector<2x1504xf32> to vector<1x94xf32>
    %42 = vector.extract_strided_slice %27 {offsets = [0, 1316], sizes = [1, 94], strides = [1, 1]} : vector<2x1504xf32> to vector<1x94xf32>
    %43 = vector.extract_strided_slice %27 {offsets = [0, 1410], sizes = [1, 94], strides = [1, 1]} : vector<2x1504xf32> to vector<1x94xf32>
    %44 = tpu.concatenate %28, %29, %30, %31, %32, %33, %34, %35, %36, %37, %38, %39, %40, %41, %42, %43 in 0 : vector<1x94xf32>, vector<1x94xf32>, vector<1x94xf32>, vector<1x94xf32>, vector<1x94xf32>, vector<1x94xf32>, vector<1x94xf32>, vector<1x94xf32>, vector<1x94xf32>, vector<1x94xf32>, vector<1x94xf32>, vector<1x94xf32>, vector<1x94xf32>, vector<1x94xf32>, vector<1x94xf32>, vector<1x94xf32> -> vector<16x94xf32>
    %45 = vector.extract_strided_slice %27 {offsets = [1, 0], sizes = [1, 94], strides = [1, 1]} : vector<2x1504xf32> to vector<1x94xf32>
    %46 = vector.extract_strided_slice %27 {offsets = [1, 94], sizes = [1, 94], strides = [1, 1]} : vector<2x1504xf32> to vector<1x94xf32>
    %47 = vector.extract_strided_slice %27 {offsets = [1, 188], sizes = [1, 94], strides = [1, 1]} : vector<2x1504xf32> to vector<1x94xf32>
    %48 = vector.extract_strided_slice %27 {offsets = [1, 282], sizes = [1, 94], strides = [1, 1]} : vector<2x1504xf32> to vector<1x94xf32>
    %49 = vector.extract_strided_slice %27 {offsets = [1, 376], sizes = [1, 94], strides = [1, 1]} : vector<2x1504xf32> to vector<1x94xf32>
    %50 = vector.extract_strided_slice %27 {offsets = [1, 470], sizes = [1, 94], strides = [1, 1]} : vector<2x1504xf32> to vector<1x94xf32>
    %51 = vector.extract_strided_slice %27 {offsets = [1, 564], sizes = [1, 94], strides = [1, 1]} : vector<2x1504xf32> to vector<1x94xf32>
    %52 = vector.extract_strided_slice %27 {offsets = [1, 658], sizes = [1, 94], strides = [1, 1]} : vector<2x1504xf32> to vector<1x94xf32>
    %53 = vector.extract_strided_slice %27 {offsets = [1, 752], sizes = [1, 94], strides = [1, 1]} : vector<2x1504xf32> to vector<1x94xf32>
    %54 = vector.extract_strided_slice %27 {offsets = [1, 846], sizes = [1, 94], strides = [1, 1]} : vector<2x1504xf32> to vector<1x94xf32>
    %55 = vector.extract_strided_slice %27 {offsets = [1, 940], sizes = [1, 94], strides = [1, 1]} : vector<2x1504xf32> to vector<1x94xf32>
    %56 = vector.extract_strided_slice %27 {offsets = [1, 1034], sizes = [1, 94], strides = [1, 1]} : vector<2x1504xf32> to vector<1x94xf32>
    %57 = vector.extract_strided_slice %27 {offsets = [1, 1128], sizes = [1, 94], strides = [1, 1]} : vector<2x1504xf32> to vector<1x94xf32>
    %58 = vector.extract_strided_slice %27 {offsets = [1, 1222], sizes = [1, 94], strides = [1, 1]} : vector<2x1504xf32> to vector<1x94xf32>
    %59 = vector.extract_strided_slice %27 {offsets = [1, 1316], sizes = [1, 94], strides = [1, 1]} : vector<2x1504xf32> to vector<1x94xf32>
    %60 = vector.extract_strided_slice %27 {offsets = [1, 1410], sizes = [1, 94], strides = [1, 1]} : vector<2x1504xf32> to vector<1x94xf32>
    %61 = tpu.concatenate %45, %46, %47, %48, %49, %50, %51, %52, %53, %54, %55, %56, %57, %58, %59, %60 in 0 : vector<1x94xf32>, vector<1x94xf32>, vector<1x94xf32>, vector<1x94xf32>, vector<1x94xf32>, vector<1x94xf32>, vector<1x94xf32>, vector<1x94xf32>, vector<1x94xf32>, vector<1x94xf32>, vector<1x94xf32>, vector<1x94xf32>, vector<1x94xf32>, vector<1x94xf32>, vector<1x94xf32>, vector<1x94xf32> -> vector<16x94xf32>
    %62 = tpu.concatenate %44, %61 in 0 : vector<16x94xf32>, vector<16x94xf32> -> vector<32x94xf32>
    %c0_13 = arith.constant 0 : index
    %c0_14 = arith.constant 0 : index
    %63 = vector.load %arg4[%c0_13, %c0_14] : memref<46x96xf32, #tpu.memory_space<vmem>>, vector<46x96xf32>
    %cst_15 = arith.constant dense<0.000000e+00> : vector<32xf32>
    %64 = vector.multi_reduction <add>, %62, %cst_15 [1] : vector<32x94xf32> to vector<32xf32>
    %65 = vector.shape_cast %64 : vector<32xf32> to vector<32x1xf32>
    %66 = arith.mulf %62, %62 : vector<32x94xf32>
    %cst_16 = arith.constant dense<0.000000e+00> : vector<32xf32>
    %67 = vector.multi_reduction <add>, %66, %cst_16 [1] : vector<32x94xf32> to vector<32xf32>
    %68 = vector.shape_cast %67 : vector<32xf32> to vector<32x1xf32>
    %69 = vector.extract_strided_slice %65 {offsets = [0, 0], sizes = [16, 1], strides = [1, 1]} : vector<32x1xf32> to vector<16x1xf32>
    %70 = vector.extract_strided_slice %68 {offsets = [0, 0], sizes = [16, 1], strides = [1, 1]} : vector<32x1xf32> to vector<16x1xf32>
    %71 = vector.extract_strided_slice %65 {offsets = [16, 0], sizes = [16, 1], strides = [1, 1]} : vector<32x1xf32> to vector<16x1xf32>
    %72 = arith.addf %69, %71 : vector<16x1xf32>
    %73 = vector.extract_strided_slice %68 {offsets = [16, 0], sizes = [16, 1], strides = [1, 1]} : vector<32x1xf32> to vector<16x1xf32>
    %74 = arith.addf %70, %73 : vector<16x1xf32>
    %cst_17 = arith.constant 0.00531914877 : f32
    %75 = vector.broadcast %cst_17 : f32 to vector<16x1xf32>
    %76 = arith.mulf %72, %75 : vector<16x1xf32>
    %cst_18 = arith.constant 0.00531914877 : f32
    %77 = vector.broadcast %cst_18 : f32 to vector<16x1xf32>
    %78 = arith.mulf %74, %77 : vector<16x1xf32>
    %79 = arith.mulf %76, %76 : vector<16x1xf32>
    %80 = arith.subf %78, %79 : vector<16x1xf32>
    %81 = vector.extract_strided_slice %63 {offsets = [30, 0], sizes = [16, 1], strides = [1, 1]} : vector<46x96xf32> to vector<16x1xf32>
    %82 = vector.extract_strided_slice %63 {offsets = [30, 1], sizes = [16, 1], strides = [1, 1]} : vector<46x96xf32> to vector<16x1xf32>
    %cst_19 = arith.constant 9.99999974E-6 : f32
    %83 = vector.broadcast %cst_19 : f32 to vector<16x1xf32>
    %84 = arith.addf %80, %83 : vector<16x1xf32>
    %85 = math.rsqrt %84 : vector<16x1xf32>
    %86 = arith.mulf %81, %85 : vector<16x1xf32>
    %87 = arith.mulf %76, %86 : vector<16x1xf32>
    %88 = arith.subf %82, %87 : vector<16x1xf32>
    %89 = tpu.concatenate %86, %86 in 0 : vector<16x1xf32>, vector<16x1xf32> -> vector<32x1xf32>
    %90 = tpu.concatenate %88, %88 in 0 : vector<16x1xf32>, vector<16x1xf32> -> vector<32x1xf32>
    %91 = vector.broadcast %89 : vector<32x1xf32> to vector<32x94xf32>
    %92 = arith.mulf %62, %91 : vector<32x94xf32>
    %93 = vector.broadcast %90 : vector<32x1xf32> to vector<32x94xf32>
    %94 = arith.addf %92, %93 : vector<32x94xf32>
    %95 = vector.extract_strided_slice %21 {offsets = [0, 0], sizes = [94, 190], strides = [1, 1]} : vector<375x752xf32> to vector<94x190xf32>
    %cst_20 = arith.constant dense<0.000000e+00> : vector<32x190xf32>
    %96 = tpu.matmul %94, %95, %cst_20 {dimension_numbers = #tpu.dot_dimension_numbers<[1], [0], [0], [1], [0, 0, 1, 1], [], []>} : vector<32x94xf32>, vector<94x190xf32>, vector<32x190xf32> -> vector<32x190xf32>
    %97 = vector.extract_strided_slice %96 {offsets = [0, 0], sizes = [32, 188], strides = [1, 1]} : vector<32x190xf32> to vector<32x188xf32>
    %98 = vector.extract_strided_slice %96 {offsets = [0, 1], sizes = [32, 188], strides = [1, 1]} : vector<32x190xf32> to vector<32x188xf32>
    %99 = vector.extract_strided_slice %96 {offsets = [0, 2], sizes = [32, 188], strides = [1, 1]} : vector<32x190xf32> to vector<32x188xf32>
    %100 = tpu.concatenate %97, %98, %99 in 0 : vector<32x188xf32>, vector<32x188xf32>, vector<32x188xf32> -> vector<96x188xf32>
    %101 = vector.extract_strided_slice %63 {offsets = [0, 0], sizes = [16, 96], strides = [1, 1]} : vector<46x96xf32> to vector<16x96xf32>
    %102 = vector.extract_strided_slice %63 {offsets = [30, 2], sizes = [16, 1], strides = [1, 1]} : vector<46x96xf32> to vector<16x1xf32>
    %cst_21 = arith.constant dense<0.000000e+00> : vector<16x188xf32>
    %103 = tpu.matmul %101, %100, %cst_21 {dimension_numbers = #tpu.dot_dimension_numbers<[1], [0], [0], [1], [0, 0, 1, 1], [], []>} : vector<16x96xf32>, vector<96x188xf32>, vector<16x188xf32> -> vector<16x188xf32>
    %104 = vector.broadcast %102 : vector<16x1xf32> to vector<16x188xf32>
    %105 = arith.addf %103, %104 : vector<16x188xf32>
    %106 = math.tanh %105 : vector<16x188xf32>
    %cst_22 = arith.constant dense<0.000000e+00> : vector<16xf32>
    %107 = vector.multi_reduction <add>, %106, %cst_22 [1] : vector<16x188xf32> to vector<16xf32>
    %108 = vector.shape_cast %107 : vector<16xf32> to vector<16x1xf32>
    %109 = arith.mulf %106, %106 : vector<16x188xf32>
    %cst_23 = arith.constant dense<0.000000e+00> : vector<16xf32>
    %110 = vector.multi_reduction <add>, %109, %cst_23 [1] : vector<16x188xf32> to vector<16xf32>
    %111 = vector.shape_cast %110 : vector<16xf32> to vector<16x1xf32>
    %112 = vector.extract_strided_slice %108 {offsets = [0, 0], sizes = [8, 1], strides = [1, 1]} : vector<16x1xf32> to vector<8x1xf32>
    %113 = vector.extract_strided_slice %111 {offsets = [0, 0], sizes = [8, 1], strides = [1, 1]} : vector<16x1xf32> to vector<8x1xf32>
    %114 = vector.extract_strided_slice %108 {offsets = [8, 0], sizes = [8, 1], strides = [1, 1]} : vector<16x1xf32> to vector<8x1xf32>
    %115 = arith.addf %112, %114 : vector<8x1xf32>
    %116 = vector.extract_strided_slice %111 {offsets = [8, 0], sizes = [8, 1], strides = [1, 1]} : vector<16x1xf32> to vector<8x1xf32>
    %117 = arith.addf %113, %116 : vector<8x1xf32>
    %cst_24 = arith.constant 0.00265957438 : f32
    %118 = vector.broadcast %cst_24 : f32 to vector<8x1xf32>
    %119 = arith.mulf %115, %118 : vector<8x1xf32>
    %cst_25 = arith.constant 0.00265957438 : f32
    %120 = vector.broadcast %cst_25 : f32 to vector<8x1xf32>
    %121 = arith.mulf %117, %120 : vector<8x1xf32>
    %122 = arith.mulf %119, %119 : vector<8x1xf32>
    %123 = arith.subf %121, %122 : vector<8x1xf32>
    %124 = vector.extract_strided_slice %63 {offsets = [30, 3], sizes = [8, 1], strides = [1, 1]} : vector<46x96xf32> to vector<8x1xf32>
    %125 = vector.extract_strided_slice %63 {offsets = [30, 4], sizes = [8, 1], strides = [1, 1]} : vector<46x96xf32> to vector<8x1xf32>
    %cst_26 = arith.constant 9.99999974E-6 : f32
    %126 = vector.broadcast %cst_26 : f32 to vector<8x1xf32>
    %127 = arith.addf %123, %126 : vector<8x1xf32>
    %128 = math.rsqrt %127 : vector<8x1xf32>
    %129 = arith.mulf %124, %128 : vector<8x1xf32>
    %130 = arith.mulf %119, %129 : vector<8x1xf32>
    %131 = arith.subf %125, %130 : vector<8x1xf32>
    %132 = tpu.concatenate %129, %129 in 0 : vector<8x1xf32>, vector<8x1xf32> -> vector<16x1xf32>
    %133 = tpu.concatenate %131, %131 in 0 : vector<8x1xf32>, vector<8x1xf32> -> vector<16x1xf32>
    %134 = vector.broadcast %132 : vector<16x1xf32> to vector<16x188xf32>
    %135 = arith.mulf %106, %134 : vector<16x188xf32>
    %136 = vector.broadcast %133 : vector<16x1xf32> to vector<16x188xf32>
    %137 = arith.addf %135, %136 : vector<16x188xf32>
    %138 = vector.extract_strided_slice %21 {offsets = [0, 0], sizes = [188, 377], strides = [1, 1]} : vector<375x752xf32> to vector<188x377xf32>
    %cst_27 = arith.constant dense<0.000000e+00> : vector<16x377xf32>
    %139 = tpu.matmul %137, %138, %cst_27 {dimension_numbers = #tpu.dot_dimension_numbers<[1], [0], [0], [1], [0, 0, 1, 1], [], []>} : vector<16x188xf32>, vector<188x377xf32>, vector<16x377xf32> -> vector<16x377xf32>
    %140 = vector.extract_strided_slice %139 {offsets = [0, 0], sizes = [16, 375], strides = [1, 1]} : vector<16x377xf32> to vector<16x375xf32>
    %141 = vector.extract_strided_slice %139 {offsets = [0, 1], sizes = [16, 375], strides = [1, 1]} : vector<16x377xf32> to vector<16x375xf32>
    %142 = vector.extract_strided_slice %139 {offsets = [0, 2], sizes = [16, 375], strides = [1, 1]} : vector<16x377xf32> to vector<16x375xf32>
    %143 = tpu.concatenate %140, %141, %142 in 0 : vector<16x375xf32>, vector<16x375xf32>, vector<16x375xf32> -> vector<48x375xf32>
    %144 = vector.extract_strided_slice %63 {offsets = [16, 0], sizes = [8, 48], strides = [1, 1]} : vector<46x96xf32> to vector<8x48xf32>
    %145 = vector.extract_strided_slice %63 {offsets = [30, 5], sizes = [8, 1], strides = [1, 1]} : vector<46x96xf32> to vector<8x1xf32>
    %cst_28 = arith.constant dense<0.000000e+00> : vector<8x375xf32>
    %146 = tpu.matmul %144, %143, %cst_28 {dimension_numbers = #tpu.dot_dimension_numbers<[1], [0], [0], [1], [0, 0, 1, 1], [], []>} : vector<8x48xf32>, vector<48x375xf32>, vector<8x375xf32> -> vector<8x375xf32>
    %147 = vector.broadcast %145 : vector<8x1xf32> to vector<8x375xf32>
    %148 = arith.addf %146, %147 : vector<8x375xf32>
    %149 = math.tanh %148 : vector<8x375xf32>
    %cst_29 = arith.constant dense<0.000000e+00> : vector<8xf32>
    %150 = vector.multi_reduction <add>, %149, %cst_29 [1] : vector<8x375xf32> to vector<8xf32>
    %151 = vector.shape_cast %150 : vector<8xf32> to vector<8x1xf32>
    %152 = arith.mulf %149, %149 : vector<8x375xf32>
    %cst_30 = arith.constant dense<0.000000e+00> : vector<8xf32>
    %153 = vector.multi_reduction <add>, %152, %cst_30 [1] : vector<8x375xf32> to vector<8xf32>
    %154 = vector.shape_cast %153 : vector<8xf32> to vector<8x1xf32>
    %155 = vector.extract_strided_slice %151 {offsets = [0, 0], sizes = [4, 1], strides = [1, 1]} : vector<8x1xf32> to vector<4x1xf32>
    %156 = vector.extract_strided_slice %154 {offsets = [0, 0], sizes = [4, 1], strides = [1, 1]} : vector<8x1xf32> to vector<4x1xf32>
    %157 = vector.extract_strided_slice %151 {offsets = [4, 0], sizes = [4, 1], strides = [1, 1]} : vector<8x1xf32> to vector<4x1xf32>
    %158 = arith.addf %155, %157 : vector<4x1xf32>
    %159 = vector.extract_strided_slice %154 {offsets = [4, 0], sizes = [4, 1], strides = [1, 1]} : vector<8x1xf32> to vector<4x1xf32>
    %160 = arith.addf %156, %159 : vector<4x1xf32>
    %cst_31 = arith.constant 0.00133333332 : f32
    %161 = vector.broadcast %cst_31 : f32 to vector<4x1xf32>
    %162 = arith.mulf %158, %161 : vector<4x1xf32>
    %cst_32 = arith.constant 0.00133333332 : f32
    %163 = vector.broadcast %cst_32 : f32 to vector<4x1xf32>
    %164 = arith.mulf %160, %163 : vector<4x1xf32>
    %165 = arith.mulf %162, %162 : vector<4x1xf32>
    %166 = arith.subf %164, %165 : vector<4x1xf32>
    %167 = vector.extract_strided_slice %63 {offsets = [30, 6], sizes = [4, 1], strides = [1, 1]} : vector<46x96xf32> to vector<4x1xf32>
    %168 = vector.extract_strided_slice %63 {offsets = [30, 7], sizes = [4, 1], strides = [1, 1]} : vector<46x96xf32> to vector<4x1xf32>
    %cst_33 = arith.constant 9.99999974E-6 : f32
    %169 = vector.broadcast %cst_33 : f32 to vector<4x1xf32>
    %170 = arith.addf %166, %169 : vector<4x1xf32>
    %171 = math.rsqrt %170 : vector<4x1xf32>
    %172 = arith.mulf %167, %171 : vector<4x1xf32>
    %173 = arith.mulf %162, %172 : vector<4x1xf32>
    %174 = arith.subf %168, %173 : vector<4x1xf32>
    %175 = tpu.concatenate %172, %172 in 0 : vector<4x1xf32>, vector<4x1xf32> -> vector<8x1xf32>
    %176 = tpu.concatenate %174, %174 in 0 : vector<4x1xf32>, vector<4x1xf32> -> vector<8x1xf32>
    %177 = vector.broadcast %175 : vector<8x1xf32> to vector<8x375xf32>
    %178 = arith.mulf %149, %177 : vector<8x375xf32>
    %179 = vector.broadcast %176 : vector<8x1xf32> to vector<8x375xf32>
    %180 = arith.addf %178, %179 : vector<8x375xf32>
    %cst_34 = arith.constant dense<0.000000e+00> : vector<8x752xf32>
    %181 = tpu.matmul %180, %21, %cst_34 {dimension_numbers = #tpu.dot_dimension_numbers<[1], [0], [0], [1], [0, 0, 1, 1], [], []>} : vector<8x375xf32>, vector<375x752xf32>, vector<8x752xf32> -> vector<8x752xf32>
    %182 = vector.extract_strided_slice %181 {offsets = [0, 0], sizes = [8, 750], strides = [1, 1]} : vector<8x752xf32> to vector<8x750xf32>
    %183 = vector.extract_strided_slice %181 {offsets = [0, 1], sizes = [8, 750], strides = [1, 1]} : vector<8x752xf32> to vector<8x750xf32>
    %184 = vector.extract_strided_slice %181 {offsets = [0, 2], sizes = [8, 750], strides = [1, 1]} : vector<8x752xf32> to vector<8x750xf32>
    %185 = tpu.concatenate %182, %183, %184 in 0 : vector<8x750xf32>, vector<8x750xf32>, vector<8x750xf32> -> vector<24x750xf32>
    %186 = vector.extract_strided_slice %63 {offsets = [24, 0], sizes = [6, 24], strides = [1, 1]} : vector<46x96xf32> to vector<6x24xf32>
    %187 = vector.extract_strided_slice %63 {offsets = [30, 8], sizes = [6, 1], strides = [1, 1]} : vector<46x96xf32> to vector<6x1xf32>
    %cst_35 = arith.constant dense<0.000000e+00> : vector<6x750xf32>
    %188 = tpu.matmul %186, %185, %cst_35 {dimension_numbers = #tpu.dot_dimension_numbers<[1], [0], [0], [1], [0, 0, 1, 1], [], []>} : vector<6x24xf32>, vector<24x750xf32>, vector<6x750xf32> -> vector<6x750xf32>
    %189 = vector.broadcast %187 : vector<6x1xf32> to vector<6x750xf32>
    %190 = arith.addf %188, %189 : vector<6x750xf32>
    %c0_36 = arith.constant 0 : index
    %c0_37 = arith.constant 0 : index
    %191 = vector.load %arg5[%c0_36, %c0_37] : memref<6x750xf32, #tpu.memory_space<vmem>>, vector<6x750xf32>
    tpu.vector_store %arg5[%c0_36, %c0_37], %190 {strides = array<i32>} : memref<6x750xf32, #tpu.memory_space<vmem>>, vector<6x750xf32>,
    return
  }
}

</mosaic_0001>

<bundles_post_ra>
// kernel: tile.18
= control target key start
LH: loop header
LB: loop body
LE: loop exit
PB: predicated region body
PF: predicated region fallthrough
CT: control target
= control target key end

     0   :  { %2 = vsyncpa [#allocation1], 0  ;;  %s48_s8 = smov [#allocation0]   ;;  %s65_s0 = inlined_call_operand.hbm [shape: f32[8], index: 0, kind: input, shape index: {}]   ;;  %s66_s1 = inlined_call_operand.vmem [shape: f32[2,8], index: 1, kind: output, shape index: {}]  }
   0x1   :  { %s8_s0 = sshll.u32 %s65_s0, 4  ;;  %s10_s9 = sshll.u32 %s48_s8, 4  ;;  %s9_s0 = int_to_ptr.hbm [resolvable:$true] %s8_s0  ;;  %s11_s9 = int_to_ptr.vmem [resolvable:$true] %s10_s9 }
   0x2   :  { %13 = dma.hbm_to_vmem [thread:$0]  %s9_s0, 16, %s11_s9, [#allocation1]  }
   0x3   :  { %46 = dma.done.wait [#allocation1], 16  }
   0x4   :  { %47 = vsyncadd [#allocation1], 4294967280  ;;  %v18_v0 = vld [vmem:[#allocation0] ss:$0 sm:$0xff] }
   0x5   :  { %19 = vst [vmem:[%s66_s1] sm:$0x3] %v18_v0 }
   0x6   :  { %20 = vsyncpa [#allocation1], 1 }

// kernel: tile.23
= control target key start
LH: loop header
LB: loop body
LE: loop exit
PB: predicated region body
PF: predicated region fallthrough
CT: control target
= control target key end

     0   :  { %2 = vsyncpa [#allocation1], 0  ;;  %s48_s8 = smov [#allocation0]   ;;  %s65_s0 = inlined_call_operand.hbm [shape: f32[4], index: 0, kind: input, shape index: {}]   ;;  %s66_s1 = inlined_call_operand.vmem [shape: f32[2,4], index: 1, kind: output, shape index: {}]  }
   0x1   :  { %s8_s0 = sshll.u32 %s65_s0, 4  ;;  %s10_s9 = sshll.u32 %s48_s8, 4  ;;  %s9_s0 = int_to_ptr.hbm [resolvable:$true] %s8_s0  ;;  %s11_s9 = int_to_ptr.vmem [resolvable:$true] %s10_s9 }
   0x2   :  { %13 = dma.hbm_to_vmem [thread:$0]  %s9_s0, 16, %s11_s9, [#allocation1]  }
   0x3   :  { %46 = dma.done.wait [#allocation1], 16  }
   0x4   :  { %47 = vsyncadd [#allocation1], 4294967280  ;;  %v18_v0 = vld [vmem:[#allocation0] ss:$0 sm:$0xff] }
   0x5   :  { %19 = vst [vmem:[%s66_s1] sm:$0x3] %v18_v0 }
   0x6   :  { %20 = vsyncpa [#allocation1], 1 }

// kernel: tile.28
= control target key start
LH: loop header
LB: loop body
LE: loop exit
PB: predicated region body
PF: predicated region fallthrough
CT: control target
= control target key end

     0   :  { %2 = vsyncpa [#allocation1], 0  ;;  %s48_s8 = smov [#allocation0]   ;;  %s65_s0 = inlined_call_operand.hbm [shape: f32[3], index: 0, kind: input, shape index: {}]   ;;  %s66_s1 = inlined_call_operand.vmem [shape: f32[2,3], index: 1, kind: output, shape index: {}]  }
   0x1   :  { %s8_s0 = sshll.u32 %s65_s0, 4  ;;  %s10_s9 = sshll.u32 %s48_s8, 4  ;;  %s9_s0 = int_to_ptr.hbm [resolvable:$true] %s8_s0  ;;  %s11_s9 = int_to_ptr.vmem [resolvable:$true] %s10_s9 }
   0x2   :  { %13 = dma.hbm_to_vmem [thread:$0]  %s9_s0, 16, %s11_s9, [#allocation1]  }
   0x3   :  { %46 = dma.done.wait [#allocation1], 16  }
   0x4   :  { %47 = vsyncadd [#allocation1], 4294967280  ;;  %v18_v0 = vld [vmem:[#allocation0] ss:$0 sm:$0xff] }
   0x5   :  { %19 = vst [vmem:[%s66_s1] sm:$0x3] %v18_v0 }
   0x6   :  { %20 = vsyncpa [#allocation1], 1 }

// kernel: conv1d_decoder_forward.1
= control target key start
LH: loop header
LB: loop body
LE: loop exit
PB: predicated region body
PF: predicated region fallthrough
CT: control target
= control target key end

     0   :  { %s9424_s0 = inlined_call_operand.vmem [shape: f32[2,8], index: 0, kind: input, shape index: {}]   ;;  %s9425_s1 = inlined_call_operand.vmem [shape: f32[9,128], index: 1, kind: input, shape index: {}]   ;;  %s9426_s2 = inlined_call_operand.vmem [shape: f32[129,256], index: 2, kind: input, shape index: {}]   ;;  %s9427_s3 = inlined_call_operand.vmem [shape: f32[257,1504], index: 3, kind: input, shape index: {}]   ;;  %s9428_s4 = inlined_call_operand.vmem [shape: f32[46,96], index: 4, kind: input, shape index: {}]   ;;  %s9429_s5 = inlined_call_operand.vmem [shape: f32[6,750], index: 5, kind: output, shape index: {}]  }
   0x1   :  { %v28_v0 = vld [vmem:[%s9427_s3] sm:$0xff]  ;;  %v30_v1 = vld [vmem:[%s9427_s3 + $0x8] sm:$0xff]  ;;  %v32_v2 = vld [vmem:[%s9427_s3 + $0x10] sm:$0xff] }
   0x2   :  { %29 = vst [vmem:[#allocation2 + $0xab0] sm:$0xff] %v28_v0  ;;  %v34_v3 = vld [vmem:[%s9427_s3 + $0x18] sm:$0xff]  ;;  %v36_v4 = vld [vmem:[%s9427_s3 + $0x20] sm:$0xff]  ;;  %v38_v5 = vld [vmem:[%s9427_s3 + $0x28] sm:$0xff] }
   0x3   :  { %31 = vst [vmem:[#allocation2 + $0xbb0] sm:$0xff] %v30_v1  ;;  %v40_v6 = vld [vmem:[%s9427_s3 + $0x30] sm:$0xff]  ;;  %v42_v7 = vld [vmem:[%s9427_s3 + $0x38] sm:$0xff]  ;;  %v44_v8 = vld [vmem:[%s9427_s3 + $0x40] sm:$0xff] }
   0x4   :  { %33 = vst [vmem:[#allocation2 + $0x4d8] sm:$0xff] %v32_v2  ;;  %v46_v9 = vld [vmem:[%s9427_s3 + $0x48] sm:$0xff]  ;;  %v48_v10 = vld [vmem:[%s9427_s3 + $0x50] sm:$0xff]  ;;  %v50_v11 = vld [vmem:[%s9427_s3 + $0x58] sm:$0xff] }
   0x5   :  { %35 = vst [vmem:[#allocation2 + $0x818] sm:$0xff] %v34_v3  ;;  %v52_v12 = vld [vmem:[%s9427_s3 + $0x60] sm:$0xff]  ;;  %v54_v13 = vld [vmem:[%s9427_s3 + $0x68] sm:$0xff]  ;;  %v56_v14 = vld [vmem:[%s9427_s3 + $0x70] sm:$0xff] }
   0x6   :  { %37 = vst [vmem:[#allocation2 + $0xc50] sm:$0xff] %v36_v4  ;;  %v58_v15 = vld [vmem:[%s9427_s3 + $0x78] sm:$0xff]  ;;  %v60_v16 = vld [vmem:[%s9427_s3 + $0x80] sm:$0xff]  ;;  %v62_v17 = vld [vmem:[%s9427_s3 + $0x88] sm:$0xff] }
   0x7   :  { %39 = vst [vmem:[#allocation2 + $0x810] sm:$0xff] %v38_v5  ;;  %v64_v18 = vld [vmem:[%s9427_s3 + $0x90] sm:$0xff]  ;;  %v66_v19 = vld [vmem:[%s9427_s3 + $0x98] sm:$0xff]  ;;  %v68_v20 = vld [vmem:[%s9427_s3 + $0xa0] sm:$0xff] }
   0x8   :  { %41 = vst [vmem:[#allocation2 + $0x770] sm:$0xff] %v40_v6  ;;  %v70_v21 = vld [vmem:[%s9427_s3 + $0xa8] sm:$0xff]  ;;  %v72_v22 = vld [vmem:[%s9427_s3 + $0xb0] sm:$0xff]  ;;  %v74_v23 = vld [vmem:[%s9427_s3 + $0xb8] sm:$0xff] }
   0x9   :  { %43 = vst [vmem:[#allocation2 + $0x338] sm:$0xff] %v42_v7  ;;  %v76_v24 = vld [vmem:[%s9427_s3 + $0xc0] sm:$0xff]  ;;  %v78_v25 = vld [vmem:[%s9427_s3 + $0xc8] sm:$0xff]  ;;  %v80_v26 = vld [vmem:[%s9427_s3 + $0xd0] sm:$0xff] }
   0xa   :  { %45 = vst [vmem:[#allocation2 + $0x450] sm:$0xff] %v44_v8  ;;  %v82_v27 = vld [vmem:[%s9427_s3 + $0xd8] sm:$0xff]  ;;  %v84_v28 = vld [vmem:[%s9427_s3 + $0xe0] sm:$0xff]  ;;  %v86_v29 = vld [vmem:[%s9427_s3 + $0xe8] sm:$0xff] }
   0xb   :  { %47 = vst [vmem:[#allocation2 + $0xb88] sm:$0xff] %v46_v9  ;;  %v88_v30 = vld [vmem:[%s9427_s3 + $0xf0] sm:$0xff]  ;;  %v90_v31 = vld [vmem:[%s9427_s3 + $0xf8] sm:$0xff]  ;;  %v92_v32 = vld [vmem:[%s9427_s3 + $0x100] sm:$0xff] }
   0xc   :  { %49 = vst [vmem:[#allocation2 + $0x918] sm:$0xff] %v48_v10  ;;  %v94_v33 = vld [vmem:[%s9427_s3 + $0x108] sm:$0xff]  ;;  %v96_v34 = vld [vmem:[%s9427_s3 + $0x110] sm:$0xff]  ;;  %v98_v35 = vld [vmem:[%s9427_s3 + $0x118] sm:$0xff] }
   0xd   :  { %51 = vst [vmem:[#allocation2 + $0xb18] sm:$0xff] %v50_v11  ;;  %v100_v36 = vld [vmem:[%s9427_s3 + $0x120] sm:$0xff]  ;;  %v102_v37 = vld [vmem:[%s9427_s3 + $0x128] sm:$0xff]  ;;  %v104_v38 = vld [vmem:[%s9427_s3 + $0x130] sm:$0xff] }
   0xe   :  { %53 = vst [vmem:[#allocation2 + $0x4f8] sm:$0xff] %v52_v12  ;;  %v106_v39 = vld [vmem:[%s9427_s3 + $0x138] sm:$0xff]  ;;  %v108_v40 = vld [vmem:[%s9427_s3 + $0x140] sm:$0xff]  ;;  %v110_v41 = vld [vmem:[%s9427_s3 + $0x148] sm:$0xff] }
   0xf   :  { %55 = vst [vmem:[#allocation2 + $0x710] sm:$0xff] %v54_v13  ;;  %v112_v42 = vld [vmem:[%s9427_s3 + $0x150] sm:$0xff]  ;;  %v114_v43 = vld [vmem:[%s9427_s3 + $0x158] sm:$0xff]  ;;  %v116_v44 = vld [vmem:[%s9427_s3 + $0x160] sm:$0xff] }
  0x10   :  { %57 = vst [vmem:[#allocation2 + $0x6d0] sm:$0xff] %v56_v14  ;;  %v118_v45 = vld [vmem:[%s9427_s3 + $0x168] sm:$0xff]  ;;  %v120_v46 = vld [vmem:[%s9427_s3 + $0x170] sm:$0xff]  ;;  %v122_v47 = vld [vmem:[%s9427_s3 + $0x178] sm:$0xff] }
  0x11   :  { %59 = vst [vmem:[#allocation2 + $0x778] sm:$0xff] %v58_v15  ;;  %v124_v48 = vld [vmem:[%s9427_s3 + $0x180] sm:$0xff]  ;;  %v126_v49 = vld [vmem:[%s9427_s3 + $0x188] sm:$0xff]  ;;  %v128_v50 = vld [vmem:[%s9427_s3 + $0x190] sm:$0xff] }
  0x12   :  { %61 = vst [vmem:[#allocation2 + $0x328] sm:$0xff] %v60_v16  ;;  %v130_v51 = vld [vmem:[%s9427_s3 + $0x198] sm:$0xff]  ;;  %v132_v52 = vld [vmem:[%s9427_s3 + $0x1a0] sm:$0xff]  ;;  %v134_v53 = vld [vmem:[%s9427_s3 + $0x1a8] sm:$0xff] }
  0x13   :  { %63 = vst [vmem:[#allocation2 + $0x730] sm:$0xff] %v62_v17  ;;  %v136_v54 = vld [vmem:[%s9427_s3 + $0x1b0] sm:$0xff]  ;;  %v138_v55 = vld [vmem:[%s9427_s3 + $0x1b8] sm:$0xff]  ;;  %v140_v56 = vld [vmem:[%s9427_s3 + $0x1c0] sm:$0xff] }
  0x14   :  { %65 = vst [vmem:[#allocation2 + $0x18] sm:$0xff] %v64_v18  ;;  %v142_v57 = vld [vmem:[%s9427_s3 + $0x1c8] sm:$0xff]  ;;  %v144_v58 = vld [vmem:[%s9427_s3 + $0x1d0] sm:$0xff]  ;;  %v146_v59 = vld [vmem:[%s9427_s3 + $0x1d8] sm:$0xff] }
  0x15   :  { %67 = vst [vmem:[#allocation2 + $0xad8] sm:$0xff] %v66_v19  ;;  %v148_v60 = vld [vmem:[%s9427_s3 + $0x1e0] sm:$0xff]  ;;  %v150_v61 = vld [vmem:[%s9427_s3 + $0x1e8] sm:$0xff]  ;;  %v152_v62 = vld [vmem:[%s9427_s3 + $0x1f0] sm:$0xff] }
  0x16   :  { %69 = vst [vmem:[#allocation2 + $0x5a0] sm:$0xff] %v68_v20  ;;  %v154_v63 = vld [vmem:[%s9427_s3 + $0x1f8] sm:$0xff]  ;;  %v156_v0 = vld [vmem:[%s9427_s3 + $0x200] sm:$0xff]  ;;  %v158_v1 = vld [vmem:[%s9427_s3 + $0x208] sm:$0xff] }
  0x17   :  { %71 = vst [vmem:[#allocation2 + $0x5b0] sm:$0xff] %v70_v21  ;;  %v160_v2 = vld [vmem:[%s9427_s3 + $0x210] sm:$0xff]  ;;  %v162_v3 = vld [vmem:[%s9427_s3 + $0x218] sm:$0xff]  ;;  %v164_v4 = vld [vmem:[%s9427_s3 + $0x220] sm:$0xff] }
  0x18   :  { %73 = vst [vmem:[#allocation2 + $0x3d8] sm:$0xff] %v72_v22  ;;  %v166_v5 = vld [vmem:[%s9427_s3 + $0x228] sm:$0xff]  ;;  %v168_v6 = vld [vmem:[%s9427_s3 + $0x230] sm:$0xff]  ;;  %v170_v7 = vld [vmem:[%s9427_s3 + $0x238] sm:$0xff] }
  0x19   :  { %75 = vst [vmem:[#allocation2 + $0xb48] sm:$0xff] %v74_v23  ;;  %v172_v8 = vld [vmem:[%s9427_s3 + $0x240] sm:$0xff]  ;;  %v174_v9 = vld [vmem:[%s9427_s3 + $0x248] sm:$0xff]  ;;  %v176_v10 = vld [vmem:[%s9427_s3 + $0x250] sm:$0xff] }
  0x1a   :  { %77 = vst [vmem:[#allocation2 + $0x50] sm:$0xff] %v76_v24  ;;  %v178_v11 = vld [vmem:[%s9427_s3 + $0x258] sm:$0xff]  ;;  %v180_v12 = vld [vmem:[%s9427_s3 + $0x260] sm:$0xff]  ;;  %v182_v13 = vld [vmem:[%s9427_s3 + $0x268] sm:$0xff] }
  0x1b   :  { %79 = vst [vmem:[#allocation2 + $0xbc8] sm:$0xff] %v78_v25  ;;  %v184_v14 = vld [vmem:[%s9427_s3 + $0x270] sm:$0xff]  ;;  %v186_v15 = vld [vmem:[%s9427_s3 + $0x278] sm:$0xff]  ;;  %v188_v16 = vld [vmem:[%s9427_s3 + $0x280] sm:$0xff] }
  0x1c   :  { %81 = vst [vmem:[#allocation2 + $0x9a0] sm:$0xff] %v80_v26  ;;  %v190_v17 = vld [vmem:[%s9427_s3 + $0x288] sm:$0xff]  ;;  %v192_v18 = vld [vmem:[%s9427_s3 + $0x290] sm:$0xff]  ;;  %v194_v19 = vld [vmem:[%s9427_s3 + $0x298] sm:$0xff] }
  0x1d   :  { %83 = vst [vmem:[#allocation2 + $0xa60] sm:$0xff] %v82_v27  ;;  %v196_v20 = vld [vmem:[%s9427_s3 + $0x2a0] sm:$0xff]  ;;  %v198_v21 = vld [vmem:[%s9427_s3 + $0x2a8] sm:$0xff]  ;;  %v200_v22 = vld [vmem:[%s9427_s3 + $0x2b0] sm:$0xff] }
  0x1e   :  { %85 = vst [vmem:[#allocation2 + $0x8e0] sm:$0xff] %v84_v28  ;;  %v202_v23 = vld [vmem:[%s9427_s3 + $0x2b8] sm:$0xff]  ;;  %v204_v24 = vld [vmem:[%s9427_s3 + $0x2c0] sm:$0xff]  ;;  %v206_v25 = vld [vmem:[%s9427_s3 + $0x2c8] sm:$0xff] }
  0x1f   :  { %87 = vst [vmem:[#allocation2 + $0xba0] sm:$0xff] %v86_v29  ;;  %v208_v26 = vld [vmem:[%s9427_s3 + $0x2d0] sm:$0xff]  ;;  %v210_v27 = vld [vmem:[%s9427_s3 + $0x2d8] sm:$0xff]  ;;  %v212_v28 = vld [vmem:[%s9427_s3 + $0x2e0] sm:$0xff] }
  0x20   :  { %89 = vst [vmem:[#allocation2 + $0xbb8] sm:$0xff] %v88_v30  ;;  %v214_v29 = vld [vmem:[%s9427_s3 + $0x2e8] sm:$0xff]  ;;  %v216_v30 = vld [vmem:[%s9427_s3 + $0x2f0] sm:$0xff] }
  0x21   :  { %91 = vst [vmem:[#allocation2 + $0x830] sm:$0xff] %v90_v31  ;;  %v218_v31 = vld [vmem:[%s9427_s3 + $0x2f8] sm:$0xff] }
  0x22   :  { %93 = vst [vmem:[#allocation2 + $0x7d0] sm:$0xff] %v92_v32  ;;  %v220_v32 = vld [vmem:[%s9427_s3 + $0x300] sm:$0xff] }
  0x23   :  { %95 = vst [vmem:[#allocation2 + $0x4e0] sm:$0xff] %v94_v33  ;;  %v222_v33 = vld [vmem:[%s9427_s3 + $0x308] sm:$0xff] }
  0x24   :  { %97 = vst [vmem:[#allocation2 + $0x3d0] sm:$0xff] %v96_v34  ;;  %v224_v34 = vld [vmem:[%s9427_s3 + $0x310] sm:$0xff] }
  0x25   :  { %99 = vst [vmem:[#allocation2 + $0x8f0] sm:$0xff] %v98_v35  ;;  %v226_v35 = vld [vmem:[%s9427_s3 + $0x318] sm:$0xff] }
  0x26   :  { %101 = vst [vmem:[#allocation2 + $0x3c8] sm:$0xff] %v100_v36  ;;  %v228_v36 = vld [vmem:[%s9427_s3 + $0x320] sm:$0xff] }
  0x27   :  { %103 = vst [vmem:[#allocation2 + $0x890] sm:$0xff] %v102_v37  ;;  %v230_v37 = vld [vmem:[%s9427_s3 + $0x328] sm:$0xff] }
  0x28   :  { %105 = vst [vmem:[#allocation2 + $0x858] sm:$0xff] %v104_v38  ;;  %v232_v38 = vld [vmem:[%s9427_s3 + $0x330] sm:$0xff] }
  0x29   :  { %107 = vst [vmem:[#allocation2 + $0x2c8] sm:$0xff] %v106_v39  ;;  %v234_v39 = vld [vmem:[%s9427_s3 + $0x338] sm:$0xff] }
  0x2a   :  { %109 = vst [vmem:[#allocation2 + $0x6a8] sm:$0xff] %v108_v40  ;;  %v236_v40 = vld [vmem:[%s9427_s3 + $0x340] sm:$0xff] }
  0x2b   :  { %111 = vst [vmem:[#allocation2 + $0xa0] sm:$0xff] %v110_v41  ;;  %v238_v41 = vld [vmem:[%s9427_s3 + $0x348] sm:$0xff] }
  0x2c   :  { %113 = vst [vmem:[#allocation2 + $0x5c8] sm:$0xff] %v112_v42  ;;  %v240_v42 = vld [vmem:[%s9427_s3 + $0x350] sm:$0xff] }
  0x2d   :  { %115 = vst [vmem:[#allocation2 + $0x5d8] sm:$0xff] %v114_v43  ;;  %v242_v43 = vld [vmem:[%s9427_s3 + $0x358] sm:$0xff] }
  0x2e   :  { %117 = vst [vmem:[#allocation2 + $0x750] sm:$0xff] %v116_v44  ;;  %v244_v44 = vld [vmem:[%s9427_s3 + $0x360] sm:$0xff] }
  0x2f   :  { %119 = vst [vmem:[#allocation2 + $0x618] sm:$0xff] %v118_v45  ;;  %v246_v45 = vld [vmem:[%s9427_s3 + $0x368] sm:$0xff] }
  0x30   :  { %121 = vst [vmem:[#allocation2 + $0xa28] sm:$0xff] %v120_v46  ;;  %v248_v46 = vld [vmem:[%s9427_s3 + $0x370] sm:$0xff] }
  0x31   :  { %123 = vst [vmem:[#allocation2 + $0xb20] sm:$0xff] %v122_v47  ;;  %v250_v47 = vld [vmem:[%s9427_s3 + $0x378] sm:$0xff] }
  0x32   :  { %125 = vst [vmem:[#allocation2 + $0xbf8] sm:$0xff] %v124_v48  ;;  %v252_v48 = vld [vmem:[%s9427_s3 + $0x380] sm:$0xff] }
  0x33   :  { %127 = vst [vmem:[#allocation2 + $0x878] sm:$0xff] %v126_v49  ;;  %v254_v49 = vld [vmem:[%s9427_s3 + $0x388] sm:$0xff] }
  0x34   :  { %129 = vst [vmem:[#allocation2 + $0x978] sm:$0xff] %v128_v50  ;;  %v256_v50 = vld [vmem:[%s9427_s3 + $0x390] sm:$0xff] }
  0x35   :  { %131 = vst [vmem:[#allocation2 + $0x7a0] sm:$0xff] %v130_v51  ;;  %v258_v51 = vld [vmem:[%s9427_s3 + $0x398] sm:$0xff] }
  0x36   :  { %133 = vst [vmem:[#allocation2 + $0x688] sm:$0xff] %v132_v52  ;;  %v260_v52 = vld [vmem:[%s9427_s3 + $0x3a0] sm:$0xff] }
  0x37   :  { %135 = vst [vmem:[#allocation2 + $0xb80] sm:$0xff] %v134_v53  ;;  %v262_v53 = vld [vmem:[%s9427_s3 + $0x3a8] sm:$0xff] }
  0x38   :  { %137 = vst [vmem:[#allocation2 + $0x2e8] sm:$0xff] %v136_v54  ;;  %v264_v54 = vld [vmem:[%s9427_s3 + $0x3b0] sm:$0xff] }
  0x39   :  { %139 = vst [vmem:[#allocation2 + $0x420] sm:$0xff] %v138_v55  ;;  %v266_v55 = vld [vmem:[%s9427_s3 + $0x3b8] sm:$0xff] }
  0x3a   :  { %141 = vst [vmem:[#allocation2 + $0x418] sm:$0xff] %v140_v56  ;;  %v268_v56 = vld [vmem:[%s9427_s3 + $0x3c0] sm:$0xff] }
  0x3b   :  { %143 = vst [vmem:[#allocation2 + $0xb60] sm:$0xff] %v142_v57  ;;  %v270_v57 = vld [vmem:[%s9427_s3 + $0x3c8] sm:$0xff] }
  0x3c   :  { %145 = vst [vmem:[#allocation2 + $0x508] sm:$0xff] %v144_v58  ;;  %v272_v58 = vld [vmem:[%s9427_s3 + $0x3d0] sm:$0xff] }
  0x3d   :  { %147 = vst [vmem:[#allocation2 + $0x678] sm:$0xff] %v146_v59  ;;  %v274_v59 = vld [vmem:[%s9427_s3 + $0x3d8] sm:$0xff] }
  0x3e   :  { %149 = vst [vmem:[#allocation2 + $0x5d0] sm:$0xff] %v148_v60  ;;  %v276_v60 = vld [vmem:[%s9427_s3 + $0x3e0] sm:$0xff] }
  0x3f   :  { %151 = vst [vmem:[#allocation2 + $0x648] sm:$0xff] %v150_v61  ;;  %v278_v61 = vld [vmem:[%s9427_s3 + $0x3e8] sm:$0xff] }
  0x40   :  { %153 = vst [vmem:[#allocation2 + $0xb38] sm:$0xff] %v152_v62  ;;  %v280_v62 = vld [vmem:[%s9427_s3 + $0x3f0] sm:$0xff] }
  0x41   :  { %155 = vst [vmem:[#allocation2 + $0x2a8] sm:$0xff] %v154_v63  ;;  %v282_v63 = vld [vmem:[%s9427_s3 + $0x3f8] sm:$0xff] }
  0x42   :  { %157 = vst [vmem:[#allocation2 + $0x9b0] sm:$0xff] %v156_v0  ;;  %v284_v0 = vld [vmem:[%s9427_s3 + $0x400] sm:$0xff] }
  0x43   :  { %159 = vst [vmem:[#allocation2 + $0x68] sm:$0xff] %v158_v1  ;;  %v286_v1 = vld [vmem:[%s9427_s3 + $0x408] sm:$0xff] }
  0x44   :  { %161 = vst [vmem:[#allocation2 + $0x90] sm:$0xff] %v160_v2  ;;  %v288_v2 = vld [vmem:[%s9427_s3 + $0x410] sm:$0xff] }
  0x45   :  { %163 = vst [vmem:[#allocation2 + $0x5b8] sm:$0xff] %v162_v3  ;;  %v290_v3 = vld [vmem:[%s9427_s3 + $0x418] sm:$0xff] }
  0x46   :  { %165 = vst [vmem:[#allocation2 + $0x6f8] sm:$0xff] %v164_v4  ;;  %v292_v4 = vld [vmem:[%s9427_s3 + $0x420] sm:$0xff] }
  0x47   :  { %167 = vst [vmem:[#allocation2 + $0x910] sm:$0xff] %v166_v5  ;;  %v294_v5 = vld [vmem:[%s9427_s3 + $0x428] sm:$0xff] }
  0x48   :  { %169 = vst [vmem:[#allocation2 + $0x848] sm:$0xff] %v168_v6  ;;  %v296_v6 = vld [vmem:[%s9427_s3 + $0x430] sm:$0xff] }
  0x49   :  { %171 = vst [vmem:[#allocation2 + $0x838] sm:$0xff] %v170_v7  ;;  %v298_v7 = vld [vmem:[%s9427_s3 + $0x438] sm:$0xff] }
  0x4a   :  { %173 = vst [vmem:[#allocation2 + $0xb58] sm:$0xff] %v172_v8  ;;  %v300_v8 = vld [vmem:[%s9427_s3 + $0x440] sm:$0xff] }
  0x4b   :  { %175 = vst [vmem:[#allocation2 + $0x3e0] sm:$0xff] %v174_v9  ;;  %v302_v9 = vld [vmem:[%s9427_s3 + $0x448] sm:$0xff] }
  0x4c   :  { %177 = vst [vmem:[#allocation2 + $0x238] sm:$0xff] %v176_v10  ;;  %v304_v10 = vld [vmem:[%s9427_s3 + $0x450] sm:$0xff] }
  0x4d   :  { %179 = vst [vmem:[#allocation2 + $0x660] sm:$0xff] %v178_v11  ;;  %v306_v11 = vld [vmem:[%s9427_s3 + $0x458] sm:$0xff] }
  0x4e   :  { %181 = vst [vmem:[#allocation2 + $0x380] sm:$0xff] %v180_v12  ;;  %v308_v12 = vld [vmem:[%s9427_s3 + $0x460] sm:$0xff] }
  0x4f   :  { %183 = vst [vmem:[#allocation2 + $0x638] sm:$0xff] %v182_v13  ;;  %v310_v13 = vld [vmem:[%s9427_s3 + $0x468] sm:$0xff] }
  0x50   :  { %185 = vst [vmem:[#allocation2 + $0x138] sm:$0xff] %v184_v14  ;;  %v312_v14 = vld [vmem:[%s9427_s3 + $0x470] sm:$0xff] }
  0x51   :  { %187 = vst [vmem:[#allocation2 + $0xd0] sm:$0xff] %v186_v15  ;;  %v314_v15 = vld [vmem:[%s9427_s3 + $0x478] sm:$0xff] }
  0x52   :  { %189 = vst [vmem:[#allocation2 + $0x170] sm:$0xff] %v188_v16  ;;  %v316_v16 = vld [vmem:[%s9427_s3 + $0x480] sm:$0xff] }
  0x53   :  { %191 = vst [vmem:[#allocation2 + $0x900] sm:$0xff] %v190_v17  ;;  %v318_v17 = vld [vmem:[%s9427_s3 + $0x488] sm:$0xff] }
  0x54   :  { %193 = vst [vmem:[#allocation2 + $0x358] sm:$0xff] %v192_v18  ;;  %v320_v18 = vld [vmem:[%s9427_s3 + $0x490] sm:$0xff] }
  0x55   :  { %195 = vst [vmem:[#allocation2 + $0x350] sm:$0xff] %v194_v19  ;;  %v322_v19 = vld [vmem:[%s9427_s3 + $0x498] sm:$0xff] }
  0x56   :  { %197 = vst [vmem:[#allocation2 + $0x6a0] sm:$0xff] %v196_v20  ;;  %v324_v20 = vld [vmem:[%s9427_s3 + $0x4a0] sm:$0xff] }
  0x57   :  { %199 = vst [vmem:[#allocation2 + $0x920] sm:$0xff] %v198_v21  ;;  %v326_v21 = vld [vmem:[%s9427_s3 + $0x4a8] sm:$0xff] }
  0x58   :  { %201 = vst [vmem:[#allocation2 + $0x228] sm:$0xff] %v200_v22  ;;  %v328_v22 = vld [vmem:[%s9427_s3 + $0x4b0] sm:$0xff] }
  0x59   :  { %203 = vst [vmem:[#allocation2 + $0x40] sm:$0xff] %v202_v23  ;;  %v330_v23 = vld [vmem:[%s9427_s3 + $0x4b8] sm:$0xff] }
  0x5a   :  { %205 = vst [vmem:[#allocation2 + $0x370] sm:$0xff] %v204_v24  ;;  %v332_v24 = vld [vmem:[%s9427_s3 + $0x4c0] sm:$0xff] }
  0x5b   :  { %207 = vst [vmem:[#allocation2 + $0xbe0] sm:$0xff] %v206_v25  ;;  %v334_v25 = vld [vmem:[%s9427_s3 + $0x4c8] sm:$0xff] }
  0x5c   :  { %209 = vst [vmem:[#allocation2 + $0xa30] sm:$0xff] %v208_v26  ;;  %v336_v26 = vld [vmem:[%s9427_s3 + $0x4d0] sm:$0xff] }
  0x5d   :  { %211 = vst [vmem:[#allocation2 + $0x960] sm:$0xff] %v210_v27  ;;  %v338_v27 = vld [vmem:[%s9427_s3 + $0x4d8] sm:$0xff] }
  0x5e   :  { %213 = vst [vmem:[#allocation2 + $0x958] sm:$0xff] %v212_v28  ;;  %v340_v28 = vld [vmem:[%s9427_s3 + $0x4e0] sm:$0xff] }
  0x5f   :  { %215 = vst [vmem:[#allocation2 + $0xae8] sm:$0xff] %v214_v29  ;;  %v342_v29 = vld [vmem:[%s9427_s3 + $0x4e8] sm:$0xff] }
  0x60   :  { %217 = vst [vmem:[#allocation2 + $0x308] sm:$0xff] %v216_v30  ;;  %v344_v30 = vld [vmem:[%s9427_s3 + $0x4f0] sm:$0xff] }
  0x61   :  { %219 = vst [vmem:[#allocation2 + $0x510] sm:$0xff] %v218_v31  ;;  %v346_v31 = vld [vmem:[%s9427_s3 + $0x4f8] sm:$0xff] }
  0x62   :  { %221 = vst [vmem:[#allocation2 + $0x8b0] sm:$0xff] %v220_v32  ;;  %v348_v32 = vld [vmem:[%s9427_s3 + $0x500] sm:$0xff] }
  0x63   :  { %223 = vst [vmem:[#allocation2 + $0x8c0] sm:$0xff] %v222_v33  ;;  %v350_v33 = vld [vmem:[%s9427_s3 + $0x508] sm:$0xff] }
  0x64   :  { %225 = vst [vmem:[#allocation2 + $0xa40] sm:$0xff] %v224_v34  ;;  %v352_v34 = vld [vmem:[%s9427_s3 + $0x510] sm:$0xff] }
  0x65   :  { %227 = vst [vmem:[#allocation2 + $0x128] sm:$0xff] %v226_v35  ;;  %v354_v35 = vld [vmem:[%s9427_s3 + $0x518] sm:$0xff] }
  0x66   :  { %229 = vst [vmem:[#allocation2 + $0x9e0] sm:$0xff] %v228_v36  ;;  %v356_v36 = vld [vmem:[%s9427_s3 + $0x520] sm:$0xff] }
  0x67   :  { %231 = vst [vmem:[#allocation2 + $0x738] sm:$0xff] %v230_v37  ;;  %v358_v37 = vld [vmem:[%s9427_s3 + $0x528] sm:$0xff] }
  0x68   :  { %233 = vst [vmem:[#allocation2 + $0x7e0] sm:$0xff] %v232_v38  ;;  %v360_v38 = vld [vmem:[%s9427_s3 + $0x530] sm:$0xff] }
  0x69   :  { %235 = vst [vmem:[#allocation2 + $0xa70] sm:$0xff] %v234_v39  ;;  %v362_v39 = vld [vmem:[%s9427_s3 + $0x538] sm:$0xff] }
  0x6a   :  { %237 = vst [vmem:[#allocation2 + $0x48] sm:$0xff] %v236_v40  ;;  %v364_v40 = vld [vmem:[%s9427_s3 + $0x540] sm:$0xff] }
  0x6b   :  { %239 = vst [vmem:[#allocation2 + $0x130] sm:$0xff] %v238_v41  ;;  %v366_v41 = vld [vmem:[%s9427_s3 + $0x548] sm:$0xff] }
  0x6c   :  { %241 = vst [vmem:[#allocation2 + $0x148] sm:$0xff] %v240_v42  ;;  %v368_v42 = vld [vmem:[%s9427_s3 + $0x550] sm:$0xff] }
  0x6d   :  { %243 = vst [vmem:[#allocation2 + $0x7f0] sm:$0xff] %v242_v43  ;;  %v370_v43 = vld [vmem:[%s9427_s3 + $0x558] sm:$0xff] }
  0x6e   :  { %245 = vst [vmem:[#allocation2 + $0xa90] sm:$0xff] %v244_v44  ;;  %v372_v44 = vld [vmem:[%s9427_s3 + $0x560] sm:$0xff] }
  0x6f   :  { %247 = vst [vmem:[#allocation2 + $0xaa0] sm:$0xff] %v246_v45  ;;  %v374_v45 = vld [vmem:[%s9427_s3 + $0x568] sm:$0xff] }
  0x70   :  { %249 = vst [vmem:[#allocation2 + $0xb30] sm:$0xff] %v248_v46  ;;  %v376_v46 = vld [vmem:[%s9427_s3 + $0x570] sm:$0xff] }
  0x71   :  { %251 = vst [vmem:[#allocation2 + $0xc38] sm:$0xff] %v250_v47  ;;  %v378_v47 = vld [vmem:[%s9427_s3 + $0x578] sm:$0xff] }
  0x72   :  { %253 = vst [vmem:[#allocation2 + $0x140] sm:$0xff] %v252_v48  ;;  %v380_v48 = vld [vmem:[%s9427_s3 + $0x580] sm:$0xff] }
  0x73   :  { %255 = vst [vmem:[#allocation2 + $0x298] sm:$0xff] %v254_v49  ;;  %v382_v49 = vld [vmem:[%s9427_s3 + $0x588] sm:$0xff] }
  0x74   :  { %257 = vst [vmem:[#allocation2 + $0x870] sm:$0xff] %v256_v50  ;;  %v384_v50 = vld [vmem:[%s9427_s3 + $0x590] sm:$0xff] }
  0x75   :  { %259 = vst [vmem:[#allocation2 + $0x260] sm:$0xff] %v258_v51  ;;  %v386_v51 = vld [vmem:[%s9427_s3 + $0x598] sm:$0xff] }
  0x76   :  { %261 = vst [vmem:[#allocation2 + $0xbf0] sm:$0xff] %v260_v52  ;;  %v388_v52 = vld [vmem:[%s9427_s3 + $0x5a0] sm:$0xff] }
  0x77   :  { %263 = vst [vmem:[#allocation2 + $0x388] sm:$0xff] %v262_v53  ;;  %v390_v53 = vld [vmem:[%s9427_s3 + $0x5a8] sm:$0xff] }
  0x78   :  { %265 = vst [vmem:[#allocation2 + $0x578] sm:$0xff] %v264_v54  ;;  %v392_v54 = vld [vmem:[%s9427_s3 + $0x5b0] sm:$0xff] }
  0x79   :  { %267 = vst [vmem:[#allocation2 + $0x4b0] sm:$0xff] %v266_v55  ;;  %v394_v55 = vld [vmem:[%s9427_s3 + $0x5b8] sm:$0xff] }
  0x7a   :  { %269 = vst [vmem:[#allocation2 + $0x748] sm:$0xff] %v268_v56  ;;  %v396_v56 = vld [vmem:[%s9427_s3 + $0x5c0] sm:$0xff] }
  0x7b   :  { %271 = vst [vmem:[#allocation2 + $0x368] sm:$0xff] %v270_v57  ;;  %v398_v57 = vld [vmem:[%s9427_s3 + $0x5c8] sm:$0xff] }
  0x7c   :  { %273 = vst [vmem:[#allocation2 + $0x5e8] sm:$0xff] %v272_v58  ;;  %v400_v58 = vld [vmem:[%s9427_s3 + $0x5d0] sm:$0xff] }
  0x7d   :  { %275 = vst [vmem:[#allocation2 + $0x1c8] sm:$0xff] %v274_v59  ;;  %v402_v59 = vld [vmem:[%s9427_s3 + $0x5d8] sm:$0xff] }
  0x7e   :  { %277 = vst [vmem:[#allocation2 + $0x670] sm:$0xff] %v276_v60  ;;  %v404_v60 = vld [vmem:[%s9427_s3 + $0x5e0] sm:$0xff] }
  0x7f   :  { %279 = vst [vmem:[#allocation2 + $0x6f0] sm:$0xff] %v278_v61  ;;  %v406_v61 = vld [vmem:[%s9427_s3 + $0x5e8] sm:$0xff] }
  0x80   :  { %281 = vst [vmem:[#allocation2] sm:$0xff] %v280_v62  ;;  %v408_v62 = vld [vmem:[%s9427_s3 + $0x5f0] sm:$0xff] }
  0x81   :  { %283 = vst [vmem:[#allocation2 + $0x1d8] sm:$0xff] %v282_v63  ;;  %v410_v63 = vld [vmem:[%s9427_s3 + $0x5f8] sm:$0xff] }
  0x82   :  { %285 = vst [vmem:[#allocation2 + $0x3a8] sm:$0xff] %v284_v0  ;;  %v412_v0 = vld [vmem:[%s9427_s3 + $0x600] sm:$0xff] }
  0x83   :  { %287 = vst [vmem:[#allocation2 + $0x3b8] sm:$0xff] %v286_v1  ;;  %v414_v1 = vld [vmem:[%s9427_s3 + $0x608] sm:$0xff] }
  0x84   :  { %289 = vst [vmem:[#allocation2 + $0x9d0] sm:$0xff] %v288_v2  ;;  %v416_v2 = vld [vmem:[%s9427_s3 + $0x610] sm:$0xff] }
  0x85   :  { %291 = vst [vmem:[#allocation2 + $0xc40] sm:$0xff] %v290_v3  ;;  %v418_v3 = vld [vmem:[%s9427_s3 + $0x618] sm:$0xff] }
  0x86   :  { %293 = vst [vmem:[#allocation2 + $0x6b8] sm:$0xff] %v292_v4  ;;  %v420_v4 = vld [vmem:[%s9427_s3 + $0x620] sm:$0xff] }
  0x87   :  { %295 = vst [vmem:[#allocation2 + $0x360] sm:$0xff] %v294_v5  ;;  %v422_v5 = vld [vmem:[%s9427_s3 + $0x628] sm:$0xff] }
  0x88   :  { %297 = vst [vmem:[#allocation2 + $0x300] sm:$0xff] %v296_v6  ;;  %v424_v6 = vld [vmem:[%s9427_s3 + $0x630] sm:$0xff] }
  0x89   :  { %299 = vst [vmem:[#allocation2 + $0xc30] sm:$0xff] %v298_v7  ;;  %v426_v7 = vld [vmem:[%s9427_s3 + $0x638] sm:$0xff] }
  0x8a   :  { %301 = vst [vmem:[#allocation2 + $0x4b8] sm:$0xff] %v300_v8  ;;  %v428_v8 = vld [vmem:[%s9427_s3 + $0x640] sm:$0xff] }
  0x8b   :  { %303 = vst [vmem:[#allocation2 + $0xa78] sm:$0xff] %v302_v9  ;;  %v430_v9 = vld [vmem:[%s9427_s3 + $0x648] sm:$0xff] }
  0x8c   :  { %305 = vst [vmem:[#allocation2 + $0x720] sm:$0xff] %v304_v10  ;;  %v432_v10 = vld [vmem:[%s9427_s3 + $0x650] sm:$0xff] }
  0x8d   :  { %307 = vst [vmem:[#allocation2 + $0x1e8] sm:$0xff] %v306_v11  ;;  %v434_v11 = vld [vmem:[%s9427_s3 + $0x658] sm:$0xff] }
  0x8e   :  { %309 = vst [vmem:[#allocation2 + $0x448] sm:$0xff] %v308_v12  ;;  %v436_v12 = vld [vmem:[%s9427_s3 + $0x660] sm:$0xff] }
  0x8f   :  { %311 = vst [vmem:[#allocation2 + $0xa10] sm:$0xff] %v310_v13  ;;  %v438_v13 = vld [vmem:[%s9427_s3 + $0x668] sm:$0xff] }
  0x90   :  { %313 = vst [vmem:[#allocation2 + $0x178] sm:$0xff] %v312_v14  ;;  %v440_v14 = vld [vmem:[%s9427_s3 + $0x670] sm:$0xff] }
  0x91   :  { %315 = vst [vmem:[#allocation2 + $0xe0] sm:$0xff] %v314_v15  ;;  %v442_v15 = vld [vmem:[%s9427_s3 + $0x678] sm:$0xff] }
  0x92   :  { %317 = vst [vmem:[#allocation2 + $0x518] sm:$0xff] %v316_v16  ;;  %v444_v16 = vld [vmem:[%s9427_s3 + $0x680] sm:$0xff] }
  0x93   :  { %319 = vst [vmem:[#allocation2 + $0x110] sm:$0xff] %v318_v17  ;;  %v446_v17 = vld [vmem:[%s9427_s3 + $0x688] sm:$0xff] }
  0x94   :  { %321 = vst [vmem:[#allocation2 + $0x3a0] sm:$0xff] %v320_v18  ;;  %v448_v18 = vld [vmem:[%s9427_s3 + $0x690] sm:$0xff] }
  0x95   :  { %323 = vst [vmem:[#allocation2 + $0x8c8] sm:$0xff] %v322_v19  ;;  %v450_v19 = vld [vmem:[%s9427_s3 + $0x698] sm:$0xff] }
  0x96   :  { %325 = vst [vmem:[#allocation2 + $0x4f0] sm:$0xff] %v324_v20  ;;  %v452_v20 = vld [vmem:[%s9427_s3 + $0x6a0] sm:$0xff] }
  0x97   :  { %327 = vst [vmem:[#allocation2 + $0x58] sm:$0xff] %v326_v21  ;;  %v454_v21 = vld [vmem:[%s9427_s3 + $0x6a8] sm:$0xff] }
  0x98   :  { %329 = vst [vmem:[#allocation2 + $0x1e0] sm:$0xff] %v328_v22  ;;  %v456_v22 = vld [vmem:[%s9427_s3 + $0x6b0] sm:$0xff] }
  0x99   :  { %331 = vst [vmem:[#allocation2 + $0x8d0] sm:$0xff] %v330_v23  ;;  %v458_v23 = vld [vmem:[%s9427_s3 + $0x6b8] sm:$0xff] }
  0x9a   :  { %333 = vst [vmem:[#allocation2 + $0xb70] sm:$0xff] %v332_v24  ;;  %v460_v24 = vld [vmem:[%s9427_s3 + $0x6c0] sm:$0xff] }
  0x9b   :  { %335 = vst [vmem:[#allocation2 + $0x198] sm:$0xff] %v334_v25  ;;  %v462_v25 = vld [vmem:[%s9427_s3 + $0x6c8] sm:$0xff] }
  0x9c   :  { %337 = vst [vmem:[#allocation2 + $0x188] sm:$0xff] %v336_v26  ;;  %v464_v26 = vld [vmem:[%s9427_s3 + $0x6d0] sm:$0xff] }
  0x9d   :  { %339 = vst [vmem:[#allocation2 + $0x530] sm:$0xff] %v338_v27  ;;  %v466_v27 = vld [vmem:[%s9427_s3 + $0x6d8] sm:$0xff] }
  0x9e   :  { %341 = vst [vmem:[#allocation2 + $0x990] sm:$0xff] %v340_v28  ;;  %v468_v28 = vld [vmem:[%s9427_s3 + $0x6e0] sm:$0xff] }
  0x9f   :  { %343 = vst [vmem:[#allocation2 + $0xd8] sm:$0xff] %v342_v29  ;;  %v470_v29 = vld [vmem:[%s9427_s3 + $0x6e8] sm:$0xff] }
  0xa0   :  { %345 = vst [vmem:[#allocation2 + $0xf8] sm:$0xff] %v344_v30  ;;  %v472_v30 = vld [vmem:[%s9427_s3 + $0x6f0] sm:$0xff] }
  0xa1   :  { %347 = vst [vmem:[#allocation2 + $0x608] sm:$0xff] %v346_v31  ;;  %v474_v31 = vld [vmem:[%s9427_s3 + $0x6f8] sm:$0xff] }
  0xa2   :  { %349 = vst [vmem:[#allocation2 + $0x478] sm:$0xff] %v348_v32  ;;  %v476_v32 = vld [vmem:[%s9427_s3 + $0x700] sm:$0xff] }
  0xa3   :  { %351 = vst [vmem:[#allocation2 + $0xb10] sm:$0xff] %v350_v33  ;;  %v478_v33 = vld [vmem:[%s9427_s3 + $0x708] sm:$0xff] }
  0xa4   :  { %353 = vst [vmem:[#allocation2 + $0xa08] sm:$0xff] %v352_v34  ;;  %v480_v34 = vld [vmem:[%s9427_s3 + $0x710] sm:$0xff] }
  0xa5   :  { %355 = vst [vmem:[#allocation2 + $0xa8] sm:$0xff] %v354_v35  ;;  %v482_v35 = vld [vmem:[%s9427_s3 + $0x718] sm:$0xff] }
  0xa6   :  { %357 = vst [vmem:[#allocation2 + $0xc0] sm:$0xff] %v356_v36  ;;  %v484_v36 = vld [vmem:[%s9427_s3 + $0x720] sm:$0xff] }
  0xa7   :  { %359 = vst [vmem:[#allocation2 + $0x4c0] sm:$0xff] %v358_v37  ;;  %v486_v37 = vld [vmem:[%s9427_s3 + $0x728] sm:$0xff] }
  0xa8   :  { %361 = vst [vmem:[#allocation2 + $0x398] sm:$0xff] %v360_v38  ;;  %v488_v38 = vld [vmem:[%s9427_s3 + $0x730] sm:$0xff] }
  0xa9   :  { %363 = vst [vmem:[#allocation2 + $0x3b0] sm:$0xff] %v362_v39  ;;  %v490_v39 = vld [vmem:[%s9427_s3 + $0x738] sm:$0xff] }
  0xaa   :  { %365 = vst [vmem:[#allocation2 + $0x28] sm:$0xff] %v364_v40  ;;  %v492_v40 = vld [vmem:[%s9427_s3 + $0x740] sm:$0xff] }
  0xab   :  { %367 = vst [vmem:[#allocation2 + $0x9a8] sm:$0xff] %v366_v41  ;;  %v494_v41 = vld [vmem:[%s9427_s3 + $0x748] sm:$0xff] }
  0xac   :  { %369 = vst [vmem:[#allocation2 + $0x550] sm:$0xff] %v368_v42  ;;  %v496_v42 = vld [vmem:[%s9427_s3 + $0x750] sm:$0xff] }
  0xad   :  { %371 = vst [vmem:[#allocation2 + $0x248] sm:$0xff] %v370_v43  ;;  %v498_v43 = vld [vmem:[%s9427_s3 + $0x758] sm:$0xff] }
  0xae   :  { %373 = vst [vmem:[#allocation2 + $0x280] sm:$0xff] %v372_v44  ;;  %v500_v44 = vld [vmem:[%s9427_s3 + $0x760] sm:$0xff] }
  0xaf   :  { %375 = vst [vmem:[#allocation2 + $0xc58] sm:$0xff] %v374_v45  ;;  %v502_v45 = vld [vmem:[%s9427_s3 + $0x768] sm:$0xff] }
  0xb0   :  { %377 = vst [vmem:[#allocation2 + $0xa80] sm:$0xff] %v376_v46  ;;  %v504_v46 = vld [vmem:[%s9427_s3 + $0x770] sm:$0xff] }
  0xb1   :  { %379 = vst [vmem:[#allocation2 + $0x78] sm:$0xff] %v378_v47  ;;  %v506_v47 = vld [vmem:[%s9427_s3 + $0x778] sm:$0xff] }
  0xb2   :  { %381 = vst [vmem:[#allocation2 + $0x440] sm:$0xff] %v380_v48  ;;  %v508_v48 = vld [vmem:[%s9427_s3 + $0x780] sm:$0xff] }
  0xb3   :  { %383 = vst [vmem:[#allocation2 + $0x2b0] sm:$0xff] %v382_v49  ;;  %v510_v49 = vld [vmem:[%s9427_s3 + $0x788] sm:$0xff] }
  0xb4   :  { %385 = vst [vmem:[#allocation2 + $0x1a8] sm:$0xff] %v384_v50  ;;  %v512_v50 = vld [vmem:[%s9427_s3 + $0x790] sm:$0xff] }
  0xb5   :  { %387 = vst [vmem:[#allocation2 + $0x408] sm:$0xff] %v386_v51  ;;  %v514_v51 = vld [vmem:[%s9427_s3 + $0x798] sm:$0xff] }
  0xb6   :  { %389 = vst [vmem:[#allocation2 + $0xb98] sm:$0xff] %v388_v52  ;;  %v516_v52 = vld [vmem:[%s9427_s3 + $0x7a0] sm:$0xff] }
  0xb7   :  { %391 = vst [vmem:[#allocation2 + $0xb90] sm:$0xff] %v390_v53  ;;  %v518_v53 = vld [vmem:[%s9427_s3 + $0x7a8] sm:$0xff] }
  0xb8   :  { %393 = vst [vmem:[#allocation2 + $0x850] sm:$0xff] %v392_v54  ;;  %v520_v54 = vld [vmem:[%s9427_s3 + $0x7b0] sm:$0xff] }
  0xb9   :  { %395 = vst [vmem:[#allocation2 + $0x928] sm:$0xff] %v394_v55  ;;  %v522_v55 = vld [vmem:[%s9427_s3 + $0x7b8] sm:$0xff] }
  0xba   :  { %397 = vst [vmem:[#allocation2 + $0x610] sm:$0xff] %v396_v56  ;;  %v524_v56 = vld [vmem:[%s9427_s3 + $0x7c0] sm:$0xff] }
  0xbb   :  { %399 = vst [vmem:[#allocation2 + $0x278] sm:$0xff] %v398_v57  ;;  %v526_v57 = vld [vmem:[%s9427_s3 + $0x7c8] sm:$0xff] }
  0xbc   :  { %401 = vst [vmem:[#allocation2 + $0x258] sm:$0xff] %v400_v58  ;;  %v528_v58 = vld [vmem:[%s9427_s3 + $0x7d0] sm:$0xff] }
  0xbd   :  { %403 = vst [vmem:[#allocation2 + $0x898] sm:$0xff] %v402_v59  ;;  %v530_v59 = vld [vmem:[%s9427_s3 + $0x7d8] sm:$0xff] }
  0xbe   :  { %405 = vst [vmem:[#allocation2 + $0xaf8] sm:$0xff] %v404_v60  ;;  %v532_v60 = vld [vmem:[%s9427_s3 + $0x7e0] sm:$0xff] }
  0xbf   :  { %407 = vst [vmem:[#allocation2 + $0x1b0] sm:$0xff] %v406_v61  ;;  %v534_v61 = vld [vmem:[%s9427_s3 + $0x7e8] sm:$0xff] }
  0xc0   :  { %409 = vst [vmem:[#allocation2 + $0x880] sm:$0xff] %v408_v62  ;;  %v536_v62 = vld [vmem:[%s9427_s3 + $0x7f0] sm:$0xff] }
  0xc1   :  { %411 = vst [vmem:[#allocation2 + $0x988] sm:$0xff] %v410_v63  ;;  %v538_v63 = vld [vmem:[%s9427_s3 + $0x7f8] sm:$0xff] }
  0xc2   :  { %413 = vst [vmem:[#allocation2 + $0x800] sm:$0xff] %v412_v0  ;;  %v540_v0 = vld [vmem:[%s9427_s3 + $0x800] sm:$0xff] }
  0xc3   :  { %415 = vst [vmem:[#allocation2 + $0x430] sm:$0xff] %v414_v1  ;;  %v542_v1 = vld [vmem:[%s9427_s3 + $0x808] sm:$0xff] }
  0xc4   :  { %417 = vst [vmem:[#allocation2 + $0x2f0] sm:$0xff] %v416_v2  ;;  %v544_v2 = vld [vmem:[%s9427_s3 + $0x810] sm:$0xff] }
  0xc5   :  { %419 = vst [vmem:[#allocation2 + $0xb50] sm:$0xff] %v418_v3  ;;  %v546_v3 = vld [vmem:[%s9427_s3 + $0x818] sm:$0xff] }
  0xc6   :  { %421 = vst [vmem:[#allocation2 + $0xbe8] sm:$0xff] %v420_v4  ;;  %v548_v4 = vld [vmem:[%s9427_s3 + $0x820] sm:$0xff] }
  0xc7   :  { %423 = vst [vmem:[#allocation2 + $0xae0] sm:$0xff] %v422_v5  ;;  %v550_v5 = vld [vmem:[%s9427_s3 + $0x828] sm:$0xff] }
  0xc8   :  { %425 = vst [vmem:[#allocation2 + $0x808] sm:$0xff] %v424_v6  ;;  %v552_v6 = vld [vmem:[%s9427_s3 + $0x830] sm:$0xff] }
  0xc9   :  { %427 = vst [vmem:[#allocation2 + $0xa98] sm:$0xff] %v426_v7  ;;  %v554_v7 = vld [vmem:[%s9427_s3 + $0x838] sm:$0xff] }
  0xca   :  { %429 = vst [vmem:[#allocation2 + $0x80] sm:$0xff] %v428_v8  ;;  %v556_v8 = vld [vmem:[%s9427_s3 + $0x840] sm:$0xff] }
  0xcb   :  { %431 = vst [vmem:[#allocation2 + $0xba8] sm:$0xff] %v430_v9  ;;  %v558_v9 = vld [vmem:[%s9427_s3 + $0x848] sm:$0xff] }
  0xcc   :  { %433 = vst [vmem:[#allocation2 + $0x400] sm:$0xff] %v432_v10  ;;  %v560_v10 = vld [vmem:[%s9427_s3 + $0x850] sm:$0xff] }
  0xcd   :  { %435 = vst [vmem:[#allocation2 + $0x820] sm:$0xff] %v434_v11  ;;  %v562_v11 = vld [vmem:[%s9427_s3 + $0x858] sm:$0xff] }
  0xce   :  { %437 = vst [vmem:[#allocation2 + $0xbc0] sm:$0xff] %v436_v12  ;;  %v564_v12 = vld [vmem:[%s9427_s3 + $0x860] sm:$0xff] }
  0xcf   :  { %439 = vst [vmem:[#allocation2 + $0x268] sm:$0xff] %v438_v13  ;;  %v566_v13 = vld [vmem:[%s9427_s3 + $0x868] sm:$0xff] }
  0xd0   :  { %441 = vst [vmem:[#allocation2 + $0x6e8] sm:$0xff] %v440_v14  ;;  %v568_v14 = vld [vmem:[%s9427_s3 + $0x870] sm:$0xff] }
  0xd1   :  { %443 = vst [vmem:[#allocation2 + $0x200] sm:$0xff] %v442_v15  ;;  %v570_v15 = vld [vmem:[%s9427_s3 + $0x878] sm:$0xff] }
  0xd2   :  { %445 = vst [vmem:[#allocation2 + $0x708] sm:$0xff] %v444_v16  ;;  %v572_v16 = vld [vmem:[%s9427_s3 + $0x880] sm:$0xff] }
  0xd3   :  { %447 = vst [vmem:[#allocation2 + $0x828] sm:$0xff] %v446_v17  ;;  %v574_v17 = vld [vmem:[%s9427_s3 + $0x888] sm:$0xff] }
  0xd4   :  { %449 = vst [vmem:[#allocation2 + $0x3e8] sm:$0xff] %v448_v18  ;;  %v576_v18 = vld [vmem:[%s9427_s3 + $0x890] sm:$0xff] }
  0xd5   :  { %451 = vst [vmem:[#allocation2 + $0x270] sm:$0xff] %v450_v19  ;;  %v578_v19 = vld [vmem:[%s9427_s3 + $0x898] sm:$0xff] }
  0xd6   :  { %453 = vst [vmem:[#allocation2 + $0xb68] sm:$0xff] %v452_v20  ;;  %v580_v20 = vld [vmem:[%s9427_s3 + $0x8a0] sm:$0xff] }
  0xd7   :  { %455 = vst [vmem:[#allocation2 + $0x2d8] sm:$0xff] %v454_v21  ;;  %v582_v21 = vld [vmem:[%s9427_s3 + $0x8a8] sm:$0xff] }
  0xd8   :  { %457 = vst [vmem:[#allocation2 + $0x1f8] sm:$0xff] %v456_v22  ;;  %v584_v22 = vld [vmem:[%s9427_s3 + $0x8b0] sm:$0xff] }
  0xd9   :  { %459 = vst [vmem:[#allocation2 + $0xc10] sm:$0xff] %v458_v23  ;;  %v586_v23 = vld [vmem:[%s9427_s3 + $0x8b8] sm:$0xff] }
  0xda   :  { %461 = vst [vmem:[#allocation2 + $0x310] sm:$0xff] %v460_v24  ;;  %v588_v24 = vld [vmem:[%s9427_s3 + $0x8c0] sm:$0xff] }
  0xdb   :  { %463 = vst [vmem:[#allocation2 + $0x2c0] sm:$0xff] %v462_v25  ;;  %v590_v25 = vld [vmem:[%s9427_s3 + $0x8c8] sm:$0xff] }
  0xdc   :  { %465 = vst [vmem:[#allocation2 + $0x480] sm:$0xff] %v464_v26  ;;  %v592_v26 = vld [vmem:[%s9427_s3 + $0x8d0] sm:$0xff] }
  0xdd   :  { %467 = vst [vmem:[#allocation2 + $0x888] sm:$0xff] %v466_v27  ;;  %v594_v27 = vld [vmem:[%s9427_s3 + $0x8d8] sm:$0xff] }
  0xde   :  { %469 = vst [vmem:[#allocation2 + $0x490] sm:$0xff] %v468_v28  ;;  %v596_v28 = vld [vmem:[%s9427_s3 + $0x8e0] sm:$0xff] }
  0xdf   :  { %471 = vst [vmem:[#allocation2 + $0x3f0] sm:$0xff] %v470_v29  ;;  %v598_v29 = vld [vmem:[%s9427_s3 + $0x8e8] sm:$0xff] }
  0xe0   :  { %473 = vst [vmem:[#allocation2 + $0x520] sm:$0xff] %v472_v30  ;;  %v600_v30 = vld [vmem:[%s9427_s3 + $0x8f0] sm:$0xff] }
  0xe1   :  { %475 = vst [vmem:[#allocation2 + $0x230] sm:$0xff] %v474_v31  ;;  %v602_v31 = vld [vmem:[%s9427_s3 + $0x8f8] sm:$0xff] }
  0xe2   :  { %477 = vst [vmem:[#allocation2 + $0x680] sm:$0xff] %v476_v32  ;;  %v604_v32 = vld [vmem:[%s9427_s3 + $0x900] sm:$0xff] }
  0xe3   :  { %479 = vst [vmem:[#allocation2 + $0x668] sm:$0xff] %v478_v33  ;;  %v606_v33 = vld [vmem:[%s9427_s3 + $0x908] sm:$0xff] }
  0xe4   :  { %481 = vst [vmem:[#allocation2 + $0x330] sm:$0xff] %v480_v34  ;;  %v608_v34 = vld [vmem:[%s9427_s3 + $0x910] sm:$0xff] }
  0xe5   :  { %483 = vst [vmem:[#allocation2 + $0x628] sm:$0xff] %v482_v35  ;;  %v610_v35 = vld [vmem:[%s9427_s3 + $0x918] sm:$0xff] }
  0xe6   :  { %485 = vst [vmem:[#allocation2 + $0x7d8] sm:$0xff] %v484_v36  ;;  %v612_v36 = vld [vmem:[%s9427_s3 + $0x920] sm:$0xff] }
  0xe7   :  { %487 = vst [vmem:[#allocation2 + $0x2b8] sm:$0xff] %v486_v37  ;;  %v614_v37 = vld [vmem:[%s9427_s3 + $0x928] sm:$0xff] }
  0xe8   :  { %489 = vst [vmem:[#allocation2 + $0xb0] sm:$0xff] %v488_v38  ;;  %v616_v38 = vld [vmem:[%s9427_s3 + $0x930] sm:$0xff] }
  0xe9   :  { %491 = vst [vmem:[#allocation2 + $0x240] sm:$0xff] %v490_v39  ;;  %v618_v39 = vld [vmem:[%s9427_s3 + $0x938] sm:$0xff] }
  0xea   :  { %493 = vst [vmem:[#allocation2 + $0x620] sm:$0xff] %v492_v40  ;;  %v620_v40 = vld [vmem:[%s9427_s3 + $0x940] sm:$0xff] }
  0xeb   :  { %495 = vst [vmem:[#allocation2 + $0x1f0] sm:$0xff] %v494_v41  ;;  %v622_v41 = vld [vmem:[%s9427_s3 + $0x948] sm:$0xff] }
  0xec   :  { %497 = vst [vmem:[#allocation2 + $0x690] sm:$0xff] %v496_v42  ;;  %v624_v42 = vld [vmem:[%s9427_s3 + $0x950] sm:$0xff] }
  0xed   :  { %499 = vst [vmem:[#allocation2 + $0x868] sm:$0xff] %v498_v43  ;;  %v626_v43 = vld [vmem:[%s9427_s3 + $0x958] sm:$0xff] }
  0xee   :  { %501 = vst [vmem:[#allocation2 + $0x5e0] sm:$0xff] %v500_v44  ;;  %v628_v44 = vld [vmem:[%s9427_s3 + $0x960] sm:$0xff] }
  0xef   :  { %503 = vst [vmem:[#allocation2 + $0xb8] sm:$0xff] %v502_v45  ;;  %v630_v45 = vld [vmem:[%s9427_s3 + $0x968] sm:$0xff] }
  0xf0   :  { %505 = vst [vmem:[#allocation2 + $0x9c0] sm:$0xff] %v504_v46  ;;  %v632_v46 = vld [vmem:[%s9427_s3 + $0x970] sm:$0xff] }
  0xf1   :  { %507 = vst [vmem:[#allocation2 + $0x8a0] sm:$0xff] %v506_v47  ;;  %v634_v47 = vld [vmem:[%s9427_s3 + $0x978] sm:$0xff] }
  0xf2   :  { %509 = vst [vmem:[#allocation2 + $0x8f8] sm:$0xff] %v508_v48  ;;  %v636_v48 = vld [vmem:[%s9427_s3 + $0x980] sm:$0xff] }
  0xf3   :  { %511 = vst [vmem:[#allocation2 + $0x588] sm:$0xff] %v510_v49  ;;  %v638_v49 = vld [vmem:[%s9427_s3 + $0x988] sm:$0xff] }
  0xf4   :  { %513 = vst [vmem:[#allocation2 + $0xbd0] sm:$0xff] %v512_v50  ;;  %v640_v50 = vld [vmem:[%s9427_s3 + $0x990] sm:$0xff] }
  0xf5   :  { %515 = vst [vmem:[#allocation2 + $0x768] sm:$0xff] %v514_v51  ;;  %v642_v51 = vld [vmem:[%s9427_s3 + $0x998] sm:$0xff] }
  0xf6   :  { %517 = vst [vmem:[#allocation2 + $0x5c0] sm:$0xff] %v516_v52  ;;  %v644_v52 = vld [vmem:[%s9427_s3 + $0x9a0] sm:$0xff] }
  0xf7   :  { %519 = vst [vmem:[#allocation2 + $0x6e0] sm:$0xff] %v518_v53  ;;  %v646_v53 = vld [vmem:[%s9427_s3 + $0x9a8] sm:$0xff] }
  0xf8   :  { %521 = vst [vmem:[#allocation2 + $0xa88] sm:$0xff] %v520_v54  ;;  %v648_v54 = vld [vmem:[%s9427_s3 + $0x9b0] sm:$0xff] }
  0xf9   :  { %523 = vst [vmem:[#allocation2 + $0x640] sm:$0xff] %v522_v55  ;;  %v650_v55 = vld [vmem:[%s9427_s3 + $0x9b8] sm:$0xff] }
  0xfa   :  { %525 = vst [vmem:[#allocation2 + $0xac8] sm:$0xff] %v524_v56  ;;  %v652_v56 = vld [vmem:[%s9427_s3 + $0x9c0] sm:$0xff] }
  0xfb   :  { %527 = vst [vmem:[#allocation2 + $0x728] sm:$0xff] %v526_v57  ;;  %v654_v57 = vld [vmem:[%s9427_s3 + $0x9c8] sm:$0xff] }
  0xfc   :  { %529 = vst [vmem:[#allocation2 + $0x1c0] sm:$0xff] %v528_v58  ;;  %v656_v58 = vld [vmem:[%s9427_s3 + $0x9d0] sm:$0xff] }
  0xfd   :  { %531 = vst [vmem:[#allocation2 + $0x10] sm:$0xff] %v530_v59  ;;  %v658_v59 = vld [vmem:[%s9427_s3 + $0x9d8] sm:$0xff] }
  0xfe   :  { %533 = vst [vmem:[#allocation2 + $0xa68] sm:$0xff] %v532_v60  ;;  %v660_v60 = vld [vmem:[%s9427_s3 + $0x9e0] sm:$0xff] }
  0xff   :  { %535 = vst [vmem:[#allocation2 + $0xac0] sm:$0xff] %v534_v61  ;;  %v662_v61 = vld [vmem:[%s9427_s3 + $0x9e8] sm:$0xff] }
 0x100   :  { %537 = vst [vmem:[#allocation2 + $0xa58] sm:$0xff] %v536_v62  ;;  %v664_v62 = vld [vmem:[%s9427_s3 + $0x9f0] sm:$0xff] }
 0x101   :  { %539 = vst [vmem:[#allocation2 + $0xb78] sm:$0xff] %v538_v63  ;;  %v666_v63 = vld [vmem:[%s9427_s3 + $0x9f8] sm:$0xff] }
 0x102   :  { %541 = vst [vmem:[#allocation2 + $0x5f8] sm:$0xff] %v540_v0  ;;  %v668_v0 = vld [vmem:[%s9427_s3 + $0xa00] sm:$0xff] }
 0x103   :  { %543 = vst [vmem:[#allocation2 + $0x318] sm:$0xff] %v542_v1  ;;  %v670_v1 = vld [vmem:[%s9427_s3 + $0xa08] sm:$0xff] }
 0x104   :  { %545 = vst [vmem:[#allocation2 + $0x7c0] sm:$0xff] %v544_v2  ;;  %v672_v2 = vld [vmem:[%s9427_s3 + $0xa10] sm:$0xff] }
 0x105   :  { %547 = vst [vmem:[#allocation2 + $0x630] sm:$0xff] %v546_v3  ;;  %v674_v3 = vld [vmem:[%s9427_s3 + $0xa18] sm:$0xff] }
 0x106   :  { %549 = vst [vmem:[#allocation2 + $0x798] sm:$0xff] %v548_v4  ;;  %v676_v4 = vld [vmem:[%s9427_s3 + $0xa20] sm:$0xff] }
 0x107   :  { %551 = vst [vmem:[#allocation2 + $0x9d8] sm:$0xff] %v550_v5  ;;  %v678_v5 = vld [vmem:[%s9427_s3 + $0xa28] sm:$0xff] }
 0x108   :  { %553 = vst [vmem:[#allocation2 + $0x120] sm:$0xff] %v552_v6  ;;  %v680_v6 = vld [vmem:[%s9427_s3 + $0xa30] sm:$0xff] }
 0x109   :  { %555 = vst [vmem:[#allocation2 + $0x9f0] sm:$0xff] %v554_v7  ;;  %v682_v7 = vld [vmem:[%s9427_s3 + $0xa38] sm:$0xff] }
 0x10a   :  { %557 = vst [vmem:[#allocation2 + $0xa18] sm:$0xff] %v556_v8  ;;  %v684_v8 = vld [vmem:[%s9427_s3 + $0xa40] sm:$0xff] }
 0x10b   :  { %559 = vst [vmem:[#allocation2 + $0x60] sm:$0xff] %v558_v9  ;;  %v686_v9 = vld [vmem:[%s9427_s3 + $0xa48] sm:$0xff] }
 0x10c   :  { %561 = vst [vmem:[#allocation2 + $0x2a0] sm:$0xff] %v560_v10  ;;  %v688_v10 = vld [vmem:[%s9427_s3 + $0xa50] sm:$0xff] }
 0x10d   :  { %563 = vst [vmem:[#allocation2 + $0x168] sm:$0xff] %v562_v11  ;;  %v690_v11 = vld [vmem:[%s9427_s3 + $0xa58] sm:$0xff] }
 0x10e   :  { %565 = vst [vmem:[#allocation2 + $0x38] sm:$0xff] %v564_v12  ;;  %v692_v12 = vld [vmem:[%s9427_s3 + $0xa60] sm:$0xff] }
 0x10f   :  { %567 = vst [vmem:[#allocation2 + $0x1d0] sm:$0xff] %v566_v13  ;;  %v694_v13 = vld [vmem:[%s9427_s3 + $0xa68] sm:$0xff] }
 0x110   :  { %569 = vst [vmem:[#allocation2 + $0x30] sm:$0xff] %v568_v14  ;;  %v696_v14 = vld [vmem:[%s9427_s3 + $0xa70] sm:$0xff] }
 0x111   :  { %571 = vst [vmem:[#allocation2 + $0x348] sm:$0xff] %v570_v15  ;;  %v698_v15 = vld [vmem:[%s9427_s3 + $0xa78] sm:$0xff] }
 0x112   :  { %573 = vst [vmem:[#allocation2 + $0xc28] sm:$0xff] %v572_v16  ;;  %v700_v16 = vld [vmem:[%s9427_s3 + $0xa80] sm:$0xff] }
 0x113   :  { %575 = vst [vmem:[#allocation2 + $0x108] sm:$0xff] %v574_v17  ;;  %v702_v17 = vld [vmem:[%s9427_s3 + $0xa88] sm:$0xff] }
 0x114   :  { %577 = vst [vmem:[#allocation2 + $0x100] sm:$0xff] %v576_v18  ;;  %v704_v18 = vld [vmem:[%s9427_s3 + $0xa90] sm:$0xff] }
 0x115   :  { %579 = vst [vmem:[#allocation2 + $0x7a8] sm:$0xff] %v578_v19  ;;  %v706_v19 = vld [vmem:[%s9427_s3 + $0xa98] sm:$0xff] }
 0x116   :  { %581 = vst [vmem:[#allocation2 + $0xa00] sm:$0xff] %v580_v20  ;;  %v708_v20 = vld [vmem:[%s9427_s3 + $0xaa0] sm:$0xff] }
 0x117   :  { %583 = vst [vmem:[#allocation2 + $0x9f8] sm:$0xff] %v582_v21  ;;  %v710_v21 = vld [vmem:[%s9427_s3 + $0xaa8] sm:$0xff] }
 0x118   :  { %585 = vst [vmem:[#allocation2 + $0x7b8] sm:$0xff] %v584_v22  ;;  %v712_v22 = vld [vmem:[%s9427_s3 + $0xab0] sm:$0xff] }
 0x119   :  { %587 = vst [vmem:[#allocation2 + $0xc20] sm:$0xff] %v586_v23  ;;  %v714_v23 = vld [vmem:[%s9427_s3 + $0xab8] sm:$0xff] }
 0x11a   :  { %589 = vst [vmem:[#allocation2 + $0x1b8] sm:$0xff] %v588_v24  ;;  %v716_v24 = vld [vmem:[%s9427_s3 + $0xac0] sm:$0xff] }
 0x11b   :  { %591 = vst [vmem:[#allocation2 + $0x7c8] sm:$0xff] %v590_v25  ;;  %v718_v25 = vld [vmem:[%s9427_s3 + $0xac8] sm:$0xff] }
 0x11c   :  { %593 = vst [vmem:[#allocation2 + $0x290] sm:$0xff] %v592_v26  ;;  %v720_v26 = vld [vmem:[%s9427_s3 + $0xad0] sm:$0xff] }
 0x11d   :  { %595 = vst [vmem:[#allocation2 + $0xaa8] sm:$0xff] %v594_v27  ;;  %v722_v27 = vld [vmem:[%s9427_s3 + $0xad8] sm:$0xff] }
 0x11e   :  { %597 = vst [vmem:[#allocation2 + $0x740] sm:$0xff] %v596_v28  ;;  %v724_v28 = vld [vmem:[%s9427_s3 + $0xae0] sm:$0xff] }
 0x11f   :  { %599 = vst [vmem:[#allocation2 + $0xf0] sm:$0xff] %v598_v29  ;;  %v726_v29 = vld [vmem:[%s9427_s3 + $0xae8] sm:$0xff] }
 0x120   :  { %601 = vst [vmem:[#allocation2 + $0x98] sm:$0xff] %v600_v30  ;;  %v728_v30 = vld [vmem:[%s9427_s3 + $0xaf0] sm:$0xff] }
 0x121   :  { %603 = vst [vmem:[#allocation2 + $0x580] sm:$0xff] %v602_v31  ;;  %v730_v31 = vld [vmem:[%s9427_s3 + $0xaf8] sm:$0xff] }
 0x122   :  { %605 = vst [vmem:[#allocation2 + $0x948] sm:$0xff] %v604_v32  ;;  %v732_v32 = vld [vmem:[%s9427_s3 + $0xb00] sm:$0xff] }
 0x123   :  { %607 = vst [vmem:[#allocation2 + $0x600] sm:$0xff] %v606_v33  ;;  %v734_v33 = vld [vmem:[%s9427_s3 + $0xb08] sm:$0xff] }
 0x124   :  { %609 = vst [vmem:[#allocation2 + $0x458] sm:$0xff] %v608_v34  ;;  %v736_v34 = vld [vmem:[%s9427_s3 + $0xb10] sm:$0xff] }
 0x125   :  { %611 = vst [vmem:[#allocation2 + $0xa20] sm:$0xff] %v610_v35  ;;  %v738_v35 = vld [vmem:[%s9427_s3 + $0xb18] sm:$0xff] }
 0x126   :  { %613 = vst [vmem:[#allocation2 + $0x428] sm:$0xff] %v612_v36  ;;  %v740_v36 = vld [vmem:[%s9427_s3 + $0xb20] sm:$0xff] }
 0x127   :  { %615 = vst [vmem:[#allocation2 + $0x4e8] sm:$0xff] %v614_v37  ;;  %v742_v37 = vld [vmem:[%s9427_s3 + $0xb28] sm:$0xff] }
 0x128   :  { %617 = vst [vmem:[#allocation2 + $0x7f8] sm:$0xff] %v616_v38  ;;  %v744_v38 = vld [vmem:[%s9427_s3 + $0xb30] sm:$0xff] }
 0x129   :  { %619 = vst [vmem:[#allocation2 + $0x438] sm:$0xff] %v618_v39  ;;  %v746_v39 = vld [vmem:[%s9427_s3 + $0xb38] sm:$0xff] }
 0x12a   :  { %621 = vst [vmem:[#allocation2 + $0x950] sm:$0xff] %v620_v40  ;;  %v748_v40 = vld [vmem:[%s9427_s3 + $0xb40] sm:$0xff] }
 0x12b   :  { %623 = vst [vmem:[#allocation2 + $0x470] sm:$0xff] %v622_v41  ;;  %v750_v41 = vld [vmem:[%s9427_s3 + $0xb48] sm:$0xff] }
 0x12c   :  { %625 = vst [vmem:[#allocation2 + $0xad0] sm:$0xff] %v624_v42  ;;  %v752_v42 = vld [vmem:[%s9427_s3 + $0xb50] sm:$0xff] }
 0x12d   :  { %627 = vst [vmem:[#allocation2 + $0x5a8] sm:$0xff] %v626_v43  ;;  %v754_v43 = vld [vmem:[%s9427_s3 + $0xb58] sm:$0xff] }
 0x12e   :  { %629 = vst [vmem:[#allocation2 + $0x908] sm:$0xff] %v628_v44  ;;  %v756_v44 = vld [vmem:[%s9427_s3 + $0xb60] sm:$0xff] }
 0x12f   :  { %631 = vst [vmem:[#allocation2 + $0x790] sm:$0xff] %v630_v45  ;;  %v758_v45 = vld [vmem:[%s9427_s3 + $0xb68] sm:$0xff] }
 0x130   :  { %633 = vst [vmem:[#allocation2 + $0xa50] sm:$0xff] %v632_v46  ;;  %v760_v46 = vld [vmem:[%s9427_s3 + $0xb70] sm:$0xff] }
 0x131   :  { %635 = vst [vmem:[#allocation2 + $0x88] sm:$0xff] %v634_v47  ;;  %v762_v47 = vld [vmem:[%s9427_s3 + $0xb78] sm:$0xff] }
 0x132   :  { %637 = vst [vmem:[#allocation2 + $0x6b0] sm:$0xff] %v636_v48  ;;  %v764_v48 = vld [vmem:[%s9427_s3 + $0xb80] sm:$0xff] }
 0x133   :  { %639 = vst [vmem:[#allocation2 + $0xb28] sm:$0xff] %v638_v49  ;;  %v766_v49 = vld [vmem:[%s9427_s3 + $0xb88] sm:$0xff] }
 0x134   :  { %641 = vst [vmem:[#allocation2 + $0x4a8] sm:$0xff] %v640_v50  ;;  %v768_v50 = vld [vmem:[%s9427_s3 + $0xb90] sm:$0xff] }
 0x135   :  { %643 = vst [vmem:[#allocation2 + $0xc08] sm:$0xff] %v642_v51  ;;  %v770_v51 = vld [vmem:[%s9427_s3 + $0xb98] sm:$0xff] }
 0x136   :  { %645 = vst [vmem:[#allocation2 + $0x500] sm:$0xff] %v644_v52  ;;  %v772_v52 = vld [vmem:[%s9427_s3 + $0xba0] sm:$0xff] }
 0x137   :  { %647 = vst [vmem:[#allocation2 + $0x7e8] sm:$0xff] %v646_v53  ;;  %v774_v53 = vld [vmem:[%s9427_s3 + $0xba8] sm:$0xff] }
 0x138   :  { %649 = vst [vmem:[#allocation2 + $0x968] sm:$0xff] %v648_v54  ;;  %v776_v54 = vld [vmem:[%s9427_s3 + $0xbb0] sm:$0xff] }
 0x139   :  { %651 = vst [vmem:[#allocation2 + $0x930] sm:$0xff] %v650_v55  ;;  %v778_v55 = vld [vmem:[%s9427_s3 + $0xbb8] sm:$0xff] }
 0x13a   :  { %653 = vst [vmem:[#allocation2 + $0xa48] sm:$0xff] %v652_v56  ;;  %v780_v56 = vld [vmem:[%s9427_s3 + $0xbc0] sm:$0xff] }
 0x13b   :  { %655 = vst [vmem:[#allocation2 + $0x8d8] sm:$0xff] %v654_v57  ;;  %v782_v57 = vld [vmem:[%s9427_s3 + $0xbc8] sm:$0xff] }
 0x13c   :  { %657 = vst [vmem:[#allocation2 + $0x5f0] sm:$0xff] %v656_v58  ;;  %v784_v58 = vld [vmem:[%s9427_s3 + $0xbd0] sm:$0xff] }
 0x13d   :  { %659 = vst [vmem:[#allocation2 + $0x4c8] sm:$0xff] %v658_v59  ;;  %v786_v59 = vld [vmem:[%s9427_s3 + $0xbd8] sm:$0xff] }
 0x13e   :  { %661 = vst [vmem:[#allocation2 + $0xb08] sm:$0xff] %v660_v60  ;;  %v788_v60 = vld [vmem:[%s9427_s3 + $0xbe0] sm:$0xff] }
 0x13f   :  { %663 = vst [vmem:[#allocation2 + $0x1a0] sm:$0xff] %v662_v61  ;;  %v790_v61 = vld [vmem:[%s9427_s3 + $0xbe8] sm:$0xff] }
 0x140   :  { %665 = vst [vmem:[#allocation2 + $0x840] sm:$0xff] %v664_v62  ;;  %v792_v62 = vld [vmem:[%s9427_s3 + $0xbf0] sm:$0xff] }
 0x141   :  { %667 = vst [vmem:[#allocation2 + $0x6d8] sm:$0xff] %v666_v63  ;;  %v794_v63 = vld [vmem:[%s9427_s3 + $0xbf8] sm:$0xff] }
 0x142   :  { %669 = vst [vmem:[#allocation2 + $0x8a8] sm:$0xff] %v668_v0  ;;  %v796_v0 = vld [vmem:[%s9427_s3 + $0xc00] sm:$0xff] }
 0x143   :  { %671 = vst [vmem:[#allocation2 + $0x698] sm:$0xff] %v670_v1  ;;  %v798_v1 = vld [vmem:[%s9427_s3 + $0xc08] sm:$0xff] }
 0x144   :  { %673 = vst [vmem:[#allocation2 + $0xa38] sm:$0xff] %v672_v2  ;;  %v800_v2 = vld [vmem:[%s9427_s3 + $0xc10] sm:$0xff] }
 0x145   :  { %675 = vst [vmem:[#allocation2 + $0xc18] sm:$0xff] %v674_v3  ;;  %v802_v3 = vld [vmem:[%s9427_s3 + $0xc18] sm:$0xff] }
 0x146   :  { %677 = vst [vmem:[#allocation2 + $0x760] sm:$0xff] %v676_v4  ;;  %v804_v4 = vld [vmem:[%s9427_s3 + $0xc20] sm:$0xff] }
 0x147   :  { %679 = vst [vmem:[#allocation2 + $0x9c8] sm:$0xff] %v678_v5  ;;  %v806_v5 = vld [vmem:[%s9427_s3 + $0xc28] sm:$0xff] }
 0x148   :  { %681 = vst [vmem:[#allocation2 + $0x3f8] sm:$0xff] %v680_v6  ;;  %v808_v6 = vld [vmem:[%s9427_s3 + $0xc30] sm:$0xff] }
 0x149   :  { %683 = vst [vmem:[#allocation2 + $0x410] sm:$0xff] %v682_v7  ;;  %v810_v7 = vld [vmem:[%s9427_s3 + $0xc38] sm:$0xff] }
 0x14a   :  { %685 = vst [vmem:[#allocation2 + $0x390] sm:$0xff] %v684_v8  ;;  %v812_v8 = vld [vmem:[%s9427_s3 + $0xc40] sm:$0xff] }
 0x14b   :  { %687 = vst [vmem:[#allocation2 + $0x528] sm:$0xff] %v686_v9  ;;  %v814_v9 = vld [vmem:[%s9427_s3 + $0xc48] sm:$0xff] }
 0x14c   :  { %689 = vst [vmem:[#allocation2 + $0x70] sm:$0xff] %v688_v10  ;;  %v816_v10 = vld [vmem:[%s9427_s3 + $0xc50] sm:$0xff] }
 0x14d   :  { %691 = vst [vmem:[#allocation2 + $0x340] sm:$0xff] %v690_v11  ;;  %v818_v11 = vld [vmem:[%s9427_s3 + $0xc58] sm:$0xff] }
 0x14e   :  { %693 = vst [vmem:[#allocation2 + $0x780] sm:$0xff] %v692_v12 }
 0x14f   :  { %695 = vst [vmem:[#allocation2 + $0x598] sm:$0xff] %v694_v13 }
 0x150   :  { %697 = vst [vmem:[#allocation2 + $0x288] sm:$0xff] %v696_v14 }
 0x151   :  { %699 = vst [vmem:[#allocation2 + $0x158] sm:$0xff] %v698_v15 }
 0x152   :  { %701 = vst [vmem:[#allocation2 + $0x3c0] sm:$0xff] %v700_v16 }
 0x153   :  { %703 = vst [vmem:[#allocation2 + $0x980] sm:$0xff] %v702_v17 }
 0x154   :  { %705 = vst [vmem:[#allocation2 + $0x758] sm:$0xff] %v704_v18 }
 0x155   :  { %707 = vst [vmem:[#allocation2 + $0x560] sm:$0xff] %v706_v19 }
 0x156   :  { %709 = vst [vmem:[#allocation2 + $0x9e8] sm:$0xff] %v708_v20 }
 0x157   :  { %711 = vst [vmem:[#allocation2 + $0x208] sm:$0xff] %v710_v21 }
 0x158   :  { %713 = vst [vmem:[#allocation2 + $0x488] sm:$0xff] %v712_v22 }
 0x159   :  { %715 = vst [vmem:[#allocation2 + $0x558] sm:$0xff] %v714_v23 }
 0x15a   :  { %717 = vst [vmem:[#allocation2 + $0xc00] sm:$0xff] %v716_v24 }
 0x15b   :  { %719 = vst [vmem:[#allocation2 + $0x548] sm:$0xff] %v718_v25 }
 0x15c   :  { %721 = vst [vmem:[#allocation2 + $0x9b8] sm:$0xff] %v720_v26 }
 0x15d   :  { %723 = vst [vmem:[#allocation2 + $0x8e8] sm:$0xff] %v722_v27 }
 0x15e   :  { %725 = vst [vmem:[#allocation2 + $0x4d0] sm:$0xff] %v724_v28 }
 0x15f   :  { %727 = vst [vmem:[#allocation2 + $0x590] sm:$0xff] %v726_v29 }
 0x160   :  { %729 = vst [vmem:[#allocation2 + $0x468] sm:$0xff] %v728_v30 }
 0x161   :  { %731 = vst [vmem:[#allocation2 + $0x320] sm:$0xff] %v730_v31 }
 0x162   :  { %733 = vst [vmem:[#allocation2 + $0x460] sm:$0xff] %v732_v32 }
 0x163   :  { %735 = vst [vmem:[#allocation2 + $0x788] sm:$0xff] %v734_v33 }
 0x164   :  { %737 = vst [vmem:[#allocation2 + $0x220] sm:$0xff] %v736_v34 }
 0x165   :  { %739 = vst [vmem:[#allocation2 + $0x378] sm:$0xff] %v738_v35 }
 0x166   :  { %741 = vst [vmem:[#allocation2 + $0xb40] sm:$0xff] %v740_v36 }
 0x167   :  { %743 = vst [vmem:[#allocation2 + $0x2e0] sm:$0xff] %v742_v37 }
 0x168   :  { %745 = vst [vmem:[#allocation2 + $0x570] sm:$0xff] %v744_v38 }
 0x169   :  { %747 = vst [vmem:[#allocation2 + $0xc8] sm:$0xff] %v746_v39 }
 0x16a   :  { %749 = vst [vmem:[#allocation2 + $0xe8] sm:$0xff] %v748_v40 }
 0x16b   :  { %751 = vst [vmem:[#allocation2 + $0x250] sm:$0xff] %v750_v41 }
 0x16c   :  { %753 = vst [vmem:[#allocation2 + $0x7b0] sm:$0xff] %v752_v42 }
 0x16d   :  { %755 = vst [vmem:[#allocation2 + $0x8b8] sm:$0xff] %v754_v43 }
 0x16e   :  { %757 = vst [vmem:[#allocation2 + $0x538] sm:$0xff] %v756_v44 }
 0x16f   :  { %759 = vst [vmem:[#allocation2 + $0xbd8] sm:$0xff] %v758_v45 }
 0x170   :  { %761 = vst [vmem:[#allocation2 + $0x190] sm:$0xff] %v760_v46 }
 0x171   :  { %763 = vst [vmem:[#allocation2 + $0x20] sm:$0xff] %v762_v47 }
 0x172   :  { %765 = vst [vmem:[#allocation2 + $0x150] sm:$0xff] %v764_v48 }
 0x173   :  { %767 = vst [vmem:[#allocation2 + $0x118] sm:$0xff] %v766_v49 }
 0x174   :  { %769 = vst [vmem:[#allocation2 + $0x540] sm:$0xff] %v768_v50 }
 0x175   :  { %771 = vst [vmem:[#allocation2 + $0xb00] sm:$0xff] %v770_v51 }
 0x176   :  { %773 = vst [vmem:[#allocation2 + $0x700] sm:$0xff] %v772_v52 }
 0x177   :  { %775 = vst [vmem:[#allocation2 + $0x218] sm:$0xff] %v774_v53 }
 0x178   :  { %777 = vst [vmem:[#allocation2 + $0x860] sm:$0xff] %v776_v54 }
 0x179   :  { %779 = vst [vmem:[#allocation2 + $0x4a0] sm:$0xff] %v778_v55 }
 0x17a   :  { %781 = vst [vmem:[#allocation2 + $0x180] sm:$0xff] %v780_v56 }
 0x17b   :  { %783 = vst [vmem:[#allocation2 + $0xaf0] sm:$0xff] %v782_v57 }
 0x17c   :  { %785 = vst [vmem:[#allocation2 + $0x568] sm:$0xff] %v784_v58 }
 0x17d   :  { %787 = vst [vmem:[#allocation2 + $0x6c0] sm:$0xff] %v786_v59 }
 0x17e   :  { %789 = vst [vmem:[#allocation2 + $0x6c8] sm:$0xff] %v788_v60 }
 0x17f   :  { %791 = vst [vmem:[#allocation2 + $0x718] sm:$0xff] %v790_v61 }
 0x180   :  { %793 = vst [vmem:[#allocation2 + $0x498] sm:$0xff] %v792_v62 }
 0x181   :  { %795 = vst [vmem:[#allocation2 + $0xab8] sm:$0xff] %v794_v63 }
 0x182   :  { %797 = vst [vmem:[#allocation2 + $0xc48] sm:$0xff] %v796_v0 }
 0x183   :  { %799 = vst [vmem:[#allocation2 + $0x658] sm:$0xff] %v798_v1 }
 0x184   :  { %801 = vst [vmem:[#allocation2 + $0x2f8] sm:$0xff] %v800_v2 }
 0x185   :  { %803 = vst [vmem:[#allocation2 + $0x210] sm:$0xff] %v802_v3 }
 0x186   :  { %805 = vst [vmem:[#allocation2 + $0x8] sm:$0xff] %v804_v4 }
 0x187   :  { %807 = vst [vmem:[#allocation2 + $0x938] sm:$0xff] %v806_v5 }
 0x188   :  { %809 = vst [vmem:[#allocation2 + $0x160] sm:$0xff] %v808_v6 }
 0x189   :  { %811 = vst [vmem:[#allocation2 + $0x998] sm:$0xff] %v810_v7 }
 0x18a   :  { %813 = vst [vmem:[#allocation2 + $0x2d0] sm:$0xff] %v812_v8 }
 0x18b   :  { %815 = vst [vmem:[#allocation2 + $0x970] sm:$0xff] %v814_v9 }
 0x18c   :  { %817 = vst [vmem:[#allocation2 + $0x650] sm:$0xff] %v816_v10 }
 0x18d   :  { %819 = vst [vmem:[#allocation2 + $0x940] sm:$0xff] %v818_v11 }
 0x18e   :  { %825 = vsyncadd [#allocation3], 50688  ;;  %v830_v12 = vld [vmem:[%s9425_s1 + $0x8] sm:$0x1]  ;;  %vm835_vm0 = vcmask 1040384   ;;  %v829_v13 = vld [vmem:[%s9425_s1] sm:$0xff]  ;;  %v986_v53 = vlaneseq }
 0x18f   :  { %4512 = vmatpush.msk.msra.mxu0 %vm835_vm0, %v830_v12  ;;  %v826_v14 = vld [vmem:[%s9424_s0] sm:$0x3]  ;;  %vm827_vm1 = vcmask 64512   ;;  %vm831_vm2 = vcmask 72704   ;;  %v890_v15 = vld [vmem:[%s9426_s2 + $0xf0] sm:$0xff]  ;;  %v891_v16 = vld [vmem:[%s9426_s2 + $0xf8] sm:$0xff] }
 0x190   :  { %v828_v17 = vsel %vm827_vm1, %v826_v14, 1.0  ;;  %904 = vmatpush.msra.mxu1 %v890_v15  ;;  %944 = vmatpush.msra.mxu3 %v891_v16  ;;  %v888_v18 = vld [vmem:[%s9426_s2 + $0xe0] sm:$0xff]  ;;  %v889_v19 = vld [vmem:[%s9426_s2 + $0xe8] sm:$0xff]  ;;  %v886_v20 = vld [vmem:[%s9426_s2 + $0xd0] sm:$0xff]  ;;  %vm894_vm3 = vcmask 7168   ;;  %v9430_v41 = vmov 1.0  }
 0x191   :  { %854 = vmatpush.msra.mxu0 %v829_v13  ;;  %v887_v21 = vld [vmem:[%s9426_s2 + $0xd8] sm:$0xff]  ;;  %v884_v22 = vld [vmem:[%s9426_s2 + $0xc0] sm:$0xff]  ;;  %v885_v23 = vld [vmem:[%s9426_s2 + $0xc8] sm:$0xff]  ;;  %v6527_v54 = vshrl.u32 %v986_v53, 7 }
 0x192   :  { %4513 = vmatmul.msk.f32.vlgmr.msra.gmra.mxu0 %vm831_vm2, %v828_v17  ;;  %905 = vmatpush.msra.mxu1 %v888_v18  ;;  %v882_v24 = vld [vmem:[%s9426_s2 + $0xb0] sm:$0xff]  ;;  %v883_v25 = vld [vmem:[%s9426_s2 + $0xb8] sm:$0xff]  ;;  %v880_v26 = vld [vmem:[%s9426_s2 + $0xa0] sm:$0xff] }
 0x193   :  { %945 = vmatpush.msra.mxu3 %v889_v19  ;;  %v892_v27 = vld [vmem:[%s9426_s2 + $0x100] sm:$0x1]  ;;  %v881_v28 = vld [vmem:[%s9426_s2 + $0xa8] sm:$0xff]  ;;  %v878_v29 = vld [vmem:[%s9426_s2 + $0x90] sm:$0xff]  ;;  %v6530_v55 = vadd.s32 88, %v6527_v54  ;;  %v6533_v56 = vadd.s32 184, %v6527_v54 }
 0x194   :  { %906 = vmatpush.msra.mxu1 %v886_v20  ;;  %4514 = vmatpush.msk.msra.mxu2 %vm835_vm0, %v892_v27  ;;  %v879_v30 = vld [vmem:[%s9426_s2 + $0x98] sm:$0xff]  ;;  %v876_v31 = vld [vmem:[%s9426_s2 + $0x80] sm:$0xff]  ;;  %v877_v32 = vld [vmem:[%s9426_s2 + $0x88] sm:$0xff]  ;;  %v6536_v57 = vadd.s32 8, %v6527_v54  ;;  %v6539_v58 = vadd.s32 16, %v6527_v54  ;;  %v6542_v59 = vadd.s32 24, %v6527_v54 }
 0x195   :  { %946 = vmatpush.msra.mxu3 %v887_v21  ;;  %v874_v33 = vld [vmem:[%s9426_s2 + $0x70] sm:$0xff]  ;;  %v875_v34 = vld [vmem:[%s9426_s2 + $0x78] sm:$0xff]  ;;  %v872_v35 = vld [vmem:[%s9426_s2 + $0x60] sm:$0xff]  ;;  %4515 = vmatmul.msk.f32.vlgmr.msra.gmra.mxu2 %vm894_vm3, %v9430_v41  ;;  %v6545_v60 = vadd.s32 368, %v6527_v54  ;;  %v6548_v61 = vadd.s32 32, %v6527_v54  ;;  %v6551_v62 = vadd.s32 40, %v6527_v54 }
 0x196   :  { %907 = vmatpush.msra.mxu1 %v884_v22  ;;  %v873_v36 = vld [vmem:[%s9426_s2 + $0x68] sm:$0xff]  ;;  %v870_v37 = vld [vmem:[%s9426_s2 + $0x50] sm:$0xff]  ;;  %v871_v38 = vld [vmem:[%s9426_s2 + $0x58] sm:$0xff]  ;;  %v6554_v63 = vadd.s32 48, %v6527_v54  ;;  %v6557_v0 = vadd.s32 56, %v6527_v54  ;;  %v6560_v1 = vadd.s32 64, %v6527_v54 }
 0x197   :  { %947 = vmatpush.msra.mxu3 %v885_v23  ;;  %v868_v39 = vld [vmem:[%s9426_s2 + $0x40] sm:$0xff]  ;;  %v869_v40 = vld [vmem:[%s9426_s2 + $0x48] sm:$0xff]  ;;  %v866_v42 = vld [vmem:[%s9426_s2 + $0x30] sm:$0xff]  ;;  %9508 = vst [vmem:[#allocation6_spill] sm:$0xff] %v6545_v60  ;;  %v6563_v2 = vadd.s32 72, %v6527_v54  ;;  %v6566_v3 = vadd.s32 80, %v6527_v54 }
 0x198   :  { %908 = vmatpush.msra.mxu1 %v882_v24  ;;  %v867_v43 = vld [vmem:[%s9426_s2 + $0x38] sm:$0xff]  ;;  %v893_v44 = vld [vmem:[%s9426_s2 + $0x108] sm:$0x1]  ;;  %v864_v45 = vld [vmem:[%s9426_s2 + $0x20] sm:$0xff]  ;;  %v6569_v4 = vadd.s32 96, %v6527_v54  ;;  %v6572_v5 = vadd.s32 104, %v6527_v54 }
 0x199   :  { %948 = vmatpush.msra.mxu3 %v883_v25  ;;  %v865_v46 = vld [vmem:[%s9426_s2 + $0x28] sm:$0xff]  ;;  %4516 = vmatpush.msk.msrb.mxu2 %vm835_vm0, %v893_v44  ;;  %v862_v47 = vld [vmem:[%s9426_s2 + $0x10] sm:$0xff]  ;;  %v863_v48 = vld [vmem:[%s9426_s2 + $0x18] sm:$0xff]  ;;  %v6575_v6 = vadd.s32 112, %v6527_v54  ;;  %v6578_v7 = vadd.s32 120, %v6527_v54  ;;  %v6581_v8 = vadd.s32 128, %v6527_v54 }
 0x19a   :  { %909 = vmatpush.msra.mxu1 %v880_v26  ;;  %v860_v49 = vld [vmem:[%s9426_s2] sm:$0xff]  ;;  %v861_v50 = vld [vmem:[%s9426_s2 + $0x8] sm:$0xff]  ;;  %v6584_v9 = vadd.s32 136, %v6527_v54  ;;  %v6587_v10 = vadd.s32 144, %v6527_v54  ;;  %v6590_v11 = vadd.s32 152, %v6527_v54  ;;  %v6593_v12 = vadd.s32 160, %v6527_v54 }
 0x19b   :  { %949 = vmatpush.msra.mxu3 %v881_v28  ;;  %v6596_v13 = vadd.s32 168, %v6527_v54  ;;  %v6599_v14 = vadd.s32 176, %v6527_v54  ;;  %v6602_v15 = vadd.s32 192, %v6527_v54  ;;  %v6605_v16 = vadd.s32 200, %v6527_v54 }
 0x19c   :  { %910 = vmatpush.msra.mxu1 %v878_v29  ;;  %v6608_v17 = vadd.s32 208, %v6527_v54  ;;  %v6611_v18 = vadd.s32 216, %v6527_v54  ;;  %v6614_v19 = vadd.s32 224, %v6527_v54  ;;  %v6617_v20 = vadd.s32 232, %v6527_v54 }
 0x19d   :  { %950 = vmatpush.msra.mxu3 %v879_v30  ;;  %4517 = vmatmul.msk.f32.vlgmr.msrb.gmra.mxu2 %vm894_vm3, %v9430_v41  ;;  %v6620_v21 = vadd.s32 240, %v6527_v54  ;;  %v6623_v22 = vadd.s32 248, %v6527_v54  ;;  %v6626_v23 = vadd.s32 256, %v6527_v54  ;;  %v6629_v24 = vadd.s32 264, %v6527_v54 }
 0x19e   :  { %911 = vmatpush.msra.mxu1 %v876_v31  ;;  %v6632_v25 = vadd.s32 272, %v6527_v54  ;;  %v6635_v26 = vadd.s32 280, %v6527_v54  ;;  %v6638_v27 = vadd.s32 288, %v6527_v54  ;;  %v6641_v28 = vadd.s32 296, %v6527_v54 }
 0x19f   :  { %951 = vmatpush.msra.mxu3 %v877_v32  ;;  %v6644_v29 = vadd.s32 304, %v6527_v54  ;;  %v6647_v30 = vadd.s32 312, %v6527_v54  ;;  %v6650_v31 = vadd.s32 320, %v6527_v54  ;;  %v6652_v32 = vand.u32 127, %v986_v53 }
 0x1a0   :  { %912 = vmatpush.msra.mxu1 %v874_v33  ;;  %v6655_v33 = vadd.s32 328, %v6527_v54  ;;  %v1050_v53 = vmul.u32 2, %v6563_v2  ;;  %v1060_v2 = vmul.u32 2, %v6590_v11  ;;  %v1070_v11 = vmul.u32 2, %v6617_v20 }
 0x1a1   :  { %952 = vmatpush.msra.mxu3 %v875_v34  ;;  %v6658_v34 = vadd.s32 336, %v6527_v54  ;;  %v6679_v44 = vadd.s32 384, %v6652_v32  ;;  %v1080_v20 = vmul.u32 2, %v6647_v30 }
 0x1a2   :  { %913 = vmatpush.msra.mxu1 %v872_v35  ;;  %v6661_v35 = vadd.s32 344, %v6527_v54 }
 0x1a3   :  { %953 = vmatpush.msra.mxu3 %v873_v36  ;;  %v6664_v36 = vadd.s32 352, %v6527_v54  ;;  %9509 = vst [vmem:[#allocation7_spill] sm:$0xff] %v6679_v44 }
 0x1a4   :  { %914 = vmatpush.msra.mxu1 %v870_v37  ;;  %v6667_v37 = vadd.s32 360, %v6527_v54 }
 0x1a5   :  { %954 = vmatpush.msra.mxu3 %v871_v38  ;;  %v1041_v38 = vmul.u32 2, %v6527_v54  ;;  %v1051_v54 = vmul.u32 2, %v6566_v3  ;;  %v1061_v3 = vmul.u32 2, %v6593_v12  ;;  %v1071_v12 = vmul.u32 2, %v6620_v21 }
 0x1a6   :  { %915 = vmatpush.msra.mxu1 %v868_v39  ;;  %v1042_v39 = vmul.u32 2, %v6536_v57  ;;  %v1052_v57 = vmul.u32 2, %v6530_v55  ;;  %v1062_v55 = vmul.u32 2, %v6596_v13  ;;  %v1072_v13 = vmul.u32 2, %v6623_v22 }
 0x1a7   :  { %955 = vmatpush.msra.mxu3 %v869_v40  ;;  %v1043_v40 = vmul.u32 2, %v6539_v58  ;;  %v1053_v58 = vmul.u32 2, %v6569_v4  ;;  %v1063_v4 = vmul.u32 2, %v6599_v14  ;;  %v1073_v14 = vmul.u32 2, %v6626_v23 }
 0x1a8   :  { %916 = vmatpush.msra.mxu1 %v866_v42  ;;  %v6673_v42 = vadd.s32 128, %v6652_v32  ;;  %v1081_v21 = vmul.u32 2, %v6650_v31  ;;  %v1082_v22 = vmul.u32 2, %v6655_v33 }
 0x1a9   :  { %956 = vmatpush.msra.mxu3 %v867_v43  ;;  %v6676_v43 = vadd.s32 256, %v6652_v32 }
 0x1aa   :  { %917 = vmatpush.msra.mxu1 %v864_v45  ;;  %v1044_v45 = vmul.u32 2, %v6542_v59  ;;  %v1054_v59 = vmul.u32 2, %v6572_v5  ;;  %v1064_v5 = vmul.u32 2, %v6533_v56  ;;  %v1074_v56 = vmul.u32 2, %v6629_v24 }
 0x1ab   :  { %957 = vmatpush.msra.mxu3 %v865_v46  ;;  %v6683_v46 = vadd.s32 512, %v6652_v32 }
 0x1ac   :  { %918 = vmatpush.msra.mxu1 %v862_v47  ;;  %v6686_v47 = vadd.s32 640, %v6652_v32  ;;  %v6737_v30 = vadd.s32 1, %v1044_v45  ;;  %v6757_v45 = vadd.s32 1, %v1054_v59  ;;  %v6775_v59 = vadd.s32 1, %v1063_v4 }
 0x1ad   :  { %958 = vmatpush.msra.mxu3 %v863_v48  ;;  %9510 = vst [vmem:[#allocation8_spill] sm:$0xff] %v6683_v46  ;;  %v1045_v48 = vmul.u32 2, %v6548_v61  ;;  %v1055_v61 = vmul.u32 2, %v6575_v6  ;;  %v1065_v6 = vmul.u32 2, %v6602_v15  ;;  %v1075_v15 = vmul.u32 2, %v6632_v25 }
 0x1ae   :  { %919 = vmatpush.msra.mxu1 %v860_v49  ;;  %9511 = vst [vmem:[#allocation9_spill] sm:$0xff] %v6686_v47  ;;  %v1046_v49 = vmul.u32 2, %v6551_v62  ;;  %v1056_v62 = vmul.u32 2, %v6578_v7  ;;  %v1066_v7 = vmul.u32 2, %v6605_v16  ;;  %v1076_v16 = vmul.u32 2, %v6635_v26 }
 0x1af   :  { %959 = vmatpush.msra.mxu3 %v861_v50  ;;  %v1047_v50 = vmul.u32 2, %v6554_v63  ;;  %v1057_v63 = vmul.u32 2, %v6581_v8  ;;  %v1067_v8 = vmul.u32 2, %v6608_v17  ;;  %v1077_v17 = vmul.u32 2, %v6638_v27  ;;  %9521 = vst [vmem:[#allocation19_spill] sm:$0xff] %v6775_v59 }
 0x1b0   :  { %v6733_v47 = vadd.s32 1, %v1042_v39  ;;  %v6739_v31 = vadd.s32 1, %v1045_v48  ;;  %v6741_v33 = vadd.s32 1, %v1046_v49  ;;  %v6749_v26 = vadd.s32 1, %v1050_v53 }
 0x1b1   :  { %v6743_v23 = vadd.s32 1, %v1047_v50  ;;  %v6753_v39 = vadd.s32 1, %v1052_v57  ;;  %v6759_v48 = vadd.s32 1, %v1055_v61  ;;  %v6761_v27 = vadd.s32 1, %v1056_v62 }
 0x1b2   :  { %9513 = vst [vmem:[#allocation11_spill] sm:$0xff] %v6733_v47  ;;  %v6763_v50 = vadd.s32 1, %v1057_v63  ;;  %v6771_v57 = vadd.s32 1, %v1061_v3  ;;  %v6777_v61 = vadd.s32 1, %v1064_v5  ;;  %v6779_v60 = vadd.s32 1, %v1065_v6 }
 0x1b3   :  { %v6781_v62 = vadd.s32 1, %v1066_v7  ;;  %v6783_v63 = vadd.s32 1, %v1067_v8  ;;  %v6791_v3 = vadd.s32 1, %v1071_v12  ;;  %v6795_v4 = vadd.s32 1, %v1073_v14 }
 0x1b4   :  { %9515 = vst [vmem:[#allocation13_spill] sm:$0xff] %v6763_v50  ;;  %v6797_v5 = vadd.s32 1, %v1074_v56  ;;  %v6799_v6 = vadd.s32 1, %v1075_v15  ;;  %v6801_v7 = vadd.s32 1, %v1076_v16  ;;  %v6803_v8 = vadd.s32 1, %v1077_v17 }
 0x1b5   :  { %9519 = vst [vmem:[#allocation17_spill] sm:$0xff] %v6771_v57  ;;  %v6811_v12 = vadd.s32 1, %v1081_v21  ;;  %v6813_v14 = vadd.s32 1, %v1082_v22  ;;  %v9536_v56 = vld [vmem:[#allocation9_spill] sm:$0xff]  ;;  %v9537_v17 = vmul.u32 2, %v6658_v34  ;;  %v9541_v34 = vmul.u32 2, %v6664_v36 }
 0x1b6   :  { %9522 = vst [vmem:[#allocation20_spill] sm:$0xff] %v6777_v61  ;;  %v9543_v21 = vmul.u32 2, %v6667_v37  ;;  %vm1201_vm6 = vcmp.eq.s32.totalorder %v6652_v32, %v6753_v39  ;;  %vm9480_vm14 = vcmp.eq.s32.totalorder %v6673_v42, %v6753_v39  ;;  %vm9478_vm13 = vcmp.eq.s32.totalorder %v6652_v32, %v6777_v61 }
 0x1b7   :  { %9523 = vst [vmem:[#allocation21_spill] sm:$0xff] %v6779_v60  ;;  %vm9477_vm5 = vcmp.eq.s32.totalorder %v6673_v42, %v6777_v61  ;;  %vm9476_vm15 = vcmp.eq.s32.totalorder %v6676_v43, %v6777_v61  ;;  %v5158_v36 = vmov 0.0  }
 0x1b8   :  { %9524 = vst [vmem:[#allocation22_spill] sm:$0xff] %v6781_v62  ;;  %v7103_v22 = vadd.s32 1, %v9543_v21  ;;  %v7406_v37 = vsel %vm1201_vm6, 1.0, %v5158_v36 }
 0x1b9   :  { %9525 = vst [vmem:[#allocation23_spill] sm:$0xff] %v6783_v63 }
 0x1ba   :  { %9526 = vst [vmem:[#allocation24_spill] sm:$0xff] %v6795_v4 }
 0x1bb   :  { %9527 = vst [vmem:[#allocation25_spill] sm:$0xff] %v6797_v5 }
 0x1bc   :  { %9528 = vst [vmem:[#allocation26_spill] sm:$0xff] %v6799_v6 }
 0x1bd   :  { %9529 = vst [vmem:[#allocation27_spill] sm:$0xff] %v6801_v7 }
 0x1be   :  { %9530 = vst [vmem:[#allocation28_spill] sm:$0xff] %v6803_v8 }
 0x1bf   :  { %9534 = vst [vmem:[#allocation32_spill] sm:$0xff] %v6811_v12 }
 0x1c0   :  { %9535 = vst [vmem:[#allocation33_spill] sm:$0xff] %v6813_v14 }
 0x1c1   :  { %9544 = vst [vmem:[#allocation37_spill] sm:$0xff] %v7103_v22 }
 0x20f   :  { %v856_v51 = vpop.f32.mrf.mxu0 }
 0x210   :  { %4987 = vtanh.f32 %v856_v51  ;;  %v1048_v51 = vmul.u32 2, %v6557_v0  ;;  %v1058_v0 = vmul.u32 2, %v6584_v9  ;;  %v1068_v9 = vmul.u32 2, %v6611_v18 }
 0x211   :  { %v1078_v18 = vmul.u32 2, %v6641_v28  ;;  %v6731_v28 = vadd.s32 1, %v1041_v38  ;;  %v6751_v38 = vadd.s32 1, %v1051_v54  ;;  %v6769_v54 = vadd.s32 1, %v1060_v2 }
 0x212   :  { %v6745_v24 = vadd.s32 1, %v1048_v51  ;;  %v6765_v51 = vadd.s32 1, %v1058_v0  ;;  %v6785_v0 = vadd.s32 1, %v1068_v9  ;;  %v6789_v2 = vadd.s32 1, %v1070_v11 }
 0x213   :  { %9512 = vst [vmem:[#allocation10_spill] sm:$0xff] %v6731_v28  ;;  %v6809_v11 = vadd.s32 1, %v1080_v20  ;;  %vm9481_vm4 = vcmp.eq.s32.totalorder %v6652_v32, %v6751_v38  ;;  %vm9479_vm9 = vcmp.eq.s32.totalorder %v6673_v42, %v6751_v38 }
 0x214   :  { %9516 = vst [vmem:[#allocation14_spill] sm:$0xff] %v6765_v51 }
 0x215   :  { %9518 = vst [vmem:[#allocation16_spill] sm:$0xff] %v6769_v54 }
 0x216   :  { %v4988_v52 = vpop.eup %4987  ;;  %9533 = vst [vmem:[#allocation31_spill] sm:$0xff] %v6809_v11 }
 0x217   :  { %920 = vmatmul.f32.vlgmr.msra.gmra.mxu1 %v4988_v52  ;;  %960 = vmatmul.f32.vlgmr.msra.gmra.mxu3 %v4988_v52  ;;  %v1049_v52 = vmul.u32 2, %v6560_v1  ;;  %v1059_v1 = vmul.u32 2, %v6587_v10  ;;  %v1069_v10 = vmul.u32 2, %v6614_v19  ;;  %v1079_v19 = vmul.u32 2, %v6644_v29 }
 0x218   :  { %v941_v41 = vpop.f32.mrf.mxu2  ;;  %v6735_v29 = vadd.s32 1, %v1043_v40  ;;  %v6755_v40 = vadd.s32 1, %v1053_v58  ;;  %v6773_v58 = vadd.s32 1, %v1062_v55  ;;  %v6793_v55 = vadd.s32 1, %v1072_v13 }
 0x219   :  { %v6747_v25 = vadd.s32 1, %v1049_v52  ;;  %v6767_v52 = vadd.s32 1, %v1059_v1 }
 0x21a   :  { %9514 = vst [vmem:[#allocation12_spill] sm:$0xff] %v6735_v29 }
 0x21b   :  { %9517 = vst [vmem:[#allocation15_spill] sm:$0xff] %v6767_v52 }
 0x21c   :  { %9520 = vst [vmem:[#allocation18_spill] sm:$0xff] %v6773_v58 }
 0x220   :  { %v981_v1 = vpop.f32.mrf.mxu2 }
 0x294   :  { %v921_v49 = vpop.f32.mrf.mxu1 }
 0x295   :  { %v942_v53 = vadd.f32 %v941_v41, %v921_v49  ;;  %v6787_v41 = vadd.s32 1, %v1069_v10  ;;  %v6805_v10 = vadd.s32 1, %v1078_v18  ;;  %v6807_v49 = vadd.s32 1, %v1079_v19 }
 0x296   :  { %v6951_v18 = vadd.s32 1, %v9537_v17  ;;  %v9539_v19 = vmul.u32 2, %v6661_v35  ;;  %v7099_v35 = vadd.s32 1, %v9541_v34  ;;  %v7416_v17 = vsel %vm9478_vm13, 1.0, %v5158_v36 }
 0x297   :  { %4989 = vtanh.f32 %v942_v53  ;;  %9531 = vst [vmem:[#allocation29_spill] sm:$0xff] %v6805_v10  ;;  %v9545_v53 = vld [vmem:[#allocation6_spill] sm:$0xff]  ;;  %v7426_v34 = vsel %vm9476_vm15, 1.0, %v5158_v36 }
 0x298   :  { %9532 = vst [vmem:[#allocation30_spill] sm:$0xff] %v6807_v49  ;;  %v6955_v20 = vadd.s32 1, %v9539_v19  ;;  %v7421_v19 = vsel %vm9477_vm5, 1.0, %v5158_v36 }
 0x299   :  { %9538 = vst [vmem:[#allocation34_spill] sm:$0xff] %v6951_v18 }
 0x29a   :  { %v961_v9 = vpop.f32.mrf.mxu3  ;;  %9540 = vst [vmem:[#allocation35_spill] sm:$0xff] %v6955_v20 }
 0x29b   :  { %v982_v13 = vadd.f32 %v981_v1, %v961_v9  ;;  %9542 = vst [vmem:[#allocation36_spill] sm:$0xff] %v7099_v35  ;;  %v9546_v1 = vmul.u32 2, %v9545_v53 }
 0x29d   :  { %v6827_v15 = vpop.eup %4989  ;;  %4991 = vtanh.f32 %v982_v13  ;;  %v7107_v9 = vadd.s32 1, %v9546_v1  ;;  %v7411_v13 = vsel %vm9480_vm14, 1.0, %v5158_v36 }
 0x29f   :  { %vm1411_vm2 = vcmp.eq.s32.totalorder %v6652_v32, %v7107_v9  ;;  %vm1412_vm10 = vcmp.eq.s32.totalorder %v6673_v42, %v7107_v9  ;;  %vm1413_vm12 = vcmp.eq.s32.totalorder %v6676_v43, %v7107_v9  ;;  %vm1414_vm8 = vcmp.eq.s32.totalorder %v6679_v44, %v7107_v9 }
 0x2a0   :  { %vm1415_vm11 = vcmp.eq.s32.totalorder %v6683_v46, %v7107_v9  ;;  %vm1416_vm7 = vcmp.eq.s32.totalorder %v9536_v56, %v7107_v9  ;;  %v7428_v21 = vsel %vm1411_vm2, 1.0, %v5158_v36  ;;  %v7430_v53 = vsel %vm1412_vm10, 1.0, %v5158_v36 }
 0x2a1   :  { %9547 = vst [vmem:[#allocation6_spill] sm:$0xff] %v7428_v21  ;;  %v7432_v1 = vsel %vm1413_vm12, 1.0, %v5158_v36  ;;  %v7434_v9 = vsel %vm1414_vm8, 1.0, %v5158_v36  ;;  %v7436_v56 = vsel %vm1415_vm11, 1.0, %v5158_v36  ;;  %v7438_v46 = vsel %vm1416_vm7, 1.0, %v5158_v36 }
 0x2a2   :  { %9548 = vst [vmem:[#allocation38_spill] sm:$0xff] %v7430_v53 }
 0x2a3   :  { %v6875_v16 = vpop.eup %4991  ;;  %9549 = vst [vmem:[#allocation39_spill] sm:$0xff] %v7432_v1 }
 0x2a4   :  { %9550 = vst [vmem:[#allocation40_spill] sm:$0xff] %v7434_v9 }
 0x2a5   :  { %9551 = vst [vmem:[#allocation41_spill] sm:$0xff] %v7436_v56 }
 0x2a6   :  { %9552 = vst [vmem:[#allocation42_spill] sm:$0xff] %v7438_v46 }
 0x2a7   :  { %5155 = dma.done.wait [#allocation3], 50688 }
 0x2a8   :  { %5156 = vsyncadd [#allocation3], 4294916608  ;;  %v1883_v44 = vld [vmem:[#allocation2 + $0xb98] sm:$0xff]  ;;  %v2075_v4 = vld [vmem:[#allocation2 + $0x700] sm:$0xff]  ;;  %s5159_s2 = smov 34   ;;  %s5160_s25 = smov 68   ;;  %vm9555_vm15 = vcmp.eq.s32.totalorder %v6673_v42, %v6749_v26  ;;  %vm9556_vm5 = vcmp.eq.s32.totalorder %v6652_v32, %v6747_v25  ;;  %vm9557_vm13 = vcmp.eq.s32.totalorder %v6673_v42, %v6747_v25 }
 0x2a9   :  { %v1871_v5 = vld [vmem:[#allocation2 + $0x28] sm:$0xff]  ;;  %2135 = vmatpush.msrb.mxu0 %v1883_v44  ;;  %2155 = vmatpush.msra.mxu2 %v2075_v4  ;;  %v1859_v7 = vld [vmem:[#allocation2 + $0x990] sm:$0xff]  ;;  %v1847_v8 = vld [vmem:[#allocation2 + $0x518] sm:$0xff]  ;;  %s5161_s26 = smov 102   ;;  %s5162_s27 = smov 8   ;;  %vm2885_vm7 = vcmask 556032  }
 0x2aa   :  { %v2063_v6 = vld [vmem:[#allocation2 + $0xe8] sm:$0xff]  ;;  %v2051_v21 = vld [vmem:[#allocation2 + $0x4d0] sm:$0xff]  ;;  %v2039_v1 = vld [vmem:[#allocation2 + $0x3c0] sm:$0xff]  ;;  %s5163_s28 = smov 42   ;;  %s5164_s29 = smov 76   ;;  %vm2992_vm8 = vcmask 1041408  }
 0x2ab   :  { %2136 = vmatpush.msrb.mxu0 %v1871_v5  ;;  %2156 = vmatpush.msra.mxu2 %v2063_v6  ;;  %v1835_v9 = vld [vmem:[#allocation2 + $0x6b8] sm:$0xff]  ;;  %v2027_v56 = vld [vmem:[#allocation2 + $0x760] sm:$0xff]  ;;  %v1823_v36 = vld [vmem:[#allocation2 + $0x748] sm:$0xff]  ;;  %s5165_s30 = smov 16   ;;  %s5166_s6 = smov 50   ;;  %vm2994_vm10 = vcmask 1042432  }
 0x2ac   :  { %v2015_v46 = vld [vmem:[#allocation2 + $0xa48] sm:$0xff]  ;;  %v1884_v10 = vld [vmem:[#allocation2 + $0xb90] sm:$0xff]  ;;  %v1860_v5 = vld [vmem:[#allocation2 + $0xd8] sm:$0xff]  ;;  %s5167_s7 = smov 110   ;;  %s5168_s8 = smov 84   ;;  %vm2996_vm11 = vcmask 1043456  }
 0x2ad   :  { %2137 = vmatpush.msrb.mxu0 %v1859_v7  ;;  %2157 = vmatpush.msra.mxu2 %v2051_v21  ;;  %v1872_v44 = vld [vmem:[#allocation2 + $0x9a8] sm:$0xff]  ;;  %v1811_v4 = vld [vmem:[#allocation2 + $0xa90] sm:$0xff]  ;;  %v1979_v21 = vld [vmem:[#allocation2 + $0xa00] sm:$0xff]  ;;  %s5169_s9 = smov 24   ;;  %s5170_s10 = smov 118   ;;  %vm3000_vm12 = vcmask 1045504  }
 0x2ae   :  { %v2003_v49 = vld [vmem:[#allocation2 + $0x908] sm:$0xff]  ;;  %2195 = vmatpush.msrb.mxu3 %v1884_v10  ;;  %v1799_v6 = vld [vmem:[#allocation2 + $0x8b0] sm:$0xff]  ;;  %v1775_v12 = vld [vmem:[#allocation2 + $0xb58] sm:$0xff]  ;;  %s5171_s11 = smov 92   ;;  %s5172_s12 = smov 58   ;;  %vm2908_vm2 = vcmask 343040  }
 0x2af   :  { %2138 = vmatpush.msrb.mxu0 %v1847_v8  ;;  %2158 = vmatpush.msra.mxu2 %v2039_v1  ;;  %v1991_v11 = vld [vmem:[#allocation2 + $0x948] sm:$0xff]  ;;  %v1848_v7 = vld [vmem:[#allocation2 + $0x110] sm:$0xff]  ;;  %v1787_v8 = vld [vmem:[#allocation2 + $0x6a0] sm:$0xff]  ;;  %s5173_s13 = smov 126   ;;  %vm2940_vm14 = vcmask 408576   ;;  %s5175_s1 = smov 1  }
 0x2b0   :  { %2196 = vmatpush.msrb.mxu3 %v1872_v44  ;;  %v2087_v1 = vld [vmem:[#allocation2 + $0xc48] sm:$0x1]  ;;  %v1967_v14 = vld [vmem:[#allocation2 + $0xa18] sm:$0xff]  ;;  %v1763_v10 = vld [vmem:[#allocation2 + $0x5d0] sm:$0xff]  ;;  %s5177_s19 = smov 127   ;;  %s5180_s23 = smov 125  }
 0x2b1   :  { %2139 = vmatpush.msrb.mxu0 %v1835_v9  ;;  %2159 = vmatpush.msra.mxu2 %v2027_v56  ;;  %v1836_v56 = vld [vmem:[#allocation2 + $0x360] sm:$0xff]  ;;  %v2088_v9 = vld [vmem:[#allocation2 + $0x658] sm:$0x1]  ;;  %v1857_v18 = vld [vmem:[#allocation2 + $0x188] sm:$0xff]  ;;  %s5181_s24 = smov 4  }
 0x2b2   :  { %2197 = vmatpush.msrb.mxu3 %v1860_v5  ;;  %4518 = vmatpush.msk.msrb.mxu1 %vm835_vm0, %v2087_v1  ;;  %v2077_v44 = vld [vmem:[#allocation2 + $0x860] sm:$0xff]  ;;  %v9553_v5 = vmov 1.0   ;;  %v1727_v1 = vld [vmem:[#allocation2 + $0x50] sm:$0xff]  ;;  %v2085_v20 = vld [vmem:[#allocation2 + $0x498] sm:$0xff] }
 0x2b3   :  { %2140 = vmatpush.msrb.mxu0 %v1823_v36  ;;  %2160 = vmatpush.msra.mxu2 %v2015_v46  ;;  %v1824_v46 = vld [vmem:[#allocation2 + $0x368] sm:$0xff] }
 0x2b4   :  { %2198 = vmatpush.msrb.mxu3 %v1848_v7  ;;  %v1955_v36 = vld [vmem:[#allocation2 + $0xa68] sm:$0xff]  ;;  %4520 = vmatpush.msk.msra.mxu1 %vm835_vm0, %v2088_v9  ;;  %v2065_v7 = vld [vmem:[#allocation2 + $0x7b0] sm:$0xff]  ;;  %v1776_v9 = vld [vmem:[#allocation2 + $0x3e0] sm:$0xff] }
 0x2b5   :  { %2141 = vmatpush.msrb.mxu0 %v1811_v4  ;;  %2161 = vmatpush.msra.mxu2 %v2003_v49  ;;  %v1812_v49 = vld [vmem:[#allocation2 + $0xaa0] sm:$0xff]  ;;  %v1943_v4 = vld [vmem:[#allocation2 + $0x8f8] sm:$0xff]  ;;  %v1749_v35 = vld [vmem:[#allocation2 + $0xa28] sm:$0xff] }
 0x2b6   :  { %2199 = vmatpush.msrb.mxu3 %v1836_v56  ;;  %4519 = vmatmul.msk.f32.vlgmr.msrb.gmra.mxu1 %vm894_vm3, %v9553_v5  ;;  %v1919_v56 = vld [vmem:[#allocation2 + $0x310] sm:$0xff] }
 0x2b7   :  { %2142 = vmatpush.msrb.mxu0 %v1799_v6  ;;  %2162 = vmatpush.msra.mxu2 %v1991_v11  ;;  %v1751_v11 = vld [vmem:[#allocation2 + $0xbf8] sm:$0xff]  ;;  %v1800_v6 = vld [vmem:[#allocation2 + $0x8c0] sm:$0xff] }
 0x2b8   :  { %2200 = vmatpush.msrb.mxu3 %v1824_v46  ;;  %2275 = vmatpush.msrb.mxu1 %v2077_v44  ;;  %v2041_v46 = vld [vmem:[#allocation2 + $0x758] sm:$0xff] }
 0x2b9   :  { %2143 = vmatpush.msrb.mxu0 %v1787_v8  ;;  %2163 = vmatpush.msra.mxu2 %v1979_v21  ;;  %v1739_v8 = vld [vmem:[#allocation2 + $0x3c8] sm:$0xff]  ;;  %v1931_v21 = vld [vmem:[#allocation2 + $0x7d8] sm:$0xff] }
 0x2ba   :  { %2201 = vmatpush.msrb.mxu3 %v1812_v49  ;;  %2276 = vmatpush.msrb.mxu1 %v2065_v7  ;;  %v1764_v49 = vld [vmem:[#allocation2 + $0x648] sm:$0xff]  ;;  %v2029_v44 = vld [vmem:[#allocation2 + $0x3f8] sm:$0xff]  ;;  %v1885_v7 = vld [vmem:[#allocation2 + $0x850] sm:$0xff] }
 0x2bb   :  { %2144 = vmatpush.msrb.mxu0 %v1775_v12  ;;  %2164 = vmatpush.msra.mxu2 %v1967_v14  ;;  %v1788_v12 = vld [vmem:[#allocation2 + $0x920] sm:$0xff]  ;;  %v2053_v14 = vld [vmem:[#allocation2 + $0x468] sm:$0xff] }
 0x2bc   :  { %2202 = vmatpush.msrb.mxu3 %v1800_v6  ;;  %2277 = vmatpush.msrb.mxu1 %v2053_v14  ;;  %v2076_v6 = vld [vmem:[#allocation2 + $0x218] sm:$0xff]  ;;  %v2017_v14 = vld [vmem:[#allocation2 + $0x5f0] sm:$0xff] }
 0x2bd   :  { %2145 = vmatpush.msrb.mxu0 %v1763_v10  ;;  %2165 = vmatpush.msra.mxu2 %v1955_v36  ;;  %v1715_v10 = vld [vmem:[#allocation2 + $0x4f8] sm:$0xff]  ;;  %v1907_v36 = vld [vmem:[#allocation2 + $0xbc0] sm:$0xff] }
 0x2be   :  { %2203 = vmatpush.msrb.mxu3 %v1788_v12  ;;  %2278 = vmatpush.msrb.mxu1 %v2041_v46  ;;  %v1873_v12 = vld [vmem:[#allocation2 + $0x550] sm:$0xff] }
 0x2bf   :  { %2146 = vmatpush.msrb.mxu0 %v1751_v11  ;;  %2166 = vmatpush.msra.mxu2 %v1943_v4  ;;  %v1703_v11 = vld [vmem:[#allocation2 + $0xab0] sm:$0xff]  ;;  %v1895_v4 = vld [vmem:[#allocation2 + $0x800] sm:$0xff] }
 0x2c0   :  { %2204 = vmatpush.msrb.mxu3 %v1776_v9  ;;  %2279 = vmatpush.msrb.mxu1 %v2029_v44  ;;  %v1861_v9 = vld [vmem:[#allocation2 + $0xf8] sm:$0xff]  ;;  %v2005_v46 = vld [vmem:[#allocation2 + $0xa50] sm:$0xff] }
 0x2c1   :  { %2147 = vmatpush.msrb.mxu0 %v1739_v8  ;;  %2167 = vmatpush.msra.mxu2 %v1931_v21  ;;  %v2064_v8 = vld [vmem:[#allocation2 + $0x250] sm:$0xff]  ;;  %v1752_v21 = vld [vmem:[#allocation2 + $0x878] sm:$0xff] }
 0x2c2   :  { %2205 = vmatpush.msrb.mxu3 %v1764_v49  ;;  %2280 = vmatpush.msrb.mxu1 %v2017_v14  ;;  %v1849_v49 = vld [vmem:[#allocation2 + $0x3a0] sm:$0xff]  ;;  %v1993_v44 = vld [vmem:[#allocation2 + $0x458] sm:$0xff] }
 0x2c3   :  { %2148 = vmatpush.msrb.mxu0 %v1727_v1  ;;  %2168 = vmatpush.msra.mxu2 %v1919_v56  ;;  %v2052_v1 = vld [vmem:[#allocation2 + $0x590] sm:$0xff]  ;;  %v1969_v14 = vld [vmem:[#allocation2 + $0x2a0] sm:$0xff] }
 0x2c4   :  { %v1740_v56 = vld [vmem:[#allocation2 + $0x890] sm:$0xff]  ;;  %2206 = vmatpush.msrb.mxu3 %v1752_v21  ;;  %2281 = vmatpush.msrb.mxu1 %v2005_v46  ;;  %v1992_v46 = vld [vmem:[#allocation2 + $0x600] sm:$0xff] }
 0x2c5   :  { %2149 = vmatpush.msrb.mxu0 %v1715_v10  ;;  %2169 = vmatpush.msra.mxu2 %v1907_v36  ;;  %v2040_v10 = vld [vmem:[#allocation2 + $0x980] sm:$0xff]  ;;  %v1728_v36 = vld [vmem:[#allocation2 + $0xbc8] sm:$0xff]  ;;  %v1704_v21 = vld [vmem:[#allocation2 + $0xbb0] sm:$0xff] }
 0x2c6   :  { %2207 = vmatpush.msrb.mxu3 %v1740_v56  ;;  %2282 = vmatpush.msrb.mxu1 %v1993_v44  ;;  %v2089_v56 = vld [vmem:[#allocation2 + $0x2f8] sm:$0x1] }
 0x2c7   :  { %2150 = vmatpush.msrb.mxu0 %v1703_v11  ;;  %2170 = vmatpush.msra.mxu2 %v1895_v4  ;;  %v2028_v11 = vld [vmem:[#allocation2 + $0x9c8] sm:$0xff]  ;;  %v1716_v4 = vld [vmem:[#allocation2 + $0x710] sm:$0xff]  ;;  %v1980_v44 = vld [vmem:[#allocation2 + $0x9f8] sm:$0xff] }
 0x2c8   :  { %2171 = vmatmul.f32.vlgmr.msra.gmra.mxu2 %v6875_v16  ;;  %2151 = vmatmul.f32.vlgmr.msrb.gmra.mxu0 %v6827_v15 }
 0x2c9   :  { %2215 = vmatpush.msra.mxu0 %v2076_v6  ;;  %2255 = vmatpush.msrb.mxu2 %v1885_v7  ;;  %v1837_v6 = vld [vmem:[#allocation2 + $0x300] sm:$0xff]  ;;  %v1981_v7 = vld [vmem:[#allocation2 + $0x7b8] sm:$0xff] }
 0x2ca   :  { %2208 = vmatpush.msrb.mxu3 %v1728_v36  ;;  %2283 = vmatpush.msrb.mxu1 %v1981_v7  ;;  %v1801_v36 = vld [vmem:[#allocation2 + $0xa40] sm:$0xff] }
 0x2cb   :  { %2216 = vmatpush.msra.mxu0 %v2064_v8  ;;  %2256 = vmatpush.msrb.mxu2 %v1873_v12  ;;  %v2016_v8 = vld [vmem:[#allocation2 + $0x8d8] sm:$0xff]  ;;  %v1825_v12 = vld [vmem:[#allocation2 + $0x5e8] sm:$0xff]  ;;  %v1968_v7 = vld [vmem:[#allocation2 + $0x60] sm:$0xff] }
 0x2cc   :  { %2209 = vmatpush.msrb.mxu3 %v1716_v4  ;;  %2284 = vmatpush.msrb.mxu1 %v1969_v14  ;;  %v1789_v4 = vld [vmem:[#allocation2 + $0x228] sm:$0xff]  ;;  %v1933_v14 = vld [vmem:[#allocation2 + $0xb0] sm:$0xff] }
 0x2cd   :  { %2217 = vmatpush.msra.mxu0 %v2052_v1  ;;  %2257 = vmatpush.msrb.mxu2 %v1861_v9  ;;  %v2004_v1 = vld [vmem:[#allocation2 + $0x790] sm:$0xff] }
 0x2ce   :  { %v1813_v9 = vld [vmem:[#allocation2 + $0xb30] sm:$0xff]  ;;  %2210 = vmatpush.msrb.mxu3 %v1704_v21  ;;  %v2054_v21 = vld [vmem:[#allocation2 + $0x320] sm:$0xff]  ;;  %4521 = vmatmul.msk.f32.vlgmr.msra.gmra.mxu1 %vm894_vm3, %v9553_v5 }
 0x2cf   :  { %2218 = vmatpush.msra.mxu0 %v2040_v10  ;;  %2258 = vmatpush.msrb.mxu2 %v1849_v49  ;;  %v2078_v10 = vld [vmem:[#allocation2 + $0x4a0] sm:$0xff]  ;;  %v1957_v49 = vld [vmem:[#allocation2 + $0xa58] sm:$0xff] }
 0x2d0   :  { %4522 = vmatpush.msk.msra.mxu3 %vm835_vm0, %v2089_v56  ;;  %2285 = vmatpush.msrb.mxu1 %v1957_v49  ;;  %v2042_v56 = vld [vmem:[#allocation2 + $0x560] sm:$0xff]  ;;  %v2030_v49 = vld [vmem:[#allocation2 + $0x410] sm:$0xff] }
 0x2d1   :  { %2219 = vmatpush.msra.mxu0 %v2028_v11  ;;  %2259 = vmatpush.msrb.mxu2 %v1837_v6  ;;  %v2066_v11 = vld [vmem:[#allocation2 + $0x8b8] sm:$0xff]  ;;  %v1945_v6 = vld [vmem:[#allocation2 + $0xbd0] sm:$0xff] }
 0x2d2   :  { %2211 = vmatmul.f32.vlgmr.msrb.gmra.mxu3 %v6827_v15  ;;  %2286 = vmatpush.msrb.mxu1 %v1945_v6  ;;  %v2018_v6 = vld [vmem:[#allocation2 + $0x4c8] sm:$0xff] }
 0x2d3   :  { %2220 = vmatpush.msra.mxu0 %v2016_v8  ;;  %2260 = vmatpush.msrb.mxu2 %v1825_v12  ;;  %v1777_v8 = vld [vmem:[#allocation2 + $0x238] sm:$0xff]  ;;  %v1956_v12 = vld [vmem:[#allocation2 + $0xac0] sm:$0xff] }
 0x2d4   :  { %2335 = vmatpush.msrb.mxu3 %v2078_v10  ;;  %v1753_v10 = vld [vmem:[#allocation2 + $0x978] sm:$0xff]  ;;  %2287 = vmatpush.msrb.mxu1 %v1933_v14  ;;  %v2006_v14 = vld [vmem:[#allocation2 + $0x88] sm:$0xff] }
 0x2d5   :  { %2221 = vmatpush.msra.mxu0 %v2004_v1  ;;  %2261 = vmatpush.msrb.mxu2 %v1813_v9  ;;  %v1765_v1 = vld [vmem:[#allocation2 + $0xb38] sm:$0xff]  ;;  %v1944_v9 = vld [vmem:[#allocation2 + $0x588] sm:$0xff] }
 0x2d6   :  { %2336 = vmatpush.msrb.mxu3 %v2066_v11  ;;  %v1909_v11 = vld [vmem:[#allocation2 + $0x6e8] sm:$0xff] }
 0x2d7   :  { %2222 = vmatpush.msra.mxu0 %v1992_v46  ;;  %2262 = vmatpush.msrb.mxu2 %v1801_v36  ;;  %v1921_v46 = vld [vmem:[#allocation2 + $0x480] sm:$0xff]  ;;  %v1932_v36 = vld [vmem:[#allocation2 + $0x2b8] sm:$0xff] }
 0x2d8   :  { %2337 = vmatpush.msrb.mxu3 %v2054_v21  ;;  %2288 = vmatpush.msrb.mxu1 %v1921_v46  ;;  %v1908_v21 = vld [vmem:[#allocation2 + $0x268] sm:$0xff] }
 0x2d9   :  { %2223 = vmatpush.msra.mxu0 %v1980_v44  ;;  %2263 = vmatpush.msrb.mxu2 %v1789_v4  ;;  %v1741_v44 = vld [vmem:[#allocation2 + $0x858] sm:$0xff]  ;;  %v1920_v4 = vld [vmem:[#allocation2 + $0x2c0] sm:$0xff]  ;;  %v1886_v46 = vld [vmem:[#allocation2 + $0x928] sm:$0xff] }
 0x2da   :  { %2338 = vmatpush.msrb.mxu3 %v2042_v56  ;;  %2289 = vmatpush.msrb.mxu1 %v1909_v11  ;;  %v1887_v56 = vld [vmem:[#allocation2 + $0x610] sm:$0xff]  ;;  %v1875_v11 = vld [vmem:[#allocation2 + $0x280] sm:$0xff] }
 0x2db   :  { %2224 = vmatpush.msra.mxu0 %v1968_v7  ;;  %2264 = vmatpush.msrb.mxu2 %v1777_v8  ;;  %v1729_v7 = vld [vmem:[#allocation2 + $0x9a0] sm:$0xff]  ;;  %v1897_v8 = vld [vmem:[#allocation2 + $0x2f0] sm:$0xff] }
 0x2dc   :  { %4523 = vmatmul.msk.f32.vlgmr.msra.gmra.mxu3 %vm894_vm3, %v9553_v5  ;;  %2290 = vmatpush.msrb.mxu1 %v1897_v8  ;;  %v1863_v8 = vld [vmem:[#allocation2 + $0x478] sm:$0xff] }
 0x2dd   :  { %2225 = vmatpush.msra.mxu0 %v1956_v12  ;;  %2265 = vmatpush.msrb.mxu2 %v1765_v1  ;;  %v1717_v12 = vld [vmem:[#allocation2 + $0x6d0] sm:$0xff] }
 0x2de   :  { %2339 = vmatpush.msrb.mxu3 %v2030_v49  ;;  %v1896_v1 = vld [vmem:[#allocation2 + $0x430] sm:$0xff]  ;;  %2291 = vmatmul.f32.vlgmr.msrb.gmra.mxu1 %v6875_v16  ;;  %v2079_v49 = vld [vmem:[#allocation2 + $0x180] sm:$0xff] }
 0x2df   :  { %2226 = vmatpush.msra.mxu0 %v1944_v9  ;;  %2266 = vmatpush.msrb.mxu2 %v1753_v10  ;;  %v1705_v9 = vld [vmem:[#allocation2 + $0x4d8] sm:$0xff]  ;;  %v2090_v10 = vld [vmem:[#allocation2 + $0x210] sm:$0x1] }
 0x2e0   :  { %2340 = vmatpush.msrb.mxu3 %v2018_v6  ;;  %2375 = vmatpush.msra.mxu1 %v1887_v56  ;;  %v2067_v6 = vld [vmem:[#allocation2 + $0x538] sm:$0xff] }
 0x2e1   :  { %2227 = vmatpush.msra.mxu0 %v1932_v36  ;;  %2267 = vmatpush.msrb.mxu2 %v1741_v44  ;;  %v1994_v36 = vld [vmem:[#allocation2 + $0xa20] sm:$0xff]  ;;  %v1874_v44 = vld [vmem:[#allocation2 + $0x248] sm:$0xff]  ;;  %v1958_v56 = vld [vmem:[#allocation2 + $0xb78] sm:$0xff] }
 0x2e2   :  { %2341 = vmatpush.msrb.mxu3 %v2006_v14  ;;  %v1850_v14 = vld [vmem:[#allocation2 + $0x8c8] sm:$0xff]  ;;  %2376 = vmatpush.msra.mxu1 %v1875_v11  ;;  %v1827_v11 = vld [vmem:[#allocation2 + $0x670] sm:$0xff] }
 0x2e3   :  { %2228 = vmatpush.msra.mxu0 %v1920_v4  ;;  %2268 = vmatpush.msrb.mxu2 %v1729_v7  ;;  %v1982_v4 = vld [vmem:[#allocation2 + $0xc20] sm:$0xff]  ;;  %v1862_v7 = vld [vmem:[#allocation2 + $0x608] sm:$0xff] }
 0x2e4   :  { %2342 = vmatpush.msrb.mxu3 %v1994_v36  ;;  %2377 = vmatpush.msra.mxu1 %v1863_v8  ;;  %v1946_v36 = vld [vmem:[#allocation2 + $0x768] sm:$0xff]  ;;  %v1815_v8 = vld [vmem:[#allocation2 + $0x140] sm:$0xff] }
 0x2e5   :  { %2229 = vmatpush.msra.mxu0 %v1908_v21  ;;  %2269 = vmatpush.msrb.mxu2 %v1717_v12  ;;  %v1970_v21 = vld [vmem:[#allocation2 + $0x168] sm:$0xff]  ;;  %v2055_v12 = vld [vmem:[#allocation2 + $0x460] sm:$0xff] }
 0x2e6   :  { %2343 = vmatpush.msrb.mxu3 %v1982_v4  ;;  %v1934_v4 = vld [vmem:[#allocation2 + $0x240] sm:$0xff] }
 0x2e7   :  { %2230 = vmatpush.msra.mxu0 %v1896_v1  ;;  %2270 = vmatpush.msrb.mxu2 %v1705_v9  ;;  %v1851_v1 = vld [vmem:[#allocation2 + $0x4f0] sm:$0xff]  ;;  %v2043_v9 = vld [vmem:[#allocation2 + $0x9e8] sm:$0xff] }
 0x2e8   :  { %2231 = vmatmul.f32.vlgmr.msra.gmra.mxu0 %v6875_v16  ;;  %2271 = vmatmul.f32.vlgmr.msrb.gmra.mxu2 %v6827_v15 }
 0x2e9   :  { %2315 = vmatpush.msrb.mxu0 %v1886_v46  ;;  %4524 = vmatpush.msk.msra.mxu2 %vm835_vm0, %v2090_v10  ;;  %v1838_v46 = vld [vmem:[#allocation2 + $0xc30] sm:$0xff]  ;;  %v1839_v10 = vld [vmem:[#allocation2 + $0x4b8] sm:$0xff] }
 0x2ea   :  { %2344 = vmatpush.msrb.mxu3 %v1970_v21  ;;  %2378 = vmatpush.msra.mxu1 %v1851_v1  ;;  %v1922_v21 = vld [vmem:[#allocation2 + $0x888] sm:$0xff]  ;;  %v1803_v1 = vld [vmem:[#allocation2 + $0x9e0] sm:$0xff] }
 0x2eb   :  { %2395 = vmatpush.msrb.mxu2 %v2079_v49  ;;  %2316 = vmatpush.msrb.mxu0 %v1874_v44  ;;  %v2031_v49 = vld [vmem:[#allocation2 + $0x390] sm:$0xff]  ;;  %v1826_v44 = vld [vmem:[#allocation2 + $0x1c8] sm:$0xff] }
 0x2ec   :  { %2345 = vmatpush.msrb.mxu3 %v1958_v56  ;;  %2379 = vmatpush.msra.mxu1 %v1839_v10  ;;  %v1910_v56 = vld [vmem:[#allocation2 + $0x200] sm:$0xff]  ;;  %v1791_v10 = vld [vmem:[#allocation2 + $0x370] sm:$0xff] }
 0x2ed   :  { %2396 = vmatpush.msrb.mxu2 %v2067_v6  ;;  %2317 = vmatpush.msrb.mxu0 %v1862_v7  ;;  %v2019_v6 = vld [vmem:[#allocation2 + $0xb08] sm:$0xff]  ;;  %v1814_v7 = vld [vmem:[#allocation2 + $0xc38] sm:$0xff] }
 0x2ee   :  { %2346 = vmatpush.msrb.mxu3 %v1946_v36  ;;  %2380 = vmatpush.msra.mxu1 %v1827_v11  ;;  %v1898_v36 = vld [vmem:[#allocation2 + $0xb50] sm:$0xff]  ;;  %v1779_v11 = vld [vmem:[#allocation2 + $0x380] sm:$0xff] }
 0x2ef   :  { %2397 = vmatpush.msrb.mxu2 %v2055_v12  ;;  %2318 = vmatpush.msrb.mxu0 %v1850_v14  ;;  %v2007_v12 = vld [vmem:[#allocation2 + $0x6b0] sm:$0xff]  ;;  %v1802_v14 = vld [vmem:[#allocation2 + $0x128] sm:$0xff] }
 0x2f0   :  { %2347 = vmatpush.msrb.mxu3 %v1934_v4  ;;  %2381 = vmatpush.msra.mxu1 %v1815_v8  ;;  %v1971_v4 = vld [vmem:[#allocation2 + $0x38] sm:$0xff] }
 0x2f1   :  { %2398 = vmatpush.msrb.mxu2 %v2043_v9  ;;  %2319 = vmatpush.msrb.mxu0 %v1838_v46  ;;  %v1995_v9 = vld [vmem:[#allocation2 + $0x428] sm:$0xff]  ;;  %v1790_v46 = vld [vmem:[#allocation2 + $0x40] sm:$0xff]  ;;  %v1959_v8 = vld [vmem:[#allocation2 + $0x5f8] sm:$0xff] }
 0x2f2   :  { %2348 = vmatpush.msrb.mxu3 %v1922_v21  ;;  %2382 = vmatpush.msra.mxu1 %v1803_v1  ;;  %v1754_v21 = vld [vmem:[#allocation2 + $0x7a0] sm:$0xff] }
 0x2f3   :  { %2399 = vmatpush.msrb.mxu2 %v2031_v49  ;;  %2320 = vmatpush.msrb.mxu0 %v1826_v44  ;;  %v1983_v49 = vld [vmem:[#allocation2 + $0x1b8] sm:$0xff]  ;;  %v1778_v44 = vld [vmem:[#allocation2 + $0x660] sm:$0xff] }
 0x2f4   :  { %2349 = vmatpush.msrb.mxu3 %v1910_v56  ;;  %2383 = vmatpush.msra.mxu1 %v1791_v10  ;;  %v1947_v1 = vld [vmem:[#allocation2 + $0x5c0] sm:$0xff]  ;;  %v1742_v56 = vld [vmem:[#allocation2 + $0x2c8] sm:$0xff] }
 0x2f5   :  { %2400 = vmatpush.msrb.mxu2 %v2019_v6  ;;  %2321 = vmatpush.msrb.mxu0 %v1814_v7  ;;  %v1766_v6 = vld [vmem:[#allocation2 + $0x2a8] sm:$0xff]  ;;  %v1767_v7 = vld [vmem:[#allocation2 + $0x9b0] sm:$0xff]  ;;  %v1935_v10 = vld [vmem:[#allocation2 + $0x620] sm:$0xff] }
 0x2f6   :  { %2350 = vmatpush.msrb.mxu3 %v1898_v36  ;;  %4525 = vmatmul.msk.f32.vlgmr.msra.gmra.mxu2 %vm894_vm3, %v9553_v5  ;;  %v1730_v36 = vld [vmem:[#allocation2 + $0xa60] sm:$0xff] }
 0x2f7   :  { %2401 = vmatpush.msrb.mxu2 %v2007_v12  ;;  %2322 = vmatpush.msrb.mxu0 %v1802_v14  ;;  %v1888_v12 = vld [vmem:[#allocation2 + $0x278] sm:$0xff]  ;;  %v1755_v14 = vld [vmem:[#allocation2 + $0x688] sm:$0xff] }
 0x2f8   :  { %2384 = vmatpush.msra.mxu1 %v1779_v11  ;;  %2351 = vmatmul.f32.vlgmr.msrb.gmra.mxu3 %v6875_v16  ;;  %v1923_v11 = vld [vmem:[#allocation2 + $0x490] sm:$0xff] }
 0x2f9   :  { %2402 = vmatpush.msrb.mxu2 %v1995_v9  ;;  %2323 = vmatpush.msrb.mxu0 %v1790_v46  ;;  %v1876_v9 = vld [vmem:[#allocation2 + $0xc58] sm:$0xff]  ;;  %v1743_v46 = vld [vmem:[#allocation2 + $0x6a8] sm:$0xff] }
 0x2fa   :  { %2385 = vmatpush.msra.mxu1 %v1767_v7  ;;  %2435 = vmatpush.msra.mxu3 %v1888_v12  ;;  %v1719_v7 = vld [vmem:[#allocation2 + $0x328] sm:$0xff]  ;;  %v1840_v12 = vld [vmem:[#allocation2 + $0xa78] sm:$0xff] }
 0x2fb   :  { %2403 = vmatpush.msrb.mxu2 %v1983_v49  ;;  %2324 = vmatpush.msrb.mxu0 %v1778_v44  ;;  %v1864_v49 = vld [vmem:[#allocation2 + $0xb10] sm:$0xff]  ;;  %v1731_v44 = vld [vmem:[#allocation2 + $0x8e0] sm:$0xff] }
 0x2fc   :  { %2386 = vmatpush.msra.mxu1 %v1755_v14  ;;  %2436 = vmatpush.msra.mxu3 %v1876_v9  ;;  %v1899_v14 = vld [vmem:[#allocation2 + $0xbe8] sm:$0xff]  ;;  %v1889_v9 = vld [vmem:[#allocation2 + $0x258] sm:$0xff] }
 0x2fd   :  { %2404 = vmatpush.msrb.mxu2 %v1971_v4  ;;  %2325 = vmatpush.msrb.mxu0 %v1766_v6  ;;  %v1718_v4 = vld [vmem:[#allocation2 + $0x778] sm:$0xff] }
 0x2fe   :  { %2387 = vmatpush.msra.mxu1 %v1743_v46  ;;  %v1852_v6 = vld [vmem:[#allocation2 + $0x58] sm:$0xff]  ;;  %2437 = vmatpush.msra.mxu3 %v1864_v49  ;;  %v1828_v46 = vld [vmem:[#allocation2 + $0x6f0] sm:$0xff]  ;;  %v1877_v49 = vld [vmem:[#allocation2 + $0xa80] sm:$0xff] }
 0x2ff   :  { %2405 = vmatpush.msrb.mxu2 %v1959_v8  ;;  %2326 = vmatpush.msrb.mxu0 %v1754_v21  ;;  %v1911_v8 = vld [vmem:[#allocation2 + $0x708] sm:$0xff]  ;;  %v1706_v21 = vld [vmem:[#allocation2 + $0x818] sm:$0xff] }
 0x300   :  { %2388 = vmatpush.msra.mxu1 %v1731_v44  ;;  %2438 = vmatpush.msra.mxu3 %v1852_v6  ;;  %v1816_v44 = vld [vmem:[#allocation2 + $0x298] sm:$0xff]  ;;  %v1865_v6 = vld [vmem:[#allocation2 + $0xa08] sm:$0xff] }
 0x301   :  { %2406 = vmatpush.msrb.mxu2 %v1947_v1  ;;  %2327 = vmatpush.msrb.mxu0 %v1742_v56  ;;  %v2091_v1 = vld [vmem:[#allocation2 + $0x8] sm:$0x1]  ;;  %v2080_v56 = vld [vmem:[#allocation2 + $0xaf0] sm:$0xff] }
 0x302   :  { %2389 = vmatpush.msra.mxu1 %v1719_v7  ;;  %2439 = vmatpush.msra.mxu3 %v1840_v12  ;;  %v2044_v7 = vld [vmem:[#allocation2 + $0x208] sm:$0xff]  ;;  %v1804_v12 = vld [vmem:[#allocation2 + $0x738] sm:$0xff] }
 0x303   :  { %2407 = vmatpush.msrb.mxu2 %v1935_v10  ;;  %2328 = vmatpush.msrb.mxu0 %v1730_v36  ;;  %v2068_v10 = vld [vmem:[#allocation2 + $0xbd8] sm:$0xff]  ;;  %v1707_v36 = vld [vmem:[#allocation2 + $0xc50] sm:$0xff] }
 0x304   :  { %2440 = vmatpush.msra.mxu3 %v1828_v46  ;;  %2390 = vmatpush.msra.mxu1 %v1707_v36  ;;  %v2057_v46 = vld [vmem:[#allocation2 + $0x220] sm:$0xff] }
 0x305   :  { %2408 = vmatpush.msrb.mxu2 %v1923_v11  ;;  %2329 = vmatpush.msrb.mxu0 %v1718_v4  ;;  %v2056_v11 = vld [vmem:[#allocation2 + $0x788] sm:$0xff]  ;;  %v2092_v4 = vld [vmem:[#allocation2 + $0x938] sm:$0x1]  ;;  %v1829_v36 = vld [vmem:[#allocation2] sm:$0xff] }
 0x306   :  { %2441 = vmatpush.msra.mxu3 %v1816_v44  ;;  %4528 = vmatpush.msk.msrb.mxu1 %vm835_vm0, %v2092_v4  ;;  %v2045_v44 = vld [vmem:[#allocation2 + $0x488] sm:$0xff]  ;;  %v1817_v4 = vld [vmem:[#allocation2 + $0x870] sm:$0xff] }
 0x307   :  { %2409 = vmatpush.msrb.mxu2 %v1911_v8  ;;  %2330 = vmatpush.msrb.mxu0 %v1706_v21  ;;  %v2081_v8 = vld [vmem:[#allocation2 + $0x568] sm:$0xff]  ;;  %v1853_v21 = vld [vmem:[#allocation2 + $0x1e0] sm:$0xff] }
 0x308   :  { %2331 = vmatmul.f32.vlgmr.msrb.gmra.mxu0 %v6827_v15  ;;  %2391 = vmatmul.f32.vlgmr.msra.gmra.mxu1 %v6827_v15 }
 0x309   :  { %2410 = vmatpush.msrb.mxu2 %v1899_v14  ;;  %4526 = vmatpush.msk.msra.mxu0 %vm835_vm0, %v2091_v1  ;;  %v2069_v14 = vld [vmem:[#allocation2 + $0x190] sm:$0xff]  ;;  %v2032_v1 = vld [vmem:[#allocation2 + $0x528] sm:$0xff] }
 0x30a   :  { %2411 = vmatmul.f32.vlgmr.msrb.gmra.mxu2 %v6875_v16  ;;  %2515 = vmatpush.msra.mxu1 %v2081_v8  ;;  %v1996_v8 = vld [vmem:[#allocation2 + $0x4e8] sm:$0xff] }
 0x30b   :  { %2455 = vmatpush.msrb.mxu0 %v2080_v56  ;;  %2495 = vmatpush.msra.mxu2 %v1889_v9  ;;  %v1841_v56 = vld [vmem:[#allocation2 + $0x720] sm:$0xff] }
 0x30c   :  { %2442 = vmatpush.msra.mxu3 %v1804_v12  ;;  %v1792_v9 = vld [vmem:[#allocation2 + $0xbe0] sm:$0xff]  ;;  %2516 = vmatpush.msra.mxu1 %v2069_v14 }
 0x30d   :  { %2456 = vmatpush.msrb.mxu0 %v2068_v10  ;;  %2496 = vmatpush.msra.mxu2 %v1877_v49  ;;  %v2020_v10 = vld [vmem:[#allocation2 + $0x1a0] sm:$0xff]  ;;  %v1780_v49 = vld [vmem:[#allocation2 + $0x638] sm:$0xff] }
 0x30e   :  { %2443 = vmatpush.msra.mxu3 %v1792_v9  ;;  %2517 = vmatpush.msra.mxu1 %v2057_v46  ;;  %v1756_v12 = vld [vmem:[#allocation2 + $0xb80] sm:$0xff]  ;;  %v2009_v46 = vld [vmem:[#allocation2 + $0x4a8] sm:$0xff] }
 0x30f   :  { %2457 = vmatpush.msrb.mxu0 %v2056_v11  ;;  %2497 = vmatpush.msra.mxu2 %v1865_v6  ;;  %v2008_v11 = vld [vmem:[#allocation2 + $0xb28] sm:$0xff]  ;;  %v2021_v14 = vld [vmem:[#allocation2 + $0x840] sm:$0xff] }
 0x310   :  { %4527 = vmatmul.msk.f32.vlgmr.msra.gmra.mxu0 %vm894_vm3, %v9553_v5  ;;  %v1768_v6 = vld [vmem:[#allocation2 + $0x68] sm:$0xff]  ;;  %2444 = vmatpush.msra.mxu3 %v1780_v49  ;;  %v1744_v9 = vld [vmem:[#allocation2 + $0xa0] sm:$0xff] }
 0x311   :  { %2458 = vmatpush.msrb.mxu0 %v2044_v7  ;;  %2498 = vmatpush.msra.mxu2 %v1853_v21  ;;  %v2033_v7 = vld [vmem:[#allocation2 + $0x70] sm:$0xff]  ;;  %v1805_v21 = vld [vmem:[#allocation2 + $0x7e0] sm:$0xff] }
 0x312   :  { %2518 = vmatpush.msra.mxu1 %v2045_v44  ;;  %2445 = vmatpush.msra.mxu3 %v1768_v6  ;;  %v1732_v49 = vld [vmem:[#allocation2 + $0xba0] sm:$0xff]  ;;  %v1997_v44 = vld [vmem:[#allocation2 + $0x7f8] sm:$0xff]  ;;  %v1720_v6 = vld [vmem:[#allocation2 + $0x730] sm:$0xff] }
 0x313   :  { %2459 = vmatpush.msrb.mxu0 %v2032_v1  ;;  %2499 = vmatpush.msra.mxu2 %v1841_v56  ;;  %v1984_v1 = vld [vmem:[#allocation2 + $0x7c8] sm:$0xff]  ;;  %v1793_v56 = vld [vmem:[#allocation2 + $0xa30] sm:$0xff] }
 0x314   :  { %2519 = vmatpush.msra.mxu1 %v2033_v7  ;;  %2446 = vmatpush.msra.mxu3 %v1756_v12  ;;  %v1985_v7 = vld [vmem:[#allocation2 + $0x290] sm:$0xff] }
 0x315   :  { %2460 = vmatpush.msrb.mxu0 %v2020_v10  ;;  %2500 = vmatpush.msra.mxu2 %v1829_v36  ;;  %v1972_v10 = vld [vmem:[#allocation2 + $0x1d0] sm:$0xff]  ;;  %v1781_v36 = vld [vmem:[#allocation2 + $0x138] sm:$0xff] }
 0x316   :  { %2520 = vmatpush.msra.mxu1 %v2021_v14  ;;  %2447 = vmatpush.msra.mxu3 %v1744_v9  ;;  %v1708_v12 = vld [vmem:[#allocation2 + $0x810] sm:$0xff]  ;;  %v2093_v9 = vld [vmem:[#allocation2 + $0x160] sm:$0x1] }
 0x317   :  { %2461 = vmatpush.msrb.mxu0 %v2008_v11  ;;  %2501 = vmatpush.msra.mxu2 %v1817_v4  ;;  %v1960_v11 = vld [vmem:[#allocation2 + $0x318] sm:$0xff]  ;;  %v1769_v4 = vld [vmem:[#allocation2 + $0x90] sm:$0xff] }
 0x318   :  { %2521 = vmatpush.msra.mxu1 %v2009_v46  ;;  %2448 = vmatpush.msra.mxu3 %v1732_v49  ;;  %v1973_v14 = vld [vmem:[#allocation2 + $0x30] sm:$0xff]  ;;  %v1961_v46 = vld [vmem:[#allocation2 + $0x7c0] sm:$0xff]  ;;  %v1733_v49 = vld [vmem:[#allocation2 + $0xbb8] sm:$0xff] }
 0x319   :  { %2462 = vmatpush.msrb.mxu0 %v1996_v8  ;;  %2502 = vmatpush.msra.mxu2 %v1805_v21  ;;  %v1948_v8 = vld [vmem:[#allocation2 + $0x6e0] sm:$0xff]  ;;  %v1757_v21 = vld [vmem:[#allocation2 + $0x2e8] sm:$0xff] }
 0x31a   :  { %2522 = vmatpush.msra.mxu1 %v1997_v44  ;;  %2449 = vmatpush.msra.mxu3 %v1720_v6  ;;  %v1912_v44 = vld [vmem:[#allocation2 + $0x828] sm:$0xff]  ;;  %v1721_v6 = vld [vmem:[#allocation2 + $0x18] sm:$0xff] }
 0x31b   :  { %2463 = vmatpush.msrb.mxu0 %v1984_v1  ;;  %2503 = vmatpush.msra.mxu2 %v1793_v56  ;;  %v1936_v1 = vld [vmem:[#allocation2 + $0x1f0] sm:$0xff]  ;;  %v1745_v56 = vld [vmem:[#allocation2 + $0x5c8] sm:$0xff] }
 0x31c   :  { %2523 = vmatpush.msra.mxu1 %v1985_v7  ;;  %2450 = vmatpush.msra.mxu3 %v1708_v12  ;;  %v1900_v7 = vld [vmem:[#allocation2 + $0xae0] sm:$0xff]  ;;  %v1937_v12 = vld [vmem:[#allocation2 + $0x690] sm:$0xff] }
 0x31d   :  { %2464 = vmatpush.msrb.mxu0 %v1972_v10  ;;  %2504 = vmatpush.msra.mxu2 %v1781_v36  ;;  %v1924_v10 = vld [vmem:[#allocation2 + $0x3f0] sm:$0xff]  ;;  %v2082_v36 = vld [vmem:[#allocation2 + $0x6c0] sm:$0xff] }
 0x31e   :  { %2524 = vmatpush.msra.mxu1 %v1973_v14  ;;  %4530 = vmatpush.msk.msrb.mxu3 %vm835_vm0, %v2093_v9  ;;  %v1890_v14 = vld [vmem:[#allocation2 + $0x898] sm:$0xff]  ;;  %v1925_v9 = vld [vmem:[#allocation2 + $0x520] sm:$0xff] }
 0x31f   :  { %2465 = vmatpush.msrb.mxu0 %v1960_v11  ;;  %2505 = vmatpush.msra.mxu2 %v1769_v4  ;;  %v1949_v11 = vld [vmem:[#allocation2 + $0xa88] sm:$0xff]  ;;  %v2070_v4 = vld [vmem:[#allocation2 + $0x20] sm:$0xff] }
 0x320   :  { %2525 = vmatpush.msra.mxu1 %v1961_v46  ;;  %2451 = vmatmul.f32.vlgmr.msra.gmra.mxu3 %v6827_v15  ;;  %v2083_v46 = vld [vmem:[#allocation2 + $0x6c8] sm:$0xff] }
 0x321   :  { %2466 = vmatpush.msrb.mxu0 %v1948_v8  ;;  %2506 = vmatpush.msra.mxu2 %v1757_v21  ;;  %v2058_v8 = vld [vmem:[#allocation2 + $0x378] sm:$0xff]  ;;  %v1709_v21 = vld [vmem:[#allocation2 + $0x770] sm:$0xff] }
 0x322   :  { %2575 = vmatpush.msra.mxu3 %v2082_v36  ;;  %2526 = vmatpush.msra.mxu1 %v1949_v11  ;;  %v2034_v36 = vld [vmem:[#allocation2 + $0x340] sm:$0xff]  ;;  %v1866_v11 = vld [vmem:[#allocation2 + $0xa8] sm:$0xff] }
 0x323   :  { %2467 = vmatpush.msrb.mxu0 %v1936_v1  ;;  %2507 = vmatpush.msra.mxu2 %v1745_v56  ;;  %v2046_v1 = vld [vmem:[#allocation2 + $0x558] sm:$0xff] }
 0x324   :  { %2576 = vmatpush.msra.mxu3 %v2070_v4  ;;  %4529 = vmatmul.msk.f32.vlgmr.msrb.gmra.mxu1 %vm894_vm3, %v9553_v5  ;;  %v2094_v56 = vld [vmem:[#allocation2 + $0x998] sm:$0x1] }
 0x325   :  { %2468 = vmatpush.msrb.mxu0 %v1924_v10  ;;  %2508 = vmatpush.msra.mxu2 %v1733_v49  ;;  %v1878_v10 = vld [vmem:[#allocation2 + $0x78] sm:$0xff]  ;;  %v1913_v49 = vld [vmem:[#allocation2 + $0x3e8] sm:$0xff] }
 0x326   :  { %2577 = vmatpush.msra.mxu3 %v2058_v8  ;;  %2527 = vmatpush.msra.mxu1 %v1937_v12  ;;  %v2022_v4 = vld [vmem:[#allocation2 + $0x6d8] sm:$0xff]  ;;  %v1854_v8 = vld [vmem:[#allocation2 + $0x8d0] sm:$0xff] }
 0x327   :  { %2469 = vmatpush.msrb.mxu0 %v1912_v44  ;;  %2509 = vmatpush.msra.mxu2 %v1721_v6  ;;  %v2071_v44 = vld [vmem:[#allocation2 + $0x150] sm:$0xff]  ;;  %v1901_v6 = vld [vmem:[#allocation2 + $0x808] sm:$0xff]  ;;  %v1891_v12 = vld [vmem:[#allocation2 + $0xaf8] sm:$0xff] }
 0x328   :  { %2578 = vmatpush.msra.mxu3 %v2046_v1  ;;  %2528 = vmatpush.msra.mxu1 %v1925_v9  ;;  %v1842_v1 = vld [vmem:[#allocation2 + $0x1e8] sm:$0xff]  ;;  %v1879_v9 = vld [vmem:[#allocation2 + $0x440] sm:$0xff] }
 0x329   :  { %2470 = vmatpush.msrb.mxu0 %v1900_v7  ;;  %2510 = vmatpush.msra.mxu2 %v1709_v21  ;;  %v2059_v7 = vld [vmem:[#allocation2 + $0xb40] sm:$0xff]  ;;  %v2010_v21 = vld [vmem:[#allocation2 + $0xc08] sm:$0xff] }
 0x32a   :  { %2511 = vmatmul.f32.vlgmr.msra.gmra.mxu2 %v6827_v15  ;;  %2471 = vmatmul.f32.vlgmr.msrb.gmra.mxu0 %v6875_v16 }
 0x32b   :  { %2555 = vmatpush.msra.mxu0 %v1890_v14  ;;  %4532 = vmatpush.msk.msrb.mxu2 %vm835_vm0, %v2094_v56  ;;  %v2047_v14 = vld [vmem:[#allocation2 + $0xc00] sm:$0xff]  ;;  %v1998_v56 = vld [vmem:[#allocation2 + $0x438] sm:$0xff] }
 0x32c   :  { %4531 = vmatmul.msk.f32.vlgmr.msrb.gmra.mxu3 %vm894_vm3, %v9553_v5  ;;  %2529 = vmatpush.msra.mxu1 %v1913_v49  ;;  %v1867_v49 = vld [vmem:[#allocation2 + $0xc0] sm:$0xff] }
 0x32d   :  { %2635 = vmatpush.msra.mxu2 %v2083_v46  ;;  %2556 = vmatpush.msra.mxu0 %v1878_v10  ;;  %v2035_v46 = vld [vmem:[#allocation2 + $0x780] sm:$0xff]  ;;  %v1830_v10 = vld [vmem:[#allocation2 + $0x1d8] sm:$0xff] }
 0x32e   :  { %2579 = vmatpush.msra.mxu3 %v2034_v36  ;;  %2530 = vmatpush.msra.mxu1 %v1901_v6  ;;  %v1986_v36 = vld [vmem:[#allocation2 + $0xaa8] sm:$0xff]  ;;  %v1855_v6 = vld [vmem:[#allocation2 + $0xb70] sm:$0xff] }
 0x32f   :  { %2636 = vmatpush.msra.mxu2 %v2071_v44  ;;  %2557 = vmatpush.msra.mxu0 %v1866_v11  ;;  %v2023_v44 = vld [vmem:[#allocation2 + $0x8a8] sm:$0xff]  ;;  %v1818_v11 = vld [vmem:[#allocation2 + $0x260] sm:$0xff] }
 0x330   :  { %2580 = vmatpush.msra.mxu3 %v2022_v4  ;;  %2531 = vmatmul.f32.vlgmr.msra.gmra.mxu1 %v6875_v16  ;;  %v1974_v4 = vld [vmem:[#allocation2 + $0x348] sm:$0xff] }
 0x331   :  { %2637 = vmatpush.msra.mxu2 %v2059_v7  ;;  %2558 = vmatpush.msra.mxu0 %v1854_v8  ;;  %v2011_v7 = vld [vmem:[#allocation2 + $0x500] sm:$0xff]  ;;  %v1806_v8 = vld [vmem:[#allocation2 + $0xa70] sm:$0xff] }
 0x332   :  { %2581 = vmatpush.msra.mxu3 %v2010_v21  ;;  %2615 = vmatpush.msrb.mxu1 %v1891_v12  ;;  %v1962_v21 = vld [vmem:[#allocation2 + $0x630] sm:$0xff]  ;;  %v1843_v12 = vld [vmem:[#allocation2 + $0x448] sm:$0xff] }
 0x333   :  { %2638 = vmatpush.msra.mxu2 %v2047_v14  ;;  %2559 = vmatpush.msra.mxu0 %v1842_v1  ;;  %v1999_v14 = vld [vmem:[#allocation2 + $0x950] sm:$0xff]  ;;  %v1794_v1 = vld [vmem:[#allocation2 + $0x960] sm:$0xff] }
 0x334   :  { %2582 = vmatpush.msra.mxu3 %v1998_v56  ;;  %2616 = vmatpush.msrb.mxu1 %v1879_v9  ;;  %v1950_v56 = vld [vmem:[#allocation2 + $0x640] sm:$0xff]  ;;  %v1831_v9 = vld [vmem:[#allocation2 + $0x3a8] sm:$0xff] }
 0x335   :  { %2639 = vmatpush.msra.mxu2 %v2035_v46  ;;  %2560 = vmatpush.msra.mxu0 %v1830_v10  ;;  %v1987_v46 = vld [vmem:[#allocation2 + $0x740] sm:$0xff]  ;;  %v1782_v10 = vld [vmem:[#allocation2 + $0xd0] sm:$0xff] }
 0x336   :  { %2583 = vmatpush.msra.mxu3 %v1986_v36  ;;  %2617 = vmatpush.msrb.mxu1 %v1867_v49  ;;  %v1938_v36 = vld [vmem:[#allocation2 + $0x868] sm:$0xff]  ;;  %v1819_v49 = vld [vmem:[#allocation2 + $0xbf0] sm:$0xff] }
 0x337   :  { %2640 = vmatpush.msra.mxu2 %v2023_v44  ;;  %2561 = vmatpush.msra.mxu0 %v1818_v11  ;;  %v1975_v44 = vld [vmem:[#allocation2 + $0xc28] sm:$0xff]  ;;  %v1770_v11 = vld [vmem:[#allocation2 + $0x5b8] sm:$0xff] }
 0x338   :  { %2584 = vmatpush.msra.mxu3 %v1974_v4  ;;  %2618 = vmatpush.msrb.mxu1 %v1855_v6  ;;  %v1926_v4 = vld [vmem:[#allocation2 + $0x230] sm:$0xff]  ;;  %v1807_v6 = vld [vmem:[#allocation2 + $0x48] sm:$0xff] }
 0x339   :  { %2641 = vmatpush.msra.mxu2 %v2011_v7  ;;  %2562 = vmatpush.msra.mxu0 %v1806_v8  ;;  %v1963_v7 = vld [vmem:[#allocation2 + $0x798] sm:$0xff]  ;;  %v1758_v8 = vld [vmem:[#allocation2 + $0x420] sm:$0xff] }
 0x33a   :  { %2585 = vmatpush.msra.mxu3 %v1962_v21  ;;  %2619 = vmatpush.msrb.mxu1 %v1843_v12  ;;  %v1914_v21 = vld [vmem:[#allocation2 + $0x270] sm:$0xff]  ;;  %v1795_v12 = vld [vmem:[#allocation2 + $0x958] sm:$0xff] }
 0x33b   :  { %2642 = vmatpush.msra.mxu2 %v1999_v14  ;;  %2563 = vmatpush.msra.mxu0 %v1794_v1  ;;  %v1951_v14 = vld [vmem:[#allocation2 + $0xac8] sm:$0xff]  ;;  %v1746_v1 = vld [vmem:[#allocation2 + $0x5d8] sm:$0xff] }
 0x33c   :  { %2586 = vmatpush.msra.mxu3 %v1950_v56  ;;  %2620 = vmatpush.msrb.mxu1 %v1831_v9  ;;  %v1902_v56 = vld [vmem:[#allocation2 + $0xa98] sm:$0xff]  ;;  %v1783_v9 = vld [vmem:[#allocation2 + $0x170] sm:$0xff] }
 0x33d   :  { %2643 = vmatpush.msra.mxu2 %v1987_v46  ;;  %2564 = vmatpush.msra.mxu0 %v1782_v10  ;;  %v1939_v46 = vld [vmem:[#allocation2 + $0x5e0] sm:$0xff]  ;;  %v1892_v10 = vld [vmem:[#allocation2 + $0x1b0] sm:$0xff] }
 0x33e   :  { %2587 = vmatpush.msra.mxu3 %v1938_v36  ;;  %2621 = vmatpush.msrb.mxu1 %v1819_v49  ;;  %v1734_v36 = vld [vmem:[#allocation2 + $0x830] sm:$0xff]  ;;  %v1771_v49 = vld [vmem:[#allocation2 + $0x6f8] sm:$0xff] }
 0x33f   :  { %2644 = vmatpush.msra.mxu2 %v1975_v44  ;;  %2565 = vmatpush.msra.mxu0 %v1770_v11  ;;  %v1927_v44 = vld [vmem:[#allocation2 + $0x680] sm:$0xff]  ;;  %v1880_v11 = vld [vmem:[#allocation2 + $0x2b0] sm:$0xff] }
 0x340   :  { %2588 = vmatpush.msra.mxu3 %v1926_v4  ;;  %2622 = vmatpush.msrb.mxu1 %v1807_v6  ;;  %v1722_v4 = vld [vmem:[#allocation2 + $0xad8] sm:$0xff] }
 0x341   :  { %2645 = vmatpush.msra.mxu2 %v1963_v7  ;;  %2566 = vmatpush.msra.mxu0 %v1758_v8  ;;  %v1759_v6 = vld [vmem:[#allocation2 + $0x418] sm:$0xff]  ;;  %v1915_v7 = vld [vmem:[#allocation2 + $0xb68] sm:$0xff]  ;;  %v1868_v8 = vld [vmem:[#allocation2 + $0x4c0] sm:$0xff] }
 0x342   :  { %2589 = vmatpush.msra.mxu3 %v1914_v21  ;;  %2623 = vmatpush.msrb.mxu1 %v1795_v12  ;;  %v1710_v21 = vld [vmem:[#allocation2 + $0x338] sm:$0xff]  ;;  %v1747_v12 = vld [vmem:[#allocation2 + $0x750] sm:$0xff] }
 0x343   :  { %2646 = vmatpush.msra.mxu2 %v1951_v14  ;;  %2567 = vmatpush.msra.mxu0 %v1746_v1  ;;  %v1903_v14 = vld [vmem:[#allocation2 + $0x80] sm:$0xff]  ;;  %v2095_v1 = vld [vmem:[#allocation2 + $0x2d0] sm:$0x1] }
 0x344   :  { %2590 = vmatpush.msra.mxu3 %v1902_v56  ;;  %4533 = vmatmul.msk.f32.vlgmr.msrb.gmra.mxu2 %vm894_vm3, %v9553_v5  ;;  %v1856_v56 = vld [vmem:[#allocation2 + $0x198] sm:$0xff] }
 0x345   :  { %2624 = vmatpush.msrb.mxu1 %v1783_v9  ;;  %2591 = vmatmul.f32.vlgmr.msra.gmra.mxu3 %v6875_v16  ;;  %v1735_v9 = vld [vmem:[#allocation2 + $0x7d0] sm:$0xff] }
 0x346   :  { %2647 = vmatpush.msra.mxu2 %v1939_v46  ;;  %2675 = vmatpush.msrb.mxu3 %v1892_v10  ;;  %v2084_v46 = vld [vmem:[#allocation2 + $0x718] sm:$0xff]  ;;  %v1893_v10 = vld [vmem:[#allocation2 + $0x880] sm:$0xff] }
 0x347   :  { %2568 = vmatpush.msra.mxu0 %v1734_v36  ;;  %2625 = vmatpush.msrb.mxu1 %v1771_v49  ;;  %v1844_v36 = vld [vmem:[#allocation2 + $0xa10] sm:$0xff]  ;;  %v1723_v49 = vld [vmem:[#allocation2 + $0x5a0] sm:$0xff] }
 0x348   :  { %2648 = vmatpush.msra.mxu2 %v1927_v44  ;;  %2676 = vmatpush.msrb.mxu3 %v1880_v11  ;;  %v2072_v44 = vld [vmem:[#allocation2 + $0x118] sm:$0xff]  ;;  %v2152_v11 = vpop.f32.mrf.mxu0 }
 0x349   :  { %2569 = vmatpush.msra.mxu0 %v1722_v4  ;;  %2626 = vmatpush.msrb.mxu1 %v1759_v6  ;;  %v1881_v6 = vld [vmem:[#allocation2 + $0x1a8] sm:$0xff] }
 0x34a   :  { %2649 = vmatpush.msra.mxu2 %v1915_v7  ;;  %2677 = vmatpush.msrb.mxu3 %v1868_v8  ;;  %v1832_v7 = vld [vmem:[#allocation2 + $0x3b8] sm:$0xff]  ;;  %v1711_v8 = vld [vmem:[#allocation2 + $0x450] sm:$0xff] }
 0x34b   :  { %2570 = vmatpush.msra.mxu0 %v1710_v21  ;;  %2627 = vmatpush.msrb.mxu1 %v1747_v12  ;;  %v2172_v4 = vpop.f32.mrf.mxu2  ;;  %v2060_v21 = vld [vmem:[#allocation2 + $0x2e0] sm:$0xff]  ;;  %v1869_v12 = vld [vmem:[#allocation2 + $0x398] sm:$0xff] }
 0x34c   :  { %2571 = vmatmul.f32.vlgmr.msra.gmra.mxu0 %v6827_v15  ;;  %2650 = vmatpush.msra.mxu2 %v1903_v14  ;;  %v2173_v14 = vadd.f32 %v2172_v4, %v2152_v11  ;;  %v2073_v11 = vld [vmem:[#allocation2 + $0x540] sm:$0xff]  ;;  %v1796_v4 = vld [vmem:[#allocation2 + $0xae8] sm:$0xff] }
 0x34d   :  { %4534 = vmatpush.msk.msrb.mxu0 %vm835_vm0, %v2095_v1  ;;  %2678 = vmatpush.msrb.mxu3 %v1856_v56  ;;  %v1820_v1 = vld [vmem:[#allocation2 + $0x388] sm:$0xff]  ;;  %v2096_v56 = vld [vmem:[#allocation2 + $0x970] sm:$0x1] }
 0x34e   :  { %2628 = vmatpush.msrb.mxu1 %v1735_v9  ;;  %2651 = vmatmul.f32.vlgmr.msra.gmra.mxu2 %v6875_v16  ;;  %v2048_v9 = vld [vmem:[#allocation2 + $0x548] sm:$0xff] }
 0x34f   :  { %2695 = vmatpush.msra.mxu0 %v2084_v46  ;;  %2735 = vmatpush.msrb.mxu2 %v1893_v10  ;;  %v2192_v46 = vpop.f32.mrf.mxu1  ;;  %v1808_v10 = vld [vmem:[#allocation2 + $0x130] sm:$0xff] }
 0x350   :  { %2679 = vmatpush.msrb.mxu3 %v1844_v36  ;;  %2629 = vmatpush.msrb.mxu1 %v1723_v49  ;;  %v2193_v36 = vadd.f32 %v2192_v46, %v2173_v14  ;;  %v1845_v49 = vld [vmem:[#allocation2 + $0x178] sm:$0xff]  ;;  %v1760_v46 = vld [vmem:[#allocation2 + $0xb60] sm:$0xff] }
 0x351   :  { %2696 = vmatpush.msra.mxu0 %v2072_v44  ;;  %2736 = vmatpush.msrb.mxu2 %v1881_v6  ;;  %v2036_v44 = vld [vmem:[#allocation2 + $0x598] sm:$0xff]  ;;  %v1833_v6 = vld [vmem:[#allocation2 + $0x9d0] sm:$0xff] }
 0x352   :  { %2680 = vmatpush.msrb.mxu3 %v1832_v7  ;;  %2630 = vmatpush.msrb.mxu1 %v1711_v8  ;;  %v2024_v7 = vld [vmem:[#allocation2 + $0x698] sm:$0xff]  ;;  %v2061_v8 = vld [vmem:[#allocation2 + $0x570] sm:$0xff]  ;;  %5107 = vtanh.f32 %v2193_v36 }
 0x353   :  { %2697 = vmatpush.msra.mxu0 %v2060_v21  ;;  %2737 = vmatpush.msrb.mxu2 %v1869_v12  ;;  %v1784_v21 = vld [vmem:[#allocation2 + $0x900] sm:$0xff]  ;;  %v1821_v12 = vld [vmem:[#allocation2 + $0x578] sm:$0xff]  ;;  %v1988_v36 = vld [vmem:[#allocation2 + $0xf0] sm:$0xff] }
 0x354   :  { %2681 = vmatpush.msrb.mxu3 %v1820_v1  ;;  %4536 = vmatpush.msk.msra.mxu1 %vm835_vm0, %v2096_v56  ;;  %v2049_v14 = vld [vmem:[#allocation2 + $0x9b8] sm:$0xff]  ;;  %v1809_v1 = vld [vmem:[#allocation2 + $0x148] sm:$0xff]  ;;  %v2000_v56 = vld [vmem:[#allocation2 + $0x470] sm:$0xff] }
 0x355   :  { %2698 = vmatpush.msra.mxu0 %v2048_v9  ;;  %2631 = vmatmul.f32.vlgmr.msrb.gmra.mxu1 %v6827_v15  ;;  %v2037_v9 = vld [vmem:[#allocation2 + $0x288] sm:$0xff] }
 0x356   :  { %2738 = vmatpush.msrb.mxu2 %v1857_v18  ;;  %2755 = vmatpush.msrb.mxu1 %v2085_v20  ;;  %v2012_v18 = vld [vmem:[#allocation2 + $0x7e8] sm:$0xff]  ;;  %v1772_v20 = vld [vmem:[#allocation2 + $0x910] sm:$0xff] }
 0x357   :  { %2682 = vmatpush.msrb.mxu3 %v1808_v10  ;;  %4535 = vmatmul.msk.f32.vlgmr.msrb.gmra.mxu0 %vm894_vm3, %v9553_v5  ;;  %v1797_v10 = vld [vmem:[#allocation2 + $0x308] sm:$0xff] }
 0x358   :  { %2739 = vmatpush.msrb.mxu2 %v1845_v49  ;;  %2699 = vmatpush.msra.mxu0 %v2036_v44  ;;  %v2025_v49 = vld [vmem:[#allocation2 + $0xa38] sm:$0xff]  ;;  %v2252_v44 = vpop.f32.mrf.mxu1 }
 0x359   :  { %2756 = vmatpush.msrb.mxu1 %v2073_v11  ;;  %2683 = vmatpush.msrb.mxu3 %v1796_v4  ;;  %v7486_v11 = vpop.eup %5107  ;;  %v1748_v4 = vld [vmem:[#allocation2 + $0x618] sm:$0xff] }
 0x35a   :  { %2740 = vmatpush.msrb.mxu2 %v1833_v6  ;;  %2700 = vmatpush.msra.mxu0 %v2024_v7  ;;  %v1976_v6 = vld [vmem:[#allocation2 + $0x108] sm:$0xff]  ;;  %v1785_v7 = vld [vmem:[#allocation2 + $0x358] sm:$0xff] }
 0x35b   :  { %2757 = vmatpush.msrb.mxu1 %v2061_v8  ;;  %2684 = vmatpush.msrb.mxu3 %v1784_v21  ;;  %v2212_v8 = vpop.f32.mrf.mxu3  ;;  %v2013_v21 = vld [vmem:[#allocation2 + $0x968] sm:$0xff] }
 0x35c   :  { %2741 = vmatpush.msrb.mxu2 %v1821_v12  ;;  %2701 = vmatpush.msra.mxu0 %v2012_v18  ;;  %v1736_v12 = vld [vmem:[#allocation2 + $0x4e0] sm:$0xff]  ;;  %v1964_v18 = vld [vmem:[#allocation2 + $0x9d8] sm:$0xff] }
 0x35d   :  { %2758 = vmatpush.msrb.mxu1 %v2049_v14  ;;  %2685 = vmatpush.msrb.mxu3 %v1772_v20  ;;  %v1773_v14 = vld [vmem:[#allocation2 + $0x848] sm:$0xff]  ;;  %v2001_v20 = vld [vmem:[#allocation2 + $0xad0] sm:$0xff] }
 0x35e   :  { %2742 = vmatpush.msrb.mxu2 %v1809_v1  ;;  %2702 = vmatpush.msra.mxu0 %v2000_v56  ;;  %v1724_v1 = vld [vmem:[#allocation2 + $0x5b0] sm:$0xff] }
 0x35f   :  { %2759 = vmatpush.msrb.mxu1 %v2037_v9  ;;  %2686 = vmatpush.msrb.mxu3 %v1760_v46  ;;  %v1952_v9 = vld [vmem:[#allocation2 + $0x728] sm:$0xff] }
 0x360   :  { %2743 = vmatpush.msrb.mxu2 %v1797_v10  ;;  %2703 = vmatpush.msra.mxu0 %v1988_v36  ;;  %v1761_v46 = vld [vmem:[#allocation2 + $0x508] sm:$0xff]  ;;  %v1989_v10 = vld [vmem:[#allocation2 + $0x98] sm:$0xff]  ;;  %v2292_v22 = vpop.f32.mrf.mxu1 }
 0x361   :  { %2760 = vmatpush.msrb.mxu1 %v2025_v49  ;;  %2687 = vmatpush.msrb.mxu3 %v1748_v4  ;;  %v1712_v36 = vld [vmem:[#allocation2 + $0xb88] sm:$0xff]  ;;  %v1940_v4 = vld [vmem:[#allocation2 + $0xb8] sm:$0xff] }
 0x362   :  { %3013 = vrot.lane.b32.xlu0 %v7486_v11, %s5159_s2  ;;  %2704 = vmatpush.msra.mxu0 %v1976_v6  ;;  %v1977_v6 = vld [vmem:[#allocation2 + $0x100] sm:$0xff] }
 0x363   :  { %2744 = vmatpush.msrb.mxu2 %v1785_v7  ;;  %2761 = vmatpush.msrb.mxu1 %v2013_v21  ;;  %v2097_v7 = vld [vmem:[#allocation2 + $0x650] sm:$0x1]  ;;  %v2086_v21 = vld [vmem:[#allocation2 + $0xab8] sm:$0xff] }
 0x364   :  { %2688 = vmatpush.msrb.mxu3 %v1736_v12  ;;  %2705 = vmatpush.msra.mxu0 %v1964_v18  ;;  %v2869_v12 = vrot.slane %v7486_v11, 7  ;;  %v1928_v18 = vld [vmem:[#allocation2 + $0x668] sm:$0xff] }
 0x365   :  { %v2232_v56 = vpop.f32.mrf.mxu0  ;;  %2745 = vmatpush.msrb.mxu2 %v1773_v14  ;;  %2762 = vmatpush.msrb.mxu1 %v2001_v20  ;;  %v1965_v20 = vld [vmem:[#allocation2 + $0x120] sm:$0xff] }
 0x366   :  { %v2233_v49 = vadd.f32 %v2232_v56, %v2212_v8  ;;  %2689 = vmatpush.msrb.mxu3 %v1724_v1  ;;  %2706 = vmatpush.msra.mxu0 %v1952_v9  ;;  %v1737_v8 = vld [vmem:[#allocation2 + $0x3d0] sm:$0xff]  ;;  %v2312_v56 = vpop.f32.mrf.mxu3  ;;  %v2074_v9 = vld [vmem:[#allocation2 + $0xb00] sm:$0xff] }
 0x367   :  { %2746 = vmatpush.msrb.mxu2 %v1761_v46  ;;  %2763 = vmatpush.msrb.mxu1 %v1989_v10  ;;  %v1916_v46 = vld [vmem:[#allocation2 + $0x2d8] sm:$0xff] }
 0x368   :  { %2690 = vmatpush.msrb.mxu3 %v1712_v36  ;;  %2707 = vmatpush.msra.mxu0 %v1940_v4  ;;  %v2253_v14 = vadd.f32 %v2252_v44, %v2233_v49  ;;  %v1953_v36 = vld [vmem:[#allocation2 + $0x1c0] sm:$0xff]  ;;  %v2062_v44 = vld [vmem:[#allocation2 + $0xc8] sm:$0xff] }
 0x369   :  { %2747 = vmatpush.msrb.mxu2 %v1749_v35  ;;  %2764 = vmatpush.msrb.mxu1 %v1977_v6  ;;  %v1725_v35 = vld [vmem:[#allocation2 + $0x3d8] sm:$0xff]  ;;  %v1904_v4 = vld [vmem:[#allocation2 + $0xba8] sm:$0xff] }
 0x36a   :  { %4538 = vmatpush.msk.msra.mxu3 %vm835_vm0, %v2097_v7  ;;  %2871 = vrot.lane.b32.xlu0 %v2869_v12, %s5159_s2  ;;  %5109 = vtanh.f32 %v2253_v14  ;;  %v1713_v6 = vld [vmem:[#allocation2 + $0x918] sm:$0xff]  ;;  %v1941_v7 = vld [vmem:[#allocation2 + $0x9c0] sm:$0xff]  ;;  %v1929_v12 = vld [vmem:[#allocation2 + $0x330] sm:$0xff] }
 0x36b   :  { %v2272_v1 = vpop.f32.mrf.mxu2  ;;  %2691 = vmatmul.f32.vlgmr.msrb.gmra.mxu3 %v6827_v15  ;;  %2708 = vmatpush.msra.mxu0 %v1928_v18  ;;  %v1882_v18 = vld [vmem:[#allocation2 + $0x408] sm:$0xff] }
 0x36c   :  { %v2293_v10 = vadd.f32 %v2292_v22, %v2272_v1  ;;  %2815 = vmatpush.msrb.mxu3 %v2086_v21  ;;  %2748 = vmatpush.msrb.mxu2 %v1737_v8  ;;  %v1894_v22 = vld [vmem:[#allocation2 + $0x988] sm:$0xff]  ;;  %v2038_v8 = vld [vmem:[#allocation2 + $0x158] sm:$0xff]  ;;  %v1870_v1 = vld [vmem:[#allocation2 + $0x3b0] sm:$0xff] }
 0x36d   :  { %2765 = vmatpush.msrb.mxu1 %v1965_v20  ;;  %2709 = vmatpush.msra.mxu0 %v1916_v46  ;;  %v2050_v21 = vld [vmem:[#allocation2 + $0x8e8] sm:$0xff]  ;;  %v1917_v20 = vld [vmem:[#allocation2 + $0x1f8] sm:$0xff]  ;;  %v1905_v46 = vld [vmem:[#allocation2 + $0x400] sm:$0xff] }
 0x36e   :  { %v2313_v49 = vadd.f32 %v2312_v56, %v2293_v10  ;;  %2816 = vmatpush.msrb.mxu3 %v2074_v9  ;;  %2749 = vmatpush.msrb.mxu2 %v1725_v35  ;;  %v2026_v9 = vld [vmem:[#allocation2 + $0xc18] sm:$0xff]  ;;  %v1858_v10 = vld [vmem:[#allocation2 + $0x530] sm:$0xff] }
 0x36f   :  { %2766 = vmatpush.msrb.mxu1 %v1953_v36  ;;  %2710 = vmatpush.msra.mxu0 %v1904_v4  ;;  %v2014_v36 = vld [vmem:[#allocation2 + $0x930] sm:$0xff]  ;;  %v2002_v4 = vld [vmem:[#allocation2 + $0x5a8] sm:$0xff] }
 0x370   :  { %5111 = vtanh.f32 %v2313_v49  ;;  %4537 = vmatmul.msk.f32.vlgmr.msra.gmra.mxu1 %vm894_vm3, %v9553_v5  ;;  %2817 = vmatpush.msrb.mxu3 %v2062_v44  ;;  %v5110_v14 = vpop.eup %5109  ;;  %v1846_v49 = vld [vmem:[#allocation2 + $0xe0] sm:$0xff] }
 0x371   :  { %2750 = vmatpush.msrb.mxu2 %v1713_v6  ;;  %2767 = vmatpush.msrb.mxu1 %v1941_v7  ;;  %v2870_v35 = vrot.slane %v5110_v14, 7  ;;  %v2098_v6 = vld [vmem:[#allocation2 + $0x940] sm:$0x1] }
 0x372   :  { %2711 = vmatmul.f32.vlgmr.msra.gmra.mxu0 %v6875_v16  ;;  %2751 = vmatmul.f32.vlgmr.msrb.gmra.mxu2 %v6827_v15  ;;  %v1834_v7 = vld [vmem:[#allocation2 + $0xc40] sm:$0xff] }
 0x373   :  { %2795 = vmatpush.msrb.mxu0 %v1894_v22  ;;  %2818 = vmatpush.msrb.mxu3 %v2050_v21  ;;  %v1990_v22 = vld [vmem:[#allocation2 + $0x580] sm:$0xff]  ;;  %v1822_v21 = vld [vmem:[#allocation2 + $0x4b0] sm:$0xff] }
 0x374   :  { %2768 = vmatpush.msrb.mxu1 %v1929_v12  ;;  %4539 = vmatmul.msk.f32.vlgmr.msra.gmra.mxu3 %vm894_vm3, %v9553_v5  ;;  %v1978_v12 = vld [vmem:[#allocation2 + $0x7a8] sm:$0xff] }
 0x375   :  { %2796 = vmatpush.msrb.mxu0 %v1882_v18  ;;  %2819 = vmatpush.msrb.mxu3 %v2038_v8  ;;  %v1810_v18 = vld [vmem:[#allocation2 + $0x7f0] sm:$0xff] }
 0x376   :  { %v7498_v56 = vpop.eup %5111  ;;  %2769 = vmatpush.msrb.mxu1 %v1917_v20  ;;  %3015 = vrot.lane.b32.xlu1 %v5110_v14, %s5159_s2  ;;  %v1966_v8 = vld [vmem:[#allocation2 + $0x9f0] sm:$0xff] }
 0x377   :  { %2797 = vmatpush.msrb.mxu0 %v1870_v1  ;;  %v3019_v44 = vrot.slane %v7498_v56, 7  ;;  %2820 = vmatpush.msrb.mxu3 %v2026_v9  ;;  %v1798_v20 = vld [vmem:[#allocation2 + $0x510] sm:$0xff]  ;;  %v2879_v1 = vrot.slane %v5110_v14, 6  ;;  %v1930_v14 = vld [vmem:[#allocation2 + $0x628] sm:$0xff] }
 0x378   :  { %2770 = vmatpush.msrb.mxu1 %v1905_v46  ;;  %2873 = vrot.lane.b32.xlu0 %v2870_v35, %s5159_s2  ;;  %v1954_v9 = vld [vmem:[#allocation2 + $0x10] sm:$0xff]  ;;  %v2888_v46 = vrot.slane %v7498_v56, 5 }
 0x379   :  { %2771 = vmatmul.f32.vlgmr.msrb.gmra.mxu1 %v6875_v16  ;;  %2798 = vmatpush.msrb.mxu0 %v1858_v10  ;;  %v2372_v10 = vpop.f32.mrf.mxu2 }
 0x37a   :  { %2821 = vmatpush.msrb.mxu3 %v2014_v36  ;;  %3022 = vrot.lane.b32.xlu2 %v3019_v44, %s5160_s25  ;;  %v1786_v44 = vld [vmem:[#allocation2 + $0x350] sm:$0xff] }
 0x37b   :  { %2799 = vmatpush.msrb.mxu0 %v1846_v49  ;;  %4540 = vmatpush.msk.msra.mxu2 %vm835_vm0, %v2098_v6  ;;  %v2352_v36 = vpop.f32.mrf.mxu3  ;;  %v1942_v49 = vld [vmem:[#allocation2 + $0x8a0] sm:$0xff] }
 0x37c   :  { %2822 = vmatpush.msrb.mxu3 %v2002_v4  ;;  %4541 = vmatmul.msk.f32.vlgmr.msra.gmra.mxu2 %vm894_vm3, %v9553_v5  ;;  %vm2875_vm3 = vcmask 277504  }
 0x37d   :  { %2800 = vmatpush.msrb.mxu0 %v1834_v7  ;;  %v2880_v7 = vrot.slane %v7498_v56, 6  ;;  %4542 = vmatpush.msk.msra.mxu1 %vm3000_vm12, %v7406_v37 }
 0x37e   :  { %2823 = vmatpush.msrb.mxu3 %v1990_v22  ;;  %3020 = vrot.lane.b32.xlu1 %v2870_v35, %s5160_s25  ;;  %v1774_v35 = vld [vmem:[#allocation2 + $0x838] sm:$0xff] }
 0x37f   :  { %2801 = vmatpush.msrb.mxu0 %v1822_v21  ;;  %v1762_v22 = vld [vmem:[#allocation2 + $0x678] sm:$0xff]  ;;  %4558 = vmatpush.msk.msrb.mxu2 %vm3000_vm12, %v7411_v13 }
 0x380   :  { %2824 = vmatpush.msrb.mxu3 %v1978_v12  ;;  %2881 = vrot.lane.b32.xlu0 %v2879_v1, %s5160_s25  ;;  %v1918_v12 = vld [vmem:[#allocation2 + $0xc10] sm:$0xff] }
 0x381   :  { %2802 = vmatpush.msrb.mxu0 %v1810_v18  ;;  %v1750_v18 = vld [vmem:[#allocation2 + $0xb20] sm:$0xff]  ;;  %v1738_v1 = vld [vmem:[#allocation2 + $0x8f0] sm:$0xff]  ;;  %4543 = vmatpush.msk.msra.mxu1 %vm9481_vm4, %v9553_v5 }
 0x382   :  { %2825 = vmatpush.msrb.mxu3 %v1966_v8  ;;  %2889 = vrot.lane.b32.xlu2 %v2888_v46, %s5161_s26  ;;  %v2893_v8 = vrot.slane %v7498_v56, 4  ;;  %v1714_v56 = vld [vmem:[#allocation2 + $0xb18] sm:$0xff] }
 0x383   :  { %2803 = vmatpush.msrb.mxu0 %v1798_v20  ;;  %v1906_v20 = vld [vmem:[#allocation2 + $0x820] sm:$0xff]  ;;  %4559 = vmatpush.msk.msrb.mxu2 %vm9479_vm9, %v9553_v5  ;;  %vm9566_vm9 = vcmp.eq.s32.totalorder %v6652_v32, %v6737_v30 }
 0x384   :  { %2826 = vmatpush.msrb.mxu3 %v1954_v9 }
 0x385   :  { %v2332_v4 = vpop.f32.mrf.mxu0  ;;  %2804 = vmatpush.msrb.mxu0 %v1786_v44  ;;  %v2392_v9 = vpop.f32.mrf.mxu1  ;;  %4560 = vmatpush.msk.msrb.mxu2 %vm9555_vm15, %v9553_v5  ;;  %vm9559_vm15 = vcmp.eq.s32.totalorder %v6673_v42, %v6745_v24 }
 0x386   :  { %v2353_v6 = vadd.f32 %v2352_v36, %v2332_v4  ;;  %2827 = vmatpush.msrb.mxu3 %v1942_v49  ;;  %2883 = vrot.lane.b32.xlu1 %v2880_v7, %s5160_s25 }
 0x387   :  { %2805 = vmatpush.msrb.mxu0 %v1774_v35  ;;  %4561 = vmatpush.msk.msrb.mxu2 %vm9557_vm13, %v9553_v5  ;;  %vm9561_vm13 = vcmp.eq.s32.totalorder %v6673_v42, %v6743_v23 }
 0x388   :  { %v2373_v21 = vadd.f32 %v2372_v10, %v2353_v6  ;;  %2828 = vmatpush.msrb.mxu3 %v1930_v14  ;;  %2895 = vrot.lane.b32.xlu0 %v2893_v8, %s5162_s27  ;;  %v1726_v10 = vld [vmem:[#allocation2 + $0xb48] sm:$0xff] }
 0x389   :  { %2806 = vmatpush.msrb.mxu0 %v1762_v22  ;;  %4562 = vmatpush.msk.msrb.mxu2 %vm9559_vm15, %v9553_v5  ;;  %vm9563_vm15 = vcmp.eq.s32.totalorder %v6673_v42, %v6741_v33 }
 0x38a   :  { %5113 = vtanh.f32 %v2373_v21  ;;  %2829 = vmatpush.msrb.mxu3 %v1918_v12  ;;  %3026 = vrot.lane.b32.xlu2 %v2880_v7, %s5161_s26  ;;  %s5184_s26 = smov 6  }
 0x38b   :  { %2807 = vmatpush.msrb.mxu0 %v1750_v18  ;;  %4563 = vmatpush.msk.msrb.mxu2 %vm9561_vm13, %v9553_v5  ;;  %vm9565_vm13 = vcmp.eq.s32.totalorder %v6673_v42, %v6739_v31 }
 0x38c   :  { %2830 = vmatpush.msrb.mxu3 %v1906_v20 }
 0x38d   :  { %v2412_v36 = vpop.f32.mrf.mxu2  ;;  %2831 = vmatmul.f32.vlgmr.msrb.gmra.mxu3 %v6875_v16  ;;  %2808 = vmatpush.msrb.mxu0 %v1738_v1  ;;  %v2432_v49 = vpop.f32.mrf.mxu0 }
 0x38e   :  { %v2413_v44 = vadd.f32 %v2412_v36, %v2392_v9  ;;  %4564 = vmatpush.msk.msrb.mxu2 %vm9563_vm15, %v9553_v5  ;;  %vm9568_vm15 = vcmp.eq.s32.totalorder %v6652_v32, %v6735_v29 }
 0x38f   :  { %2809 = vmatpush.msrb.mxu0 %v1726_v10 }
 0x390   :  { %v5114_v4 = vpop.eup %5113  ;;  %v2433_v35 = vadd.f32 %v2432_v49, %v2413_v44  ;;  %3030 = vrot.lane.b32.xlu0 %v2888_v46, %s5162_s27  ;;  %4565 = vmatpush.msk.msrb.mxu2 %vm9565_vm13, %v9553_v5  ;;  %vm9572_vm13 = vcmp.eq.s32.totalorder %v6673_v42, %v6733_v47 }
 0x391   :  { %v2902_v6 = vrot.slane %v5114_v4, 3  ;;  %v2894_v14 = vrot.slane %v5114_v4, 4  ;;  %2810 = vmatpush.msrb.mxu0 %v1714_v56  ;;  %v3029_v21 = vrot.slane %v5114_v4, 5 }
 0x392   :  { %5115 = vtanh.f32 %v2433_v35  ;;  %2811 = vmatmul.f32.vlgmr.msrb.gmra.mxu0 %v6827_v15 }
 0x393   :  { %2897 = vrot.lane.b32.xlu1 %v2894_v14, %s5162_s27  ;;  %2904 = vrot.lane.b32.xlu2 %v2902_v6, %s5163_s28 }
 0x398   :  { %v5116_v7 = vpop.eup %5115  ;;  %3037 = vrot.lane.b32.xlu0 %v2894_v14, %s5163_s28 }
 0x399   :  { %v2903_v22 = vrot.slane %v5116_v7, 3  ;;  %v3036_v16 = vrot.slane %v5116_v7, 4  ;;  %v2912_v8 = vrot.slane %v5116_v7, 2 }
 0x39b   :  { %3032 = vrot.lane.b32.xlu1 %v3029_v21, %s5162_s27  ;;  %3044 = vrot.lane.b32.xlu2 %v2903_v22, %s5164_s29 }
 0x3a0   :  { %2906 = vrot.lane.b32.xlu0 %v2903_v22, %s5163_s28 }
 0x3a1   :  { %v2492_v12 = vpop.f32.mrf.mxu1 }
 0x3a3   :  { %3039 = vrot.lane.b32.xlu1 %v3036_v16, %s5163_s28  ;;  %v2452_v18 = vpop.f32.mrf.mxu3 }
 0x3a7   :  { %v2472_v46 = vpop.f32.mrf.mxu0 }
 0x3a8   :  { %v2473_v36 = vadd.f32 %v2472_v46, %v2452_v18 }
 0x3aa   :  { %v2493_v44 = vadd.f32 %v2492_v12, %v2473_v36 }
 0x3ab   :  { %2914 = vrot.lane.b32.xlu1 %v2912_v8, %s5164_s29 }
 0x3ad   :  { %v2512_v15 = vpop.f32.mrf.mxu2  ;;  %v2532_v20 = vpop.f32.mrf.mxu1 }
 0x3ae   :  { %v2533_v1 = vadd.f32 %v2532_v20, %v2512_v15 }
 0x3af   :  { %v2552_v9 = vpop.f32.mrf.mxu3 }
 0x3b0   :  { %v2553_v10 = vadd.f32 %v2552_v9, %v2533_v1 }
 0x3b2   :  { %5117 = vtanh.f32 %v2553_v10 }
 0x3b3   :  { %5119 = vtanh.f32 %v2493_v44 }
 0x3b8   :  { %v5118_v49 = vpop.eup %5117 }
 0x3b9   :  { %2928 = vrot.lane.b32.xlu1 %v5118_v49, %s5165_s30  ;;  %v2934_v4 = vrot.slane %v5118_v49, 7  ;;  %v3053_v56 = vrot.slane %v5118_v49, 1  ;;  %v7521_v35 = vpop.eup %5119 }
 0x3ba   :  { %v2921_v6 = vrot.slane %v7521_v35, 1  ;;  %v3043_v14 = vrot.slane %v7521_v35, 3  ;;  %v9467_v12 = vrot.slane %v7521_v35, 2 }
 0x3bb   :  { %2936 = vrot.lane.b32.xlu2 %v2934_v4, %s5166_s6  ;;  %3056 = vrot.lane.b32.xlu0 %v3053_v56, %s5165_s30 }
 0x3c1   :  { %3060 = vrot.lane.b32.xlu1 %v5118_v49, %s5166_s6 }
 0x3c3   :  { %3054 = vrot.lane.b32.xlu2 %v2921_v6, %s5165_s30  ;;  %3046 = vrot.lane.b32.xlu0 %v3043_v14, %s5164_s29 }
 0x3c7   :  { %v2612_v7 = vpop.f32.mrf.mxu2 }
 0x3c8   :  { %v2592_v21 = vpop.f32.mrf.mxu3 }
 0x3c9   :  { %v2572_v22 = vpop.f32.mrf.mxu0  ;;  %2926 = vrot.lane.b32.xlu1 %v7521_v35, %s5165_s30 }
 0x3ca   :  { %v2593_v16 = vadd.f32 %v2592_v21, %v2572_v22 }
 0x3cb   :  { %2916 = vrot.lane.b32.xlu2 %v9467_v12, %s5164_s29  ;;  %2922 = vrot.lane.b32.xlu0 %v2921_v6, %s5167_s7 }
 0x3cc   :  { %v2613_v18 = vadd.f32 %v2612_v7, %v2593_v16 }
 0x3ce   :  { %5121 = vtanh.f32 %v2613_v18 }
 0x3d1   :  { %v2652_v8 = vpop.f32.mrf.mxu2 }
 0x3d2   :  { %v2632_v15 = vpop.f32.mrf.mxu1 }
 0x3d3   :  { %v2653_v20 = vadd.f32 %v2652_v8, %v2632_v15 }
 0x3d4   :  { %v5122_v46 = vpop.eup %5121  ;;  %v2672_v1 = vpop.f32.mrf.mxu0 }
 0x3d5   :  { %3062 = vrot.lane.b32.xlu2 %v5122_v46, %s5166_s6  ;;  %v2935_v9 = vrot.slane %v5122_v46, 7  ;;  %v2673_v36 = vadd.f32 %v2672_v1, %v2653_v20  ;;  %v3014_v10 = vpop.permute.xlu0 %3013  ;;  %v3023_v49 = vpop.permute.xlu2 %3022  ;;  %v2944_v6 = vrot.slane %v5122_v46, 6  ;;  %v3011_v46 = vrot.slane %v7486_v11, 1 }
 0x3d7   :  { %3067 = vrot.lane.b32.xlu0 %v2935_v9, %s5168_s8  ;;  %5123 = vtanh.f32 %v2673_v36 }
 0x3dd   :  { %2938 = vrot.lane.b32.xlu2 %v2935_v9, %s5166_s6  ;;  %v5124_v44 = vpop.eup %5123  ;;  %v2872_v14 = vpop.permute.xlu0 %2871  ;;  %s5185_s6 = smov 122  }
 0x3de   :  { %v3066_v4 = vrot.slane %v5124_v44, 7  ;;  %v2945_v56 = vrot.slane %v5124_v44, 6  ;;  %v2958_v7 = vrot.slane %v5124_v44, 4  ;;  %v2890_v22 = vpop.permute.xlu2 %2889  ;;  %v2953_v18 = vrot.slane %v5124_v44, 5 }
 0x3e0   :  { %3069 = vrot.lane.b32.xlu1 %v3066_v4, %s5168_s8  ;;  %2948 = vrot.lane.b32.xlu0 %v2945_v56, %s5168_s8 }
 0x3e5   :  { %2946 = vrot.lane.b32.xlu2 %v2944_v6, %s5168_s8 }
 0x3e6   :  { %v3027_v4 = vpop.permute.xlu2 %3026 }
 0x3e8   :  { %2960 = vrot.lane.b32.xlu0 %v2958_v7, %s5169_s9  ;;  %v3016_v21 = vpop.permute.xlu1 %3015 }
 0x3e9   :  { %v3017_v16 = vsel %vm2875_vm3, %v3014_v10, %v3016_v21 }
 0x3ea   :  { %v2874_v8 = vpop.permute.xlu0 %2873  ;;  %v3100_v9 = vsel %vm835_vm0, %v3011_v46, %v3017_v16 }
 0x3eb   :  { %v2876_v53 = vsel %vm2875_vm3, %v2872_v14, %v2874_v8  ;;  %vm2998_vm3 = vcmask 1044480  }
 0x3ed   :  { %v2732_v15 = vpop.f32.mrf.mxu1  ;;  %2954 = vrot.lane.b32.xlu2 %v2953_v18, %s5170_s10 }
 0x3ee   :  { %v2692_v20 = vpop.f32.mrf.mxu3 }
 0x3ef   :  { %v2712_v6 = vpop.f32.mrf.mxu0 }
 0x3f0   :  { %3077 = vrot.lane.b32.xlu0 %v2953_v18, %s5169_s9  ;;  %v3021_v1 = vpop.permute.xlu1 %3020  ;;  %v2713_v60 = vadd.f32 %v2712_v6, %v2692_v20  ;;  %v7555_v20 = vpop.permute.xlu2 %2904 }
 0x3f1   :  { %v3024_v36 = vsel %vm2885_vm7, %v3021_v1, %v3023_v49  ;;  %v2991_v49 = vsel %vm835_vm0, %v7486_v11, %v2876_v53 }
 0x3f2   :  { %v3101_v10 = vsel %vm2992_vm8, %v3100_v9, %v3024_v36  ;;  %v2882_v7 = vpop.permute.xlu0 %2881 }
 0x3f3   :  { %v3102_v44 = vsel %vm2994_vm10, %v3101_v10, %v3027_v4 }
 0x3f5   :  { %3073 = vrot.lane.b32.xlu2 %v2945_v56, %s5170_s10  ;;  %v2752_v21 = vpop.f32.mrf.mxu2  ;;  %v2733_v56 = vadd.f32 %v2732_v15, %v2713_v60 }
 0x3f6   :  { %v2772_v12 = vpop.f32.mrf.mxu1 }
 0x3f7   :  { %v2773_v61 = vadd.f32 %v2772_v12, %v2752_v21  ;;  %v2792_v18 = vpop.f32.mrf.mxu3 }
 0x3f8   :  { %v2884_v63 = vpop.permute.xlu1 %2883  ;;  %v7565_v36 = vpop.permute.xlu2 %3044 }
 0x3f9   :  { %v2793_v62 = vadd.f32 %v2792_v18, %v2773_v61  ;;  %v2886_v16 = vsel %vm2885_vm7, %v2882_v7, %v2884_v63  ;;  %vm9554_vm7 = vcmp.eq.s32.totalorder %v6652_v32, %v6749_v26 }
 0x3fa   :  { %v2993_v46 = vsel %vm2992_vm8, %v2991_v49, %v2886_v16  ;;  %v7551_v9 = vpop.permute.xlu0 %2895  ;;  %4544 = vmatpush.msk.msra.mxu1 %vm9554_vm7, %v9553_v5  ;;  %vm9558_vm7 = vcmp.eq.s32.totalorder %v6652_v32, %v6745_v24 }
 0x3fb   :  { %5125 = vtanh.f32 %v2793_v62  ;;  %v7549_v1 = vsel %vm2994_vm10, %v2993_v46, %v2890_v22 }
 0x3fc   :  { %5127 = vtanh.f32 %v2733_v56  ;;  %4545 = vmatpush.msk.msra.mxu1 %vm9556_vm5, %v9553_v5  ;;  %vm9560_vm5 = vcmp.eq.s32.totalorder %v6652_v32, %v6743_v23 }
 0x3fe   :  { %4546 = vmatpush.msk.msra.mxu1 %vm9558_vm7, %v9553_v5  ;;  %vm9562_vm7 = vcmp.eq.s32.totalorder %v6652_v32, %v6741_v33 }
 0x3ff   :  { %v2852_v6 = vpop.f32.mrf.mxu2 }
 0x400   :  { %4547 = vmatpush.msk.msra.mxu1 %vm9560_vm5, %v9553_v5  ;;  %vm9564_vm5 = vcmp.eq.s32.totalorder %v6652_v32, %v6739_v31 }
 0x401   :  { %v5126_v14 = vpop.eup %5125 }
 0x402   :  { %v2969_v12 = vrot.slane %v5126_v14, 3  ;;  %v3083_v8 = vrot.slane %v5126_v14, 4  ;;  %v5128_v62 = vpop.eup %5127  ;;  %v3031_v60 = vpop.permute.xlu0 %3030  ;;  %v2978_v53 = vrot.slane %v5126_v14, 2  ;;  %4548 = vmatpush.msk.msra.mxu1 %vm9562_vm7, %v9553_v5  ;;  %vm9567_vm7 = vcmp.eq.s32.totalorder %v6673_v42, %v6737_v30 }
 0x403   :  { %v2959_v63 = vrot.slane %v5128_v62, 4  ;;  %v3076_v21 = vrot.slane %v5128_v62, 5  ;;  %v2968_v46 = vrot.slane %v5128_v62, 3  ;;  %4566 = vmatpush.msk.msrb.mxu2 %vm9567_vm7, %v9553_v5  ;;  %vm9573_vm7 = vcmp.eq.s32.totalorder %v6652_v32, %v6731_v28 }
 0x404   :  { %3091 = vrot.lane.b32.xlu1 %v2969_v12, %s5171_s11  ;;  %3086 = vrot.lane.b32.xlu0 %v3083_v8, %s5172_s12 }
 0x405   :  { %v7553_v61 = vpop.permute.xlu1 %2897  ;;  %2972 = vrot.lane.b32.xlu2 %v2969_v12, %s5172_s12  ;;  %4549 = vmatpush.msk.msra.mxu1 %vm9564_vm5, %v9553_v5  ;;  %vm9569_vm5 = vcmp.eq.s32.totalorder %v6673_v42, %v6735_v29 }
 0x406   :  { %4567 = vmatpush.msk.msrb.mxu2 %vm9569_vm5, %v9553_v5  ;;  %vm9575_vm5 = vcmp.eq.s32.totalorder %v6652_v32, %v6761_v27 }
 0x407   :  { %4550 = vmatpush.msk.msra.mxu1 %vm9566_vm9, %v9553_v5  ;;  %vm9571_vm9 = vcmp.eq.s32.totalorder %v6652_v32, %v6733_v47 }
 0x408   :  { %4568 = vmatpush.msk.msrb.mxu2 %vm9572_vm13, %v9553_v5  ;;  %vm9576_vm13 = vcmp.eq.s32.totalorder %v6652_v32, %v6759_v48 }
 0x409   :  { %4551 = vmatpush.msk.msra.mxu1 %vm9568_vm15, %v9553_v5  ;;  %vm9574_vm15 = vcmp.eq.s32.totalorder %v6673_v42, %v6731_v28 }
 0x40a   :  { %v3038_v49 = vpop.permute.xlu0 %3037  ;;  %4569 = vmatpush.msk.msrb.mxu2 %vm9574_vm15, %v9553_v5  ;;  %vm9578_vm15 = vcmp.eq.s32.totalorder %v6652_v32, %v6757_v45 }
 0x40b   :  { %4552 = vmatpush.msk.msra.mxu1 %vm9571_vm9, %v9553_v5  ;;  %vm2930_vm9 = vcmask 130048  }
 0x40c   :  { %2962 = vrot.lane.b32.xlu1 %v2959_v63, %s5169_s9  ;;  %2980 = vrot.lane.b32.xlu0 %v2978_v53, %s5171_s11 }
 0x40d   :  { %v3033_v11 = vpop.permute.xlu1 %3032  ;;  %3084 = vrot.lane.b32.xlu2 %v2959_v63, %s5172_s12  ;;  %v9570_v63 = vrot.slane %v7521_v35, 2  ;;  %4553 = vmatpush.msk.msra.mxu1 %vm9573_vm7, %v9553_v5  ;;  %vm9577_vm7 = vcmp.eq.s32.totalorder %v6652_v32, %v6775_v59 }
 0x40e   :  { %v3034_v22 = vsel %vm827_vm1, %v3031_v60, %v3033_v11  ;;  %4594 = vmatpush.msk.msra.mxu2 %vm2996_vm11, %v7416_v17 }
 0x40f   :  { %v3103_v15 = vsel %vm2996_vm11, %v3102_v44, %v3034_v22  ;;  %v2812_v4 = vpop.f32.mrf.mxu0  ;;  %4578 = vmatpush.msk.msrb.mxu1 %vm9575_vm5, %v9553_v5  ;;  %vm9579_vm5 = vcmp.eq.s32.totalorder %v6652_v32, %v6773_v58 }
 0x410   :  { %v2832_v10 = vpop.f32.mrf.mxu3  ;;  %4595 = vmatpush.msk.msra.mxu2 %vm9577_vm7, %v9553_v5  ;;  %vm9581_vm7 = vcmp.eq.s32.totalorder %v6652_v32, %v6771_v57 }
 0x411   :  { %v2833_v7 = vadd.f32 %v2832_v10, %v2812_v4  ;;  %4579 = vmatpush.msk.msrb.mxu1 %vm9576_vm13, %v9553_v5  ;;  %vm9580_vm13 = vcmp.eq.s32.totalorder %v6652_v32, %v6755_v40 }
 0x412   :  { %v2907_v60 = vpop.permute.xlu0 %2906  ;;  %4596 = vmatpush.msk.msra.mxu2 %vm9579_vm5, %v9553_v5  ;;  %vm9583_vm5 = vcmp.eq.s32.totalorder %v6652_v32, %v6767_v52 }
 0x413   :  { %v2853_v18 = vadd.f32 %v2852_v6, %v2833_v7  ;;  %4580 = vmatpush.msk.msrb.mxu1 %vm9578_vm15, %v9553_v5  ;;  %vm9582_vm15 = vcmp.eq.s32.totalorder %v6652_v32, %v6769_v54 }
 0x414   :  { %3079 = vrot.lane.b32.xlu1 %v3076_v21, %s5169_s9  ;;  %4597 = vmatpush.msk.msra.mxu2 %vm9581_vm7, %v9553_v5  ;;  %vm9584_vm7 = vcmp.eq.s32.totalorder %v6652_v32, %v6749_v26 }
 0x415   :  { %v3040_v16 = vpop.permute.xlu1 %3039  ;;  %5129 = vtanh.f32 %v2853_v18  ;;  %v7584_v13 = vpop.permute.xlu2 %2936  ;;  %4581 = vmatpush.msk.msrb.mxu1 %vm9580_vm13, %v9553_v5  ;;  %vm2918_vm13 = vcmask 621568  }
 0x416   :  { %v3041_v44 = vsel %vm2908_vm2, %v3038_v49, %v3040_v16  ;;  %4598 = vmatpush.msk.msra.mxu2 %vm9582_vm15, %v9553_v5  ;;  %vm9585_vm15 = vcmp.eq.s32.totalorder %v6652_v32, %v6765_v51 }
 0x417   :  { %v7578_v37 = vsel %vm2998_vm3, %v3103_v15, %v3041_v44  ;;  %4582 = vmatpush.msk.msrb.mxu1 %vm1201_vm6, %v9553_v5 }
 0x418   :  { %4599 = vmatpush.msk.msra.mxu2 %vm9583_vm5, %v9553_v5  ;;  %vm9586_vm5 = vcmp.eq.s32.totalorder %v6652_v32, %v6747_v25 }
 0x419   :  { %4583 = vmatpush.msk.msrb.mxu1 %vm9481_vm4, %v9553_v5  ;;  %vm9588_vm4 = vcmp.eq.s32.totalorder %v6652_v32, %v6745_v24 }
 0x41a   :  { %4600 = vmatpush.msk.msra.mxu2 %vm9585_vm15, %v9553_v5  ;;  %vm9590_vm15 = vcmp.eq.s32.totalorder %v6652_v32, %v6741_v33 }
 0x41b   :  { %v5130_v56 = vpop.eup %5129  ;;  %4584 = vmatpush.msk.msrb.mxu1 %vm9584_vm7, %v9553_v5  ;;  %vm9587_vm7 = vcmp.eq.s32.totalorder %v6652_v32, %v6763_v50 }
 0x41c   :  { %2970 = vrot.lane.b32.xlu1 %v2968_v46, %s5172_s12  ;;  %v3090_v14 = vrot.slane %v5130_v56, 3  ;;  %v2979_v12 = vrot.slane %v5130_v56, 2  ;;  %v2987_v35 = vrot.slane %v5130_v56, 1  ;;  %4601 = vmatpush.msk.msra.mxu2 %vm9587_vm7, %v9553_v5  ;;  %vm9595_vm7 = vcmp.eq.s32.totalorder %v6652_v32, %v6731_v28 }
 0x41d   :  { %v3055_v8 = vpop.permute.xlu2 %3054  ;;  %v2915_v62 = vpop.permute.xlu1 %2914  ;;  %4585 = vmatpush.msk.msrb.mxu1 %vm9586_vm5, %v9553_v5  ;;  %vm9592_vm5 = vcmp.eq.s32.totalorder %v6652_v32, %v6737_v30 }
 0x41e   :  { %3093 = vrot.lane.b32.xlu2 %v3090_v14, %s5171_s11  ;;  %3097 = vrot.lane.b32.xlu0 %v2979_v12, %s5173_s13  ;;  %v2899_v14 = vsel %vm827_vm1, %v7551_v9, %v7553_v61  ;;  %vm2964_vm1 = vcmask 195584  }
 0x41f   :  { %4586 = vmatpush.msk.msrb.mxu1 %vm9588_vm4, %v9553_v5  ;;  %vm9591_vm4 = vcmp.eq.s32.totalorder %v6652_v32, %v6739_v31 }
 0x424   :  { %2982 = vrot.lane.b32.xlu1 %v2979_v12, %s5171_s11  ;;  %v2909_v12 = vsel %vm2908_vm2, %v7555_v20, %v2907_v60  ;;  %vm2974_vm2 = vcmask 474112  }
 0x425   :  { %v2917_v53 = vpop.permute.xlu2 %2916 }
 0x426   :  { %3050 = vrot.lane.b32.xlu2 %v9570_v63, %s5167_s7  ;;  %v2997_v63 = vsel %vm2996_vm11, %v7549_v1, %v2899_v14 }
 0x42b   :  { %v2929_v11 = vpop.permute.xlu1 %2928 }
 0x42c   :  { %2988 = vrot.lane.b32.xlu1 %v2987_v35, %s5173_s13  ;;  %v2999_v35 = vsel %vm2998_vm3, %v2997_v63, %v2909_v12 }
 0x42d   :  { %v3057_v22 = vpop.permute.xlu0 %3056 }
 0x42e   :  { %v3058_v15 = vsel %vm2930_vm9, %v3055_v8, %v3057_v22  ;;  %v2919_v8 = vsel %vm2918_vm13, %v2915_v62, %v2917_v53 }
 0x42f   :  { %v3063_v17 = vpop.permute.xlu2 %3062 }
 0x433   :  { %v3061_v4 = vpop.permute.xlu1 %3060 }
 0x434   :  { %v3064_v10 = vsel %vm2940_vm14, %v3061_v4, %v3063_v17 }
 0x435   :  { %v3107_v6 = vsel %vm835_vm0, %v3058_v15, %v3064_v10  ;;  %v3047_v7 = vpop.permute.xlu0 %3046 }
 0x436   :  { %v3048_v18 = vsel %vm2918_vm13, %v7565_v36, %v3047_v7  ;;  %vm2984_vm13 = vcmask 752640  }
 0x437   :  { %v2939_v21 = vpop.permute.xlu2 %2938  ;;  %v3105_v16 = vsel %vm3000_vm12, %v7578_v37, %v3048_v18 }
 0x438   :  { %v2941_v49 = vsel %vm2940_vm14, %v7584_v13, %v2939_v21  ;;  %vm9589_vm14 = vcmp.eq.s32.totalorder %v6652_v32, %v6743_v23 }
 0x439   :  { %4587 = vmatpush.msk.msrb.mxu1 %vm9589_vm14, %v9553_v5  ;;  %vm3002_vm14 = vcmask 1046528  }
 0x43b   :  { %v2927_v36 = vpop.permute.xlu1 %2926  ;;  %4588 = vmatpush.msk.msrb.mxu1 %vm9590_vm15, %v9553_v5  ;;  %vm2950_vm15 = vcmask 687104  }
 0x43c   :  { %v2931_v44 = vsel %vm2930_vm9, %v2927_v36, %v2929_v11  ;;  %vm9594_vm9 = vcmp.eq.s32.totalorder %v6652_v32, %v6733_v47  ;;  %v3001_v11 = vsel %vm3000_vm12, %v2999_v35, %v2919_v8 }
 0x43d   :  { %v3004_v37 = vsel %vm835_vm0, %v2931_v44, %v2941_v49  ;;  %v2923_v13 = vpop.permute.xlu0 %2922  ;;  %4589 = vmatpush.msk.msrb.mxu1 %vm9591_vm4, %v9553_v5  ;;  %vm9593_vm0 = vcmp.eq.s32.totalorder %v6652_v32, %v6735_v29  ;;  %vm3120_vm4 = vcmask 769024  }
 0x43e   :  { %v7788_v22 = vsel %vm3002_vm14, %v3001_v11, %v2923_v13 }
 0x43f   :  { %4590 = vmatpush.msk.msrb.mxu1 %vm9592_vm5, %v9553_v5  ;;  %v2947_v46 = vpop.permute.xlu2 %2946  ;;  %v3121_v20 = vsel %vm3120_vm4, %v7788_v22, 0.0  ;;  %v3133_v60 = vmul.f32 %v7788_v22, %v7788_v22 }
 0x441   :  { %4591 = vmatpush.msk.msrb.mxu1 %vm9593_vm0, %v9553_v5  ;;  %v3137_v15 = vsel %vm3120_vm4, %v3133_v60, 0.0 }
 0x443   :  { %4592 = vmatpush.msk.msrb.mxu1 %vm9594_vm9, %v9553_v5 }
 0x445   :  { %4593 = vmatpush.msk.msrb.mxu1 %vm9595_vm7, %v9553_v5 }
 0x447   :  { %v2955_v17 = vpop.permute.xlu2 %2954 }
 0x449   :  { %v3068_v56 = vpop.permute.xlu0 %3067 }
 0x44f   :  { %v3074_v53 = vpop.permute.xlu2 %3073 }
 0x452   :  { %v2949_v9 = vpop.permute.xlu0 %2948  ;;  %v3070_v7 = vpop.permute.xlu1 %3069 }
 0x453   :  { %v2951_v61 = vsel %vm2950_vm15, %v2947_v46, %v2949_v9  ;;  %v3071_v12 = vsel %vm2950_vm15, %v3068_v56, %v3070_v7  ;;  %vm9596_vm15 = vcmp.eq.s32.totalorder %v6676_v43, %v6761_v27 }
 0x454   :  { %v3005_v62 = vsel %vm2992_vm8, %v3004_v37, %v2951_v61  ;;  %v3108_v8 = vsel %vm2992_vm8, %v3107_v6, %v3071_v12 }
 0x455   :  { %v3006_v1 = vsel %vm2994_vm10, %v3005_v62, %v2955_v17 }
 0x456   :  { %3122 = vadd.xlane.f32.xlu1 %v3121_v20 }
 0x45a   :  { %v2961_v10 = vpop.permute.xlu0 %2960 }
 0x45e   :  { %3138 = vadd.xlane.f32.xlu1 %v3137_v15 }
 0x45f   :  { %v2973_v4 = vpop.permute.xlu2 %2972 }
 0x462   :  { %v3078_v18 = vpop.permute.xlu0 %3077 }
 0x467   :  { %v3085_v21 = vpop.permute.xlu2 %3084 }
 0x476   :  { %v3092_v49 = vpop.permute.xlu1 %3091  ;;  %v3087_v44 = vpop.permute.xlu0 %3086 }
 0x477   :  { %v3088_v56 = vsel %vm2974_vm2, %v3085_v21, %v3087_v44 }
 0x478   :  { %v3094_v36 = vpop.permute.xlu2 %3093 }
 0x479   :  { %v3095_v62 = vsel %vm2984_vm13, %v3092_v49, %v3094_v36 }
 0x47e   :  { %v2963_v13 = vpop.permute.xlu1 %2962  ;;  %v2981_v17 = vpop.permute.xlu0 %2980 }
 0x47f   :  { %v2965_v21 = vsel %vm2964_vm1, %v2961_v10, %v2963_v13 }
 0x480   :  { %v3051_v37 = vpop.permute.xlu2 %3050  ;;  %v3007_v49 = vsel %vm2996_vm11, %v3006_v1, %v2965_v21 }
 0x481   :  { %v7799_v46 = vsel %vm3002_vm14, %v3105_v16, %v3051_v37  ;;  %v3109_v16 = vsel %vm2994_vm10, %v3108_v8, %v3074_v53 }
 0x482   :  { %v3127_v14 = vsel %vm3120_vm4, %v7799_v46, 0.0  ;;  %v3135_v35 = vmul.f32 %v7799_v46, %v7799_v46 }
 0x483   :  { %3128 = vadd.xlane.f32.xlu0 %v3127_v14 }
 0x484   :  { %v3143_v61 = vsel %vm3120_vm4, %v3135_v35, 0.0 }
 0x486   :  { %v3080_v63 = vpop.permute.xlu1 %3079 }
 0x487   :  { %v3081_v11 = vsel %vm2964_vm1, %v3078_v18, %v3080_v63 }
 0x488   :  { %v3110_v9 = vsel %vm2996_vm11, %v3109_v16, %v3081_v11 }
 0x489   :  { %v3111_v6 = vsel %vm2998_vm3, %v3110_v9, %v3088_v56 }
 0x48a   :  { %v3112_v60 = vsel %vm3000_vm12, %v3111_v6, %v3095_v62 }
 0x48b   :  { %3144 = vadd.xlane.f32.xlu0 %v3143_v61 }
 0x48e   :  { %v2971_v20 = vpop.permute.xlu1 %2970 }
 0x48f   :  { %v2975_v44 = vsel %vm2974_vm2, %v2971_v20, %v2973_v4  ;;  %vm9597_vm2 = vcmp.eq.s32.totalorder %v6676_v43, %v6759_v48 }
 0x490   :  { %v3098_v15 = vpop.permute.xlu0 %3097  ;;  %v3008_v36 = vsel %vm2998_vm3, %v3007_v49, %v2975_v44 }
 0x491   :  { %v7815_v7 = vsel %vm3002_vm14, %v3112_v60, %v3098_v15 }
 0x492   :  { %v3136_v53 = vmul.f32 %v7815_v7, %v7815_v7  ;;  %v3130_v10 = vsel %vm3120_vm4, %v7815_v7, 0.0 }
 0x494   :  { %v3146_v18 = vsel %vm3120_vm4, %v3136_v53, 0.0 }
 0x495   :  { %3147 = vadd.xlane.f32.xlu1 %v3146_v18 }
 0x496   :  { %v2983_v37 = vpop.permute.xlu1 %2982 }
 0x497   :  { %v2985_v14 = vsel %vm2984_vm13, %v2981_v17, %v2983_v37  ;;  %vm9598_vm13 = vcmp.eq.s32.totalorder %v6676_v43, %v6775_v59 }
 0x498   :  { %v3009_v8 = vsel %vm3000_vm12, %v3008_v36, %v2985_v14 }
 0x49e   :  { %v2989_v12 = vpop.permute.xlu1 %2988 }
 0x49f   :  { %v7826_v63 = vsel %vm3002_vm14, %v3009_v8, %v2989_v12 }
 0x4a0   :  { %v3124_v35 = vsel %vm3120_vm4, %v7826_v63, 0.0  ;;  %v3134_v4 = vmul.f32 %v7826_v63, %v7826_v63 }
 0x4a1   :  { %3125 = vadd.xlane.f32.xlu2 %v3124_v35 }
 0x4a2   :  { %v3140_v1 = vsel %vm3120_vm4, %v3134_v4, 0.0 }
 0x4a9   :  { %3131 = vadd.xlane.f32.xlu2 %v3130_v10 }
 0x4b1   :  { %3141 = vadd.xlane.f32.xlu2 %v3140_v1 }
 0x4c9   :  { %v3123_v11 = vpop.xlane.xlu1 %3122 }
 0x4d1   :  { %v3139_v9 = vpop.xlane.xlu1 %3138 }
 0x4f6   :  { %v3129_v13 = vpop.xlane.xlu0 %3128 }
 0x4f7   :  { %v3149_v16 = vadd.f32 %v3129_v13, %v3123_v11  ;;  %v5174_v13 = vmov 0  }
 0x4f8   :  { %4994 = vset.pattern.permute.xlu1 %v5174_v13  ;;  %4993 = vset.pattern.permute.xlu0 %v5174_v13 }
 0x4f9   :  { %v3153_v56 = vmul.f32 0.005319149, %v3149_v16 }
 0x4fb   :  { %v3157_v20 = vmul.f32 %v3153_v56, %v3153_v56 }
 0x4fe   :  { %v3145_v17 = vpop.xlane.xlu0 %3144 }
 0x4ff   :  { %v3151_v61 = vadd.f32 %v3145_v17, %v3139_v9 }
 0x501   :  { %v3155_v6 = vmul.f32 0.005319149, %v3151_v61 }
 0x503   :  { %v3159_v62 = vsub.f32 %v3155_v6, %v3157_v20 }
 0x505   :  { %v3161_v15 = vadd.f32 1e-05, %v3159_v62 }
 0x507   :  { %5131 = vrsqrt.f32 %v3161_v15  ;;  %vm3169_vm3 = vweird.f32 %v3161_v15 }
 0x508   :  { %v3148_v44 = vpop.xlane.xlu1 %3147 }
 0x50d   :  { %v5132_v37 = vpop.eup %5131 }
 0x50e   :  { %v3164_v49 = vmul.f32 %v5132_v37, %v3161_v15  ;;  %vm3170_vm10 = vweird.f32 %v5132_v37 }
 0x50f   :  { %vm3171_vm5 = vmor %vm3169_vm3, %vm3170_vm10  ;;  %vm9599_vm10 = vcmp.eq.s32.totalorder %v6676_v43, %v6757_v45  ;;  %vm9600_vm3 = vcmp.eq.s32.totalorder %v6676_v43, %v6773_v58 }
 0x510   :  { %v3165_v35 = vmul.f32 %v5132_v37, %v3164_v49 }
 0x512   :  { %v3166_v1 = vmul.f32 0.5, %v3165_v35 }
 0x514   :  { %v3126_v60 = vpop.xlane.xlu2 %3125  ;;  %v3167_v11 = vsub.f32 1.5, %v3166_v1 }
 0x516   :  { %v3168_v9 = vmul.f32 %v5132_v37, %v3167_v11 }
 0x518   :  { %v3172_v20 = vsel %vm3171_vm5, %v5132_v37, %v3168_v9  ;;  %v7848_v37 = vld [vmem:[%s9428_s4 + $0x20] sm:$0xff]  ;;  %vm9601_vm5 = vcmp.eq.s32.totalorder %v6676_v43, %v6755_v40 }
 0x51c   :  { %v3132_v53 = vpop.xlane.xlu2 %3131 }
 0x51d   :  { %v3150_v18 = vadd.f32 %v3132_v53, %v3126_v60  ;;  %v3185_v60 = vrot.slane %v3172_v20, 2 }
 0x51f   :  { %v3154_v21 = vmul.f32 0.005319149, %v3150_v18  ;;  %v7838_v18 = vld [vmem:[%s9428_s4 + $0x18] sm:$0xff] }
 0x520   :  { %v3191_v49 = vmul.f32 %v3185_v60, %v7838_v18 }
 0x521   :  { %v3158_v12 = vmul.f32 %v3154_v21, %v3154_v21 }
 0x524   :  { %v3142_v14 = vpop.xlane.xlu2 %3141 }
 0x525   :  { %v3152_v36 = vadd.f32 %v3148_v44, %v3142_v14  ;;  %v7843_v14 = vld [vmem:[%s9428_s4 + $0x28] sm:$0x3f] }
 0x527   :  { %v3156_v8 = vmul.f32 0.005319149, %v3152_v36 }
 0x529   :  { %v3160_v10 = vsub.f32 %v3156_v8, %v3158_v12 }
 0x52b   :  { %v3162_v4 = vadd.f32 1e-05, %v3160_v10 }
 0x52d   :  { %5133 = vrsqrt.f32 %v3162_v4  ;;  %vm3179_vm9 = vweird.f32 %v3162_v4 }
 0x533   :  { %v5134_v17 = vpop.eup %5133 }
 0x534   :  { %v3174_v16 = vmul.f32 %v5134_v17, %v3162_v4  ;;  %vm3180_vm0 = vweird.f32 %v5134_v17  ;;  %v3197_v4 = vrot.slane %v3191_v49, 6 }
 0x535   :  { %vm3181_vm7 = vmor %vm3179_vm9, %vm3180_vm0  ;;  %vm9602_vm0 = vcmp.eq.s32.totalorder %v6676_v43, %v6771_v57  ;;  %vm9603_vm9 = vcmp.eq.s32.totalorder %v6676_v43, %v6753_v39 }
 0x536   :  { %v3175_v61 = vmul.f32 %v5134_v17, %v3174_v16 }
 0x538   :  { %v3176_v6 = vmul.f32 0.5, %v3175_v61 }
 0x53a   :  { %v3177_v62 = vsub.f32 1.5, %v3176_v6  ;;  %v5176_v6 = vmov 1  }
 0x53b   :  { %4995 = vset.pattern.permute.xlu2 %v5176_v6 }
 0x53c   :  { %v3178_v53 = vmul.f32 %v5134_v17, %v3177_v62 }
 0x53e   :  { %v3182_v44 = vsel %vm3181_vm7, %v5134_v17, %v3178_v53  ;;  %vm9604_vm7 = vcmp.eq.s32.totalorder %v6676_v43, %v6769_v54 }
 0x53f   :  { %v3186_v15 = vrot.slane %v3182_v44, 2 }
 0x541   :  { %v3187_v36 = vsel %vm3000_vm12, %v3185_v60, %v3186_v15  ;;  %v3193_v12 = vmul.f32 %v3186_v15, %v7843_v14 }
 0x542   :  { %v3192_v8 = vmul.f32 %v3187_v36, %v7848_v37 }
 0x543   :  { %v3200_v35 = vrot.slane %v3193_v12, 6 }
 0x544   :  { %v3198_v10 = vrot.slane %v3192_v8, 6 }
 0x546   :  { %v3201_v1 = vsel %vm2992_vm8, %v3198_v10, %v3200_v35  ;;  %v3199_v13 = vsel %vm2992_vm8, %v3197_v4, %v3198_v10 }
 0x547   :  { %v3205_v11 = vmul.f32 %v3201_v1, %v3154_v21  ;;  %v3204_v17 = vmul.f32 %v3199_v13, %v3153_v56 }
 0x549   :  { %v3209_v16 = vrot.slane %v3205_v11, 2  ;;  %v3208_v9 = vrot.slane %v3204_v17, 2 }
 0x54b   :  { %3215 = vrot.lane.b32.xlu1 %v3209_v16, %s5175_s1  ;;  %3211 = vrot.lane.b32.xlu2 %v3208_v9, %s5175_s1  ;;  %v3210_v61 = vsel %vm3000_vm12, %v3208_v9, %v3209_v16 }
 0x54c   :  { %3213 = vrot.lane.b32.xlu0 %v3210_v61, %s5175_s1 }
 0x553   :  { %3236 = vperm.xlu1 %4994, %v3201_v1  }
 0x554   :  { %3232 = vperm.xlu0 %4993, %v3199_v13  }
 0x5a5   :  { %v3212_v20 = vpop.permute.xlu2 %3211 }
 0x5a6   :  { %v3220_v62 = vsub.f32 %v7838_v18, %v3212_v20 }
 0x5a8   :  { %v3226_v56 = vrot.slane %v3220_v62, 6 }
 0x5bd   :  { %v3216_v21 = vpop.permute.xlu1 %3215 }
 0x5be   :  { %v3214_v60 = vpop.permute.xlu0 %3213  ;;  %v3222_v15 = vsub.f32 %v7843_v14, %v3216_v21 }
 0x5bf   :  { %v3221_v53 = vsub.f32 %v7848_v37, %v3214_v60 }
 0x5c0   :  { %v3229_v36 = vrot.slane %v3222_v15, 6 }
 0x5c1   :  { %v3227_v44 = vrot.slane %v3221_v53, 6 }
 0x5c3   :  { %v3228_v49 = vsel %vm2992_vm8, %v3226_v56, %v3227_v44  ;;  %v3230_v12 = vsel %vm2992_vm8, %v3227_v44, %v3229_v36 }
 0x5c4   :  { %3244 = vperm.xlu2 %4995, %v3228_v49  }
 0x5c5   :  { %v3237_v1 = vpop.permute.xlu1 %3236 }
 0x5c6   :  { %v3233_v8 = vpop.permute.xlu0 %3232 }
 0x5c7   :  { %v3239_v35 = vmul.f32 %v3233_v8, %v7788_v22  ;;  %v3240_v22 = vmul.f32 %v3237_v1, %v7826_v63  ;;  %v3241_v63 = vmul.f32 %v3233_v8, %v7799_v46  ;;  %v3242_v46 = vmul.f32 %v3237_v1, %v7815_v7 }
 0x5cc   :  { %3248 = vperm.xlu2 %4995, %v3230_v12  }
 0x61e   :  { %v3245_v10 = vpop.permute.xlu2 %3244 }
 0x61f   :  { %v3251_v4 = vadd.f32 %v3245_v10, %v3239_v35  ;;  %v3253_v11 = vadd.f32 %v3245_v10, %v3241_v63 }
 0x621   :  { %4554 = vmatmul.msk.f32.vlgmr.msra.gmra.mxu1 %vm3120_vm4, %v3251_v4  ;;  %4570 = vmatmul.msk.f32.vlgmr.msrb.gmra.mxu2 %vm3120_vm4, %v3251_v4 }
 0x622   :  { %4630 = vmatpush.msk.msra.mxu1 %vm9596_vm15, %v9553_v5  ;;  %4646 = vmatpush.msk.msrb.mxu2 %vm2996_vm11, %v7426_v34  ;;  %vm9605_vm15 = vcmp.eq.s32.totalorder %v6676_v43, %v6751_v38 }
 0x624   :  { %4631 = vmatpush.msk.msra.mxu1 %vm9597_vm2, %v9553_v5  ;;  %4647 = vmatpush.msk.msrb.mxu2 %vm9598_vm13, %v9553_v5  ;;  %vm9606_vm2 = vcmp.eq.s32.totalorder %v6676_v43, %v6767_v52  ;;  %vm9607_vm13 = vcmp.eq.s32.totalorder %v6676_v43, %v6749_v26 }
 0x626   :  { %v3249_v13 = vpop.permute.xlu2 %3248  ;;  %4632 = vmatpush.msk.msra.mxu1 %vm9599_vm10, %v9553_v5  ;;  %4648 = vmatpush.msk.msrb.mxu2 %vm9600_vm3, %v9553_v5  ;;  %vm9608_vm10 = vcmp.eq.s32.totalorder %v6676_v43, %v6765_v51  ;;  %vm9609_vm3 = vcmp.eq.s32.totalorder %v6676_v43, %v6747_v25 }
 0x627   :  { %v3252_v34 = vadd.f32 %v3249_v13, %v3240_v22  ;;  %v3254_v17 = vadd.f32 %v3249_v13, %v3242_v46 }
 0x628   :  { %4633 = vmatpush.msk.msra.mxu1 %vm9601_vm5, %v9553_v5  ;;  %4649 = vmatpush.msk.msrb.mxu2 %vm9602_vm0, %v9553_v5  ;;  %vm9610_vm5 = vcmp.eq.s32.totalorder %v6676_v43, %v6763_v50  ;;  %vm9611_vm0 = vcmp.eq.s32.totalorder %v6676_v43, %v6745_v24 }
 0x629   :  { %4555 = vmatmul.msk.f32.gmra.mxu1 %vm3120_vm4, %v3252_v34  ;;  %4571 = vmatmul.msk.f32.gmra.mxu2 %vm3120_vm4, %v3252_v34 }
 0x62a   :  { %4634 = vmatpush.msk.msra.mxu1 %vm9603_vm9, %v9553_v5  ;;  %4650 = vmatpush.msk.msrb.mxu2 %vm9604_vm7, %v9553_v5  ;;  %vm9612_vm9 = vcmp.eq.s32.totalorder %v6676_v43, %v6743_v23  ;;  %vm9613_vm7 = vcmp.eq.s32.totalorder %v6676_v43, %v6741_v33 }
 0x62c   :  { %4635 = vmatpush.msk.msra.mxu1 %vm9605_vm15, %v9553_v5  ;;  %4651 = vmatpush.msk.msrb.mxu2 %vm9606_vm2, %v9553_v5  ;;  %vm9614_vm15 = vcmp.eq.s32.totalorder %v6676_v43, %v6739_v31  ;;  %vm9615_vm2 = vcmp.eq.s32.totalorder %v6676_v43, %v6737_v30 }
 0x62e   :  { %4636 = vmatpush.msk.msra.mxu1 %vm9607_vm13, %v9553_v5  ;;  %4652 = vmatpush.msk.msrb.mxu2 %vm9608_vm10, %v9553_v5  ;;  %vm9616_vm13 = vcmp.eq.s32.totalorder %v6676_v43, %v6735_v29  ;;  %vm9617_vm10 = vcmp.eq.s32.totalorder %v6676_v43, %v6733_v47 }
 0x630   :  { %4637 = vmatpush.msk.msra.mxu1 %vm9609_vm3, %v9553_v5  ;;  %4653 = vmatpush.msk.msrb.mxu2 %vm9610_vm5, %v9553_v5  ;;  %vm9618_vm3 = vcmp.eq.s32.totalorder %v6676_v43, %v6731_v28  ;;  %vm3355_vm5 = vcmask 1039360  }
 0x631   :  { %4556 = vmatmul.msk.f32.gmra.mxu1 %vm3120_vm4, %v3253_v11  ;;  %4572 = vmatmul.msk.f32.gmra.mxu2 %vm3120_vm4, %v3253_v11  ;;  %v5178_v11 = vmov 2  }
 0x632   :  { %4638 = vmatpush.msk.msra.mxu1 %vm9611_vm0, %v9553_v5  ;;  %5037 = vset.pattern.permute.xlu1 %v5178_v11  ;;  %vm3416_vm0 = vcmask 785408  }
 0x633   :  { %5038 = vset.pattern.permute.xlu0 %v5178_v11  ;;  %5036 = vset.pattern.permute.xlu2 %v5178_v11 }
 0x634   :  { %4639 = vmatpush.msk.msra.mxu1 %vm9612_vm9, %v9553_v5  ;;  %vm9619_vm9 = vcmp.eq.s32.totalorder %v6673_v42, %v6775_v59 }
 0x636   :  { %4640 = vmatpush.msk.msra.mxu1 %vm9613_vm7, %v9553_v5  ;;  %vm9620_vm7 = vcmp.eq.s32.totalorder %v6673_v42, %v6773_v58 }
 0x638   :  { %4641 = vmatpush.msk.msra.mxu1 %vm9614_vm15, %v9553_v5  ;;  %vm9621_vm15 = vcmp.eq.s32.totalorder %v6673_v42, %v6771_v57 }
 0x639   :  { %4557 = vmatmul.msk.f32.gmra.mxu1 %vm3120_vm4, %v3254_v17  ;;  %4573 = vmatmul.msk.f32.gmra.mxu2 %vm3120_vm4, %v3254_v17  ;;  %vm3384_vm4 = vcmask 1031168  }
 0x63a   :  { %4642 = vmatpush.msk.msra.mxu1 %vm9615_vm2, %v9553_v5  ;;  %vm9622_vm2 = vcmp.eq.s32.totalorder %v6673_v42, %v6769_v54 }
 0x63c   :  { %4643 = vmatpush.msk.msra.mxu1 %vm9616_vm13, %v9553_v5  ;;  %vm9623_vm13 = vcmp.eq.s32.totalorder %v6673_v42, %v6761_v27 }
 0x63e   :  { %4644 = vmatpush.msk.msra.mxu1 %vm9617_vm10, %v9553_v5  ;;  %vm9624_vm10 = vcmp.eq.s32.totalorder %v6673_v42, %v6767_v52 }
 0x640   :  { %4645 = vmatpush.msk.msra.mxu1 %vm9618_vm3, %v9553_v5  ;;  %vm9625_vm3 = vcmp.eq.s32.totalorder %v6673_v42, %v6759_v48 }
 0x69e   :  { %v7968_v7 = vpop.f32.mrf.mxu1 }
 0x6a4   :  { %v7970_v16 = vpop.f32.mrf.mxu2 }
 0x6a6   :  { %v7972_v9 = vpop.f32.mrf.mxu1 }
 0x6a7   :  { %v5001_v60 = vpack.i.bf16 %v7968_v7, %v7972_v9 }
 0x6ac   :  { %v7974_v61 = vpop.f32.mrf.mxu2 }
 0x6ad   :  { %v4996_v6 = vpack.i.bf16 %v7970_v16, %v7974_v61 }
 0x6ae   :  { %v7978_v20 = vpop.f32.mrf.mxu1 }
 0x6af   :  { %4997 = vrot.lane.b32.xlu0 %v4996_v6, %s5173_s13 }
 0x6b4   :  { %v7981_v62 = vpop.f32.mrf.mxu2 }
 0x6b6   :  { %v7985_v53 = vpop.f32.mrf.mxu1 }
 0x6b7   :  { %v5006_v21 = vpack.i.bf16 %v7978_v20, %v7985_v53  ;;  %5002 = vrot.lane.b32.xlu0 %v5001_v60, %s5173_s13 }
 0x6b9   :  { %5007 = vrot.lane.b32.xlu2 %v5006_v21, %s5173_s13 }
 0x6bc   :  { %v3328_v56 = vpop.f32.mrf.mxu2 }
 0x6bd   :  { %v5016_v44 = vpack.i.bf16 %v7981_v62, %v3328_v56 }
 0x6bf   :  { %5017 = vrot.lane.b32.xlu1 %v5016_v44, %s5173_s13  ;;  %5032 = vrot.lane.b32.xlu0 %v5001_v60, %s5177_s19 }
 0x6c1   :  { %5012 = vrot.lane.b32.xlu2 %v4996_v6, %s5177_s19 }
 0x6c7   :  { %5022 = vrot.lane.b32.xlu1 %v5016_v44, %s5177_s19  ;;  %3407 = vperm.xlu0 %5038, %v7843_v14  }
 0x6c9   :  { %3399 = vperm.xlu2 %5036, %v7838_v18  }
 0x6cf   :  { %5027 = vrot.lane.b32.xlu1 %v5006_v21, %s5177_s19 }
 0x6d7   :  { %3403 = vperm.xlu1 %5037, %v7848_v37  }
 0x713   :  { %v5008_v49 = vpop.permute.xlu2 %5007 }
 0x714   :  { %v5009_v8 = vunpack.i.l.bf16 %v5008_v49  ;;  %v5010_v4 = vunpack.i.h.bf16 %v5008_v49 }
 0x71b   :  { %v5013_v44 = vpop.permute.xlu2 %5012 }
 0x721   :  { %v4998_v15 = vpop.permute.xlu0 %4997 }
 0x722   :  { %v4999_v13 = vunpack.i.l.bf16 %v4998_v15  ;;  %v5000_v46 = vunpack.i.h.bf16 %v4998_v15  ;;  %v5014_v15 = vunpack.i.l.bf16 %v5013_v44 }
 0x729   :  { %v5003_v36 = vpop.permute.xlu0 %5002 }
 0x72a   :  { %v5004_v1 = vunpack.i.l.bf16 %v5003_v36  ;;  %v5005_v34 = vunpack.i.h.bf16 %v5003_v36  ;;  %v5015_v36 = vunpack.i.h.bf16 %v5013_v44 }
 0x72c   :  { %v3386_v17 = vsel %vm3384_vm4, %v5004_v1, %v4999_v13  ;;  %v3385_v21 = vsel %vm3384_vm4, %v5005_v34, %v5000_v46  ;;  %v3114_v34 = vld [vmem:[%s9428_s4] sm:$0xff] }
 0x731   :  { %v5018_v12 = vpop.permute.xlu1 %5017 }
 0x732   :  { %v5020_v35 = vunpack.i.h.bf16 %v5018_v12  ;;  %v5019_v10 = vunpack.i.l.bf16 %v5018_v12  ;;  %v5033_v12 = vpop.permute.xlu0 %5032 }
 0x733   :  { %v5034_v14 = vunpack.i.l.bf16 %v5033_v12  ;;  %v5035_v1 = vunpack.i.h.bf16 %v5033_v12 }
 0x734   :  { %3450 = vmatpush.msra.mxu3 %v5019_v10  ;;  %v3388_v22 = vsel %vm3384_vm4, %v5009_v8, %v5019_v10  ;;  %v3387_v63 = vsel %vm3384_vm4, %v5010_v4, %v5020_v35 }
 0x735   :  { %3427 = vmatpush.msra.mxu0 %v3388_v22 }
 0x736   :  { %3451 = vmatpush.msra.mxu3 %v5020_v35 }
 0x737   :  { %3428 = vmatpush.msra.mxu0 %v3387_v63 }
 0x738   :  { %3452 = vmatpush.msra.mxu3 %v4999_v13  ;;  %v3357_v13 = vsel %vm3355_vm5, %v5034_v14, %v5014_v15 }
 0x739   :  { %v5023_v6 = vpop.permute.xlu1 %5022  ;;  %3429 = vmatpush.msra.mxu0 %v3386_v17 }
 0x73a   :  { %v5024_v60 = vunpack.i.l.bf16 %v5023_v6  ;;  %3453 = vmatpush.msra.mxu3 %v5000_v46  ;;  %v5025_v49 = vunpack.i.h.bf16 %v5023_v6  ;;  %v3408_v63 = vpop.permute.xlu0 %3407 }
 0x73b   :  { %3430 = vmatpush.msra.mxu0 %v3385_v21  ;;  %v3412_v46 = vrot.slane %v3408_v63, 6 }
 0x73c   :  { %3454 = vmatpush.msra.mxu3 %v5024_v60 }
 0x73e   :  { %3455 = vmatpush.msra.mxu3 %v5025_v49 }
 0x740   :  { %3456 = vmatpush.msra.mxu3 %v5014_v15 }
 0x741   :  { %v5028_v8 = vpop.permute.xlu1 %5027 }
 0x742   :  { %v5030_v35 = vunpack.i.h.bf16 %v5028_v8  ;;  %v5029_v10 = vunpack.i.l.bf16 %v5028_v8  ;;  %3457 = vmatpush.msra.mxu3 %v5015_v36 }
 0x744   :  { %3458 = vmatpush.msra.mxu3 %v3328_v56  ;;  %v3359_v4 = vsel %vm3355_vm5, %v5029_v10, %v5024_v60  ;;  %v3358_v22 = vsel %vm3355_vm5, %v5030_v35, %v5025_v49  ;;  %v3356_v56 = vsel %vm3355_vm5, %v5035_v1, %v5015_v36 }
 0x745   :  { %3431 = vmatpush.msra.mxu0 %v3359_v4 }
 0x746   :  { %3459 = vmatpush.msra.mxu3 %v7981_v62 }
 0x747   :  { %3432 = vmatpush.msra.mxu0 %v3358_v22 }
 0x748   :  { %3460 = vmatpush.msra.mxu3 %v7974_v61 }
 0x749   :  { %3433 = vmatpush.msra.mxu0 %v3357_v13 }
 0x74a   :  { %3461 = vmatpush.msra.mxu3 %v7970_v16  ;;  %v3115_v16 = vld [vmem:[%s9428_s4 + $0x8] sm:$0xff] }
 0x74b   :  { %3434 = vmatpush.msra.mxu0 %v3356_v56  ;;  %4576 = vmatmul.msk.f32.vlgmr.msra.gmra.mxu3 %vm3416_vm0, %v3114_v34 }
 0x74c   :  { %4620 = vmatpush.msk.msrb.mxu3 %vm2996_vm11, %v7421_v19  ;;  %v3404_v19 = vpop.permute.xlu1 %3403 }
 0x74d   :  { %3435 = vmatpush.msra.mxu0 %v7985_v53 }
 0x74e   :  { %4621 = vmatpush.msk.msrb.mxu3 %vm9619_vm9, %v9553_v5  ;;  %vm9626_vm9 = vcmp.eq.s32.totalorder %v6673_v42, %v6765_v51 }
 0x74f   :  { %3436 = vmatpush.msra.mxu0 %v7978_v20 }
 0x750   :  { %4622 = vmatpush.msk.msrb.mxu3 %vm9620_vm7, %v9553_v5  ;;  %vm9627_vm7 = vcmp.eq.s32.totalorder %v6673_v42, %v6757_v45 }
 0x751   :  { %3437 = vmatpush.msra.mxu0 %v7972_v9  ;;  %v3410_v9 = vrot.slane %v3404_v19, 6 }
 0x752   :  { %4623 = vmatpush.msk.msrb.mxu3 %vm9621_vm15, %v9553_v5  ;;  %vm9628_vm15 = vcmp.eq.s32.totalorder %v6673_v42, %v6763_v50 }
 0x753   :  { %3438 = vmatpush.msra.mxu0 %v7968_v7  ;;  %4577 = vmatmul.msk.f32.gmra.mxu3 %vm3416_vm0, %v3115_v16  ;;  %v3400_v7 = vpop.permute.xlu2 %3399  ;;  %v3413_v6 = vsel %vm2992_vm8, %v3410_v9, %v3412_v46 }
 0x754   :  { %4574 = vmatmul.msk.f32.vlgmr.msra.gmra.mxu0 %vm3416_vm0, %v3114_v34  ;;  %4624 = vmatpush.msk.msrb.mxu3 %vm9622_vm2, %v9553_v5  ;;  %vm9629_vm2 = vcmp.eq.s32.totalorder %v6673_v42, %v6755_v40  ;;  %v3409_v61 = vrot.slane %v3400_v7, 6 }
 0x755   :  { %4604 = vmatpush.msk.msrb.mxu0 %vm9623_vm13, %v9553_v5  ;;  %vm9630_vm13 = vcmp.eq.s32.totalorder %v6673_v42, %v6753_v39 }
 0x756   :  { %4625 = vmatpush.msk.msrb.mxu3 %vm9624_vm10, %v9553_v5  ;;  %vm9631_vm10 = vcmp.eq.s32.totalorder %v6673_v42, %v6751_v38  ;;  %v3411_v20 = vsel %vm2992_vm8, %v3409_v61, %v3410_v9  ;;  %v5179_v61 = vmov 3  }
 0x757   :  { %4605 = vmatpush.msk.msrb.mxu0 %vm9625_vm3, %v9553_v5  ;;  %vm9632_vm3 = vcmp.eq.s32.totalorder %v6673_v42, %v6749_v26  ;;  %5039 = vset.pattern.permute.xlu0 %v5179_v61 }
 0x758   :  { %4626 = vmatpush.msk.msrb.mxu3 %vm9626_vm9, %v9553_v5  ;;  %vm9633_vm9 = vcmp.eq.s32.totalorder %v6673_v42, %v6747_v25 }
 0x759   :  { %4606 = vmatpush.msk.msrb.mxu0 %vm9627_vm7, %v9553_v5  ;;  %vm9635_vm7 = vcmp.eq.s32.totalorder %v6673_v42, %v6743_v23 }
 0x75a   :  { %4627 = vmatpush.msk.msrb.mxu3 %vm9628_vm15, %v9553_v5  ;;  %vm9636_vm15 = vcmp.eq.s32.totalorder %v6673_v42, %v6741_v33 }
 0x75b   :  { %4607 = vmatpush.msk.msrb.mxu0 %vm9629_vm2, %v9553_v5  ;;  %vm9637_vm2 = vcmp.eq.s32.totalorder %v6673_v42, %v6739_v31 }
 0x75c   :  { %4575 = vmatmul.msk.f32.gmra.mxu0 %vm3416_vm0, %v3115_v16  ;;  %vm9634_vm0 = vcmp.eq.s32.totalorder %v6673_v42, %v6745_v24 }
 0x75d   :  { %4608 = vmatpush.msk.msrb.mxu0 %vm9630_vm13, %v9553_v5  ;;  %vm9638_vm13 = vcmp.eq.s32.totalorder %v6673_v42, %v6737_v30 }
 0x75f   :  { %4609 = vmatpush.msk.msrb.mxu0 %vm9631_vm10, %v9553_v5  ;;  %vm9639_vm10 = vcmp.eq.s32.totalorder %v6673_v42, %v6735_v29 }
 0x761   :  { %4610 = vmatpush.msk.msrb.mxu0 %vm9632_vm3, %v9553_v5  ;;  %vm9640_vm3 = vcmp.eq.s32.totalorder %v6673_v42, %v6733_v47 }
 0x763   :  { %4611 = vmatpush.msk.msrb.mxu0 %vm9633_vm9, %v9553_v5  ;;  %vm9641_vm9 = vcmp.eq.s32.totalorder %v6673_v42, %v6731_v28 }
 0x765   :  { %4612 = vmatpush.msk.msrb.mxu0 %vm9634_vm0, %v9553_v5  ;;  %vm3473_vm0 = vcmask 490496  }
 0x767   :  { %4613 = vmatpush.msk.msrb.mxu0 %vm9635_vm7, %v9553_v5 }
 0x769   :  { %4614 = vmatpush.msk.msrb.mxu0 %vm9636_vm15, %v9553_v5 }
 0x76b   :  { %4615 = vmatpush.msk.msrb.mxu0 %vm9637_vm2, %v9553_v5 }
 0x76d   :  { %4616 = vmatpush.msk.msrb.mxu0 %vm9638_vm13, %v9553_v5  ;;  %vm9642_vm13 = vcmp.eq.s32.totalorder %v6652_v32, %v6793_v55 }
 0x76f   :  { %4617 = vmatpush.msk.msrb.mxu0 %vm9639_vm10, %v9553_v5  ;;  %vm9643_vm10 = vcmp.eq.s32.totalorder %v6652_v32, %v6791_v3 }
 0x771   :  { %4618 = vmatpush.msk.msrb.mxu0 %vm9640_vm3, %v9553_v5  ;;  %vm9644_vm3 = vcmp.eq.s32.totalorder %v6652_v32, %v6789_v2 }
 0x773   :  { %4619 = vmatpush.msk.msrb.mxu0 %vm9641_vm9, %v9553_v5  ;;  %vm9645_vm9 = vcmp.eq.s32.totalorder %v6652_v32, %v6787_v41 }
 0x7ce   :  { %v3463_v62 = vpop.f32.mrf.mxu3 }
 0x7cf   :  { %v3464_v53 = vadd.f32 %v3463_v62, %v3411_v20 }
 0x7d1   :  { %5135 = vtanh.f32 %v3464_v53  ;;  %v3440_v11 = vpop.f32.mrf.mxu0 }
 0x7d2   :  { %v3441_v17 = vadd.f32 %v3440_v11, %v3411_v20 }
 0x7d4   :  { %5137 = vtanh.f32 %v3441_v17 }
 0x7d6   :  { %v3466_v60 = vpop.f32.mrf.mxu3 }
 0x7d7   :  { %v8121_v21 = vpop.eup %5135  ;;  %v3467_v44 = vadd.f32 %v3466_v60, %v3413_v6 }
 0x7d8   :  { %v3474_v49 = vsel %vm3473_vm0, %v8121_v21, 0.0  ;;  %v3483_v15 = vmul.f32 %v8121_v21, %v8121_v21 }
 0x7d9   :  { %5139 = vtanh.f32 %v3467_v44  ;;  %v3443_v36 = vpop.f32.mrf.mxu0 }
 0x7da   :  { %v8127_v12 = vpop.eup %5137  ;;  %v3444_v8 = vadd.f32 %v3443_v36, %v3413_v6  ;;  %v3486_v35 = vsel %vm3473_vm0, %v3483_v15, 0.0 }
 0x7db   :  { %v3475_v10 = vadd.f32 %v8127_v12, %v3474_v49  ;;  %v3482_v14 = vmul.f32 %v8127_v12, %v8127_v12 }
 0x7dc   :  { %5141 = vtanh.f32 %v3444_v8 }
 0x7dd   :  { %3476 = vadd.xlane.f32.xlu2 %v3475_v10  ;;  %v3487_v4 = vadd.f32 %v3486_v35, %v3482_v14 }
 0x7df   :  { %v8133_v1 = vpop.eup %5139  ;;  %3488 = vadd.xlane.f32.xlu0 %v3487_v4 }
 0x7e0   :  { %v3485_v22 = vmul.f32 %v8133_v1, %v8133_v1  ;;  %v3478_v34 = vsel %vm3473_vm0, %v8133_v1, 0.0 }
 0x7e2   :  { %v8137_v13 = vpop.eup %5141  ;;  %v3490_v19 = vsel %vm3473_vm0, %v3485_v22, 0.0 }
 0x7e3   :  { %v3479_v56 = vadd.f32 %v8137_v13, %v3478_v34  ;;  %v3484_v16 = vmul.f32 %v8137_v13, %v8137_v13 }
 0x7e5   :  { %3480 = vadd.xlane.f32.xlu1 %v3479_v56  ;;  %v3491_v7 = vadd.f32 %v3490_v19, %v3484_v16 }
 0x7e7   :  { %3492 = vadd.xlane.f32.xlu2 %v3491_v7 }
 0x850   :  { %v3477_v9 = vpop.xlane.xlu2 %3476 }
 0x852   :  { %v3489_v53 = vpop.xlane.xlu0 %3488 }
 0x858   :  { %v3481_v20 = vpop.xlane.xlu1 %3480 }
 0x859   :  { %v3494_v62 = vadd.f32 %v3481_v20, %v3477_v9  ;;  %v5182_v20 = vmov 4  }
 0x85a   :  { %v3493_v63 = vpop.xlane.xlu2 %3492  ;;  %5040 = vset.pattern.permute.xlu1 %v5182_v20  ;;  %v9679_v20 = vld [vmem:[#allocation29_spill] sm:$0xff] }
 0x85b   :  { %v3496_v11 = vmul.f32 0.0026595744, %v3494_v62  ;;  %v3495_v46 = vadd.f32 %v3493_v63, %v3489_v53 }
 0x85d   :  { %v3498_v17 = vmul.f32 %v3496_v11, %v3496_v11  ;;  %v3497_v6 = vmul.f32 0.0026595744, %v3495_v46 }
 0x85f   :  { %v3499_v60 = vsub.f32 %v3497_v6, %v3498_v17 }
 0x861   :  { %v3500_v44 = vadd.f32 1e-05, %v3499_v60 }
 0x863   :  { %5143 = vrsqrt.f32 %v3500_v44  ;;  %vm3507_vm15 = vweird.f32 %v3500_v44 }
 0x869   :  { %v5144_v49 = vpop.eup %5143 }
 0x86a   :  { %v3502_v15 = vmul.f32 %v5144_v49, %v3500_v44  ;;  %vm3508_vm7 = vweird.f32 %v5144_v49 }
 0x86b   :  { %vm3509_vm2 = vmor %vm3507_vm15, %vm3508_vm7  ;;  %vm9646_vm7 = vcmp.eq.s32.totalorder %v6652_v32, %v6785_v0 }
 0x86c   :  { %v3503_v36 = vmul.f32 %v5144_v49, %v3502_v15 }
 0x86e   :  { %v3504_v8 = vmul.f32 0.5, %v3503_v36 }
 0x870   :  { %v3505_v35 = vsub.f32 1.5, %v3504_v8 }
 0x872   :  { %v3506_v10 = vmul.f32 %v5144_v49, %v3505_v35 }
 0x874   :  { %v3510_v14 = vsel %vm3509_vm2, %v5144_v49, %v3506_v10  ;;  %v9651_v10 = vld [vmem:[#allocation21_spill] sm:$0xff] }
 0x875   :  { %v3512_v4 = vrot.slane %v3510_v14, 2  ;;  %v9653_v14 = vld [vmem:[#allocation20_spill] sm:$0xff] }
 0x877   :  { %v3514_v22 = vmul.f32 %v3512_v4, %v7838_v18  ;;  %v3515_v34 = vmul.f32 %v3512_v4, %v7848_v37  ;;  %v9662_v4 = vld [vmem:[#allocation38_spill] sm:$0xff] }
 0x879   :  { %v3518_v56 = vrot.slane %v3514_v22, 6  ;;  %v3519_v16 = vrot.slane %v3515_v34, 6  ;;  %v9663_v22 = vld [vmem:[#allocation37_spill] sm:$0xff]  ;;  %v9665_v34 = vld [vmem:[#allocation36_spill] sm:$0xff] }
 0x87b   :  { %v3520_v19 = vsel %vm2992_vm8, %v3518_v56, %v3519_v16  ;;  %v9667_v56 = vld [vmem:[#allocation35_spill] sm:$0xff]  ;;  %v9669_v16 = vld [vmem:[#allocation34_spill] sm:$0xff] }
 0x87c   :  { %3538 = vperm.xlu0 %5039, %v3520_v19   ;;  %3521 = vrot.lane.b32.xlu1 %v3520_v19, %s5180_s23  ;;  %v9671_v19 = vld [vmem:[#allocation33_spill] sm:$0xff] }
 0x8ee   :  { %v3522_v7 = vpop.permute.xlu1 %3521  ;;  %v3539_v60 = vpop.permute.xlu0 %3538 }
 0x8ef   :  { %v3524_v9 = vmul.f32 %v3522_v7, %v3496_v11  ;;  %v3541_v44 = vmul.f32 %v8127_v12, %v3539_v60  ;;  %v3542_v11 = vmul.f32 %v8121_v21, %v3539_v60  ;;  %v3543_v8 = vmul.f32 %v8137_v13, %v3539_v60  ;;  %v9649_v13 = vld [vmem:[#allocation22_spill] sm:$0xff]  ;;  %v9673_v7 = vld [vmem:[#allocation32_spill] sm:$0xff] }
 0x8f0   :  { %v3544_v12 = vmul.f32 %v8133_v1, %v3539_v60  ;;  %v9647_v1 = vld [vmem:[#allocation23_spill] sm:$0xff]  ;;  %vm9650_vm2 = vcmp.eq.s32.totalorder %v6652_v32, %v9649_v13 }
 0x8f1   :  { %v3526_v61 = vrot.slane %v3524_v9, 2  ;;  %vm9648_vm15 = vcmp.eq.s32.totalorder %v6652_v32, %v9647_v1  ;;  %v9675_v9 = vld [vmem:[#allocation31_spill] sm:$0xff] }
 0x8f3   :  { %3527 = vrot.lane.b32.xlu2 %v3526_v61, %s5181_s24  ;;  %v9677_v61 = vld [vmem:[#allocation30_spill] sm:$0xff] }
 0x94d   :  { %v3528_v62 = vpop.permute.xlu2 %3527 }
 0x94e   :  { %v3530_v53 = vsub.f32 %v7838_v18, %v3528_v62  ;;  %v3531_v63 = vsub.f32 %v7848_v37, %v3528_v62  ;;  %v9681_v62 = vld [vmem:[#allocation28_spill] sm:$0xff] }
 0x950   :  { %v3534_v46 = vrot.slane %v3530_v53, 6  ;;  %v3535_v17 = vrot.slane %v3531_v63, 6  ;;  %v9683_v53 = vld [vmem:[#allocation27_spill] sm:$0xff]  ;;  %v9685_v63 = vld [vmem:[#allocation26_spill] sm:$0xff] }
 0x952   :  { %v3536_v6 = vsel %vm2992_vm8, %v3534_v46, %v3535_v17  ;;  %v9687_v46 = vld [vmem:[#allocation25_spill] sm:$0xff]  ;;  %v9689_v17 = vld [vmem:[#allocation24_spill] sm:$0xff] }
 0x953   :  { %3546 = vperm.xlu1 %5040, %v3536_v6  }
 0x9c5   :  { %v3547_v49 = vpop.permute.xlu1 %3546 }
 0x9c6   :  { %v3549_v15 = vadd.f32 %v3547_v49, %v3541_v44  ;;  %v3550_v36 = vadd.f32 %v3547_v49, %v3542_v11  ;;  %v3551_v21 = vadd.f32 %v3547_v49, %v3543_v8  ;;  %v3552_v35 = vadd.f32 %v3547_v49, %v3544_v12 }
 0x9c8   :  { %3584 = vmatmul.f32.vlgmr.msrb.gmra.mxu1 %v3549_v15  ;;  %4602 = vmatmul.msk.f32.vlgmr.msra.gmra.mxu2 %vm3473_vm0, %v3550_v36 }
 0x9c9   :  { %3630 = vmatmul.f32.vlgmr.msrb.gmra.mxu0 %v3549_v15  ;;  %4628 = vmatmul.msk.f32.vlgmr.msrb.gmra.mxu3 %vm3473_vm0, %v3550_v36 }
 0x9ca   :  { %4675 = vmatpush.msk.msrb.mxu1 %vm9642_vm13, %v9553_v5  ;;  %vm9652_vm13 = vcmp.eq.s32.totalorder %v6652_v32, %v9651_v10 }
 0x9cc   :  { %4676 = vmatpush.msk.msrb.mxu1 %vm9643_vm10, %v9553_v5  ;;  %vm9654_vm10 = vcmp.eq.s32.totalorder %v6652_v32, %v9653_v14 }
 0x9ce   :  { %4677 = vmatpush.msk.msrb.mxu1 %vm9644_vm3, %v9553_v5  ;;  %vm9655_vm3 = vcmp.eq.s32.totalorder %v6652_v32, %v6775_v59 }
 0x9d0   :  { %3587 = vmatmul.f32.gmra.mxu1 %v3551_v21  ;;  %4603 = vmatmul.msk.f32.gmra.mxu2 %vm3473_vm0, %v3552_v35 }
 0x9d1   :  { %3633 = vmatmul.f32.gmra.mxu0 %v3551_v21  ;;  %4629 = vmatmul.msk.f32.gmra.mxu3 %vm3473_vm0, %v3552_v35 }
 0x9d2   :  { %4678 = vmatpush.msk.msrb.mxu1 %vm9645_vm9, %v9553_v5  ;;  %vm9656_vm9 = vcmp.eq.s32.totalorder %v6652_v32, %v6773_v58 }
 0x9d4   :  { %4679 = vmatpush.msk.msrb.mxu1 %vm9646_vm7, %v9553_v5  ;;  %vm9657_vm7 = vcmp.eq.s32.totalorder %v6652_v32, %v6771_v57 }
 0x9d6   :  { %4680 = vmatpush.msk.msrb.mxu1 %vm9648_vm15, %v9553_v5  ;;  %vm9658_vm15 = vcmp.eq.s32.totalorder %v6652_v32, %v6769_v54 }
 0x9d8   :  { %3676 = vmatmul.f32.vlgmr.msra.gmra.mxu1 %v3549_v15  ;;  %4654 = vmatmul.msk.f32.vlgmr.msrb.gmra.mxu2 %vm3473_vm0, %v3550_v36 }
 0x9d9   :  { %4681 = vmatpush.msk.msrb.mxu1 %vm9650_vm2, %v9553_v5  ;;  %vm9659_vm2 = vcmp.eq.s32.totalorder %v6652_v32, %v6767_v52 }
 0x9db   :  { %4682 = vmatpush.msk.msrb.mxu1 %vm9652_vm13, %v9553_v5  ;;  %vm9661_vm13 = vcmp.eq.s32.totalorder %v6652_v32, %v6763_v50 }
 0x9dd   :  { %4683 = vmatpush.msk.msrb.mxu1 %vm9654_vm10, %v9553_v5  ;;  %vm9664_vm10 = vcmp.eq.s32.totalorder %v6673_v42, %v9663_v22 }
 0x9df   :  { %4684 = vmatpush.msk.msrb.mxu1 %vm9655_vm3, %v9553_v5  ;;  %vm9666_vm3 = vcmp.eq.s32.totalorder %v6673_v42, %v9665_v34 }
 0x9e0   :  { %3679 = vmatmul.f32.gmra.mxu1 %v3551_v21  ;;  %4655 = vmatmul.msk.f32.gmra.mxu2 %vm3473_vm0, %v3552_v35  ;;  %vm9660_vm0 = vcmp.eq.s32.totalorder %v6652_v32, %v6765_v51 }
 0x9e1   :  { %4685 = vmatpush.msk.msrb.mxu1 %vm9656_vm9, %v9553_v5  ;;  %vm9668_vm9 = vcmp.eq.s32.totalorder %v6673_v42, %v9667_v56 }
 0x9e3   :  { %4686 = vmatpush.msk.msrb.mxu1 %vm9657_vm7, %v9553_v5  ;;  %vm9670_vm7 = vcmp.eq.s32.totalorder %v6673_v42, %v9669_v16 }
 0x9e5   :  { %4687 = vmatpush.msk.msrb.mxu1 %vm9658_vm15, %v9553_v5  ;;  %vm9672_vm15 = vcmp.eq.s32.totalorder %v6673_v42, %v9671_v19 }
 0x9e7   :  { %4688 = vmatpush.msk.msrb.mxu1 %vm9659_vm2, %v9553_v5  ;;  %vm9674_vm2 = vcmp.eq.s32.totalorder %v6673_v42, %v9673_v7 }
 0x9e9   :  { %4689 = vmatpush.msk.msrb.mxu1 %vm9660_vm0, %v9553_v5  ;;  %vm9676_vm0 = vcmp.eq.s32.totalorder %v6673_v42, %v9675_v9 }
 0x9eb   :  { %4690 = vmatpush.msk.msrb.mxu1 %vm9661_vm13, %v9553_v5  ;;  %vm9678_vm13 = vcmp.eq.s32.totalorder %v6673_v42, %v9677_v61 }
 0x9ed   :  { %4739 = vmatpush.msk.msra.mxu1 %vm3002_vm14, %v9662_v4 }
 0x9ef   :  { %4740 = vmatpush.msk.msra.mxu1 %vm9664_vm10, %v9553_v5  ;;  %vm9680_vm10 = vcmp.eq.s32.totalorder %v6673_v42, %v9679_v20 }
 0x9f1   :  { %4741 = vmatpush.msk.msra.mxu1 %vm9666_vm3, %v9553_v5  ;;  %vm9682_vm3 = vcmp.eq.s32.totalorder %v6673_v42, %v9681_v62 }
 0x9f3   :  { %4742 = vmatpush.msk.msra.mxu1 %vm9668_vm9, %v9553_v5  ;;  %vm9684_vm9 = vcmp.eq.s32.totalorder %v6673_v42, %v9683_v53 }
 0x9f5   :  { %4743 = vmatpush.msk.msra.mxu1 %vm9670_vm7, %v9553_v5  ;;  %vm9686_vm7 = vcmp.eq.s32.totalorder %v6673_v42, %v9685_v63 }
 0x9f7   :  { %4744 = vmatpush.msk.msra.mxu1 %vm9672_vm15, %v9553_v5  ;;  %vm9688_vm15 = vcmp.eq.s32.totalorder %v6673_v42, %v9687_v46 }
 0x9f9   :  { %4745 = vmatpush.msk.msra.mxu1 %vm9674_vm2, %v9553_v5  ;;  %vm9690_vm2 = vcmp.eq.s32.totalorder %v6673_v42, %v9689_v17 }
 0x9fb   :  { %4746 = vmatpush.msk.msra.mxu1 %vm9676_vm0, %v9553_v5  ;;  %vm3766_vm0 = vcmask 392192  }
 0x9fd   :  { %4747 = vmatpush.msk.msra.mxu1 %vm9678_vm13, %v9553_v5  ;;  %vm9691_vm13 = vcmp.eq.s32.totalorder %v6652_v32, %v6761_v27 }
 0x9ff   :  { %4748 = vmatpush.msk.msra.mxu1 %vm9680_vm10, %v9553_v5  ;;  %vm9692_vm10 = vcmp.eq.s32.totalorder %v6673_v42, %v6761_v27 }
 0xa01   :  { %4749 = vmatpush.msk.msra.mxu1 %vm9682_vm3, %v9553_v5  ;;  %vm9694_vm3 = vcmp.eq.s32.totalorder %v6652_v32, %v6759_v48 }
 0xa03   :  { %4750 = vmatpush.msk.msra.mxu1 %vm9684_vm9, %v9553_v5  ;;  %vm9695_vm9 = vcmp.eq.s32.totalorder %v6673_v42, %v6759_v48 }
 0xa05   :  { %4751 = vmatpush.msk.msra.mxu1 %vm9686_vm7, %v9553_v5  ;;  %vm9696_vm7 = vcmp.eq.s32.totalorder %v6652_v32, %v9663_v22 }
 0xa07   :  { %4752 = vmatpush.msk.msra.mxu1 %vm9688_vm15, %v9553_v5  ;;  %vm9697_vm15 = vcmp.eq.s32.totalorder %v6652_v32, %v6757_v45 }
 0xa09   :  { %4753 = vmatpush.msk.msra.mxu1 %vm9690_vm2, %v9553_v5  ;;  %vm9698_vm2 = vcmp.eq.s32.totalorder %v6673_v42, %v6757_v45 }
 0xa45   :  { %v3585_v6 = vpop.f32.mrf.mxu1 }
 0xa46   :  { %v3631_v60 = vpop.f32.mrf.mxu0 }
 0xa4b   :  { %v3608_v44 = vpop.f32.mrf.mxu2 }
 0xa4c   :  { %v3654_v11 = vpop.f32.mrf.mxu3  ;;  %v3609_v59 = vadd.f32 %v3608_v44, %v3585_v6 }
 0xa4d   :  { %v3588_v49 = vpop.f32.mrf.mxu1  ;;  %v3655_v51 = vadd.f32 %v3654_v11, %v3631_v60 }
 0xa4e   :  { %v3634_v36 = vpop.f32.mrf.mxu0 }
 0xa53   :  { %v3611_v15 = vpop.f32.mrf.mxu2 }
 0xa54   :  { %v8283_v8 = vadd.f32 %v3611_v15, %v3588_v49  ;;  %v3657_v12 = vpop.f32.mrf.mxu3 }
 0xa55   :  { %v3658_v21 = vadd.f32 %v3657_v12, %v3634_v36  ;;  %v3677_v4 = vpop.f32.mrf.mxu1 }
 0xa57   :  { %v5046_v35 = vpack.i.bf16 %v3658_v21, %v8283_v8 }
 0xa59   :  { %5047 = vrot.lane.b32.xlu1 %v5046_v35, %s5177_s19  ;;  %5042 = vrot.lane.b32.xlu2 %v5046_v35, %s5173_s13 }
 0xa5b   :  { %v3700_v50 = vpop.f32.mrf.mxu2 }
 0xa5c   :  { %v3701_v52 = vadd.f32 %v3700_v50, %v3677_v4  ;;  %v5183_v50 = vmov 5  }
 0xa5d   :  { %v3680_v57 = vpop.f32.mrf.mxu1  ;;  %5071 = vset.pattern.permute.xlu0 %v5183_v50  ;;  %5072 = vset.pattern.permute.xlu2 %v5183_v50 }
 0xa5e   :  { %v5051_v54 = vpack.i.bf16 %v3701_v52, %v3655_v51  ;;  %3757 = vperm.xlu0 %5071, %v7838_v18  }
 0xa61   :  { %5052 = vrot.lane.b32.xlu2 %v5051_v54, %s5173_s13 }
 0xa63   :  { %v3703_v58 = vpop.f32.mrf.mxu2 }
 0xa64   :  { %v3704_v49 = vadd.f32 %v3703_v58, %v3680_v57 }
 0xa66   :  { %v5056_v15 = vpack.i.bf16 %v3609_v59, %v3704_v49 }
 0xa68   :  { %5057 = vrot.lane.b32.xlu1 %v5056_v15, %s5173_s13 }
 0xa69   :  { %5062 = vrot.lane.b32.xlu2 %v5056_v15, %s5177_s19 }
 0xa70   :  { %5067 = vrot.lane.b32.xlu1 %v5051_v54, %s5177_s19 }
 0xa71   :  { %3760 = vperm.xlu2 %5072, %v7848_v37  }
 0xab3   :  { %v5043_v36 = vpop.permute.xlu2 %5042 }
 0xab4   :  { %v5045_v12 = vunpack.i.h.bf16 %v5043_v36  ;;  %v5044_v35 = vunpack.i.l.bf16 %v5043_v36 }
 0xab6   :  { %v3748_v60 = vsel %vm3384_vm4, %v5044_v35, %v5045_v12 }
 0xab7   :  { %3780 = vmatpush.msra.mxu3 %v3748_v60 }
 0xabb   :  { %v5053_v57 = vpop.permute.xlu2 %5052 }
 0xabc   :  { %v5055_v6 = vunpack.i.h.bf16 %v5053_v57  ;;  %v5054_v44 = vunpack.i.l.bf16 %v5053_v57 }
 0xabe   :  { %v3747_v50 = vsel %vm3384_vm4, %v5054_v44, %v5055_v6 }
 0xac3   :  { %v5063_v36 = vpop.permute.xlu2 %5062 }
 0xac4   :  { %v5064_v18 = vunpack.i.l.bf16 %v5063_v36 }
 0xacb   :  { %v5048_v58 = vpop.permute.xlu1 %5047 }
 0xacc   :  { %v5050_v4 = vunpack.i.h.bf16 %v5048_v58  ;;  %v5049_v54 = vunpack.i.l.bf16 %v5048_v58 }
 0xace   :  { %v3726_v37 = vsel %vm3355_vm5, %v5049_v54, %v5050_v4  ;;  %v3727_v57 = vsel %vm3355_vm5, %v5050_v4, %v5064_v18  ;;  %v9791_v4 = vld [vmem:[#allocation13_spill] sm:$0xff] }
 0xad0   :  { %v3758_v54 = vpop.permute.xlu0 %3757 }
 0xada   :  { %v5058_v11 = vpop.permute.xlu1 %5057 }
 0xadb   :  { %v5060_v15 = vunpack.i.h.bf16 %v5058_v11  ;;  %v5059_v14 = vunpack.i.l.bf16 %v5058_v11  ;;  %v5065_v11 = vunpack.i.h.bf16 %v5063_v36  ;;  %v3761_v36 = vpop.permute.xlu2 %3760 }
 0xadd   :  { %3820 = vmatpush.msra.mxu0 %v5059_v14  ;;  %v3746_v35 = vsel %vm3384_vm4, %v5060_v15, %v5054_v44  ;;  %v3749_v60 = vsel %vm3384_vm4, %v5045_v12, %v5059_v14  ;;  %v9787_v44 = vld [vmem:[#allocation14_spill] sm:$0xff] }
 0xade   :  { %3781 = vmatpush.msra.mxu3 %v3746_v35  ;;  %3800 = vmatpush.msra.mxu2 %v3749_v60  ;;  %v3762_v35 = vrot.slane %v3758_v54, 6  ;;  %v3763_v60 = vrot.slane %v3761_v36, 6 }
 0xadf   :  { %3821 = vmatpush.msra.mxu0 %v5055_v6  ;;  %v3116_v6 = vld [vmem:[%s9428_s4 + $0x10] sm:$0xff] }
 0xae0   :  { %3782 = vmatpush.msra.mxu3 %v3726_v37  ;;  %3801 = vmatpush.msra.mxu2 %v3747_v50 }
 0xae1   :  { %3822 = vmatpush.msra.mxu0 %v5064_v18  ;;  %v3764_v18 = vsel %vm2992_vm8, %v3762_v35, %v3763_v60 }
 0xae2   :  { %v5068_v58 = vpop.permute.xlu1 %5067  ;;  %3802 = vmatpush.msra.mxu2 %v3727_v57 }
 0xae3   :  { %v5070_v10 = vunpack.i.h.bf16 %v5068_v58  ;;  %v5069_v15 = vunpack.i.l.bf16 %v5068_v58 }
 0xae5   :  { %3823 = vmatpush.msra.mxu0 %v5070_v10  ;;  %v3724_v14 = vsel %vm3355_vm5, %v5065_v11, %v5069_v15  ;;  %v3725_v12 = vsel %vm3355_vm5, %v5069_v15, %v5070_v10  ;;  %v9693_v10 = vld [vmem:[#allocation6_spill] sm:$0xff] }
 0xae6   :  { %3783 = vmatpush.msra.mxu3 %v3724_v14  ;;  %3803 = vmatpush.msra.mxu2 %v3725_v12 }
 0xae7   :  { %3824 = vmatpush.msra.mxu0 %v3704_v49  ;;  %v9783_v49 = vld [vmem:[#allocation15_spill] sm:$0xff] }
 0xae8   :  { %3784 = vmatpush.msra.mxu3 %v8283_v8  ;;  %3804 = vmatpush.msra.mxu2 %v3658_v21  ;;  %v9775_v8 = vld [vmem:[#allocation17_spill] sm:$0xff]  ;;  %v9779_v21 = vld [vmem:[#allocation16_spill] sm:$0xff] }
 0xae9   :  { %3825 = vmatpush.msra.mxu0 %v3701_v52  ;;  %v9767_v52 = vld [vmem:[#allocation19_spill] sm:$0xff] }
 0xaea   :  { %3785 = vmatpush.msra.mxu3 %v3609_v59  ;;  %3805 = vmatpush.msra.mxu2 %v3655_v51  ;;  %v9763_v51 = vld [vmem:[#allocation20_spill] sm:$0xff]  ;;  %v9771_v59 = vld [vmem:[#allocation18_spill] sm:$0xff] }
 0xaeb   :  { %4656 = vmatmul.msk.f32.vlgmr.msra.gmra.mxu3 %vm3766_vm0, %v3116_v6  ;;  %4657 = vmatmul.msk.f32.vlgmr.msra.gmra.mxu2 %vm3766_vm0, %v3116_v6 }
 0xaec   :  { %4658 = vmatmul.msk.f32.vlgmr.msra.gmra.mxu0 %vm3766_vm0, %v3116_v6  ;;  %4659 = vmatpush.msk.msrb.mxu3 %vm9691_vm13, %v9553_v5  ;;  %vm9699_vm0 = vcmp.eq.s32.totalorder %v6652_v32, %v9665_v34  ;;  %vm9700_vm13 = vcmp.eq.s32.totalorder %v6652_v32, %v6755_v40 }
 0xaed   :  { %4707 = vmatpush.msk.msrb.mxu0 %vm9692_vm10, %v9553_v5  ;;  %4691 = vmatpush.msk.msrb.mxu2 %vm3002_vm14, %v9693_v10  ;;  %vm9701_vm10 = vcmp.eq.s32.totalorder %v6673_v42, %v6755_v40 }
 0xaee   :  { %4660 = vmatpush.msk.msrb.mxu3 %vm9694_vm3, %v9553_v5  ;;  %vm9702_vm3 = vcmp.eq.s32.totalorder %v6652_v32, %v9667_v56 }
 0xaef   :  { %4708 = vmatpush.msk.msrb.mxu0 %vm9695_vm9, %v9553_v5  ;;  %4692 = vmatpush.msk.msrb.mxu2 %vm9696_vm7, %v9553_v5  ;;  %vm9703_vm9 = vcmp.eq.s32.totalorder %v6673_v42, %v6753_v39  ;;  %vm9704_vm7 = vcmp.eq.s32.totalorder %v6652_v32, %v9669_v16 }
 0xaf0   :  { %4661 = vmatpush.msk.msrb.mxu3 %vm9697_vm15, %v9553_v5  ;;  %vm9705_vm15 = vcmp.eq.s32.totalorder %v6652_v32, %v6751_v38 }
 0xaf1   :  { %4709 = vmatpush.msk.msrb.mxu0 %vm9698_vm2, %v9553_v5  ;;  %4693 = vmatpush.msk.msrb.mxu2 %vm9699_vm0, %v9553_v5  ;;  %vm9706_vm2 = vcmp.eq.s32.totalorder %v6673_v42, %v6751_v38  ;;  %vm9708_vm0 = vcmp.eq.s32.totalorder %v6652_v32, %v6749_v26 }
 0xaf2   :  { %4662 = vmatpush.msk.msrb.mxu3 %vm9700_vm13, %v9553_v5  ;;  %vm9709_vm13 = vcmp.eq.s32.totalorder %v6673_v42, %v6749_v26 }
 0xaf3   :  { %4710 = vmatpush.msk.msrb.mxu0 %vm9701_vm10, %v9553_v5  ;;  %4694 = vmatpush.msk.msrb.mxu2 %vm9702_vm3, %v9553_v5  ;;  %vm9710_vm10 = vcmp.eq.s32.totalorder %v6652_v32, %v9673_v7  ;;  %vm9711_vm3 = vcmp.eq.s32.totalorder %v6652_v32, %v6747_v25 }
 0xaf4   :  { %4663 = vmatpush.msk.msrb.mxu3 %vm1201_vm6, %v9553_v5  ;;  %vm9707_vm6 = vcmp.eq.s32.totalorder %v6652_v32, %v9671_v19 }
 0xaf5   :  { %4711 = vmatpush.msk.msrb.mxu0 %vm9703_vm9, %v9553_v5  ;;  %4695 = vmatpush.msk.msrb.mxu2 %vm9704_vm7, %v9553_v5  ;;  %vm9712_vm9 = vcmp.eq.s32.totalorder %v6673_v42, %v6747_v25  ;;  %vm9713_vm7 = vcmp.eq.s32.totalorder %v6652_v32, %v9675_v9 }
 0xaf6   :  { %4664 = vmatpush.msk.msrb.mxu3 %vm9705_vm15, %v9553_v5  ;;  %vm9714_vm15 = vcmp.eq.s32.totalorder %v6652_v32, %v6745_v24 }
 0xaf7   :  { %4712 = vmatpush.msk.msrb.mxu0 %vm9706_vm2, %v9553_v5  ;;  %4696 = vmatpush.msk.msrb.mxu2 %vm9707_vm6, %v9553_v5  ;;  %vm9715_vm2 = vcmp.eq.s32.totalorder %v6673_v42, %v6745_v24  ;;  %vm9716_vm6 = vcmp.eq.s32.totalorder %v6652_v32, %v9677_v61 }
 0xaf8   :  { %4665 = vmatpush.msk.msrb.mxu3 %vm9708_vm0, %v9553_v5  ;;  %vm9717_vm0 = vcmp.eq.s32.totalorder %v6652_v32, %v6743_v23 }
 0xaf9   :  { %4713 = vmatpush.msk.msrb.mxu0 %vm9709_vm13, %v9553_v5  ;;  %4697 = vmatpush.msk.msrb.mxu2 %vm9710_vm10, %v9553_v5  ;;  %vm9718_vm13 = vcmp.eq.s32.totalorder %v6673_v42, %v6743_v23  ;;  %vm9719_vm10 = vcmp.eq.s32.totalorder %v6652_v32, %v9679_v20 }
 0xafa   :  { %4666 = vmatpush.msk.msrb.mxu3 %vm9711_vm3, %v9553_v5  ;;  %vm9720_vm3 = vcmp.eq.s32.totalorder %v6652_v32, %v6741_v33 }
 0xafb   :  { %4714 = vmatpush.msk.msrb.mxu0 %vm9712_vm9, %v9553_v5  ;;  %4698 = vmatpush.msk.msrb.mxu2 %vm9713_vm7, %v9553_v5  ;;  %vm9721_vm9 = vcmp.eq.s32.totalorder %v6673_v42, %v6741_v33  ;;  %vm9722_vm7 = vcmp.eq.s32.totalorder %v6652_v32, %v9681_v62 }
 0xafc   :  { %4667 = vmatpush.msk.msrb.mxu3 %vm9714_vm15, %v9553_v5  ;;  %vm9723_vm15 = vcmp.eq.s32.totalorder %v6652_v32, %v6739_v31 }
 0xafd   :  { %4715 = vmatpush.msk.msrb.mxu0 %vm9715_vm2, %v9553_v5  ;;  %4699 = vmatpush.msk.msrb.mxu2 %vm9716_vm6, %v9553_v5  ;;  %vm9724_vm2 = vcmp.eq.s32.totalorder %v6673_v42, %v6739_v31  ;;  %vm9725_vm6 = vcmp.eq.s32.totalorder %v6652_v32, %v9683_v53 }
 0xafe   :  { %4668 = vmatpush.msk.msrb.mxu3 %vm9717_vm0, %v9553_v5  ;;  %vm9726_vm0 = vcmp.eq.s32.totalorder %v6652_v32, %v6737_v30 }
 0xaff   :  { %4716 = vmatpush.msk.msrb.mxu0 %vm9718_vm13, %v9553_v5  ;;  %4700 = vmatpush.msk.msrb.mxu2 %vm9719_vm10, %v9553_v5  ;;  %vm9727_vm13 = vcmp.eq.s32.totalorder %v6673_v42, %v6737_v30  ;;  %vm9728_vm10 = vcmp.eq.s32.totalorder %v6652_v32, %v9685_v63 }
 0xb00   :  { %4669 = vmatpush.msk.msrb.mxu3 %vm9720_vm3, %v9553_v5  ;;  %vm9729_vm3 = vcmp.eq.s32.totalorder %v6652_v32, %v6735_v29 }
 0xb01   :  { %4717 = vmatpush.msk.msrb.mxu0 %vm9721_vm9, %v9553_v5  ;;  %4701 = vmatpush.msk.msrb.mxu2 %vm9722_vm7, %v9553_v5  ;;  %vm9730_vm9 = vcmp.eq.s32.totalorder %v6673_v42, %v6735_v29  ;;  %vm9731_vm7 = vcmp.eq.s32.totalorder %v6652_v32, %v9687_v46 }
 0xb02   :  { %4670 = vmatpush.msk.msrb.mxu3 %vm9723_vm15, %v9553_v5  ;;  %vm9732_vm15 = vcmp.eq.s32.totalorder %v6652_v32, %v6733_v47 }
 0xb03   :  { %4718 = vmatpush.msk.msrb.mxu0 %vm9724_vm2, %v9553_v5  ;;  %4702 = vmatpush.msk.msrb.mxu2 %vm9725_vm6, %v9553_v5  ;;  %vm9733_vm2 = vcmp.eq.s32.totalorder %v6673_v42, %v6733_v47  ;;  %vm9734_vm6 = vcmp.eq.s32.totalorder %v6652_v32, %v9689_v17 }
 0xb04   :  { %4671 = vmatpush.msk.msrb.mxu3 %vm9726_vm0, %v9553_v5  ;;  %vm9735_vm0 = vcmp.eq.s32.totalorder %v6652_v32, %v6731_v28  ;;  %v9759_v32 = vld [vmem:[#allocation21_spill] sm:$0xff] }
 0xb05   :  { %4719 = vmatpush.msk.msrb.mxu0 %vm9727_vm13, %v9553_v5  ;;  %4703 = vmatpush.msk.msrb.mxu2 %vm9728_vm10, %v9553_v5  ;;  %vm9736_vm13 = vcmp.eq.s32.totalorder %v6676_v43, %v6761_v27  ;;  %vm9737_vm10 = vcmp.eq.s32.totalorder %v6673_v42, %v6731_v28 }
 0xb06   :  { %4672 = vmatpush.msk.msrb.mxu3 %vm9729_vm3, %v9553_v5  ;;  %vm9738_vm3 = vcmp.eq.s32.totalorder %v6673_v42, %v6793_v55 }
 0xb07   :  { %4720 = vmatpush.msk.msrb.mxu0 %vm9730_vm9, %v9553_v5  ;;  %4704 = vmatpush.msk.msrb.mxu2 %vm9731_vm7, %v9553_v5  ;;  %vm9739_vm9 = vcmp.eq.s32.totalorder %v6676_v43, %v6793_v55  ;;  %vm9740_vm7 = vcmp.eq.s32.totalorder %v6676_v43, %v6759_v48 }
 0xb08   :  { %4673 = vmatpush.msk.msrb.mxu3 %vm9732_vm15, %v9553_v5  ;;  %vm9741_vm15 = vcmp.eq.s32.totalorder %v6673_v42, %v6791_v3 }
 0xb09   :  { %4721 = vmatpush.msk.msrb.mxu0 %vm9733_vm2, %v9553_v5  ;;  %4705 = vmatpush.msk.msrb.mxu2 %vm9734_vm6, %v9553_v5  ;;  %vm9742_vm2 = vcmp.eq.s32.totalorder %v6676_v43, %v6791_v3  ;;  %vm9743_vm6 = vcmp.eq.s32.totalorder %v6676_v43, %v6757_v45 }
 0xb0a   :  { %4674 = vmatpush.msk.msrb.mxu3 %vm9735_vm0, %v9553_v5  ;;  %vm9744_vm0 = vcmp.eq.s32.totalorder %v6673_v42, %v6789_v2 }
 0xb0b   :  { %4755 = vmatpush.msk.msra.mxu2 %vm9736_vm13, %v9553_v5  ;;  %4722 = vmatpush.msk.msrb.mxu0 %vm9737_vm10, %v9553_v5  ;;  %vm9745_vm13 = vcmp.eq.s32.totalorder %v6676_v43, %v6789_v2  ;;  %vm9746_vm10 = vcmp.eq.s32.totalorder %v6676_v43, %v6755_v40 }
 0xb0c   :  { %4723 = vmatpush.msk.msra.mxu3 %vm9738_vm3, %v9553_v5  ;;  %vm9747_vm3 = vcmp.eq.s32.totalorder %v6673_v42, %v6787_v41 }
 0xb0d   :  { %4771 = vmatpush.msk.msra.mxu0 %vm9739_vm9, %v9553_v5  ;;  %4756 = vmatpush.msk.msra.mxu2 %vm9740_vm7, %v9553_v5  ;;  %vm9748_vm9 = vcmp.eq.s32.totalorder %v6676_v43, %v6787_v41  ;;  %vm9749_vm7 = vcmp.eq.s32.totalorder %v6676_v43, %v6753_v39 }
 0xb0e   :  { %4724 = vmatpush.msk.msra.mxu3 %vm9741_vm15, %v9553_v5  ;;  %vm9750_vm15 = vcmp.eq.s32.totalorder %v6673_v42, %v6785_v0 }
 0xb0f   :  { %4772 = vmatpush.msk.msra.mxu0 %vm9742_vm2, %v9553_v5  ;;  %4757 = vmatpush.msk.msra.mxu2 %vm9743_vm6, %v9553_v5  ;;  %vm9751_vm2 = vcmp.eq.s32.totalorder %v6676_v43, %v6785_v0  ;;  %vm9752_vm6 = vcmp.eq.s32.totalorder %v6676_v43, %v6751_v38 }
 0xb10   :  { %4725 = vmatpush.msk.msra.mxu3 %vm9744_vm0, %v9553_v5  ;;  %vm9753_vm0 = vcmp.eq.s32.totalorder %v6673_v42, %v9647_v1 }
 0xb11   :  { %4773 = vmatpush.msk.msra.mxu0 %vm9745_vm13, %v9553_v5  ;;  %4758 = vmatpush.msk.msra.mxu2 %vm9746_vm10, %v9553_v5  ;;  %vm9754_vm13 = vcmp.eq.s32.totalorder %v6676_v43, %v9647_v1  ;;  %vm9755_vm10 = vcmp.eq.s32.totalorder %v6676_v43, %v6749_v26 }
 0xb12   :  { %4726 = vmatpush.msk.msra.mxu3 %vm9747_vm3, %v9553_v5  ;;  %vm9756_vm3 = vcmp.eq.s32.totalorder %v6673_v42, %v9649_v13 }
 0xb13   :  { %4774 = vmatpush.msk.msra.mxu0 %vm9748_vm9, %v9553_v5  ;;  %4759 = vmatpush.msk.msra.mxu2 %vm9749_vm7, %v9553_v5  ;;  %vm9757_vm9 = vcmp.eq.s32.totalorder %v6676_v43, %v9649_v13  ;;  %vm9758_vm7 = vcmp.eq.s32.totalorder %v6676_v43, %v6747_v25 }
 0xb14   :  { %4727 = vmatpush.msk.msra.mxu3 %vm9750_vm15, %v9553_v5  ;;  %vm9760_vm15 = vcmp.eq.s32.totalorder %v6673_v42, %v9759_v32 }
 0xb15   :  { %4775 = vmatpush.msk.msra.mxu0 %vm9751_vm2, %v9553_v5  ;;  %4760 = vmatpush.msk.msra.mxu2 %vm9752_vm6, %v9553_v5  ;;  %vm9761_vm2 = vcmp.eq.s32.totalorder %v6676_v43, %v9759_v32  ;;  %vm9762_vm6 = vcmp.eq.s32.totalorder %v6676_v43, %v6745_v24 }
 0xb16   :  { %4728 = vmatpush.msk.msra.mxu3 %vm9753_vm0, %v9553_v5  ;;  %vm9764_vm0 = vcmp.eq.s32.totalorder %v6673_v42, %v9763_v51 }
 0xb17   :  { %4776 = vmatpush.msk.msra.mxu0 %vm9754_vm13, %v9553_v5  ;;  %4761 = vmatpush.msk.msra.mxu2 %vm9755_vm10, %v9553_v5  ;;  %vm9765_vm13 = vcmp.eq.s32.totalorder %v6676_v43, %v9763_v51  ;;  %vm9766_vm10 = vcmp.eq.s32.totalorder %v6676_v43, %v6743_v23 }
 0xb18   :  { %4729 = vmatpush.msk.msra.mxu3 %vm9756_vm3, %v9553_v5  ;;  %vm9768_vm3 = vcmp.eq.s32.totalorder %v6673_v42, %v9767_v52 }
 0xb19   :  { %4777 = vmatpush.msk.msra.mxu0 %vm9757_vm9, %v9553_v5  ;;  %4762 = vmatpush.msk.msra.mxu2 %vm9758_vm7, %v9553_v5  ;;  %vm9769_vm9 = vcmp.eq.s32.totalorder %v6676_v43, %v9767_v52  ;;  %vm9770_vm7 = vcmp.eq.s32.totalorder %v6676_v43, %v6741_v33 }
 0xb1a   :  { %4730 = vmatpush.msk.msra.mxu3 %vm9760_vm15, %v9553_v5  ;;  %vm9772_vm15 = vcmp.eq.s32.totalorder %v6673_v42, %v9771_v59 }
 0xb1b   :  { %4778 = vmatpush.msk.msra.mxu0 %vm9761_vm2, %v9553_v5  ;;  %4763 = vmatpush.msk.msra.mxu2 %vm9762_vm6, %v9553_v5  ;;  %vm9773_vm2 = vcmp.eq.s32.totalorder %v6676_v43, %v9771_v59  ;;  %vm9774_vm6 = vcmp.eq.s32.totalorder %v6676_v43, %v6739_v31 }
 0xb1c   :  { %4731 = vmatpush.msk.msra.mxu3 %vm9764_vm0, %v9553_v5  ;;  %vm9776_vm0 = vcmp.eq.s32.totalorder %v6673_v42, %v9775_v8 }
 0xb1d   :  { %4779 = vmatpush.msk.msra.mxu0 %vm9765_vm13, %v9553_v5  ;;  %4764 = vmatpush.msk.msra.mxu2 %vm9766_vm10, %v9553_v5  ;;  %vm9777_vm13 = vcmp.eq.s32.totalorder %v6676_v43, %v9775_v8  ;;  %vm9778_vm10 = vcmp.eq.s32.totalorder %v6676_v43, %v6737_v30 }
 0xb1e   :  { %4732 = vmatpush.msk.msra.mxu3 %vm9768_vm3, %v9553_v5  ;;  %vm9780_vm3 = vcmp.eq.s32.totalorder %v6673_v42, %v9779_v21 }
 0xb1f   :  { %4780 = vmatpush.msk.msra.mxu0 %vm9769_vm9, %v9553_v5  ;;  %4765 = vmatpush.msk.msra.mxu2 %vm9770_vm7, %v9553_v5  ;;  %vm9781_vm9 = vcmp.eq.s32.totalorder %v6676_v43, %v9779_v21  ;;  %vm9782_vm7 = vcmp.eq.s32.totalorder %v6676_v43, %v6735_v29 }
 0xb20   :  { %4733 = vmatpush.msk.msra.mxu3 %vm9772_vm15, %v9553_v5  ;;  %vm9784_vm15 = vcmp.eq.s32.totalorder %v6673_v42, %v9783_v49 }
 0xb21   :  { %4781 = vmatpush.msk.msra.mxu0 %vm9773_vm2, %v9553_v5  ;;  %4766 = vmatpush.msk.msra.mxu2 %vm9774_vm6, %v9553_v5  ;;  %vm9785_vm2 = vcmp.eq.s32.totalorder %v6676_v43, %v9783_v49  ;;  %vm9786_vm6 = vcmp.eq.s32.totalorder %v6676_v43, %v6733_v47 }
 0xb22   :  { %4734 = vmatpush.msk.msra.mxu3 %vm9776_vm0, %v9553_v5  ;;  %vm9788_vm0 = vcmp.eq.s32.totalorder %v6673_v42, %v9787_v44 }
 0xb23   :  { %4782 = vmatpush.msk.msra.mxu0 %vm9777_vm13, %v9553_v5  ;;  %4767 = vmatpush.msk.msra.mxu2 %vm9778_vm10, %v9553_v5  ;;  %vm9789_vm13 = vcmp.eq.s32.totalorder %v6676_v43, %v9787_v44  ;;  %vm9790_vm10 = vcmp.eq.s32.totalorder %v6676_v43, %v6731_v28 }
 0xb24   :  { %4735 = vmatpush.msk.msra.mxu3 %vm9780_vm3, %v9553_v5  ;;  %vm9792_vm3 = vcmp.eq.s32.totalorder %v6673_v42, %v9791_v4 }
 0xb25   :  { %4783 = vmatpush.msk.msra.mxu0 %vm9781_vm9, %v9553_v5  ;;  %4768 = vmatpush.msk.msra.mxu2 %vm9782_vm7, %v9553_v5  ;;  %vm9793_vm9 = vcmp.eq.s32.totalorder %v6676_v43, %v9791_v4  ;;  %vm3834_vm7 = vcmask 973824  }
 0xb26   :  { %4736 = vmatpush.msk.msra.mxu3 %vm9784_vm15, %v9553_v5 }
 0xb27   :  { %4784 = vmatpush.msk.msra.mxu0 %vm9785_vm2, %v9553_v5  ;;  %4769 = vmatpush.msk.msra.mxu2 %vm9786_vm6, %v9553_v5 }
 0xb28   :  { %4737 = vmatpush.msk.msra.mxu3 %vm9788_vm0, %v9553_v5  ;;  %vm9799_vm0 = vcmp.eq.s32.totalorder %v6676_v43, %v9663_v22 }
 0xb29   :  { %4785 = vmatpush.msk.msra.mxu0 %vm9789_vm13, %v9553_v5  ;;  %4770 = vmatpush.msk.msra.mxu2 %vm9790_vm10, %v9553_v5 }
 0xb2a   :  { %4738 = vmatpush.msk.msra.mxu3 %vm9792_vm3, %v9553_v5 }
 0xb2b   :  { %4786 = vmatpush.msk.msra.mxu0 %vm9793_vm9, %v9553_v5  ;;  %vm9803_vm9 = vcmp.eq.s32.totalorder %v6676_v43, %v9665_v34 }
 0xb69   :  { %v3827_v37 = vpop.f32.mrf.mxu0 }
 0xb6a   :  { %v3828_v50 = vadd.f32 %v3827_v37, %v3764_v18 }
 0xb6c   :  { %5145 = vtanh.f32 %v3828_v50 }
 0xb6e   :  { %v3787_v57 = vpop.f32.mrf.mxu3  ;;  %v3807_v58 = vpop.f32.mrf.mxu2 }
 0xb6f   :  { %v3788_v11 = vadd.f32 %v3787_v57, %v3764_v18  ;;  %v3808_v15 = vadd.f32 %v3807_v58, %v3764_v18 }
 0xb71   :  { %5147 = vtanh.f32 %v3788_v11 }
 0xb72   :  { %5149 = vtanh.f32 %v3808_v15  ;;  %v8685_v42 = vpop.eup %5145 }
 0xb73   :  { %v3841_v14 = vmul.f32 %v8685_v42, %v8685_v42  ;;  %v3835_v10 = vsel %vm3834_vm7, %v8685_v42, 0.0 }
 0xb75   :  { %v3843_v60 = vsel %vm3834_vm7, %v3841_v14, 0.0 }
 0xb77   :  { %v8689_v12 = vpop.eup %5147 }
 0xb78   :  { %v8691_v6 = vpop.eup %5149  ;;  %v3839_v54 = vmul.f32 %v8689_v12, %v8689_v12 }
 0xb79   :  { %v3833_v36 = vadd.f32 %v8691_v6, %v8689_v12  ;;  %v3840_v35 = vmul.f32 %v8691_v6, %v8691_v6 }
 0xb7b   :  { %v3836_v18 = vadd.f32 %v3835_v10, %v3833_v36  ;;  %v3842_v37 = vadd.f32 %v3840_v35, %v3839_v54 }
 0xb7d   :  { %3837 = vadd.xlane.f32.xlu1 %v3836_v18  ;;  %v3844_v50 = vadd.f32 %v3843_v60, %v3842_v37 }
 0xb7f   :  { %3845 = vadd.xlane.f32.xlu2 %v3844_v50 }
 0xbf0   :  { %v3838_v57 = vpop.xlane.xlu1 %3837 }
 0xbf1   :  { %v3848_v58 = vrot.slane %v3838_v57, 4 }
 0xbf2   :  { %v3846_v11 = vpop.xlane.xlu2 %3845 }
 0xbf3   :  { %v3850_v15 = vadd.f32 %v3848_v58, %v3838_v57  ;;  %v3852_v4 = vrot.slane %v3846_v11, 4  ;;  %v5186_v58 = vmov 6  }
 0xbf4   :  { %5073 = vset.pattern.permute.xlu0 %v5186_v58 }
 0xbf5   :  { %v3855_v28 = vmul.f32 0.0013333333, %v3850_v15  ;;  %v3854_v44 = vadd.f32 %v3852_v4, %v3846_v11 }
 0xbf7   :  { %v3857_v47 = vmul.f32 %v3855_v28, %v3855_v28  ;;  %v3856_v17 = vmul.f32 0.0013333333, %v3854_v44 }
 0xbf9   :  { %v3858_v49 = vsub.f32 %v3856_v17, %v3857_v47  ;;  %v8705_v47 = vld [vmem:[%s9428_s4 + $0x18] sm:$0xff] }
 0xbfb   :  { %v3859_v29 = vadd.f32 1e-05, %v3858_v49 }
 0xbfd   :  { %5151 = vrsqrt.f32 %v3859_v29  ;;  %vm3866_vm2 = vweird.f32 %v3859_v29 }
 0xc03   :  { %v5152_v46 = vpop.eup %5151 }
 0xc04   :  { %v3861_v21 = vmul.f32 %v5152_v46, %v3859_v29  ;;  %vm3867_vm15 = vweird.f32 %v5152_v46 }
 0xc05   :  { %vm3868_vm6 = vmor %vm3866_vm2, %vm3867_vm15 }
 0xc06   :  { %v3862_v14 = vmul.f32 %v5152_v46, %v3861_v21  ;;  %v8711_v21 = vld [vmem:[%s9428_s4 + $0x20] sm:$0xff]  ;;  %s5187_s4 = smov 7  }
 0xc08   :  { %v3863_v10 = vmul.f32 0.5, %v3862_v14 }
 0xc0a   :  { %v3864_v54 = vsub.f32 1.5, %v3863_v10  ;;  %v5188_v10 = vmov 7  }
 0xc0b   :  { %5074 = vset.pattern.permute.xlu1 %v5188_v10  ;;  %v9848_v10 = vld [vmem:[#allocation25_spill] sm:$0xff] }
 0xc0c   :  { %v3865_v36 = vmul.f32 %v5152_v46, %v3864_v54 }
 0xc0e   :  { %v3869_v35 = vsel %vm3868_vm6, %v5152_v46, %v3865_v36 }
 0xc0f   :  { %v3871_v60 = vrot.slane %v3869_v35, 2 }
 0xc11   :  { %3872 = vrot.lane.b32.xlu0 %v3871_v60, %s5184_s26 }
 0xc83   :  { %v3873_v18 = vpop.permute.xlu0 %3872 }
 0xc84   :  { %v3875_v17 = vmul.f32 %v8705_v47, %v3873_v18  ;;  %v3876_v29 = vmul.f32 %v8711_v21, %v3873_v18 }
 0xc86   :  { %v3879_v49 = vrot.slane %v3875_v17, 6  ;;  %v3880_v46 = vrot.slane %v3876_v29, 6  ;;  %v3894_v44 = vrot.slane %v3875_v17, 2  ;;  %v3895_v4 = vrot.slane %v3876_v29, 2 }
 0xc88   :  { %v3881_v37 = vsel %vm2992_vm8, %v3879_v49, %v3880_v46  ;;  %v3896_v50 = vsel %vm3000_vm12, %v3894_v44, %v3895_v4 }
 0xc89   :  { %3882 = vrot.lane.b32.xlu0 %v3881_v37, %s5185_s6  ;;  %v3898_v57 = vsel %vm2996_vm11, %v3881_v37, %v3896_v50 }
 0xcfb   :  { %v3883_v11 = vpop.permute.xlu0 %3882 }
 0xcfc   :  { %v3885_v15 = vmul.f32 %v3883_v11, %v3855_v28 }
 0xcfe   :  { %v3887_v14 = vrot.slane %v3885_v15, 2 }
 0xd00   :  { %3888 = vrot.lane.b32.xlu0 %v3887_v14, %s5187_s4  ;;  %v9845_v14 = vld [vmem:[#allocation16_spill] sm:$0xff] }
 0xd08   :  { %3912 = vperm.xlu0 %5073, %v3898_v57  }
 0xd72   :  { %v3889_v54 = vpop.permute.xlu0 %3888 }
 0xd73   :  { %v3891_v36 = vsub.f32 %v8705_v47, %v3889_v54  ;;  %v3892_v35 = vsub.f32 %v8711_v21, %v3889_v54  ;;  %v9850_v54 = vld [vmem:[#allocation12_spill] sm:$0xff] }
 0xd75   :  { %v3901_v60 = vrot.slane %v3891_v36, 6  ;;  %v3902_v18 = vrot.slane %v3892_v35, 6  ;;  %v3905_v17 = vrot.slane %v3891_v36, 2  ;;  %v3906_v29 = vrot.slane %v3892_v35, 2  ;;  %v9852_v36 = vld [vmem:[#allocation15_spill] sm:$0xff]  ;;  %v9855_v35 = vld [vmem:[#allocation24_spill] sm:$0xff] }
 0xd77   :  { %v3903_v49 = vsel %vm2992_vm8, %v3901_v60, %v3902_v18  ;;  %v3907_v46 = vsel %vm3000_vm12, %v3905_v17, %v3906_v29  ;;  %v9857_v60 = vld [vmem:[#allocation11_spill] sm:$0xff]  ;;  %v9859_v18 = vld [vmem:[#allocation14_spill] sm:$0xff]  ;;  %v9864_v17 = vld [vmem:[#allocation9_spill] sm:$0xff] }
 0xd78   :  { %v3909_v28 = vsel %vm2996_vm11, %v3903_v49, %v3907_v46  ;;  %v9866_v29 = vld [vmem:[#allocation10_spill] sm:$0xff]  ;;  %v9868_v49 = vld [vmem:[#allocation13_spill] sm:$0xff] }
 0xd79   :  { %3920 = vperm.xlu1 %5074, %v3909_v28  }
 0xd7a   :  { %v3913_v44 = vpop.permute.xlu0 %3912 }
 0xd7b   :  { %v3915_v4 = vmul.f32 %v8689_v12, %v3913_v44  ;;  %v3916_v37 = vmul.f32 %v8691_v6, %v3913_v44  ;;  %v3917_v50 = vmul.f32 %v8685_v42, %v3913_v44  ;;  %v9794_v12 = vld [vmem:[#allocation39_spill] sm:$0xff]  ;;  %v9798_v6 = vld [vmem:[#allocation40_spill] sm:$0xff] }
 0xd7c   :  { %v9795_v42 = vld [vmem:[#allocation7_spill] sm:$0xff] }
 0xd7d   :  { %vm9796_vm11 = vcmp.eq.s32.totalorder %v9795_v42, %v6761_v27  ;;  %vm9797_vm12 = vcmp.eq.s32.totalorder %v9795_v42, %v6793_v55  ;;  %vm9800_vm13 = vcmp.eq.s32.totalorder %v9795_v42, %v6759_v48  ;;  %vm9801_vm10 = vcmp.eq.s32.totalorder %v9795_v42, %v6791_v3 }
 0xd7e   :  { %vm9802_vm3 = vcmp.eq.s32.totalorder %v9795_v42, %v9663_v22  ;;  %vm9804_vm15 = vcmp.eq.s32.totalorder %v9795_v42, %v6757_v45  ;;  %vm9805_vm2 = vcmp.eq.s32.totalorder %v9795_v42, %v6789_v2  ;;  %vm9806_vm6 = vcmp.eq.s32.totalorder %v9795_v42, %v9665_v34 }
 0xdeb   :  { %v3921_v57 = vpop.permute.xlu1 %3920 }
 0xdec   :  { %v8725_v58 = vadd.f32 %v3921_v57, %v3915_v4  ;;  %v8727_v11 = vadd.f32 %v3921_v57, %v3916_v37  ;;  %v8729_v15 = vadd.f32 %v3921_v57, %v3917_v50 }
 0xdee   :  { %3963 = vmatmul.f32.vlgmr.msrb.gmra.mxu3 %v8725_v58  ;;  %3983 = vmatmul.f32.vlgmr.msrb.gmra.mxu1 %v8727_v11 }
 0xdef   :  { %4706 = vmatmul.msk.f32.vlgmr.msrb.gmra.mxu2 %vm3834_vm7, %v8729_v15  ;;  %4023 = vmatmul.f32.vlgmr.msrb.gmra.mxu0 %v8725_v58 }
 0xdf0   :  { %4787 = vmatpush.msk.msrb.mxu3 %vm3002_vm14, %v9794_v12  ;;  %4803 = vmatpush.msk.msrb.mxu1 %vm9796_vm11, %v9553_v5  ;;  %vm9807_vm11 = vcmp.eq.s32.totalorder %v6676_v43, %v9667_v56 }
 0xdf1   :  { %4819 = vmatpush.msk.msrb.mxu2 %vm9797_vm12, %v9553_v5  ;;  %4835 = vmatpush.msk.msrb.mxu0 %vm3002_vm14, %v9798_v6  ;;  %vm9808_vm12 = vcmp.eq.s32.totalorder %v9795_v42, %v6755_v40 }
 0xdf2   :  { %4788 = vmatpush.msk.msrb.mxu3 %vm9799_vm0, %v9553_v5  ;;  %4804 = vmatpush.msk.msrb.mxu1 %vm9800_vm13, %v9553_v5  ;;  %vm9809_vm0 = vcmp.eq.s32.totalorder %v9795_v42, %v6787_v41  ;;  %vm9810_vm13 = vcmp.eq.s32.totalorder %v9795_v42, %v9667_v56 }
 0xdf3   :  { %4820 = vmatpush.msk.msrb.mxu2 %vm9801_vm10, %v9553_v5  ;;  %4836 = vmatpush.msk.msrb.mxu0 %vm9802_vm3, %v9553_v5  ;;  %vm9811_vm10 = vcmp.eq.s32.totalorder %v6676_v43, %v9669_v16  ;;  %vm9812_vm3 = vcmp.eq.s32.totalorder %v9795_v42, %v6753_v39 }
 0xdf4   :  { %4789 = vmatpush.msk.msrb.mxu3 %vm9803_vm9, %v9553_v5  ;;  %4805 = vmatpush.msk.msrb.mxu1 %vm9804_vm15, %v9553_v5  ;;  %vm9813_vm9 = vcmp.eq.s32.totalorder %v9795_v42, %v6785_v0  ;;  %vm9814_vm15 = vcmp.eq.s32.totalorder %v9795_v42, %v9669_v16 }
 0xdf5   :  { %4821 = vmatpush.msk.msrb.mxu2 %vm9805_vm2, %v9553_v5  ;;  %4837 = vmatpush.msk.msrb.mxu0 %vm9806_vm6, %v9553_v5  ;;  %vm9815_vm2 = vcmp.eq.s32.totalorder %v6676_v43, %v9671_v19  ;;  %vm9816_vm6 = vcmp.eq.s32.totalorder %v9795_v42, %v6751_v38 }
 0xdf6   :  { %4790 = vmatpush.msk.msrb.mxu3 %vm9807_vm11, %v9553_v5  ;;  %4806 = vmatpush.msk.msrb.mxu1 %vm9808_vm12, %v9553_v5  ;;  %vm9817_vm11 = vcmp.eq.s32.totalorder %v9795_v42, %v9647_v1  ;;  %vm9818_vm12 = vcmp.eq.s32.totalorder %v9795_v42, %v9671_v19 }
 0xdf7   :  { %4822 = vmatpush.msk.msrb.mxu2 %vm9809_vm0, %v9553_v5  ;;  %4838 = vmatpush.msk.msrb.mxu0 %vm9810_vm13, %v9553_v5  ;;  %vm9819_vm0 = vcmp.eq.s32.totalorder %v6676_v43, %v9673_v7  ;;  %vm9820_vm13 = vcmp.eq.s32.totalorder %v9795_v42, %v6749_v26 }
 0xdf8   :  { %4043 = vmatmul.f32.vlgmr.msra.gmra.mxu3 %v8727_v11  ;;  %4754 = vmatmul.msk.f32.vlgmr.msra.gmra.mxu1 %vm3834_vm7, %v8729_v15 }
 0xdf9   :  { %4083 = vmatmul.f32.vlgmr.msra.gmra.mxu2 %v8725_v58  ;;  %4103 = vmatmul.f32.vlgmr.msra.gmra.mxu0 %v8727_v11 }
 0xdfa   :  { %4791 = vmatpush.msk.msrb.mxu3 %vm9811_vm10, %v9553_v5  ;;  %4807 = vmatpush.msk.msrb.mxu1 %vm9812_vm3, %v9553_v5  ;;  %vm9821_vm10 = vcmp.eq.s32.totalorder %v9795_v42, %v9649_v13  ;;  %vm9822_vm3 = vcmp.eq.s32.totalorder %v9795_v42, %v9673_v7 }
 0xdfb   :  { %4823 = vmatpush.msk.msrb.mxu2 %vm9813_vm9, %v9553_v5  ;;  %4839 = vmatpush.msk.msrb.mxu0 %vm9814_vm15, %v9553_v5  ;;  %vm9823_vm9 = vcmp.eq.s32.totalorder %v6676_v43, %v9675_v9  ;;  %vm9824_vm15 = vcmp.eq.s32.totalorder %v9795_v42, %v6747_v25 }
 0xdfc   :  { %4792 = vmatpush.msk.msrb.mxu3 %vm9815_vm2, %v9553_v5  ;;  %4808 = vmatpush.msk.msrb.mxu1 %vm9816_vm6, %v9553_v5  ;;  %vm9825_vm2 = vcmp.eq.s32.totalorder %v9795_v42, %v9759_v32  ;;  %vm9826_vm6 = vcmp.eq.s32.totalorder %v9795_v42, %v9675_v9 }
 0xdfd   :  { %4824 = vmatpush.msk.msrb.mxu2 %vm9817_vm11, %v9553_v5  ;;  %4840 = vmatpush.msk.msrb.mxu0 %vm9818_vm12, %v9553_v5  ;;  %vm9827_vm11 = vcmp.eq.s32.totalorder %v6676_v43, %v9677_v61  ;;  %vm9828_vm12 = vcmp.eq.s32.totalorder %v9795_v42, %v6745_v24 }
 0xdfe   :  { %4793 = vmatpush.msk.msrb.mxu3 %vm9819_vm0, %v9553_v5  ;;  %4809 = vmatpush.msk.msrb.mxu1 %vm9820_vm13, %v9553_v5  ;;  %vm9829_vm0 = vcmp.eq.s32.totalorder %v9795_v42, %v9763_v51  ;;  %vm9830_vm13 = vcmp.eq.s32.totalorder %v9795_v42, %v9677_v61 }
 0xdff   :  { %4825 = vmatpush.msk.msrb.mxu2 %vm9821_vm10, %v9553_v5  ;;  %4841 = vmatpush.msk.msrb.mxu0 %vm9822_vm3, %v9553_v5  ;;  %vm9831_vm10 = vcmp.eq.s32.totalorder %v6676_v43, %v9679_v20  ;;  %vm9832_vm3 = vcmp.eq.s32.totalorder %v9795_v42, %v6743_v23 }
 0xe00   :  { %4794 = vmatpush.msk.msrb.mxu3 %vm9823_vm9, %v9553_v5  ;;  %4810 = vmatpush.msk.msrb.mxu1 %vm9824_vm15, %v9553_v5  ;;  %vm9833_vm9 = vcmp.eq.s32.totalorder %v9795_v42, %v9767_v52  ;;  %vm9834_vm15 = vcmp.eq.s32.totalorder %v9795_v42, %v9679_v20 }
 0xe01   :  { %4826 = vmatpush.msk.msrb.mxu2 %vm9825_vm2, %v9553_v5  ;;  %4842 = vmatpush.msk.msrb.mxu0 %vm9826_vm6, %v9553_v5  ;;  %vm9835_vm2 = vcmp.eq.s32.totalorder %v6676_v43, %v9681_v62  ;;  %vm9836_vm6 = vcmp.eq.s32.totalorder %v9795_v42, %v6741_v33 }
 0xe02   :  { %4795 = vmatpush.msk.msrb.mxu3 %vm9827_vm11, %v9553_v5  ;;  %4811 = vmatpush.msk.msrb.mxu1 %vm9828_vm12, %v9553_v5  ;;  %vm9837_vm11 = vcmp.eq.s32.totalorder %v9795_v42, %v9771_v59  ;;  %vm9838_vm12 = vcmp.eq.s32.totalorder %v9795_v42, %v9681_v62 }
 0xe03   :  { %4827 = vmatpush.msk.msrb.mxu2 %vm9829_vm0, %v9553_v5  ;;  %4843 = vmatpush.msk.msrb.mxu0 %vm9830_vm13, %v9553_v5  ;;  %vm9839_vm0 = vcmp.eq.s32.totalorder %v6676_v43, %v9683_v53  ;;  %vm9840_vm13 = vcmp.eq.s32.totalorder %v9795_v42, %v6739_v31 }
 0xe04   :  { %4796 = vmatpush.msk.msrb.mxu3 %vm9831_vm10, %v9553_v5  ;;  %4812 = vmatpush.msk.msrb.mxu1 %vm9832_vm3, %v9553_v5  ;;  %vm9841_vm10 = vcmp.eq.s32.totalorder %v9795_v42, %v9775_v8  ;;  %vm9842_vm3 = vcmp.eq.s32.totalorder %v9795_v42, %v9683_v53 }
 0xe05   :  { %4828 = vmatpush.msk.msrb.mxu2 %vm9833_vm9, %v9553_v5  ;;  %4844 = vmatpush.msk.msrb.mxu0 %vm9834_vm15, %v9553_v5  ;;  %vm9843_vm9 = vcmp.eq.s32.totalorder %v6676_v43, %v9685_v63  ;;  %vm9844_vm15 = vcmp.eq.s32.totalorder %v9795_v42, %v6737_v30 }
 0xe06   :  { %4797 = vmatpush.msk.msrb.mxu3 %vm9835_vm2, %v9553_v5  ;;  %4813 = vmatpush.msk.msrb.mxu1 %vm9836_vm6, %v9553_v5  ;;  %vm9846_vm2 = vcmp.eq.s32.totalorder %v9795_v42, %v9845_v14  ;;  %vm9847_vm6 = vcmp.eq.s32.totalorder %v9795_v42, %v9685_v63 }
 0xe07   :  { %4829 = vmatpush.msk.msrb.mxu2 %vm9837_vm11, %v9553_v5  ;;  %4845 = vmatpush.msk.msrb.mxu0 %vm9838_vm12, %v9553_v5  ;;  %vm9849_vm11 = vcmp.eq.s32.totalorder %v6676_v43, %v9848_v10  ;;  %vm9851_vm12 = vcmp.eq.s32.totalorder %v9795_v42, %v9850_v54 }
 0xe08   :  { %4798 = vmatpush.msk.msrb.mxu3 %vm9839_vm0, %v9553_v5  ;;  %4814 = vmatpush.msk.msrb.mxu1 %vm9840_vm13, %v9553_v5  ;;  %vm9853_vm0 = vcmp.eq.s32.totalorder %v9795_v42, %v9852_v36  ;;  %vm9854_vm13 = vcmp.eq.s32.totalorder %v9795_v42, %v9848_v10 }
 0xe09   :  { %4830 = vmatpush.msk.msrb.mxu2 %vm9841_vm10, %v9553_v5  ;;  %4846 = vmatpush.msk.msrb.mxu0 %vm9842_vm3, %v9553_v5  ;;  %vm9856_vm10 = vcmp.eq.s32.totalorder %v6676_v43, %v9855_v35  ;;  %vm9858_vm3 = vcmp.eq.s32.totalorder %v9795_v42, %v9857_v60  ;;  %v9862_v43 = vld [vmem:[#allocation8_spill] sm:$0xff] }
 0xe0a   :  { %4799 = vmatpush.msk.msrb.mxu3 %vm9843_vm9, %v9553_v5  ;;  %4815 = vmatpush.msk.msrb.mxu1 %vm9844_vm15, %v9553_v5  ;;  %vm9860_vm9 = vcmp.eq.s32.totalorder %v9795_v42, %v9859_v18  ;;  %vm9861_vm15 = vcmp.eq.s32.totalorder %v9795_v42, %v9855_v35 }
 0xe0b   :  { %4831 = vmatpush.msk.msrb.mxu2 %vm9846_vm2, %v9553_v5  ;;  %4847 = vmatpush.msk.msrb.mxu0 %vm9847_vm6, %v9553_v5  ;;  %vm9863_vm2 = vcmp.eq.s32.totalorder %v9862_v43, %v6761_v27  ;;  %vm9865_vm6 = vcmp.eq.s32.totalorder %v9864_v17, %v6761_v27  ;;  %v9872_v27 = vld [vmem:[#allocation41_spill] sm:$0xff] }
 0xe0c   :  { %4800 = vmatpush.msk.msrb.mxu3 %vm9849_vm11, %v9553_v5  ;;  %4816 = vmatpush.msk.msrb.mxu1 %vm9851_vm12, %v9553_v5  ;;  %vm9867_vm11 = vcmp.eq.s32.totalorder %v9795_v42, %v9866_v29  ;;  %vm9869_vm12 = vcmp.eq.s32.totalorder %v9795_v42, %v9868_v49 }
 0xe0d   :  { %4832 = vmatpush.msk.msrb.mxu2 %vm9853_vm0, %v9553_v5  ;;  %4848 = vmatpush.msk.msrb.mxu0 %vm9854_vm13, %v9553_v5  ;;  %vm9870_vm0 = vcmp.eq.s32.totalorder %v9862_v43, %v6759_v48  ;;  %vm9871_vm13 = vcmp.eq.s32.totalorder %v9862_v43, %v6793_v55 }
 0xe0e   :  { %4801 = vmatpush.msk.msrb.mxu3 %vm9856_vm10, %v9553_v5  ;;  %4817 = vmatpush.msk.msrb.mxu1 %vm9858_vm3, %v9553_v5  ;;  %vm9873_vm10 = vcmp.eq.s32.totalorder %v9864_v17, %v6759_v48  ;;  %vm9874_vm3 = vcmp.eq.s32.totalorder %v9862_v43, %v6757_v45 }
 0xe0f   :  { %4833 = vmatpush.msk.msrb.mxu2 %vm9860_vm9, %v9553_v5  ;;  %4849 = vmatpush.msk.msrb.mxu0 %vm9861_vm15, %v9553_v5  ;;  %vm9875_vm9 = vcmp.eq.s32.totalorder %v9862_v43, %v6791_v3  ;;  %vm9876_vm15 = vcmp.eq.s32.totalorder %v9862_v43, %v9663_v22 }
 0xe10   :  { %4802 = vmatmul.msk.f32.vlgmr.msrb.gmra.mxu3 %vm3834_vm7, %v8729_v15  ;;  %4850 = vmatmul.msk.f32.vlgmr.msrb.gmra.mxu0 %vm3834_vm7, %v8729_v15 }
 0xe11   :  { %4851 = vmatpush.msk.msra.mxu3 %vm9863_vm2, %v9553_v5  ;;  %4899 = vmatpush.msk.msra.mxu0 %vm9865_vm6, %v9553_v5  ;;  %vm9877_vm2 = vcmp.eq.s32.totalorder %v9864_v17, %v6757_v45  ;;  %vm9878_vm6 = vcmp.eq.s32.totalorder %v9862_v43, %v6755_v40 }
 0xe12   :  { %4818 = vmatpush.msk.msrb.mxu1 %vm9867_vm11, %v9553_v5  ;;  %4834 = vmatpush.msk.msrb.mxu2 %vm9869_vm12, %v9553_v5  ;;  %vm9879_vm11 = vcmp.eq.s32.totalorder %v9862_v43, %v6789_v2  ;;  %vm9880_vm12 = vcmp.eq.s32.totalorder %v9862_v43, %v9665_v34 }
 0xe13   :  { %4143 = vmatmul.f32.vlgmr.msrb.gmra.mxu1 %v8725_v58  ;;  %4163 = vmatmul.f32.vlgmr.msrb.gmra.mxu2 %v8727_v11 }
 0xe14   :  { %4852 = vmatpush.msk.msra.mxu3 %vm9870_vm0, %v9553_v5  ;;  %4867 = vmatpush.msk.msra.mxu1 %vm9871_vm13, %v9553_v5  ;;  %vm9881_vm0 = vcmp.eq.s32.totalorder %v9864_v17, %v6755_v40  ;;  %vm9882_vm13 = vcmp.eq.s32.totalorder %v9862_v43, %v6753_v39 }
 0xe15   :  { %4883 = vmatpush.msk.msra.mxu2 %vm3002_vm14, %v9872_v27  ;;  %4900 = vmatpush.msk.msra.mxu0 %vm9873_vm10, %v9553_v5  ;;  %vm9883_vm10 = vcmp.eq.s32.totalorder %v9862_v43, %v6787_v41 }
 0xe16   :  { %4853 = vmatpush.msk.msra.mxu3 %vm9874_vm3, %v9553_v5  ;;  %4868 = vmatpush.msk.msra.mxu1 %vm9875_vm9, %v9553_v5  ;;  %vm9884_vm3 = vcmp.eq.s32.totalorder %v9862_v43, %v9667_v56  ;;  %vm9885_vm9 = vcmp.eq.s32.totalorder %v9864_v17, %v6753_v39 }
 0xe17   :  { %4884 = vmatpush.msk.msra.mxu2 %vm9876_vm15, %v9553_v5  ;;  %4901 = vmatpush.msk.msra.mxu0 %vm9877_vm2, %v9553_v5  ;;  %vm9886_vm15 = vcmp.eq.s32.totalorder %v9862_v43, %v6751_v38  ;;  %vm9887_vm2 = vcmp.eq.s32.totalorder %v9862_v43, %v6785_v0 }
 0xe18   :  { %4854 = vmatpush.msk.msra.mxu3 %vm9878_vm6, %v9553_v5  ;;  %4869 = vmatpush.msk.msra.mxu1 %vm9879_vm11, %v9553_v5  ;;  %vm9888_vm6 = vcmp.eq.s32.totalorder %v9862_v43, %v9669_v16  ;;  %vm9889_vm11 = vcmp.eq.s32.totalorder %v9864_v17, %v6751_v38 }
 0xe19   :  { %4885 = vmatpush.msk.msra.mxu2 %vm9880_vm12, %v9553_v5  ;;  %4902 = vmatpush.msk.msra.mxu0 %vm9881_vm0, %v9553_v5  ;;  %vm9890_vm12 = vcmp.eq.s32.totalorder %v9862_v43, %v6749_v26  ;;  %vm9891_vm0 = vcmp.eq.s32.totalorder %v9862_v43, %v9647_v1 }
 0xe1a   :  { %4855 = vmatpush.msk.msra.mxu3 %vm9882_vm13, %v9553_v5  ;;  %4870 = vmatpush.msk.msra.mxu1 %vm9883_vm10, %v9553_v5  ;;  %vm9892_vm13 = vcmp.eq.s32.totalorder %v9862_v43, %v9671_v19  ;;  %vm9893_vm10 = vcmp.eq.s32.totalorder %v9864_v17, %v6749_v26 }
 0xe1b   :  { %4886 = vmatpush.msk.msra.mxu2 %vm9884_vm3, %v9553_v5  ;;  %4903 = vmatpush.msk.msra.mxu0 %vm9885_vm9, %v9553_v5  ;;  %vm9894_vm3 = vcmp.eq.s32.totalorder %v9862_v43, %v6747_v25  ;;  %vm9895_vm9 = vcmp.eq.s32.totalorder %v9862_v43, %v9649_v13 }
 0xe1c   :  { %4856 = vmatpush.msk.msra.mxu3 %vm9886_vm15, %v9553_v5  ;;  %4871 = vmatpush.msk.msra.mxu1 %vm9887_vm2, %v9553_v5  ;;  %vm9896_vm15 = vcmp.eq.s32.totalorder %v9862_v43, %v9673_v7  ;;  %vm9897_vm2 = vcmp.eq.s32.totalorder %v9864_v17, %v6747_v25 }
 0xe1d   :  { %4887 = vmatpush.msk.msra.mxu2 %vm9888_vm6, %v9553_v5  ;;  %4904 = vmatpush.msk.msra.mxu0 %vm9889_vm11, %v9553_v5  ;;  %vm9898_vm6 = vcmp.eq.s32.totalorder %v9862_v43, %v6745_v24  ;;  %vm9899_vm11 = vcmp.eq.s32.totalorder %v9862_v43, %v9759_v32 }
 0xe1e   :  { %4857 = vmatpush.msk.msra.mxu3 %vm9890_vm12, %v9553_v5  ;;  %4872 = vmatpush.msk.msra.mxu1 %vm9891_vm0, %v9553_v5  ;;  %vm9900_vm12 = vcmp.eq.s32.totalorder %v9862_v43, %v9675_v9  ;;  %vm9901_vm0 = vcmp.eq.s32.totalorder %v9864_v17, %v6745_v24 }
 0xe1f   :  { %4888 = vmatpush.msk.msra.mxu2 %vm9892_vm13, %v9553_v5  ;;  %4905 = vmatpush.msk.msra.mxu0 %vm9893_vm10, %v9553_v5  ;;  %vm9902_vm13 = vcmp.eq.s32.totalorder %v9862_v43, %v6743_v23  ;;  %vm9903_vm10 = vcmp.eq.s32.totalorder %v9862_v43, %v9763_v51 }
 0xe20   :  { %4858 = vmatpush.msk.msra.mxu3 %vm9894_vm3, %v9553_v5  ;;  %4873 = vmatpush.msk.msra.mxu1 %vm9895_vm9, %v9553_v5  ;;  %vm9904_vm3 = vcmp.eq.s32.totalorder %v9862_v43, %v9677_v61  ;;  %vm9905_vm9 = vcmp.eq.s32.totalorder %v9864_v17, %v6743_v23  ;;  %v9933_v23 = vld [vmem:[#allocation42_spill] sm:$0xff] }
 0xe21   :  { %4889 = vmatpush.msk.msra.mxu2 %vm9896_vm15, %v9553_v5  ;;  %4906 = vmatpush.msk.msra.mxu0 %vm9897_vm2, %v9553_v5  ;;  %vm9906_vm15 = vcmp.eq.s32.totalorder %v9862_v43, %v6741_v33  ;;  %vm9907_vm2 = vcmp.eq.s32.totalorder %v9862_v43, %v9767_v52 }
 0xe22   :  { %4859 = vmatpush.msk.msra.mxu3 %vm9898_vm6, %v9553_v5  ;;  %4874 = vmatpush.msk.msra.mxu1 %vm9899_vm11, %v9553_v5  ;;  %vm9908_vm6 = vcmp.eq.s32.totalorder %v9862_v43, %v9679_v20  ;;  %vm9909_vm11 = vcmp.eq.s32.totalorder %v9864_v17, %v6741_v33 }
 0xe23   :  { %4890 = vmatpush.msk.msra.mxu2 %vm9900_vm12, %v9553_v5  ;;  %4907 = vmatpush.msk.msra.mxu0 %vm9901_vm0, %v9553_v5  ;;  %vm9910_vm12 = vcmp.eq.s32.totalorder %v9862_v43, %v6739_v31  ;;  %vm9911_vm0 = vcmp.eq.s32.totalorder %v9862_v43, %v9771_v59 }
 0xe24   :  { %4860 = vmatpush.msk.msra.mxu3 %vm9902_vm13, %v9553_v5  ;;  %4875 = vmatpush.msk.msra.mxu1 %vm9903_vm10, %v9553_v5  ;;  %vm9912_vm13 = vcmp.eq.s32.totalorder %v9862_v43, %v9681_v62  ;;  %vm9913_vm10 = vcmp.eq.s32.totalorder %v9864_v17, %v6739_v31 }
 0xe25   :  { %4891 = vmatpush.msk.msra.mxu2 %vm9904_vm3, %v9553_v5  ;;  %4908 = vmatpush.msk.msra.mxu0 %vm9905_vm9, %v9553_v5  ;;  %vm9914_vm3 = vcmp.eq.s32.totalorder %v9862_v43, %v6737_v30  ;;  %vm9915_vm9 = vcmp.eq.s32.totalorder %v9862_v43, %v9775_v8 }
 0xe26   :  { %4861 = vmatpush.msk.msra.mxu3 %vm9906_vm15, %v9553_v5  ;;  %4876 = vmatpush.msk.msra.mxu1 %vm9907_vm2, %v9553_v5  ;;  %vm9916_vm15 = vcmp.eq.s32.totalorder %v9862_v43, %v9683_v53  ;;  %vm9917_vm2 = vcmp.eq.s32.totalorder %v9864_v17, %v6737_v30 }
 0xe27   :  { %4892 = vmatpush.msk.msra.mxu2 %vm9908_vm6, %v9553_v5  ;;  %4909 = vmatpush.msk.msra.mxu0 %vm9909_vm11, %v9553_v5  ;;  %vm9918_vm6 = vcmp.eq.s32.totalorder %v9862_v43, %v9850_v54  ;;  %vm9919_vm11 = vcmp.eq.s32.totalorder %v9862_v43, %v9845_v14 }
 0xe28   :  { %4862 = vmatpush.msk.msra.mxu3 %vm9910_vm12, %v9553_v5  ;;  %4877 = vmatpush.msk.msra.mxu1 %vm9911_vm0, %v9553_v5  ;;  %vm9920_vm12 = vcmp.eq.s32.totalorder %v9862_v43, %v9685_v63  ;;  %vm9921_vm0 = vcmp.eq.s32.totalorder %v9864_v17, %v9850_v54  ;;  %v5189_v54 = vmov 8  }
 0xe29   :  { %4893 = vmatpush.msk.msra.mxu2 %vm9912_vm13, %v9553_v5  ;;  %4910 = vmatpush.msk.msra.mxu0 %vm9913_vm10, %v9553_v5  ;;  %vm9922_vm13 = vcmp.eq.s32.totalorder %v9862_v43, %v9857_v60  ;;  %vm9923_vm10 = vcmp.eq.s32.totalorder %v9862_v43, %v9852_v36 }
 0xe2a   :  { %4863 = vmatpush.msk.msra.mxu3 %vm9914_vm3, %v9553_v5  ;;  %4878 = vmatpush.msk.msra.mxu1 %vm9915_vm9, %v9553_v5  ;;  %vm9924_vm3 = vcmp.eq.s32.totalorder %v9862_v43, %v9848_v10  ;;  %vm9925_vm9 = vcmp.eq.s32.totalorder %v9864_v17, %v9857_v60 }
 0xe2b   :  { %4894 = vmatpush.msk.msra.mxu2 %vm9916_vm15, %v9553_v5  ;;  %4911 = vmatpush.msk.msra.mxu0 %vm9917_vm2, %v9553_v5  ;;  %vm9926_vm15 = vcmp.eq.s32.totalorder %v9862_v43, %v9866_v29  ;;  %vm9927_vm2 = vcmp.eq.s32.totalorder %v9862_v43, %v9859_v18 }
 0xe2c   :  { %4864 = vmatpush.msk.msra.mxu3 %vm9918_vm6, %v9553_v5  ;;  %4879 = vmatpush.msk.msra.mxu1 %vm9919_vm11, %v9553_v5  ;;  %vm9928_vm6 = vcmp.eq.s32.totalorder %v9862_v43, %v9855_v35  ;;  %vm9929_vm11 = vcmp.eq.s32.totalorder %v9864_v17, %v9866_v29 }
 0xe2d   :  { %4895 = vmatpush.msk.msra.mxu2 %vm9920_vm12, %v9553_v5  ;;  %4912 = vmatpush.msk.msra.mxu0 %vm9921_vm0, %v9553_v5  ;;  %vm9930_vm12 = vcmp.eq.s32.totalorder %v9864_v17, %v6793_v55  ;;  %vm9931_vm0 = vcmp.eq.s32.totalorder %v9862_v43, %v9868_v49 }
 0xe2e   :  { %4865 = vmatpush.msk.msra.mxu3 %vm9922_vm13, %v9553_v5  ;;  %4880 = vmatpush.msk.msra.mxu1 %vm9923_vm10, %v9553_v5  ;;  %vm9932_vm13 = vcmp.eq.s32.totalorder %v9864_v17, %v6791_v3  ;;  %vm9934_vm10 = vcmp.eq.s32.totalorder %v9864_v17, %v6789_v2 }
 0xe2f   :  { %4896 = vmatpush.msk.msra.mxu2 %vm9924_vm3, %v9553_v5  ;;  %4913 = vmatpush.msk.msra.mxu0 %vm9925_vm9, %v9553_v5  ;;  %vm9935_vm3 = vcmp.eq.s32.totalorder %v9864_v17, %v9663_v22  ;;  %vm9936_vm9 = vcmp.eq.s32.totalorder %v9864_v17, %v6787_v41 }
 0xe30   :  { %4866 = vmatpush.msk.msra.mxu3 %vm9926_vm15, %v9553_v5  ;;  %4881 = vmatpush.msk.msra.mxu1 %vm9927_vm2, %v9553_v5  ;;  %vm9937_vm15 = vcmp.eq.s32.totalorder %v9864_v17, %v9665_v34  ;;  %vm9939_vm2 = vcmp.eq.s32.totalorder %v9864_v17, %v9667_v56 }
 0xe31   :  { %4897 = vmatpush.msk.msra.mxu2 %vm9928_vm6, %v9553_v5  ;;  %4914 = vmatpush.msk.msra.mxu0 %vm9929_vm11, %v9553_v5  ;;  %vm9940_vm6 = vcmp.eq.s32.totalorder %v9864_v17, %v9647_v1  ;;  %vm9941_vm11 = vcmp.eq.s32.totalorder %v9864_v17, %v9669_v16 }
 0xe32   :  { %4203 = vmatmul.f32.vlgmr.msra.gmra.mxu3 %v8725_v58  ;;  %4898 = vmatmul.msk.f32.vlgmr.msra.gmra.mxu2 %vm3834_vm7, %v8729_v15 }
 0xe33   :  { %4263 = vmatmul.f32.vlgmr.msra.gmra.mxu0 %v8725_v58  ;;  %4915 = vmatpush.msk.msrb.mxu3 %vm9930_vm12, %v9553_v5  ;;  %vm9942_vm12 = vcmp.eq.s32.totalorder %v9864_v17, %v9649_v13 }
 0xe34   :  { %4882 = vmatpush.msk.msra.mxu1 %vm9931_vm0, %v9553_v5  ;;  %vm9943_vm0 = vcmp.eq.s32.totalorder %v9864_v17, %v9671_v19  ;;  %5106 = vset.pattern.permute.xlu1 %v5189_v54 }
 0xe35   :  { %4223 = vmatmul.f32.vlgmr.msra.gmra.mxu1 %v8727_v11  ;;  %4916 = vmatpush.msk.msrb.mxu3 %vm9932_vm13, %v9553_v5  ;;  %vm9944_vm13 = vcmp.eq.s32.totalorder %v9864_v17, %v9759_v32 }
 0xe36   :  { %4931 = vmatpush.msk.msrb.mxu1 %vm3002_vm14, %v9933_v23  ;;  %vm9938_vm14 = vcmp.eq.s32.totalorder %v9864_v17, %v6785_v0  ;;  %5105 = vset.pattern.permute.xlu0 %v5189_v54 }
 0xe37   :  { %4917 = vmatpush.msk.msrb.mxu3 %vm9934_vm10, %v9553_v5  ;;  %vm9945_vm10 = vcmp.eq.s32.totalorder %v9864_v17, %v9673_v7 }
 0xe38   :  { %4932 = vmatpush.msk.msrb.mxu1 %vm9935_vm3, %v9553_v5  ;;  %vm9946_vm3 = vcmp.eq.s32.totalorder %v9864_v17, %v9763_v51 }
 0xe39   :  { %4918 = vmatpush.msk.msrb.mxu3 %vm9936_vm9, %v9553_v5  ;;  %vm9947_vm9 = vcmp.eq.s32.totalorder %v9864_v17, %v9675_v9 }
 0xe3a   :  { %4933 = vmatpush.msk.msrb.mxu1 %vm9937_vm15, %v9553_v5  ;;  %vm9948_vm15 = vcmp.eq.s32.totalorder %v9864_v17, %v9767_v52 }
 0xe3b   :  { %4919 = vmatpush.msk.msrb.mxu3 %vm9938_vm14, %v9553_v5  ;;  %vm9949_vm14 = vcmp.eq.s32.totalorder %v9864_v17, %v9677_v61 }
 0xe3c   :  { %4934 = vmatpush.msk.msrb.mxu1 %vm9939_vm2, %v9553_v5  ;;  %vm9950_vm2 = vcmp.eq.s32.totalorder %v9864_v17, %v9771_v59 }
 0xe3d   :  { %4920 = vmatpush.msk.msrb.mxu3 %vm9940_vm6, %v9553_v5  ;;  %vm9951_vm6 = vcmp.eq.s32.totalorder %v9864_v17, %v9679_v20 }
 0xe3e   :  { %4935 = vmatpush.msk.msrb.mxu1 %vm9941_vm11, %v9553_v5  ;;  %vm9952_vm11 = vcmp.eq.s32.totalorder %v9864_v17, %v9775_v8 }
 0xe3f   :  { %4921 = vmatpush.msk.msrb.mxu3 %vm9942_vm12, %v9553_v5  ;;  %vm9953_vm12 = vcmp.eq.s32.totalorder %v9864_v17, %v9681_v62 }
 0xe40   :  { %4936 = vmatpush.msk.msrb.mxu1 %vm9943_vm0, %v9553_v5  ;;  %vm9954_vm0 = vcmp.eq.s32.totalorder %v9864_v17, %v9845_v14 }
 0xe41   :  { %4922 = vmatpush.msk.msrb.mxu3 %vm9944_vm13, %v9553_v5  ;;  %vm9955_vm13 = vcmp.eq.s32.totalorder %v9864_v17, %v9683_v53 }
 0xe42   :  { %4937 = vmatpush.msk.msrb.mxu1 %vm9945_vm10, %v9553_v5  ;;  %vm9956_vm10 = vcmp.eq.s32.totalorder %v9864_v17, %v9852_v36 }
 0xe43   :  { %4923 = vmatpush.msk.msrb.mxu3 %vm9946_vm3, %v9553_v5  ;;  %vm9957_vm3 = vcmp.eq.s32.totalorder %v9864_v17, %v9685_v63 }
 0xe44   :  { %4938 = vmatpush.msk.msrb.mxu1 %vm9947_vm9, %v9553_v5  ;;  %vm9958_vm9 = vcmp.eq.s32.totalorder %v9864_v17, %v9859_v18 }
 0xe45   :  { %4924 = vmatpush.msk.msrb.mxu3 %vm9948_vm15, %v9553_v5  ;;  %vm9959_vm15 = vcmp.eq.s32.totalorder %v9864_v17, %v9848_v10 }
 0xe46   :  { %4939 = vmatpush.msk.msrb.mxu1 %vm9949_vm14, %v9553_v5  ;;  %vm9960_vm14 = vcmp.eq.s32.totalorder %v9864_v17, %v9868_v49 }
 0xe47   :  { %4925 = vmatpush.msk.msrb.mxu3 %vm9950_vm2, %v9553_v5  ;;  %vm9961_vm2 = vcmp.eq.s32.totalorder %v9864_v17, %v9855_v35 }
 0xe48   :  { %4940 = vmatpush.msk.msrb.mxu1 %vm9951_vm6, %v9553_v5 }
 0xe49   :  { %4926 = vmatpush.msk.msrb.mxu3 %vm9952_vm11, %v9553_v5 }
 0xe4a   :  { %4941 = vmatpush.msk.msrb.mxu1 %vm9953_vm12, %v9553_v5 }
 0xe4b   :  { %4927 = vmatpush.msk.msrb.mxu3 %vm9954_vm0, %v9553_v5 }
 0xe4c   :  { %4942 = vmatpush.msk.msrb.mxu1 %vm9955_vm13, %v9553_v5 }
 0xe4d   :  { %4928 = vmatpush.msk.msrb.mxu3 %vm9956_vm10, %v9553_v5 }
 0xe4e   :  { %4943 = vmatpush.msk.msrb.mxu1 %vm9957_vm3, %v9553_v5 }
 0xe4f   :  { %4929 = vmatpush.msk.msrb.mxu3 %vm9958_vm9, %v9553_v5 }
 0xe50   :  { %4944 = vmatpush.msk.msrb.mxu1 %vm9959_vm15, %v9553_v5 }
 0xe51   :  { %4930 = vmatpush.msk.msrb.mxu3 %vm9960_vm14, %v9553_v5 }
 0xe52   :  { %4945 = vmatpush.msk.msrb.mxu1 %vm9961_vm2, %v9553_v5  ;;  %4283 = vmatmul.f32.vlgmr.msrb.gmra.mxu3 %v8727_v11 }
 0xe53   :  { %4946 = vmatmul.msk.f32.vlgmr.msrb.gmra.mxu1 %vm3834_vm7, %v8729_v15 }
 0xe6b   :  { %v3984_v25 = vpop.f32.mrf.mxu1 }
 0xe6c   :  { %v4024_v30 = vpop.f32.mrf.mxu0 }
 0xe71   :  { %v3964_v24 = vpop.f32.mrf.mxu3 }
 0xe72   :  { %v3985_v26 = vadd.f32 %v3984_v25, %v3964_v24  ;;  %v4004_v38 = vpop.f32.mrf.mxu2 }
 0xe74   :  { %v4005_v40 = vadd.f32 %v4004_v38, %v3985_v26 }
 0xe75   :  { %v4064_v39 = vpop.f32.mrf.mxu1 }
 0xe76   :  { %v4104_v41 = vpop.f32.mrf.mxu0 }
 0xe7b   :  { %v4044_v31 = vpop.f32.mrf.mxu3 }
 0xe7c   :  { %v4045_v33 = vadd.f32 %v4044_v31, %v4024_v30  ;;  %v4084_v0 = vpop.f32.mrf.mxu2 }
 0xe7d   :  { %v4105_v5 = vadd.f32 %v4104_v41, %v4084_v0 }
 0xe7e   :  { %v4065_v45 = vadd.f32 %v4064_v39, %v4045_v33 }
 0xe80   :  { %v5080_v48 = vpack.i.bf16 %v4065_v45, %v4005_v40 }
 0xe82   :  { %5081 = vrot.lane.b32.xlu0 %v5080_v48, %s5177_s19  ;;  %5076 = vrot.lane.b32.xlu2 %v5080_v48, %s5173_s13 }
 0xe8d   :  { %v4184_v13 = vpop.f32.mrf.mxu0 }
 0xe90   :  { %v4144_v2 = vpop.f32.mrf.mxu1 }
 0xe93   :  { %v4124_v3 = vpop.f32.mrf.mxu3 }
 0xe94   :  { %v4125_v22 = vadd.f32 %v4124_v3, %v4105_v5 }
 0xe96   :  { %v4164_v55 = vpop.f32.mrf.mxu2 }
 0xe97   :  { %v4165_v1 = vadd.f32 %v4164_v55, %v4144_v2 }
 0xe99   :  { %v9373_v34 = vadd.f32 %v4184_v13, %v4165_v1 }
 0xe9b   :  { %v5085_v56 = vpack.i.bf16 %v9373_v34, %v4125_v22 }
 0xe9d   :  { %5086 = vrot.lane.b32.xlu0 %v5085_v56, %s5173_s13 }
 0xea5   :  { %5091 = vrot.lane.b32.xlu0 %v5085_v56, %s5177_s19 }
 0xead   :  { %4360 = vperm.xlu0 %5105, %v8705_v47  }
 0xeb0   :  { %v4264_v9 = vpop.f32.mrf.mxu0 }
 0xeb2   :  { %v4224_v19 = vpop.f32.mrf.mxu1 }
 0xeb5   :  { %v4204_v16 = vpop.f32.mrf.mxu3  ;;  %v4244_v62 = vpop.f32.mrf.mxu2 }
 0xeb6   :  { %v4225_v7 = vadd.f32 %v4224_v19, %v4204_v16 }
 0xeb8   :  { %v4245_v63 = vadd.f32 %v4244_v62, %v4225_v7 }
 0xed0   :  { %v4304_v53 = vpop.f32.mrf.mxu1 }
 0xed5   :  { %v4284_v61 = vpop.f32.mrf.mxu3 }
 0xed6   :  { %v4285_v20 = vadd.f32 %v4284_v61, %v4264_v9 }
 0xed8   :  { %v4305_v32 = vadd.f32 %v4304_v53, %v4285_v20 }
 0xeda   :  { %v5095_v51 = vpack.i.bf16 %v4305_v32, %v4245_v63 }
 0xedc   :  { %5096 = vrot.lane.b32.xlu1 %v5095_v51, %s5173_s13  ;;  %5101 = vrot.lane.b32.xlu2 %v5095_v51, %s5177_s19  ;;  %v5077_v52 = vpop.permute.xlu2 %5076 }
 0xedd   :  { %v5079_v59 = vunpack.i.h.bf16 %v5077_v52  ;;  %v5078_v8 = vunpack.i.l.bf16 %v5077_v52 }
 0xedf   :  { %v4348_v46 = vsel %vm3384_vm4, %v5078_v8, %v5079_v59 }
 0xee0   :  { %4384 = vmatpush.msrb.mxu2 %v4348_v46 }
 0xee4   :  { %4363 = vperm.xlu1 %5106, %v8711_v21  }
 0xef4   :  { %v5082_v28 = vpop.permute.xlu0 %5081 }
 0xef5   :  { %v5084_v44 = vunpack.i.h.bf16 %v5082_v28  ;;  %v5083_v4 = vunpack.i.l.bf16 %v5082_v28 }
 0xef7   :  { %v4325_v37 = vsel %vm3355_vm5, %v5083_v4, %v5084_v44 }
 0xef8   :  { %4385 = vmatpush.msrb.mxu2 %v4325_v37 }
 0xefa   :  { %4386 = vmatpush.msrb.mxu2 %v4005_v40 }
 0xefb   :  { %4947 = vmatmul.msk.f32.vlgmr.msrb.gmra.mxu2 %vm2964_vm1, %v8705_v47 }
 0xf0f   :  { %v5087_v50 = vpop.permute.xlu0 %5086 }
 0xf10   :  { %v5089_v57 = vunpack.i.h.bf16 %v5087_v50  ;;  %v5088_v58 = vunpack.i.l.bf16 %v5087_v50 }
 0xf12   :  { %v4349_v11 = vsel %vm3384_vm4, %v5079_v59, %v5088_v58  ;;  %v4350_v15 = vsel %vm3384_vm4, %v5088_v58, %v5089_v57 }
 0xf13   :  { %4404 = vmatpush.msrb.mxu0 %v4349_v11  ;;  %4424 = vmatpush.msra.mxu2 %v4350_v15 }
 0xf17   :  { %v5092_v12 = vpop.permute.xlu0 %5091 }
 0xf18   :  { %v5094_v42 = vunpack.i.h.bf16 %v5092_v12  ;;  %v5093_v6 = vunpack.i.l.bf16 %v5092_v12 }
 0xf1a   :  { %v4326_v14 = vsel %vm3355_vm5, %v5084_v44, %v5093_v6  ;;  %v4327_v10 = vsel %vm3355_vm5, %v5093_v6, %v5094_v42 }
 0xf1b   :  { %4405 = vmatpush.msrb.mxu0 %v4326_v14  ;;  %4425 = vmatpush.msra.mxu2 %v4327_v10 }
 0xf1d   :  { %4406 = vmatpush.msrb.mxu0 %v4065_v45  ;;  %4426 = vmatpush.msra.mxu2 %v4125_v22 }
 0xf1e   :  { %4948 = vmatmul.msk.f32.vlgmr.msrb.gmra.mxu0 %vm2964_vm1, %v8705_v47  ;;  %4949 = vmatmul.msk.f32.vlgmr.msra.gmra.mxu2 %vm2964_vm1, %v8705_v47 }
 0xf1f   :  { %v4361_v25 = vpop.permute.xlu0 %4360 }
 0xf20   :  { %v4365_v30 = vrot.slane %v4361_v25, 6 }
 0xf36   :  { %v5102_v36 = vpop.permute.xlu2 %5101 }
 0xf37   :  { %v5104_v60 = vunpack.i.h.bf16 %v5102_v36  ;;  %v5103_v18 = vunpack.i.l.bf16 %v5102_v36 }
 0xf39   :  { %v4328_v27 = vsel %vm3355_vm5, %v5094_v42, %v5103_v18  ;;  %v4329_v23 = vsel %vm3355_vm5, %v5103_v18, %v5104_v60 }
 0xf4e   :  { %v5097_v35 = vpop.permute.xlu1 %5096 }
 0xf4f   :  { %v5099_v43 = vunpack.i.h.bf16 %v5097_v35  ;;  %v5098_v17 = vunpack.i.l.bf16 %v5097_v35 }
 0xf51   :  { %v4351_v29 = vsel %vm3384_vm4, %v5089_v57, %v5098_v17  ;;  %v4352_v49 = vsel %vm3384_vm4, %v5098_v17, %v5099_v43 }
 0xf52   :  { %4444 = vmatpush.msra.mxu0 %v4351_v29  ;;  %4464 = vmatpush.msrb.mxu2 %v4352_v49 }
 0xf54   :  { %4445 = vmatpush.msra.mxu0 %v4328_v27  ;;  %4465 = vmatpush.msrb.mxu2 %v4329_v23 }
 0xf56   :  { %4446 = vmatpush.msra.mxu0 %v9373_v34  ;;  %4466 = vmatpush.msrb.mxu2 %v4245_v63  ;;  %v4364_v24 = vpop.permute.xlu1 %4363 }
 0xf57   :  { %4951 = vmatmul.msk.f32.vlgmr.msrb.gmra.mxu2 %vm2964_vm1, %v8705_v47  ;;  %4950 = vmatmul.msk.f32.vlgmr.msra.gmra.mxu0 %vm2964_vm1, %v8705_v47  ;;  %v4366_v26 = vrot.slane %v4364_v24, 6 }
 0xf58   :  { %4484 = vmatpush.msrb.mxu0 %v5099_v43 }
 0xf59   :  { %v4367_v38 = vsel %vm2992_vm8, %v4365_v30, %v4366_v26  ;;  %vm4496_vm8 = vcmask 898048  }
 0xf5a   :  { %4485 = vmatpush.msrb.mxu0 %v5104_v60 }
 0xf5c   :  { %4486 = vmatpush.msrb.mxu0 %v4305_v32 }
 0xf5f   :  { %4952 = vmatmul.msk.f32.vlgmr.msrb.gmra.mxu0 %vm2964_vm1, %v8705_v47 }
 0xf7e   :  { %v4388_v21 = vpop.f32.mrf.mxu2 }
 0xf7f   :  { %v4389_v39 = vadd.f32 %v4388_v21, %v4367_v38 }
 0xf81   :  { %4491 = vst [vmem:[%s9429_s5] sm:$0x3f] %v4389_v39 }
 0xf9b   :  { %v4408_v31 = vpop.f32.mrf.mxu0 }
 0xf9c   :  { %v4409_v40 = vadd.f32 %v4408_v31, %v4367_v38 }
 0xf9e   :  { %4492 = vst [vmem:[%s9429_s5 + $0x8] sm:$0x3f] %v4409_v40 }
 0xfa1   :  { %v4428_v33 = vpop.f32.mrf.mxu2 }
 0xfa2   :  { %v4429_v45 = vadd.f32 %v4428_v33, %v4367_v38 }
 0xfa4   :  { %4493 = vst [vmem:[%s9429_s5 + $0x10] sm:$0x3f] %v4429_v45 }
 0xfd4   :  { %v4448_v47 = vpop.f32.mrf.mxu0 }
 0xfd5   :  { %v4449_v48 = vadd.f32 %v4448_v47, %v4367_v38 }
 0xfd7   :  { %4494 = vst [vmem:[%s9429_s5 + $0x18] sm:$0x3f] %v4449_v48 }
 0xfda   :  { %v4468_v0 = vpop.f32.mrf.mxu2 }
 0xfdb   :  { %v4469_v41 = vadd.f32 %v4468_v0, %v4367_v38 }
 0xfdc   :  { %v4488_v2 = vpop.f32.mrf.mxu0 }
 0xfdd   :  { %4495 = vst [vmem:[%s9429_s5 + $0x20] sm:$0x3f] %v4469_v41  ;;  %v4489_v3 = vadd.f32 %v4488_v2, %v4367_v38 }
 0xfdf   :  { %4497 = vst.msk [vmem:[%s9429_s5 + $0x28] sm:$0x3f] %vm4496_vm8, %v4489_v3 }
 0xfe0   :  { %4502 = vsyncmov [#allocation3] }
 0xfe3   :  { %s4503_s18 = vpop.sfrf %4502 }
 0xfe4   :  { %p4953_p0 = scmp.ne.s32.totalorder %s4503_s18, 0 }
 0xfe6   :  { %4507 = shalt.err (%p4953_p0)  }

</bundles_post_ra>
